<compile_context>
chip_gen: v7x
topology: tpu7x:2x2x1
jax: 0.10.0
libtpu: 0.0.40
codegen_flags: <defaults>
</compile_context>

<pallas_src>
import functools

import jax
import jax.numpy as jnp
from jax.experimental import pallas as pl
from jax.experimental.pallas import tpu as pltpu

CP = 128   # feature width = one full lane register (lane-dense by construction)
KS = 3     # conv kernel size
PAD = 1    # "same" padding for 3x3 stride-1 conv


# ------------------------------ Pallas kernel -------------------------------

def _backbone_kernel(p_ref, w0_ref, b0_ref, w1_ref, b1_ref, w2_ref, b2_ref,
                     o_ref, hpad_ref, *, H, W, NB):
    """One grid step = NB images, fully on-chip.

    stem matmul -> basic residual block (2x conv3x3) -> global average pool.
    Intermediate activations live in one bf16 halo scratch; the pooled
    (NB, CP) feature rows are the only HBM output.
    """
    HW = H * W

    # Re-zero the halo scratch every step (cheap).  A one-time
    # @pl.when(program_id == 0) init would leave the second TensorCore's
    # private scratch uninitialised under "parallel" grid semantics.
    hpad_ref[...] = jnp.zeros_like(hpad_ref)

    def conv3x3(w_ref, acc0):
        """3x3 'same' conv over the zero-padded bf16 scratch.

        dx-major: one (H+2, W, CP) plane load per column shift, then the 3 row
        taps are free leading-axis slices -> 3 (sublane-shifted) loads per conv
        instead of 9, and every (HW, CP) x (CP, CP) matmul is a fully dense
        bf16 contraction with f32 accumulation.
        """
        acc = acc0
        for dx in range(KS):
            plane = hpad_ref[:, dx:dx + W, :]                  # (H+2, W, CP)
            for dy in range(KS):
                v = plane[dy:dy + H].reshape(HW, CP)           # contiguous
                acc = acc + jnp.dot(v, w_ref[dx * KS + dy],
                                    preferred_element_type=jnp.float32)
        return acc

    for b in range(NB):   # unrolled: images per grid step (amortizes step cost)
        # Stem: all 9 taps x cin folded into ONE dense 128-lane contraction
        # (patch tensor built in the wrapper) -> a single MXU matmul.
        h = jnp.dot(p_ref[b], w0_ref[...],
                    preferred_element_type=jnp.float32) + b0_ref[...]
        h = jnp.maximum(h, 0.0)                                # (HW, CP) f32
        hpad_ref[1:H + 1, 1:W + 1, :] = (
            h.reshape(H, W, CP).astype(jnp.bfloat16))

        # Residual block, conv1.
        h1 = jnp.maximum(conv3x3(w1_ref, b1_ref[...]), 0.0)

        # Re-read the (bf16) stem output as the residual BEFORE overwriting the
        # scratch, instead of keeping a second 32-vreg f32 copy live.
        res = hpad_ref[1:H + 1, 1:W + 1, :].reshape(HW, CP)
        hpad_ref[1:H + 1, 1:W + 1, :] = (
            h1.reshape(H, W, CP).astype(jnp.bfloat16))

        # conv2: accumulator initialised with residual + folded-BN bias.
        h2 = jnp.maximum(
            conv3x3(w2_ref, res.astype(jnp.float32) + b2_ref[...]), 0.0)

        # Global-average-pool epilogue -> one lane-dense feature row.
        o_ref[0, b:b + 1, :] = jnp.mean(
            h2, axis=0, keepdims=True).astype(o_ref.dtype)

    # TODO(synk): on v6e/v7x, pairs of taps could additionally be packed into
    # K=256 contractions to fill the 256-deep MXU (needs per-generation weight
    # packing); left out to keep a single layout for all chips.


# ------------------------------ Pallas wrapper -------------------------------

def backbone_forward(params, x_nchw, *, images_per_step=2):
    """Backbone feature extraction: NCHW image -> (N, CP) pooled features."""
    N, cin, H, W = x_nchw.shape
    assert W % 8 == 0 and H >= KS and W >= KS, "toy path assumes aligned W"
    HW = H * W
    k0 = KS * KS * cin
    K0 = params["w0"].shape[0]
    assert K0 >= k0

    NB = max(1, min(images_per_step, N))
    while N % NB:                       # keep the grid exact for the demo
        NB -= 1
    grid = N // NB

    # Stem im2col in the wrapper: bf16 BEFORE padding, 9 shifted views of the
    # 3-channel image -> (N, HW, K0) bf16 patch tensor (smaller than shipping
    # a 128-lane padded image to the kernel).  Tap order t = dy*KS + dx.
    x = jnp.transpose(x_nchw, (0, 2, 3, 1)).astype(jnp.bfloat16)
    xp = jnp.pad(x, ((0, 0), (PAD, PAD), (PAD, PAD), (0, 0)))
    taps = [xp[:, dy:dy + H, dx:dx + W, :]
            for dy in range(KS) for dx in range(KS)]
    patches = jnp.concatenate(taps, axis=-1).reshape(N, HW, k0)
    patches = jnp.pad(patches, ((0, 0), (0, 0), (0, K0 - k0)))

    kernel = functools.partial(_backbone_kernel, H=H, W=W, NB=NB)
    w_spec = pl.BlockSpec((KS * KS, CP, CP), lambda n: (0, 0, 0))
    b_spec = pl.BlockSpec((1, CP), lambda n: (0, 0))

    feats = pl.pallas_call(
        kernel,
        out_shape=jax.ShapeDtypeStruct((grid, NB, CP), jnp.float32),
        grid=(grid,),
        in_specs=[
            pl.BlockSpec((NB, HW, K0), lambda n: (n, 0, 0)),   # stem patches
            pl.BlockSpec((K0, CP), lambda n: (0, 0)), b_spec,  # stem (BN folded)
            w_spec, b_spec,                                    # block conv1
            w_spec, b_spec,                                    # block conv2
        ],
        out_specs=pl.BlockSpec((1, NB, CP), lambda n: (n, 0, 0)),
        scratch_shapes=[
            pltpu.VMEM((H + 2 * PAD, W + 2 * PAD, CP), jnp.bfloat16)],
        compiler_params=pltpu.CompilerParams(
            dimension_semantics=("parallel",),
            vmem_limit_bytes=32 * 1024 * 1024),
    )(patches, params["w0"], params["b0"], params["w1"], params["b1"],
      params["w2"], params["b2"])

    # TODO(synk): for real ResNet resolutions (e.g. 224x224) tile H into row
    # bands with a 1-pixel halo per conv and grid over (N, bands); the
    # whole-image-resident scratch would exceed v7x's 64 MiB VMEM.
    return feats.reshape(N, CP)


# ------------------------------ parameter prep -------------------------------

def _fold_bn(gamma, beta, mean, var, eps=1e-5):
    scale = gamma / jnp.sqrt(var + eps)
    return scale, beta - mean * scale


def init_params(key, cin=3, c=CP):
    """Synthetic conv + BN weights; BN folded into the (bf16) conv weights and
    packed into the kernel layout."""
    keys = jax.random.split(key, 6)

    def conv_w(kk, cin_, cout_):
        fan = KS * KS * cin_
        return jax.random.normal(kk, (KS, KS, cin_, cout_),
                                 jnp.float32) / jnp.sqrt(fan)

    def bn(kk, cout_):
        k1, k2 = jax.random.split(kk)
        gamma = 1.0 + 0.1 * jax.random.normal(k1, (cout_,), jnp.float32)
        beta = 0.1 * jax.random.normal(k2, (cout_,), jnp.float32)
        return _fold_bn(gamma, beta, jnp.zeros((cout_,), jnp.float32),
                        jnp.ones((cout_,), jnp.float32))

    def pack_block_conv(w, scale):
        # Kernel layout: w_packed[dx*KS + dy, ci, co] = w[dy, dx, ci, co]*s[co]
        wf = w * scale[None, None, None, :]
        return (jnp.transpose(wf, (1, 0, 2, 3))
                .reshape(KS * KS, c, c).astype(jnp.bfloat16))

    p = {}
    # Stem: 9 taps x cin rows packed along K, kept at one full 128-lane tile
    # (27 real rows; the stem is <6% of total MXU work).
    w0 = conv_w(keys[0], cin, c)
    s0, b0 = bn(keys[1], c)
    k0 = KS * KS * cin
    w0f = (w0 * s0[None, None, None, :]).reshape(k0, c)
    p["w0"] = (jnp.zeros((CP, c), jnp.float32).at[:k0].set(w0f)
               .astype(jnp.bfloat16))
    p["b0"] = b0.reshape(1, c)

    w1 = conv_w(keys[2], c, c)
    s1, b1 = bn(keys[3], c)
    p["w1"], p["b1"] = pack_block_conv(w1, s1), b1.reshape(1, c)

    w2 = conv_w(keys[4], c, c)
    s2, b2 = bn(keys[5], c)
    p["w2"], p["b2"] = pack_block_conv(w2, s2), b2.reshape(1, c)
    return p


# ---------------------------- pure-JAX reference -----------------------------

def _round_bf16(a):
    return a.astype(jnp.bfloat16).astype(jnp.float32)


def _unpack_block_conv(wp):
    # (KS*KS, C, C) with index dx*KS + dy  ->  HWIO (dy, dx, ci, co), f32
    c = wp.shape[-1]
    w = wp.astype(jnp.float32).reshape(KS, KS, c, c)   # [dx, dy, ci, co]
    return jnp.transpose(w, (1, 0, 2, 3))              # [dy, dx, ci, co]


def backbone_reference(params, x_nchw):
    """Reference mirroring the kernel numerics: bf16 weights, bf16-rounded
    activations between layers, f32 accumulation."""
    _, cin, _, _ = x_nchw.shape
    x = _round_bf16(jnp.transpose(x_nchw, (0, 2, 3, 1)))
    k0 = KS * KS * cin
    w0 = params["w0"][:k0].astype(jnp.float32).reshape(KS, KS, cin, CP)

    def conv(inp, w_hwio, b):
        y = jax.lax.conv_general_dilated(
            inp, w_hwio, window_strides=(1, 1), padding="SAME",
            dimension_numbers=("NHWC", "HWIO", "NHWC"))
        return y + b.reshape(1, 1, 1, CP)

    h = _round_bf16(jax.nn.relu(conv(x, w0, params["b0"])))
    h1 = _round_bf16(jax.nn.relu(
        conv(h, _unpack_block_conv(params["w1"]), params["b1"])))
    h2 = jax.nn.relu(
        conv(h1, _unpack_block_conv(params["w2"]), params["b2"]) + h)
    return jnp.mean(h2, axis=(1, 2))


# ----------------------------------- main ------------------------------------

if __name__ == "__main__":
    key = jax.random.PRNGKey(0)
    k_x, k_p = jax.random.split(key)

    x = jax.random.normal(k_x, (8, 3, 16, 16), jnp.float32)        # NCHW
    params = init_params(k_p, cin=3, c=CP)

    feats = jax.jit(backbone_forward)(params, x)
    jax.block_until_ready(feats)

    assert feats.shape == (8, CP)
    assert bool(jnp.isfinite(feats).all())

    ref = backbone_reference(params, x)
    err = float(jnp.max(jnp.abs(feats - ref)))
    assert jnp.allclose(feats, ref, rtol=5e-2, atol=5e-2), (
        "max abs diff vs reference: %f" % err)

    print("KERNEL_OK")
</pallas_src>

<mosaic_0001>
module attributes {stable_mosaic.version = 11 : i64} {
  func.func @_backbone_kernel(%arg0: i32, %arg1: memref<2x256x128xbf16, #tpu.memory_space<vmem>>, %arg2: memref<128x128xbf16, #tpu.memory_space<vmem>>, %arg3: memref<1x128xf32, #tpu.memory_space<vmem>>, %arg4: memref<9x128x128xbf16, #tpu.memory_space<vmem>>, %arg5: memref<1x128xf32, #tpu.memory_space<vmem>>, %arg6: memref<9x128x128xbf16, #tpu.memory_space<vmem>>, %arg7: memref<1x128xf32, #tpu.memory_space<vmem>>, %arg8: memref<1x2x128xf32, #tpu.memory_space<vmem>>, %arg9: memref<18x18x128xbf16, #tpu.memory_space<vmem>>) attributes {dimension_semantics = [#tpu.dimension_semantics<parallel>], iteration_bounds = array<i64: 4>, scalar_prefetch = 0 : i64, scratch_operands = 1 : i64, tpu.core_type = #tpu.core_type<tc>, window_params = [{transform_indices = @transform_0, window_bounds = array<i64: 2, 256, 128>}, {pipeline_mode = #tpu.pipeline_mode<synchronous>, transform_indices = @transform_1, window_bounds = array<i64: 128, 128>}, {pipeline_mode = #tpu.pipeline_mode<synchronous>, transform_indices = @transform_2, window_bounds = array<i64: 1, 128>}, {pipeline_mode = #tpu.pipeline_mode<synchronous>, transform_indices = @transform_3, window_bounds = array<i64: 9, 128, 128>}, {pipeline_mode = #tpu.pipeline_mode<synchronous>, transform_indices = @transform_4, window_bounds = array<i64: 1, 128>}, {pipeline_mode = #tpu.pipeline_mode<synchronous>, transform_indices = @transform_5, window_bounds = array<i64: 9, 128, 128>}, {pipeline_mode = #tpu.pipeline_mode<synchronous>, transform_indices = @transform_6, window_bounds = array<i64: 1, 128>}, {transform_indices = @transform_7, window_bounds = array<i64: 1, 2, 128>}]} {
    %cst = arith.constant 0.000000e+00 : bf16
    %0 = vector.broadcast %cst : bf16 to vector<18x18x128xbf16>
    %c0 = arith.constant 0 : index
    %c0_0 = arith.constant 0 : index
    %c0_1 = arith.constant 0 : index
    %1 = vector.load %arg9[%c0, %c0_0, %c0_1] : memref<18x18x128xbf16, #tpu.memory_space<vmem>>, vector<18x18x128xbf16>
    tpu.vector_store %arg9[%c0, %c0_0, %c0_1], %0 {strides = array<i32>} : memref<18x18x128xbf16, #tpu.memory_space<vmem>>, vector<18x18x128xbf16>,
    %c0_2 = arith.constant 0 : index
    %c0_3 = arith.constant 0 : index
    %c0_4 = arith.constant 0 : index
    %2 = vector.load %arg1[%c0_2, %c0_3, %c0_4] : memref<2x256x128xbf16, #tpu.memory_space<vmem>>, vector<1x256x128xbf16>
    %3 = vector.shape_cast %2 : vector<1x256x128xbf16> to vector<256x128xbf16>
    %c0_5 = arith.constant 0 : index
    %c0_6 = arith.constant 0 : index
    %4 = vector.load %arg2[%c0_5, %c0_6] : memref<128x128xbf16, #tpu.memory_space<vmem>>, vector<128x128xbf16>
    %cst_7 = arith.constant dense<0.000000e+00> : vector<256x128xf32>
    %5 = tpu.matmul %3, %4, %cst_7 {dimension_numbers = #tpu.dot_dimension_numbers<[1], [0], [0], [1], [0, 0, 1, 1], [], []>} : vector<256x128xbf16>, vector<128x128xbf16>, vector<256x128xf32> -> vector<256x128xf32>
    %c0_8 = arith.constant 0 : index
    %c0_9 = arith.constant 0 : index
    %6 = vector.load %arg3[%c0_8, %c0_9] : memref<1x128xf32, #tpu.memory_space<vmem>>, vector<1x128xf32>
    %7 = vector.broadcast %6 : vector<1x128xf32> to vector<256x128xf32>
    %8 = arith.addf %5, %7 : vector<256x128xf32>
    %cst_10 = arith.constant 0.000000e+00 : f32
    %9 = vector.broadcast %cst_10 : f32 to vector<256x128xf32>
    %10 = arith.maximumf %8, %9 : vector<256x128xf32>
    %11 = vector.shape_cast %10 : vector<256x128xf32> to vector<16x16x128xf32>
    %12 = arith.truncf %11 : vector<16x16x128xf32> to vector<16x16x128xbf16>
    %c1 = arith.constant 1 : index
    %c1_11 = arith.constant 1 : index
    %c0_12 = arith.constant 0 : index
    %13 = vector.load %arg9[%c1, %c1_11, %c0_12] : memref<18x18x128xbf16, #tpu.memory_space<vmem>>, vector<16x16x128xbf16>
    tpu.vector_store %arg9[%c1, %c1_11, %c0_12], %12 {strides = array<i32>} : memref<18x18x128xbf16, #tpu.memory_space<vmem>>, vector<16x16x128xbf16>,
    %c0_13 = arith.constant 0 : index
    %c0_14 = arith.constant 0 : index
    %14 = vector.load %arg5[%c0_13, %c0_14] : memref<1x128xf32, #tpu.memory_space<vmem>>, vector<1x128xf32>
    %c0_15 = arith.constant 0 : index
    %c0_16 = arith.constant 0 : index
    %c0_17 = arith.constant 0 : index
    %15 = vector.load %arg9[%c0_15, %c0_16, %c0_17] : memref<18x18x128xbf16, #tpu.memory_space<vmem>>, vector<18x16x128xbf16>
    %16 = vector.extract_strided_slice %15 {offsets = [0, 0, 0], sizes = [16, 16, 128], strides = [1, 1, 1]} : vector<18x16x128xbf16> to vector<16x16x128xbf16>
    %17 = vector.shape_cast %16 : vector<16x16x128xbf16> to vector<256x128xbf16>
    %c0_18 = arith.constant 0 : index
    %c0_19 = arith.constant 0 : index
    %c0_20 = arith.constant 0 : index
    %18 = vector.load %arg4[%c0_18, %c0_19, %c0_20] : memref<9x128x128xbf16, #tpu.memory_space<vmem>>, vector<1x128x128xbf16>
    %19 = vector.shape_cast %18 : vector<1x128x128xbf16> to vector<128x128xbf16>
    %cst_21 = arith.constant dense<0.000000e+00> : vector<256x128xf32>
    %20 = tpu.matmul %17, %19, %cst_21 {dimension_numbers = #tpu.dot_dimension_numbers<[1], [0], [0], [1], [0, 0, 1, 1], [], []>} : vector<256x128xbf16>, vector<128x128xbf16>, vector<256x128xf32> -> vector<256x128xf32>
    %21 = vector.broadcast %14 : vector<1x128xf32> to vector<256x128xf32>
    %22 = arith.addf %21, %20 : vector<256x128xf32>
    %23 = vector.extract_strided_slice %15 {offsets = [1, 0, 0], sizes = [16, 16, 128], strides = [1, 1, 1]} : vector<18x16x128xbf16> to vector<16x16x128xbf16>
    %24 = vector.shape_cast %23 : vector<16x16x128xbf16> to vector<256x128xbf16>
    %c1_22 = arith.constant 1 : index
    %c0_23 = arith.constant 0 : index
    %c0_24 = arith.constant 0 : index
    %25 = vector.load %arg4[%c1_22, %c0_23, %c0_24] : memref<9x128x128xbf16, #tpu.memory_space<vmem>>, vector<1x128x128xbf16>
    %26 = vector.shape_cast %25 : vector<1x128x128xbf16> to vector<128x128xbf16>
    %cst_25 = arith.constant dense<0.000000e+00> : vector<256x128xf32>
    %27 = tpu.matmul %24, %26, %cst_25 {dimension_numbers = #tpu.dot_dimension_numbers<[1], [0], [0], [1], [0, 0, 1, 1], [], []>} : vector<256x128xbf16>, vector<128x128xbf16>, vector<256x128xf32> -> vector<256x128xf32>
    %28 = arith.addf %22, %27 : vector<256x128xf32>
    %29 = vector.extract_strided_slice %15 {offsets = [2, 0, 0], sizes = [16, 16, 128], strides = [1, 1, 1]} : vector<18x16x128xbf16> to vector<16x16x128xbf16>
    %30 = vector.shape_cast %29 : vector<16x16x128xbf16> to vector<256x128xbf16>
    %c2 = arith.constant 2 : index
    %c0_26 = arith.constant 0 : index
    %c0_27 = arith.constant 0 : index
    %31 = vector.load %arg4[%c2, %c0_26, %c0_27] : memref<9x128x128xbf16, #tpu.memory_space<vmem>>, vector<1x128x128xbf16>
    %32 = vector.shape_cast %31 : vector<1x128x128xbf16> to vector<128x128xbf16>
    %cst_28 = arith.constant dense<0.000000e+00> : vector<256x128xf32>
    %33 = tpu.matmul %30, %32, %cst_28 {dimension_numbers = #tpu.dot_dimension_numbers<[1], [0], [0], [1], [0, 0, 1, 1], [], []>} : vector<256x128xbf16>, vector<128x128xbf16>, vector<256x128xf32> -> vector<256x128xf32>
    %34 = arith.addf %28, %33 : vector<256x128xf32>
    %c0_29 = arith.constant 0 : index
    %c1_30 = arith.constant 1 : index
    %c0_31 = arith.constant 0 : index
    %35 = vector.load %arg9[%c0_29, %c1_30, %c0_31] : memref<18x18x128xbf16, #tpu.memory_space<vmem>>, vector<18x16x128xbf16>
    %36 = vector.extract_strided_slice %35 {offsets = [0, 0, 0], sizes = [16, 16, 128], strides = [1, 1, 1]} : vector<18x16x128xbf16> to vector<16x16x128xbf16>
    %37 = vector.shape_cast %36 : vector<16x16x128xbf16> to vector<256x128xbf16>
    %c3 = arith.constant 3 : index
    %c0_32 = arith.constant 0 : index
    %c0_33 = arith.constant 0 : index
    %38 = vector.load %arg4[%c3, %c0_32, %c0_33] : memref<9x128x128xbf16, #tpu.memory_space<vmem>>, vector<1x128x128xbf16>
    %39 = vector.shape_cast %38 : vector<1x128x128xbf16> to vector<128x128xbf16>
    %cst_34 = arith.constant dense<0.000000e+00> : vector<256x128xf32>
    %40 = tpu.matmul %37, %39, %cst_34 {dimension_numbers = #tpu.dot_dimension_numbers<[1], [0], [0], [1], [0, 0, 1, 1], [], []>} : vector<256x128xbf16>, vector<128x128xbf16>, vector<256x128xf32> -> vector<256x128xf32>
    %41 = arith.addf %34, %40 : vector<256x128xf32>
    %42 = vector.extract_strided_slice %35 {offsets = [1, 0, 0], sizes = [16, 16, 128], strides = [1, 1, 1]} : vector<18x16x128xbf16> to vector<16x16x128xbf16>
    %43 = vector.shape_cast %42 : vector<16x16x128xbf16> to vector<256x128xbf16>
    %c4 = arith.constant 4 : index
    %c0_35 = arith.constant 0 : index
    %c0_36 = arith.constant 0 : index
    %44 = vector.load %arg4[%c4, %c0_35, %c0_36] : memref<9x128x128xbf16, #tpu.memory_space<vmem>>, vector<1x128x128xbf16>
    %45 = vector.shape_cast %44 : vector<1x128x128xbf16> to vector<128x128xbf16>
    %cst_37 = arith.constant dense<0.000000e+00> : vector<256x128xf32>
    %46 = tpu.matmul %43, %45, %cst_37 {dimension_numbers = #tpu.dot_dimension_numbers<[1], [0], [0], [1], [0, 0, 1, 1], [], []>} : vector<256x128xbf16>, vector<128x128xbf16>, vector<256x128xf32> -> vector<256x128xf32>
    %47 = arith.addf %41, %46 : vector<256x128xf32>
    %48 = vector.extract_strided_slice %35 {offsets = [2, 0, 0], sizes = [16, 16, 128], strides = [1, 1, 1]} : vector<18x16x128xbf16> to vector<16x16x128xbf16>
    %49 = vector.shape_cast %48 : vector<16x16x128xbf16> to vector<256x128xbf16>
    %c5 = arith.constant 5 : index
    %c0_38 = arith.constant 0 : index
    %c0_39 = arith.constant 0 : index
    %50 = vector.load %arg4[%c5, %c0_38, %c0_39] : memref<9x128x128xbf16, #tpu.memory_space<vmem>>, vector<1x128x128xbf16>
    %51 = vector.shape_cast %50 : vector<1x128x128xbf16> to vector<128x128xbf16>
    %cst_40 = arith.constant dense<0.000000e+00> : vector<256x128xf32>
    %52 = tpu.matmul %49, %51, %cst_40 {dimension_numbers = #tpu.dot_dimension_numbers<[1], [0], [0], [1], [0, 0, 1, 1], [], []>} : vector<256x128xbf16>, vector<128x128xbf16>, vector<256x128xf32> -> vector<256x128xf32>
    %53 = arith.addf %47, %52 : vector<256x128xf32>
    %c0_41 = arith.constant 0 : index
    %c2_42 = arith.constant 2 : index
    %c0_43 = arith.constant 0 : index
    %54 = vector.load %arg9[%c0_41, %c2_42, %c0_43] : memref<18x18x128xbf16, #tpu.memory_space<vmem>>, vector<18x16x128xbf16>
    %55 = vector.extract_strided_slice %54 {offsets = [0, 0, 0], sizes = [16, 16, 128], strides = [1, 1, 1]} : vector<18x16x128xbf16> to vector<16x16x128xbf16>
    %56 = vector.shape_cast %55 : vector<16x16x128xbf16> to vector<256x128xbf16>
    %c6 = arith.constant 6 : index
    %c0_44 = arith.constant 0 : index
    %c0_45 = arith.constant 0 : index
    %57 = vector.load %arg4[%c6, %c0_44, %c0_45] : memref<9x128x128xbf16, #tpu.memory_space<vmem>>, vector<1x128x128xbf16>
    %58 = vector.shape_cast %57 : vector<1x128x128xbf16> to vector<128x128xbf16>
    %cst_46 = arith.constant dense<0.000000e+00> : vector<256x128xf32>
    %59 = tpu.matmul %56, %58, %cst_46 {dimension_numbers = #tpu.dot_dimension_numbers<[1], [0], [0], [1], [0, 0, 1, 1], [], []>} : vector<256x128xbf16>, vector<128x128xbf16>, vector<256x128xf32> -> vector<256x128xf32>
    %60 = arith.addf %53, %59 : vector<256x128xf32>
    %61 = vector.extract_strided_slice %54 {offsets = [1, 0, 0], sizes = [16, 16, 128], strides = [1, 1, 1]} : vector<18x16x128xbf16> to vector<16x16x128xbf16>
    %62 = vector.shape_cast %61 : vector<16x16x128xbf16> to vector<256x128xbf16>
    %c7 = arith.constant 7 : index
    %c0_47 = arith.constant 0 : index
    %c0_48 = arith.constant 0 : index
    %63 = vector.load %arg4[%c7, %c0_47, %c0_48] : memref<9x128x128xbf16, #tpu.memory_space<vmem>>, vector<1x128x128xbf16>
    %64 = vector.shape_cast %63 : vector<1x128x128xbf16> to vector<128x128xbf16>
    %cst_49 = arith.constant dense<0.000000e+00> : vector<256x128xf32>
    %65 = tpu.matmul %62, %64, %cst_49 {dimension_numbers = #tpu.dot_dimension_numbers<[1], [0], [0], [1], [0, 0, 1, 1], [], []>} : vector<256x128xbf16>, vector<128x128xbf16>, vector<256x128xf32> -> vector<256x128xf32>
    %66 = arith.addf %60, %65 : vector<256x128xf32>
    %67 = vector.extract_strided_slice %54 {offsets = [2, 0, 0], sizes = [16, 16, 128], strides = [1, 1, 1]} : vector<18x16x128xbf16> to vector<16x16x128xbf16>
    %68 = vector.shape_cast %67 : vector<16x16x128xbf16> to vector<256x128xbf16>
    %c8 = arith.constant 8 : index
    %c0_50 = arith.constant 0 : index
    %c0_51 = arith.constant 0 : index
    %69 = vector.load %arg4[%c8, %c0_50, %c0_51] : memref<9x128x128xbf16, #tpu.memory_space<vmem>>, vector<1x128x128xbf16>
    %70 = vector.shape_cast %69 : vector<1x128x128xbf16> to vector<128x128xbf16>
    %cst_52 = arith.constant dense<0.000000e+00> : vector<256x128xf32>
    %71 = tpu.matmul %68, %70, %cst_52 {dimension_numbers = #tpu.dot_dimension_numbers<[1], [0], [0], [1], [0, 0, 1, 1], [], []>} : vector<256x128xbf16>, vector<128x128xbf16>, vector<256x128xf32> -> vector<256x128xf32>
    %72 = arith.addf %66, %71 : vector<256x128xf32>
    %cst_53 = arith.constant 0.000000e+00 : f32
    %73 = vector.broadcast %cst_53 : f32 to vector<256x128xf32>
    %74 = arith.maximumf %72, %73 : vector<256x128xf32>
    %c1_54 = arith.constant 1 : index
    %c1_55 = arith.constant 1 : index
    %c0_56 = arith.constant 0 : index
    %75 = vector.load %arg9[%c1_54, %c1_55, %c0_56] : memref<18x18x128xbf16, #tpu.memory_space<vmem>>, vector<16x16x128xbf16>
    %76 = vector.shape_cast %75 : vector<16x16x128xbf16> to vector<256x128xbf16>
    %77 = vector.shape_cast %74 : vector<256x128xf32> to vector<16x16x128xf32>
    %78 = arith.truncf %77 : vector<16x16x128xf32> to vector<16x16x128xbf16>
    %c1_57 = arith.constant 1 : index
    %c1_58 = arith.constant 1 : index
    %c0_59 = arith.constant 0 : index
    %79 = vector.load %arg9[%c1_57, %c1_58, %c0_59] : memref<18x18x128xbf16, #tpu.memory_space<vmem>>, vector<16x16x128xbf16>
    tpu.vector_store %arg9[%c1_57, %c1_58, %c0_59], %78 {strides = array<i32>} : memref<18x18x128xbf16, #tpu.memory_space<vmem>>, vector<16x16x128xbf16>,
    %80 = arith.extf %76 : vector<256x128xbf16> to vector<256x128xf32>
    %c0_60 = arith.constant 0 : index
    %c0_61 = arith.constant 0 : index
    %81 = vector.load %arg7[%c0_60, %c0_61] : memref<1x128xf32, #tpu.memory_space<vmem>>, vector<1x128xf32>
    %82 = vector.broadcast %81 : vector<1x128xf32> to vector<256x128xf32>
    %83 = arith.addf %80, %82 : vector<256x128xf32>
    %c0_62 = arith.constant 0 : index
    %c0_63 = arith.constant 0 : index
    %c0_64 = arith.constant 0 : index
    %84 = vector.load %arg9[%c0_62, %c0_63, %c0_64] : memref<18x18x128xbf16, #tpu.memory_space<vmem>>, vector<18x16x128xbf16>
    %85 = vector.extract_strided_slice %84 {offsets = [0, 0, 0], sizes = [16, 16, 128], strides = [1, 1, 1]} : vector<18x16x128xbf16> to vector<16x16x128xbf16>
    %86 = vector.shape_cast %85 : vector<16x16x128xbf16> to vector<256x128xbf16>
    %c0_65 = arith.constant 0 : index
    %c0_66 = arith.constant 0 : index
    %c0_67 = arith.constant 0 : index
    %87 = vector.load %arg6[%c0_65, %c0_66, %c0_67] : memref<9x128x128xbf16, #tpu.memory_space<vmem>>, vector<1x128x128xbf16>
    %88 = vector.shape_cast %87 : vector<1x128x128xbf16> to vector<128x128xbf16>
    %cst_68 = arith.constant dense<0.000000e+00> : vector<256x128xf32>
    %89 = tpu.matmul %86, %88, %cst_68 {dimension_numbers = #tpu.dot_dimension_numbers<[1], [0], [0], [1], [0, 0, 1, 1], [], []>} : vector<256x128xbf16>, vector<128x128xbf16>, vector<256x128xf32> -> vector<256x128xf32>
    %90 = arith.addf %83, %89 : vector<256x128xf32>
    %91 = vector.extract_strided_slice %84 {offsets = [1, 0, 0], sizes = [16, 16, 128], strides = [1, 1, 1]} : vector<18x16x128xbf16> to vector<16x16x128xbf16>
    %92 = vector.shape_cast %91 : vector<16x16x128xbf16> to vector<256x128xbf16>
    %c1_69 = arith.constant 1 : index
    %c0_70 = arith.constant 0 : index
    %c0_71 = arith.constant 0 : index
    %93 = vector.load %arg6[%c1_69, %c0_70, %c0_71] : memref<9x128x128xbf16, #tpu.memory_space<vmem>>, vector<1x128x128xbf16>
    %94 = vector.shape_cast %93 : vector<1x128x128xbf16> to vector<128x128xbf16>
    %cst_72 = arith.constant dense<0.000000e+00> : vector<256x128xf32>
    %95 = tpu.matmul %92, %94, %cst_72 {dimension_numbers = #tpu.dot_dimension_numbers<[1], [0], [0], [1], [0, 0, 1, 1], [], []>} : vector<256x128xbf16>, vector<128x128xbf16>, vector<256x128xf32> -> vector<256x128xf32>
    %96 = arith.addf %90, %95 : vector<256x128xf32>
    %97 = vector.extract_strided_slice %84 {offsets = [2, 0, 0], sizes = [16, 16, 128], strides = [1, 1, 1]} : vector<18x16x128xbf16> to vector<16x16x128xbf16>
    %98 = vector.shape_cast %97 : vector<16x16x128xbf16> to vector<256x128xbf16>
    %c2_73 = arith.constant 2 : index
    %c0_74 = arith.constant 0 : index
    %c0_75 = arith.constant 0 : index
    %99 = vector.load %arg6[%c2_73, %c0_74, %c0_75] : memref<9x128x128xbf16, #tpu.memory_space<vmem>>, vector<1x128x128xbf16>
    %100 = vector.shape_cast %99 : vector<1x128x128xbf16> to vector<128x128xbf16>
    %cst_76 = arith.constant dense<0.000000e+00> : vector<256x128xf32>
    %101 = tpu.matmul %98, %100, %cst_76 {dimension_numbers = #tpu.dot_dimension_numbers<[1], [0], [0], [1], [0, 0, 1, 1], [], []>} : vector<256x128xbf16>, vector<128x128xbf16>, vector<256x128xf32> -> vector<256x128xf32>
    %102 = arith.addf %96, %101 : vector<256x128xf32>
    %c0_77 = arith.constant 0 : index
    %c1_78 = arith.constant 1 : index
    %c0_79 = arith.constant 0 : index
    %103 = vector.load %arg9[%c0_77, %c1_78, %c0_79] : memref<18x18x128xbf16, #tpu.memory_space<vmem>>, vector<18x16x128xbf16>
    %104 = vector.extract_strided_slice %103 {offsets = [0, 0, 0], sizes = [16, 16, 128], strides = [1, 1, 1]} : vector<18x16x128xbf16> to vector<16x16x128xbf16>
    %105 = vector.shape_cast %104 : vector<16x16x128xbf16> to vector<256x128xbf16>
    %c3_80 = arith.constant 3 : index
    %c0_81 = arith.constant 0 : index
    %c0_82 = arith.constant 0 : index
    %106 = vector.load %arg6[%c3_80, %c0_81, %c0_82] : memref<9x128x128xbf16, #tpu.memory_space<vmem>>, vector<1x128x128xbf16>
    %107 = vector.shape_cast %106 : vector<1x128x128xbf16> to vector<128x128xbf16>
    %cst_83 = arith.constant dense<0.000000e+00> : vector<256x128xf32>
    %108 = tpu.matmul %105, %107, %cst_83 {dimension_numbers = #tpu.dot_dimension_numbers<[1], [0], [0], [1], [0, 0, 1, 1], [], []>} : vector<256x128xbf16>, vector<128x128xbf16>, vector<256x128xf32> -> vector<256x128xf32>
    %109 = arith.addf %102, %108 : vector<256x128xf32>
    %110 = vector.extract_strided_slice %103 {offsets = [1, 0, 0], sizes = [16, 16, 128], strides = [1, 1, 1]} : vector<18x16x128xbf16> to vector<16x16x128xbf16>
    %111 = vector.shape_cast %110 : vector<16x16x128xbf16> to vector<256x128xbf16>
    %c4_84 = arith.constant 4 : index
    %c0_85 = arith.constant 0 : index
    %c0_86 = arith.constant 0 : index
    %112 = vector.load %arg6[%c4_84, %c0_85, %c0_86] : memref<9x128x128xbf16, #tpu.memory_space<vmem>>, vector<1x128x128xbf16>
    %113 = vector.shape_cast %112 : vector<1x128x128xbf16> to vector<128x128xbf16>
    %cst_87 = arith.constant dense<0.000000e+00> : vector<256x128xf32>
    %114 = tpu.matmul %111, %113, %cst_87 {dimension_numbers = #tpu.dot_dimension_numbers<[1], [0], [0], [1], [0, 0, 1, 1], [], []>} : vector<256x128xbf16>, vector<128x128xbf16>, vector<256x128xf32> -> vector<256x128xf32>
    %115 = arith.addf %109, %114 : vector<256x128xf32>
    %116 = vector.extract_strided_slice %103 {offsets = [2, 0, 0], sizes = [16, 16, 128], strides = [1, 1, 1]} : vector<18x16x128xbf16> to vector<16x16x128xbf16>
    %117 = vector.shape_cast %116 : vector<16x16x128xbf16> to vector<256x128xbf16>
    %c5_88 = arith.constant 5 : index
    %c0_89 = arith.constant 0 : index
    %c0_90 = arith.constant 0 : index
    %118 = vector.load %arg6[%c5_88, %c0_89, %c0_90] : memref<9x128x128xbf16, #tpu.memory_space<vmem>>, vector<1x128x128xbf16>
    %119 = vector.shape_cast %118 : vector<1x128x128xbf16> to vector<128x128xbf16>
    %cst_91 = arith.constant dense<0.000000e+00> : vector<256x128xf32>
    %120 = tpu.matmul %117, %119, %cst_91 {dimension_numbers = #tpu.dot_dimension_numbers<[1], [0], [0], [1], [0, 0, 1, 1], [], []>} : vector<256x128xbf16>, vector<128x128xbf16>, vector<256x128xf32> -> vector<256x128xf32>
    %121 = arith.addf %115, %120 : vector<256x128xf32>
    %c0_92 = arith.constant 0 : index
    %c2_93 = arith.constant 2 : index
    %c0_94 = arith.constant 0 : index
    %122 = vector.load %arg9[%c0_92, %c2_93, %c0_94] : memref<18x18x128xbf16, #tpu.memory_space<vmem>>, vector<18x16x128xbf16>
    %123 = vector.extract_strided_slice %122 {offsets = [0, 0, 0], sizes = [16, 16, 128], strides = [1, 1, 1]} : vector<18x16x128xbf16> to vector<16x16x128xbf16>
    %124 = vector.shape_cast %123 : vector<16x16x128xbf16> to vector<256x128xbf16>
    %c6_95 = arith.constant 6 : index
    %c0_96 = arith.constant 0 : index
    %c0_97 = arith.constant 0 : index
    %125 = vector.load %arg6[%c6_95, %c0_96, %c0_97] : memref<9x128x128xbf16, #tpu.memory_space<vmem>>, vector<1x128x128xbf16>
    %126 = vector.shape_cast %125 : vector<1x128x128xbf16> to vector<128x128xbf16>
    %cst_98 = arith.constant dense<0.000000e+00> : vector<256x128xf32>
    %127 = tpu.matmul %124, %126, %cst_98 {dimension_numbers = #tpu.dot_dimension_numbers<[1], [0], [0], [1], [0, 0, 1, 1], [], []>} : vector<256x128xbf16>, vector<128x128xbf16>, vector<256x128xf32> -> vector<256x128xf32>
    %128 = arith.addf %121, %127 : vector<256x128xf32>
    %129 = vector.extract_strided_slice %122 {offsets = [1, 0, 0], sizes = [16, 16, 128], strides = [1, 1, 1]} : vector<18x16x128xbf16> to vector<16x16x128xbf16>
    %130 = vector.shape_cast %129 : vector<16x16x128xbf16> to vector<256x128xbf16>
    %c7_99 = arith.constant 7 : index
    %c0_100 = arith.constant 0 : index
    %c0_101 = arith.constant 0 : index
    %131 = vector.load %arg6[%c7_99, %c0_100, %c0_101] : memref<9x128x128xbf16, #tpu.memory_space<vmem>>, vector<1x128x128xbf16>
    %132 = vector.shape_cast %131 : vector<1x128x128xbf16> to vector<128x128xbf16>
    %cst_102 = arith.constant dense<0.000000e+00> : vector<256x128xf32>
    %133 = tpu.matmul %130, %132, %cst_102 {dimension_numbers = #tpu.dot_dimension_numbers<[1], [0], [0], [1], [0, 0, 1, 1], [], []>} : vector<256x128xbf16>, vector<128x128xbf16>, vector<256x128xf32> -> vector<256x128xf32>
    %134 = arith.addf %128, %133 : vector<256x128xf32>
    %135 = vector.extract_strided_slice %122 {offsets = [2, 0, 0], sizes = [16, 16, 128], strides = [1, 1, 1]} : vector<18x16x128xbf16> to vector<16x16x128xbf16>
    %136 = vector.shape_cast %135 : vector<16x16x128xbf16> to vector<256x128xbf16>
    %c8_103 = arith.constant 8 : index
    %c0_104 = arith.constant 0 : index
    %c0_105 = arith.constant 0 : index
    %137 = vector.load %arg6[%c8_103, %c0_104, %c0_105] : memref<9x128x128xbf16, #tpu.memory_space<vmem>>, vector<1x128x128xbf16>
    %138 = vector.shape_cast %137 : vector<1x128x128xbf16> to vector<128x128xbf16>
    %cst_106 = arith.constant dense<0.000000e+00> : vector<256x128xf32>
    %139 = tpu.matmul %136, %138, %cst_106 {dimension_numbers = #tpu.dot_dimension_numbers<[1], [0], [0], [1], [0, 0, 1, 1], [], []>} : vector<256x128xbf16>, vector<128x128xbf16>, vector<256x128xf32> -> vector<256x128xf32>
    %140 = arith.addf %134, %139 : vector<256x128xf32>
    %cst_107 = arith.constant 0.000000e+00 : f32
    %141 = vector.broadcast %cst_107 : f32 to vector<256x128xf32>
    %142 = arith.maximumf %140, %141 : vector<256x128xf32>
    %cst_108 = arith.constant dense<0.000000e+00> : vector<128xf32>
    %143 = vector.multi_reduction <add>, %142, %cst_108 [0] : vector<256x128xf32> to vector<128xf32>
    %144 = vector.shape_cast %143 : vector<128xf32> to vector<1x128xf32>
    %cst_109 = arith.constant 2.560000e+02 : f32
    %145 = vector.broadcast %cst_109 : f32 to vector<1x128xf32>
    %146 = arith.divf %144, %145 : vector<1x128xf32>
    %c0_110 = arith.constant 0 : index
    %c0_111 = arith.constant 0 : index
    %c0_112 = arith.constant 0 : index
    %147 = vector.load %arg8[%c0_110, %c0_111, %c0_112] : memref<1x2x128xf32, #tpu.memory_space<vmem>>, vector<1x1x128xf32>
    %148 = vector.shape_cast %147 : vector<1x1x128xf32> to vector<1x128xf32>
    %149 = vector.shape_cast %146 : vector<1x128xf32> to vector<1x1x128xf32>
    tpu.vector_store %arg8[%c0_110, %c0_111, %c0_112], %149 {strides = array<i32>} : memref<1x2x128xf32, #tpu.memory_space<vmem>>, vector<1x1x128xf32>,
    %c1_113 = arith.constant 1 : index
    %c0_114 = arith.constant 0 : index
    %c0_115 = arith.constant 0 : index
    %150 = vector.load %arg1[%c1_113, %c0_114, %c0_115] : memref<2x256x128xbf16, #tpu.memory_space<vmem>>, vector<1x256x128xbf16>
    %151 = vector.shape_cast %150 : vector<1x256x128xbf16> to vector<256x128xbf16>
    %c0_116 = arith.constant 0 : index
    %c0_117 = arith.constant 0 : index
    %152 = vector.load %arg2[%c0_116, %c0_117] : memref<128x128xbf16, #tpu.memory_space<vmem>>, vector<128x128xbf16>
    %cst_118 = arith.constant dense<0.000000e+00> : vector<256x128xf32>
    %153 = tpu.matmul %151, %152, %cst_118 {dimension_numbers = #tpu.dot_dimension_numbers<[1], [0], [0], [1], [0, 0, 1, 1], [], []>} : vector<256x128xbf16>, vector<128x128xbf16>, vector<256x128xf32> -> vector<256x128xf32>
    %c0_119 = arith.constant 0 : index
    %c0_120 = arith.constant 0 : index
    %154 = vector.load %arg3[%c0_119, %c0_120] : memref<1x128xf32, #tpu.memory_space<vmem>>, vector<1x128xf32>
    %155 = vector.broadcast %154 : vector<1x128xf32> to vector<256x128xf32>
    %156 = arith.addf %153, %155 : vector<256x128xf32>
    %cst_121 = arith.constant 0.000000e+00 : f32
    %157 = vector.broadcast %cst_121 : f32 to vector<256x128xf32>
    %158 = arith.maximumf %156, %157 : vector<256x128xf32>
    %159 = vector.shape_cast %158 : vector<256x128xf32> to vector<16x16x128xf32>
    %160 = arith.truncf %159 : vector<16x16x128xf32> to vector<16x16x128xbf16>
    %c1_122 = arith.constant 1 : index
    %c1_123 = arith.constant 1 : index
    %c0_124 = arith.constant 0 : index
    %161 = vector.load %arg9[%c1_122, %c1_123, %c0_124] : memref<18x18x128xbf16, #tpu.memory_space<vmem>>, vector<16x16x128xbf16>
    tpu.vector_store %arg9[%c1_122, %c1_123, %c0_124], %160 {strides = array<i32>} : memref<18x18x128xbf16, #tpu.memory_space<vmem>>, vector<16x16x128xbf16>,
    %c0_125 = arith.constant 0 : index
    %c0_126 = arith.constant 0 : index
    %162 = vector.load %arg5[%c0_125, %c0_126] : memref<1x128xf32, #tpu.memory_space<vmem>>, vector<1x128xf32>
    %c0_127 = arith.constant 0 : index
    %c0_128 = arith.constant 0 : index
    %c0_129 = arith.constant 0 : index
    %163 = vector.load %arg9[%c0_127, %c0_128, %c0_129] : memref<18x18x128xbf16, #tpu.memory_space<vmem>>, vector<18x16x128xbf16>
    %164 = vector.extract_strided_slice %163 {offsets = [0, 0, 0], sizes = [16, 16, 128], strides = [1, 1, 1]} : vector<18x16x128xbf16> to vector<16x16x128xbf16>
    %165 = vector.shape_cast %164 : vector<16x16x128xbf16> to vector<256x128xbf16>
    %c0_130 = arith.constant 0 : index
    %c0_131 = arith.constant 0 : index
    %c0_132 = arith.constant 0 : index
    %166 = vector.load %arg4[%c0_130, %c0_131, %c0_132] : memref<9x128x128xbf16, #tpu.memory_space<vmem>>, vector<1x128x128xbf16>
    %167 = vector.shape_cast %166 : vector<1x128x128xbf16> to vector<128x128xbf16>
    %cst_133 = arith.constant dense<0.000000e+00> : vector<256x128xf32>
    %168 = tpu.matmul %165, %167, %cst_133 {dimension_numbers = #tpu.dot_dimension_numbers<[1], [0], [0], [1], [0, 0, 1, 1], [], []>} : vector<256x128xbf16>, vector<128x128xbf16>, vector<256x128xf32> -> vector<256x128xf32>
    %169 = vector.broadcast %162 : vector<1x128xf32> to vector<256x128xf32>
    %170 = arith.addf %169, %168 : vector<256x128xf32>
    %171 = vector.extract_strided_slice %163 {offsets = [1, 0, 0], sizes = [16, 16, 128], strides = [1, 1, 1]} : vector<18x16x128xbf16> to vector<16x16x128xbf16>
    %172 = vector.shape_cast %171 : vector<16x16x128xbf16> to vector<256x128xbf16>
    %c1_134 = arith.constant 1 : index
    %c0_135 = arith.constant 0 : index
    %c0_136 = arith.constant 0 : index
    %173 = vector.load %arg4[%c1_134, %c0_135, %c0_136] : memref<9x128x128xbf16, #tpu.memory_space<vmem>>, vector<1x128x128xbf16>
    %174 = vector.shape_cast %173 : vector<1x128x128xbf16> to vector<128x128xbf16>
    %cst_137 = arith.constant dense<0.000000e+00> : vector<256x128xf32>
    %175 = tpu.matmul %172, %174, %cst_137 {dimension_numbers = #tpu.dot_dimension_numbers<[1], [0], [0], [1], [0, 0, 1, 1], [], []>} : vector<256x128xbf16>, vector<128x128xbf16>, vector<256x128xf32> -> vector<256x128xf32>
    %176 = arith.addf %170, %175 : vector<256x128xf32>
    %177 = vector.extract_strided_slice %163 {offsets = [2, 0, 0], sizes = [16, 16, 128], strides = [1, 1, 1]} : vector<18x16x128xbf16> to vector<16x16x128xbf16>
    %178 = vector.shape_cast %177 : vector<16x16x128xbf16> to vector<256x128xbf16>
    %c2_138 = arith.constant 2 : index
    %c0_139 = arith.constant 0 : index
    %c0_140 = arith.constant 0 : index
    %179 = vector.load %arg4[%c2_138, %c0_139, %c0_140] : memref<9x128x128xbf16, #tpu.memory_space<vmem>>, vector<1x128x128xbf16>
    %180 = vector.shape_cast %179 : vector<1x128x128xbf16> to vector<128x128xbf16>
    %cst_141 = arith.constant dense<0.000000e+00> : vector<256x128xf32>
    %181 = tpu.matmul %178, %180, %cst_141 {dimension_numbers = #tpu.dot_dimension_numbers<[1], [0], [0], [1], [0, 0, 1, 1], [], []>} : vector<256x128xbf16>, vector<128x128xbf16>, vector<256x128xf32> -> vector<256x128xf32>
    %182 = arith.addf %176, %181 : vector<256x128xf32>
    %c0_142 = arith.constant 0 : index
    %c1_143 = arith.constant 1 : index
    %c0_144 = arith.constant 0 : index
    %183 = vector.load %arg9[%c0_142, %c1_143, %c0_144] : memref<18x18x128xbf16, #tpu.memory_space<vmem>>, vector<18x16x128xbf16>
    %184 = vector.extract_strided_slice %183 {offsets = [0, 0, 0], sizes = [16, 16, 128], strides = [1, 1, 1]} : vector<18x16x128xbf16> to vector<16x16x128xbf16>
    %185 = vector.shape_cast %184 : vector<16x16x128xbf16> to vector<256x128xbf16>
    %c3_145 = arith.constant 3 : index
    %c0_146 = arith.constant 0 : index
    %c0_147 = arith.constant 0 : index
    %186 = vector.load %arg4[%c3_145, %c0_146, %c0_147] : memref<9x128x128xbf16, #tpu.memory_space<vmem>>, vector<1x128x128xbf16>
    %187 = vector.shape_cast %186 : vector<1x128x128xbf16> to vector<128x128xbf16>
    %cst_148 = arith.constant dense<0.000000e+00> : vector<256x128xf32>
    %188 = tpu.matmul %185, %187, %cst_148 {dimension_numbers = #tpu.dot_dimension_numbers<[1], [0], [0], [1], [0, 0, 1, 1], [], []>} : vector<256x128xbf16>, vector<128x128xbf16>, vector<256x128xf32> -> vector<256x128xf32>
    %189 = arith.addf %182, %188 : vector<256x128xf32>
    %190 = vector.extract_strided_slice %183 {offsets = [1, 0, 0], sizes = [16, 16, 128], strides = [1, 1, 1]} : vector<18x16x128xbf16> to vector<16x16x128xbf16>
    %191 = vector.shape_cast %190 : vector<16x16x128xbf16> to vector<256x128xbf16>
    %c4_149 = arith.constant 4 : index
    %c0_150 = arith.constant 0 : index
    %c0_151 = arith.constant 0 : index
    %192 = vector.load %arg4[%c4_149, %c0_150, %c0_151] : memref<9x128x128xbf16, #tpu.memory_space<vmem>>, vector<1x128x128xbf16>
    %193 = vector.shape_cast %192 : vector<1x128x128xbf16> to vector<128x128xbf16>
    %cst_152 = arith.constant dense<0.000000e+00> : vector<256x128xf32>
    %194 = tpu.matmul %191, %193, %cst_152 {dimension_numbers = #tpu.dot_dimension_numbers<[1], [0], [0], [1], [0, 0, 1, 1], [], []>} : vector<256x128xbf16>, vector<128x128xbf16>, vector<256x128xf32> -> vector<256x128xf32>
    %195 = arith.addf %189, %194 : vector<256x128xf32>
    %196 = vector.extract_strided_slice %183 {offsets = [2, 0, 0], sizes = [16, 16, 128], strides = [1, 1, 1]} : vector<18x16x128xbf16> to vector<16x16x128xbf16>
    %197 = vector.shape_cast %196 : vector<16x16x128xbf16> to vector<256x128xbf16>
    %c5_153 = arith.constant 5 : index
    %c0_154 = arith.constant 0 : index
    %c0_155 = arith.constant 0 : index
    %198 = vector.load %arg4[%c5_153, %c0_154, %c0_155] : memref<9x128x128xbf16, #tpu.memory_space<vmem>>, vector<1x128x128xbf16>
    %199 = vector.shape_cast %198 : vector<1x128x128xbf16> to vector<128x128xbf16>
    %cst_156 = arith.constant dense<0.000000e+00> : vector<256x128xf32>
    %200 = tpu.matmul %197, %199, %cst_156 {dimension_numbers = #tpu.dot_dimension_numbers<[1], [0], [0], [1], [0, 0, 1, 1], [], []>} : vector<256x128xbf16>, vector<128x128xbf16>, vector<256x128xf32> -> vector<256x128xf32>
    %201 = arith.addf %195, %200 : vector<256x128xf32>
    %c0_157 = arith.constant 0 : index
    %c2_158 = arith.constant 2 : index
    %c0_159 = arith.constant 0 : index
    %202 = vector.load %arg9[%c0_157, %c2_158, %c0_159] : memref<18x18x128xbf16, #tpu.memory_space<vmem>>, vector<18x16x128xbf16>
    %203 = vector.extract_strided_slice %202 {offsets = [0, 0, 0], sizes = [16, 16, 128], strides = [1, 1, 1]} : vector<18x16x128xbf16> to vector<16x16x128xbf16>
    %204 = vector.shape_cast %203 : vector<16x16x128xbf16> to vector<256x128xbf16>
    %c6_160 = arith.constant 6 : index
    %c0_161 = arith.constant 0 : index
    %c0_162 = arith.constant 0 : index
    %205 = vector.load %arg4[%c6_160, %c0_161, %c0_162] : memref<9x128x128xbf16, #tpu.memory_space<vmem>>, vector<1x128x128xbf16>
    %206 = vector.shape_cast %205 : vector<1x128x128xbf16> to vector<128x128xbf16>
    %cst_163 = arith.constant dense<0.000000e+00> : vector<256x128xf32>
    %207 = tpu.matmul %204, %206, %cst_163 {dimension_numbers = #tpu.dot_dimension_numbers<[1], [0], [0], [1], [0, 0, 1, 1], [], []>} : vector<256x128xbf16>, vector<128x128xbf16>, vector<256x128xf32> -> vector<256x128xf32>
    %208 = arith.addf %201, %207 : vector<256x128xf32>
    %209 = vector.extract_strided_slice %202 {offsets = [1, 0, 0], sizes = [16, 16, 128], strides = [1, 1, 1]} : vector<18x16x128xbf16> to vector<16x16x128xbf16>
    %210 = vector.shape_cast %209 : vector<16x16x128xbf16> to vector<256x128xbf16>
    %c7_164 = arith.constant 7 : index
    %c0_165 = arith.constant 0 : index
    %c0_166 = arith.constant 0 : index
    %211 = vector.load %arg4[%c7_164, %c0_165, %c0_166] : memref<9x128x128xbf16, #tpu.memory_space<vmem>>, vector<1x128x128xbf16>
    %212 = vector.shape_cast %211 : vector<1x128x128xbf16> to vector<128x128xbf16>
    %cst_167 = arith.constant dense<0.000000e+00> : vector<256x128xf32>
    %213 = tpu.matmul %210, %212, %cst_167 {dimension_numbers = #tpu.dot_dimension_numbers<[1], [0], [0], [1], [0, 0, 1, 1], [], []>} : vector<256x128xbf16>, vector<128x128xbf16>, vector<256x128xf32> -> vector<256x128xf32>
    %214 = arith.addf %208, %213 : vector<256x128xf32>
    %215 = vector.extract_strided_slice %202 {offsets = [2, 0, 0], sizes = [16, 16, 128], strides = [1, 1, 1]} : vector<18x16x128xbf16> to vector<16x16x128xbf16>
    %216 = vector.shape_cast %215 : vector<16x16x128xbf16> to vector<256x128xbf16>
    %c8_168 = arith.constant 8 : index
    %c0_169 = arith.constant 0 : index
    %c0_170 = arith.constant 0 : index
    %217 = vector.load %arg4[%c8_168, %c0_169, %c0_170] : memref<9x128x128xbf16, #tpu.memory_space<vmem>>, vector<1x128x128xbf16>
    %218 = vector.shape_cast %217 : vector<1x128x128xbf16> to vector<128x128xbf16>
    %cst_171 = arith.constant dense<0.000000e+00> : vector<256x128xf32>
    %219 = tpu.matmul %216, %218, %cst_171 {dimension_numbers = #tpu.dot_dimension_numbers<[1], [0], [0], [1], [0, 0, 1, 1], [], []>} : vector<256x128xbf16>, vector<128x128xbf16>, vector<256x128xf32> -> vector<256x128xf32>
    %220 = arith.addf %214, %219 : vector<256x128xf32>
    %cst_172 = arith.constant 0.000000e+00 : f32
    %221 = vector.broadcast %cst_172 : f32 to vector<256x128xf32>
    %222 = arith.maximumf %220, %221 : vector<256x128xf32>
    %c1_173 = arith.constant 1 : index
    %c1_174 = arith.constant 1 : index
    %c0_175 = arith.constant 0 : index
    %223 = vector.load %arg9[%c1_173, %c1_174, %c0_175] : memref<18x18x128xbf16, #tpu.memory_space<vmem>>, vector<16x16x128xbf16>
    %224 = vector.shape_cast %223 : vector<16x16x128xbf16> to vector<256x128xbf16>
    %225 = vector.shape_cast %222 : vector<256x128xf32> to vector<16x16x128xf32>
    %226 = arith.truncf %225 : vector<16x16x128xf32> to vector<16x16x128xbf16>
    %c1_176 = arith.constant 1 : index
    %c1_177 = arith.constant 1 : index
    %c0_178 = arith.constant 0 : index
    %227 = vector.load %arg9[%c1_176, %c1_177, %c0_178] : memref<18x18x128xbf16, #tpu.memory_space<vmem>>, vector<16x16x128xbf16>
    tpu.vector_store %arg9[%c1_176, %c1_177, %c0_178], %226 {strides = array<i32>} : memref<18x18x128xbf16, #tpu.memory_space<vmem>>, vector<16x16x128xbf16>,
    %228 = arith.extf %224 : vector<256x128xbf16> to vector<256x128xf32>
    %c0_179 = arith.constant 0 : index
    %c0_180 = arith.constant 0 : index
    %229 = vector.load %arg7[%c0_179, %c0_180] : memref<1x128xf32, #tpu.memory_space<vmem>>, vector<1x128xf32>
    %230 = vector.broadcast %229 : vector<1x128xf32> to vector<256x128xf32>
    %231 = arith.addf %228, %230 : vector<256x128xf32>
    %c0_181 = arith.constant 0 : index
    %c0_182 = arith.constant 0 : index
    %c0_183 = arith.constant 0 : index
    %232 = vector.load %arg9[%c0_181, %c0_182, %c0_183] : memref<18x18x128xbf16, #tpu.memory_space<vmem>>, vector<18x16x128xbf16>
    %233 = vector.extract_strided_slice %232 {offsets = [0, 0, 0], sizes = [16, 16, 128], strides = [1, 1, 1]} : vector<18x16x128xbf16> to vector<16x16x128xbf16>
    %234 = vector.shape_cast %233 : vector<16x16x128xbf16> to vector<256x128xbf16>
    %c0_184 = arith.constant 0 : index
    %c0_185 = arith.constant 0 : index
    %c0_186 = arith.constant 0 : index
    %235 = vector.load %arg6[%c0_184, %c0_185, %c0_186] : memref<9x128x128xbf16, #tpu.memory_space<vmem>>, vector<1x128x128xbf16>
    %236 = vector.shape_cast %235 : vector<1x128x128xbf16> to vector<128x128xbf16>
    %cst_187 = arith.constant dense<0.000000e+00> : vector<256x128xf32>
    %237 = tpu.matmul %234, %236, %cst_187 {dimension_numbers = #tpu.dot_dimension_numbers<[1], [0], [0], [1], [0, 0, 1, 1], [], []>} : vector<256x128xbf16>, vector<128x128xbf16>, vector<256x128xf32> -> vector<256x128xf32>
    %238 = arith.addf %231, %237 : vector<256x128xf32>
    %239 = vector.extract_strided_slice %232 {offsets = [1, 0, 0], sizes = [16, 16, 128], strides = [1, 1, 1]} : vector<18x16x128xbf16> to vector<16x16x128xbf16>
    %240 = vector.shape_cast %239 : vector<16x16x128xbf16> to vector<256x128xbf16>
    %c1_188 = arith.constant 1 : index
    %c0_189 = arith.constant 0 : index
    %c0_190 = arith.constant 0 : index
    %241 = vector.load %arg6[%c1_188, %c0_189, %c0_190] : memref<9x128x128xbf16, #tpu.memory_space<vmem>>, vector<1x128x128xbf16>
    %242 = vector.shape_cast %241 : vector<1x128x128xbf16> to vector<128x128xbf16>
    %cst_191 = arith.constant dense<0.000000e+00> : vector<256x128xf32>
    %243 = tpu.matmul %240, %242, %cst_191 {dimension_numbers = #tpu.dot_dimension_numbers<[1], [0], [0], [1], [0, 0, 1, 1], [], []>} : vector<256x128xbf16>, vector<128x128xbf16>, vector<256x128xf32> -> vector<256x128xf32>
    %244 = arith.addf %238, %243 : vector<256x128xf32>
    %245 = vector.extract_strided_slice %232 {offsets = [2, 0, 0], sizes = [16, 16, 128], strides = [1, 1, 1]} : vector<18x16x128xbf16> to vector<16x16x128xbf16>
    %246 = vector.shape_cast %245 : vector<16x16x128xbf16> to vector<256x128xbf16>
    %c2_192 = arith.constant 2 : index
    %c0_193 = arith.constant 0 : index
    %c0_194 = arith.constant 0 : index
    %247 = vector.load %arg6[%c2_192, %c0_193, %c0_194] : memref<9x128x128xbf16, #tpu.memory_space<vmem>>, vector<1x128x128xbf16>
    %248 = vector.shape_cast %247 : vector<1x128x128xbf16> to vector<128x128xbf16>
    %cst_195 = arith.constant dense<0.000000e+00> : vector<256x128xf32>
    %249 = tpu.matmul %246, %248, %cst_195 {dimension_numbers = #tpu.dot_dimension_numbers<[1], [0], [0], [1], [0, 0, 1, 1], [], []>} : vector<256x128xbf16>, vector<128x128xbf16>, vector<256x128xf32> -> vector<256x128xf32>
    %250 = arith.addf %244, %249 : vector<256x128xf32>
    %c0_196 = arith.constant 0 : index
    %c1_197 = arith.constant 1 : index
    %c0_198 = arith.constant 0 : index
    %251 = vector.load %arg9[%c0_196, %c1_197, %c0_198] : memref<18x18x128xbf16, #tpu.memory_space<vmem>>, vector<18x16x128xbf16>
    %252 = vector.extract_strided_slice %251 {offsets = [0, 0, 0], sizes = [16, 16, 128], strides = [1, 1, 1]} : vector<18x16x128xbf16> to vector<16x16x128xbf16>
    %253 = vector.shape_cast %252 : vector<16x16x128xbf16> to vector<256x128xbf16>
    %c3_199 = arith.constant 3 : index
    %c0_200 = arith.constant 0 : index
    %c0_201 = arith.constant 0 : index
    %254 = vector.load %arg6[%c3_199, %c0_200, %c0_201] : memref<9x128x128xbf16, #tpu.memory_space<vmem>>, vector<1x128x128xbf16>
    %255 = vector.shape_cast %254 : vector<1x128x128xbf16> to vector<128x128xbf16>
    %cst_202 = arith.constant dense<0.000000e+00> : vector<256x128xf32>
    %256 = tpu.matmul %253, %255, %cst_202 {dimension_numbers = #tpu.dot_dimension_numbers<[1], [0], [0], [1], [0, 0, 1, 1], [], []>} : vector<256x128xbf16>, vector<128x128xbf16>, vector<256x128xf32> -> vector<256x128xf32>
    %257 = arith.addf %250, %256 : vector<256x128xf32>
    %258 = vector.extract_strided_slice %251 {offsets = [1, 0, 0], sizes = [16, 16, 128], strides = [1, 1, 1]} : vector<18x16x128xbf16> to vector<16x16x128xbf16>
    %259 = vector.shape_cast %258 : vector<16x16x128xbf16> to vector<256x128xbf16>
    %c4_203 = arith.constant 4 : index
    %c0_204 = arith.constant 0 : index
    %c0_205 = arith.constant 0 : index
    %260 = vector.load %arg6[%c4_203, %c0_204, %c0_205] : memref<9x128x128xbf16, #tpu.memory_space<vmem>>, vector<1x128x128xbf16>
    %261 = vector.shape_cast %260 : vector<1x128x128xbf16> to vector<128x128xbf16>
    %cst_206 = arith.constant dense<0.000000e+00> : vector<256x128xf32>
    %262 = tpu.matmul %259, %261, %cst_206 {dimension_numbers = #tpu.dot_dimension_numbers<[1], [0], [0], [1], [0, 0, 1, 1], [], []>} : vector<256x128xbf16>, vector<128x128xbf16>, vector<256x128xf32> -> vector<256x128xf32>
    %263 = arith.addf %257, %262 : vector<256x128xf32>
    %264 = vector.extract_strided_slice %251 {offsets = [2, 0, 0], sizes = [16, 16, 128], strides = [1, 1, 1]} : vector<18x16x128xbf16> to vector<16x16x128xbf16>
    %265 = vector.shape_cast %264 : vector<16x16x128xbf16> to vector<256x128xbf16>
    %c5_207 = arith.constant 5 : index
    %c0_208 = arith.constant 0 : index
    %c0_209 = arith.constant 0 : index
    %266 = vector.load %arg6[%c5_207, %c0_208, %c0_209] : memref<9x128x128xbf16, #tpu.memory_space<vmem>>, vector<1x128x128xbf16>
    %267 = vector.shape_cast %266 : vector<1x128x128xbf16> to vector<128x128xbf16>
    %cst_210 = arith.constant dense<0.000000e+00> : vector<256x128xf32>
    %268 = tpu.matmul %265, %267, %cst_210 {dimension_numbers = #tpu.dot_dimension_numbers<[1], [0], [0], [1], [0, 0, 1, 1], [], []>} : vector<256x128xbf16>, vector<128x128xbf16>, vector<256x128xf32> -> vector<256x128xf32>
    %269 = arith.addf %263, %268 : vector<256x128xf32>
    %c0_211 = arith.constant 0 : index
    %c2_212 = arith.constant 2 : index
    %c0_213 = arith.constant 0 : index
    %270 = vector.load %arg9[%c0_211, %c2_212, %c0_213] : memref<18x18x128xbf16, #tpu.memory_space<vmem>>, vector<18x16x128xbf16>
    %271 = vector.extract_strided_slice %270 {offsets = [0, 0, 0], sizes = [16, 16, 128], strides = [1, 1, 1]} : vector<18x16x128xbf16> to vector<16x16x128xbf16>
    %272 = vector.shape_cast %271 : vector<16x16x128xbf16> to vector<256x128xbf16>
    %c6_214 = arith.constant 6 : index
    %c0_215 = arith.constant 0 : index
    %c0_216 = arith.constant 0 : index
    %273 = vector.load %arg6[%c6_214, %c0_215, %c0_216] : memref<9x128x128xbf16, #tpu.memory_space<vmem>>, vector<1x128x128xbf16>
    %274 = vector.shape_cast %273 : vector<1x128x128xbf16> to vector<128x128xbf16>
    %cst_217 = arith.constant dense<0.000000e+00> : vector<256x128xf32>
    %275 = tpu.matmul %272, %274, %cst_217 {dimension_numbers = #tpu.dot_dimension_numbers<[1], [0], [0], [1], [0, 0, 1, 1], [], []>} : vector<256x128xbf16>, vector<128x128xbf16>, vector<256x128xf32> -> vector<256x128xf32>
    %276 = arith.addf %269, %275 : vector<256x128xf32>
    %277 = vector.extract_strided_slice %270 {offsets = [1, 0, 0], sizes = [16, 16, 128], strides = [1, 1, 1]} : vector<18x16x128xbf16> to vector<16x16x128xbf16>
    %278 = vector.shape_cast %277 : vector<16x16x128xbf16> to vector<256x128xbf16>
    %c7_218 = arith.constant 7 : index
    %c0_219 = arith.constant 0 : index
    %c0_220 = arith.constant 0 : index
    %279 = vector.load %arg6[%c7_218, %c0_219, %c0_220] : memref<9x128x128xbf16, #tpu.memory_space<vmem>>, vector<1x128x128xbf16>
    %280 = vector.shape_cast %279 : vector<1x128x128xbf16> to vector<128x128xbf16>
    %cst_221 = arith.constant dense<0.000000e+00> : vector<256x128xf32>
    %281 = tpu.matmul %278, %280, %cst_221 {dimension_numbers = #tpu.dot_dimension_numbers<[1], [0], [0], [1], [0, 0, 1, 1], [], []>} : vector<256x128xbf16>, vector<128x128xbf16>, vector<256x128xf32> -> vector<256x128xf32>
    %282 = arith.addf %276, %281 : vector<256x128xf32>
    %283 = vector.extract_strided_slice %270 {offsets = [2, 0, 0], sizes = [16, 16, 128], strides = [1, 1, 1]} : vector<18x16x128xbf16> to vector<16x16x128xbf16>
    %284 = vector.shape_cast %283 : vector<16x16x128xbf16> to vector<256x128xbf16>
    %c8_222 = arith.constant 8 : index
    %c0_223 = arith.constant 0 : index
    %c0_224 = arith.constant 0 : index
    %285 = vector.load %arg6[%c8_222, %c0_223, %c0_224] : memref<9x128x128xbf16, #tpu.memory_space<vmem>>, vector<1x128x128xbf16>
    %286 = vector.shape_cast %285 : vector<1x128x128xbf16> to vector<128x128xbf16>
    %cst_225 = arith.constant dense<0.000000e+00> : vector<256x128xf32>
    %287 = tpu.matmul %284, %286, %cst_225 {dimension_numbers = #tpu.dot_dimension_numbers<[1], [0], [0], [1], [0, 0, 1, 1], [], []>} : vector<256x128xbf16>, vector<128x128xbf16>, vector<256x128xf32> -> vector<256x128xf32>
    %288 = arith.addf %282, %287 : vector<256x128xf32>
    %cst_226 = arith.constant 0.000000e+00 : f32
    %289 = vector.broadcast %cst_226 : f32 to vector<256x128xf32>
    %290 = arith.maximumf %288, %289 : vector<256x128xf32>
    %cst_227 = arith.constant dense<0.000000e+00> : vector<128xf32>
    %291 = vector.multi_reduction <add>, %290, %cst_227 [0] : vector<256x128xf32> to vector<128xf32>
    %292 = vector.shape_cast %291 : vector<128xf32> to vector<1x128xf32>
    %cst_228 = arith.constant 2.560000e+02 : f32
    %293 = vector.broadcast %cst_228 : f32 to vector<1x128xf32>
    %294 = arith.divf %292, %293 : vector<1x128xf32>
    %c0_229 = arith.constant 0 : index
    %c1_230 = arith.constant 1 : index
    %c0_231 = arith.constant 0 : index
    %295 = vector.load %arg8[%c0_229, %c1_230, %c0_231] : memref<1x2x128xf32, #tpu.memory_space<vmem>>, vector<1x1x128xf32>
    %296 = vector.shape_cast %295 : vector<1x1x128xf32> to vector<1x128xf32>
    %297 = vector.shape_cast %294 : vector<1x128xf32> to vector<1x1x128xf32>
    tpu.vector_store %arg8[%c0_229, %c1_230, %c0_231], %297 {strides = array<i32>} : memref<1x2x128xf32, #tpu.memory_space<vmem>>, vector<1x1x128xf32>,
    return
  }
  func.func @transform_0(%arg0: i32) -> (i32, i32, i32) {
    %c0_i32 = arith.constant 0 : i32
    %c0_i32_0 = arith.constant 0 : i32
    %c0_i32_1 = arith.constant 0 : i32
    return %arg0, %c0_i32, %c0_i32_0 : i32, i32, i32
  }
  func.func @transform_1(%arg0: i32) -> (i32, i32) {
    %c0_i32 = arith.constant 0 : i32
    %c0_i32_0 = arith.constant 0 : i32
    %c0_i32_1 = arith.constant 0 : i32
    return %c0_i32, %c0_i32_0 : i32, i32
  }
  func.func @transform_2(%arg0: i32) -> (i32, i32) {
    %c0_i32 = arith.constant 0 : i32
    %c0_i32_0 = arith.constant 0 : i32
    %c0_i32_1 = arith.constant 0 : i32
    return %c0_i32, %c0_i32_0 : i32, i32
  }
  func.func @transform_3(%arg0: i32) -> (i32, i32, i32) {
    %c0_i32 = arith.constant 0 : i32
    %c0_i32_0 = arith.constant 0 : i32
    %c0_i32_1 = arith.constant 0 : i32
    %c0_i32_2 = arith.constant 0 : i32
    return %c0_i32, %c0_i32_0, %c0_i32_1 : i32, i32, i32
  }
  func.func @transform_4(%arg0: i32) -> (i32, i32) {
    %c0_i32 = arith.constant 0 : i32
    %c0_i32_0 = arith.constant 0 : i32
    %c0_i32_1 = arith.constant 0 : i32
    return %c0_i32, %c0_i32_0 : i32, i32
  }
  func.func @transform_5(%arg0: i32) -> (i32, i32, i32) {
    %c0_i32 = arith.constant 0 : i32
    %c0_i32_0 = arith.constant 0 : i32
    %c0_i32_1 = arith.constant 0 : i32
    %c0_i32_2 = arith.constant 0 : i32
    return %c0_i32, %c0_i32_0, %c0_i32_1 : i32, i32, i32
  }
  func.func @transform_6(%arg0: i32) -> (i32, i32) {
    %c0_i32 = arith.constant 0 : i32
    %c0_i32_0 = arith.constant 0 : i32
    %c0_i32_1 = arith.constant 0 : i32
    return %c0_i32, %c0_i32_0 : i32, i32
  }
  func.func @transform_7(%arg0: i32) -> (i32, i32, i32) {
    %c0_i32 = arith.constant 0 : i32
    %c0_i32_0 = arith.constant 0 : i32
    %c0_i32_1 = arith.constant 0 : i32
    return %arg0, %c0_i32, %c0_i32_0 : i32, i32, i32
  }
}

</mosaic_0001>

<bundles_post_ra>
// kernel: backbone_forward.1
= control target key start
LH: loop header
LB: loop body
LE: loop exit
PB: predicated region body
PF: predicated region fallthrough
CT: control target
= control target key end

     0   :  { %12 = vsyncpa [#allocation4], 0  ;;  %s28997_s0 = inlined_call_operand.vmem [shape: bf16[8,256,128], index: 0, kind: input, shape index: {}]   ;;  %s28998_s1 = inlined_call_operand.vmem [shape: bf16[128,128], index: 1, kind: input, shape index: {}]   ;;  %s28999_s2 = inlined_call_operand.vmem [shape: f32[1,128], index: 2, kind: input, shape index: {}]   ;;  %s29000_s3 = inlined_call_operand.vmem [shape: bf16[9,128,128], index: 3, kind: input, shape index: {}]   ;;  %s29001_s4 = inlined_call_operand.vmem [shape: f32[1,128], index: 4, kind: input, shape index: {}]   ;;  %s29002_s5 = inlined_call_operand.vmem [shape: bf16[9,128,128], index: 5, kind: input, shape index: {}]   ;;  %s29003_s6 = inlined_call_operand.vmem [shape: f32[1,128], index: 6, kind: input, shape index: {}]   ;;  %s29004_s7 = inlined_call_operand.hbm [shape: f32[4,2,128], index: 7, kind: output, shape index: {}]  }
   0x1   :  { %14 = vsyncpa [#allocation4 + $0x1], 0  ;;  %s23668_s24 = smov 0   ;;  %s23670_s25 = smov 0  }
   0x2   :  { %s23672_s26 = smov 0   ;;  %s23674_s27 = smov 0  }
   0x3 LB: > { %s23689_s28 = sadd.s32 4294967295, %s23624_s27   ;;  %s17767_s29 = sadd.s32 4294967294, %s23624_s27   ;;  %s23624_s27 = sphi %s23674_s27, %s29537_s27   ;;  %s23620_s26 = sphi %s23672_s26, %s29536_s26   ;;  %s23616_s25 = sphi %s23670_s25, %s29535_s25   ;;  %s23612_s24 = sphi %s23668_s24, %s29534_s24  }
   0x4   : > { %s23693_s30 = sadd.s32 1, %s23624_s27   ;;  %s179_s8 = sadd.s32 1, %s23620_s26 }
   0x5   : > { %s176_s9 = ssub.s32 %s23624_s27, %s23693_s30  ;;  %p189_p0 = scmp.ne.s32.totalorder %s23620_s26, %s23616_s25 }
   0x6   : > { %p177_p1 = scmp.eq.s32.totalorder %s176_s9, 0  ;;  %p190_p2 = scmp.eq.s32.totalorder %s23689_s28, 3 }
   0x7   : > { %p195_p3 = scmp.ne.s32.totalorder %s23616_s25, %s23612_s24  ;;  %p196_p4 = scmp.eq.s32.totalorder %s17767_s29, 3 }
   0x8   : > { %s23704_s10 = scalar_select %p177_p1, %s23620_s26, %s179_s8  }
   0x9   : > { %p23706_p5 = por %p190_p2, %p189_p0  ;;  %p23710_p6 = por %p196_p4, %p195_p3 }
   0xa   : > { %p17770_p7 = scmp.ge.s32.totalorder %s23624_s27, 1  ;;  %p242_p8 = scmp.lt.s32.totalorder %s23624_s27, 5 }
   0xc   : > { %p243_p9 = pnand %p17770_p7, %p242_p8 }
   0xe   : > { %246 = sbr.rel (%p243_p9) target bundleno = 3247 (0xcaf), region = 48 }
  0x15   : > { %v23138_v0 = vld [vmem:[%s28998_s1] sm:$0xff]   ;;  %s17772_s15 = sshll.u32 %s23689_s28, 1  ;;  %v23723_v1 = vld [vmem:[%s28998_s1 + $0x8] sm:$0xff]   ;;  %v23626_v2 = vmov 0   ;;  %v23140_v3 = vld [vmem:[%s28998_s1 + $0x10] sm:$0xff]   ;;  %vm1149_vm3 = vcmask 1043456  }
  0x16   : > { %p276_p10 = scmp.lt.s32.totalorder %s17772_s15, 7  ;;  %20122 = vmatprep.subr.bf16.mxu0 %v23138_v0  ;;  %289 = vst [vmem:[#allocation2 + $0x18] sm:$0xf] %v23626_v2  ;;  %283 = vst [vmem:[#allocation2] sm:$0xf] %v23626_v2  ;;  %v23141_v4 = vld [vmem:[%s28998_s1 + $0x18] sm:$0xff]  }
  0x17   : > { %20123 = vmatpush3.bf16.msra.mxu0 %v23138_v0  ;;  %284 = vst [vmem:[#allocation2 + $0x4] sm:$0xf] %v23626_v2  ;;  %285 = vst [vmem:[#allocation2 + $0x8] sm:$0x1] %v23626_v2  ;;  %v23142_v6 = vld [vmem:[%s28998_s1 + $0x20] sm:$0xff]   ;;  %v23143_v7 = vld [vmem:[%s28998_s1 + $0x28] sm:$0xff]  }
  0x18   : > { %s29539_s15 = smov (!%p276_p10, %s17772_s15), 7  ;;  %286 = vst [vmem:[#allocation2 + $0xc] sm:$0xf] %v23626_v2  ;;  %287 = vst [vmem:[#allocation2 + $0x10] sm:$0xf] %v23626_v2  ;;  %20124 = vmatprep.subr.bf16.mxu0 %v23723_v1  ;;  %v23144_v8 = vld [vmem:[%s28998_s1 + $0x30] sm:$0xff]  }
  0x19   : > { %288 = vst [vmem:[#allocation2 + $0x14] sm:$0x1] %v23626_v2  ;;  %290 = vst [vmem:[#allocation2 + $0x1c] sm:$0xf] %v23626_v2  ;;  %s19081_s20 = sshll.u32 %s29539_s15, 7  ;;  %v23145_v9 = vld [vmem:[%s28998_s1 + $0x38] sm:$0xff]  }
  0x1a   : > { %291 = vst [vmem:[#allocation2 + $0x20] sm:$0x1] %v23626_v2  ;;  %292 = vst [vmem:[#allocation2 + $0x24] sm:$0xf] %v23626_v2  ;;  %s23735_s23 = scalar_lea.vmem %s28997_s0, %s19081_s20  ;;  %v23162_v10 = vld [vmem:[%s29000_s3] sm:$0xff]   ;;  %v23163_v11 = vld [vmem:[%s29000_s3 + $0x8] sm:$0xff]  }
  0x1b   : > { %293 = vst [vmem:[#allocation2 + $0x28] sm:$0xf] %v23626_v2  ;;  %294 = vst [vmem:[#allocation2 + $0x2c] sm:$0x1] %v23626_v2  ;;  %20125 = vmatpush3.bf16.msra.mxu0 %v23723_v1  ;;  %v23146_v5 = vld [vmem:[%s23735_s23] sm:$0xff]   ;;  %20170 = vmatprep.subr.bf16.mxu1 %v23162_v10  ;;  %v23147_v12 = vld [vmem:[%s23735_s23 + $0x8] sm:$0xff]  }
  0x1c   : > { %295 = vst [vmem:[#allocation2 + $0x30] sm:$0xf] %v23626_v2  ;;  %296 = vst [vmem:[#allocation2 + $0x34] sm:$0xf] %v23626_v2  ;;  %20126 = vmatprep.subr.bf16.mxu0 %v23140_v3  ;;  %20138 = vmatprep.mubr.bf16.mxu0 %v23146_v5  ;;  %v23148_v13 = vld [vmem:[%s23735_s23 + $0x10] sm:$0xff]   ;;  %v23149_v14 = vld [vmem:[%s23735_s23 + $0x18] sm:$0xff]  }
  0x1d   : > { %297 = vst [vmem:[#allocation2 + $0x38] sm:$0x1] %v23626_v2  ;;  %298 = vst [vmem:[#allocation2 + $0x3c] sm:$0xf] %v23626_v2  ;;  %20171 = vmatpush3.bf16.msra.mxu1 %v23162_v10  ;;  %v23150_v15 = vld [vmem:[%s23735_s23 + $0x20] sm:$0xff]   ;;  %v23151_v16 = vld [vmem:[%s23735_s23 + $0x28] sm:$0xff]  }
  0x1e   : > { %299 = vst [vmem:[#allocation2 + $0x40] sm:$0xf] %v23626_v2  ;;  %300 = vst [vmem:[#allocation2 + $0x44] sm:$0x1] %v23626_v2  ;;  %20172 = vmatprep.subr.bf16.mxu1 %v23163_v11  ;;  %v23152_v17 = vld [vmem:[%s23735_s23 + $0x30] sm:$0xff]   ;;  %v23153_v18 = vld [vmem:[%s23735_s23 + $0x38] sm:$0xff]  }
  0x1f   : > { %301 = vst [vmem:[#allocation2 + $0x48] sm:$0xf] %v23626_v2  ;;  %302 = vst [vmem:[#allocation2 + $0x4c] sm:$0xf] %v23626_v2  ;;  %20127 = vmatpush3.bf16.msra.mxu0 %v23140_v3  ;;  %v23154_v19 = vld [vmem:[%s23735_s23 + $0x40] sm:$0xff]   ;;  %v23155_v20 = vld [vmem:[%s23735_s23 + $0x48] sm:$0xff]  }
  0x20   : > { %303 = vst [vmem:[#allocation2 + $0x50] sm:$0x1] %v23626_v2  ;;  %304 = vst [vmem:[#allocation2 + $0x54] sm:$0xf] %v23626_v2  ;;  %20128 = vmatprep.subr.bf16.mxu0 %v23141_v4  ;;  %v23156_v21 = vld [vmem:[%s23735_s23 + $0x50] sm:$0xff]   ;;  %v23157_v22 = vld [vmem:[%s23735_s23 + $0x58] sm:$0xff]  }
  0x21   : > { %305 = vst [vmem:[#allocation2 + $0x58] sm:$0xf] %v23626_v2  ;;  %306 = vst [vmem:[#allocation2 + $0x5c] sm:$0x1] %v23626_v2  ;;  %20173 = vmatpush3.bf16.msra.mxu1 %v23163_v11  ;;  %v23158_v23 = vld [vmem:[%s23735_s23 + $0x60] sm:$0xff]   ;;  %v23159_v24 = vld [vmem:[%s23735_s23 + $0x68] sm:$0xff]  }
  0x22   : > { %307 = vst [vmem:[#allocation2 + $0x60] sm:$0xf] %v23626_v2  ;;  %308 = vst [vmem:[#allocation2 + $0x64] sm:$0xf] %v23626_v2  ;;  %v23160_v25 = vld [vmem:[%s23735_s23 + $0x70] sm:$0xff]   ;;  %v23161_v26 = vld [vmem:[%s23735_s23 + $0x78] sm:$0xff]  }
  0x23   : > { %309 = vst [vmem:[#allocation2 + $0x68] sm:$0x1] %v23626_v2  ;;  %310 = vst [vmem:[#allocation2 + $0x6c] sm:$0xf] %v23626_v2  ;;  %20129 = vmatpush3.bf16.msra.mxu0 %v23141_v4  ;;  %v23164_v27 = vld [vmem:[%s29000_s3 + $0x10] sm:$0xff]   ;;  %v23165_v28 = vld [vmem:[%s29000_s3 + $0x18] sm:$0xff]  }
  0x24   : > { %311 = vst [vmem:[#allocation2 + $0x70] sm:$0xf] %v23626_v2  ;;  %312 = vst [vmem:[#allocation2 + $0x74] sm:$0x1] %v23626_v2  ;;  %20130 = vmatprep.subr.bf16.mxu0 %v23142_v6  ;;  %20174 = vmatprep.subr.bf16.mxu1 %v23164_v27  ;;  %v23166_v29 = vld [vmem:[%s29000_s3 + $0x20] sm:$0xff]   ;;  %v23167_v30 = vld [vmem:[%s29000_s3 + $0x28] sm:$0xff]  }
  0x25   : > { %313 = vst [vmem:[#allocation2 + $0x78] sm:$0xf] %v23626_v2  ;;  %314 = vst [vmem:[#allocation2 + $0x7c] sm:$0xf] %v23626_v2  ;;  %20175 = vmatpush3.bf16.msra.mxu1 %v23164_v27  ;;  %v23168_v31 = vld [vmem:[%s29000_s3 + $0x30] sm:$0xff]   ;;  %v23169_v32 = vld [vmem:[%s29000_s3 + $0x38] sm:$0xff]  }
  0x26   : > { %315 = vst [vmem:[#allocation2 + $0x80] sm:$0x1] %v23626_v2  ;;  %316 = vst [vmem:[#allocation2 + $0x84] sm:$0xf] %v23626_v2  ;;  %20176 = vmatprep.subr.bf16.mxu1 %v23165_v28  ;;  %v23170_v33 = vld [vmem:[#allocation2] sm:$0xff]   ;;  %vm1156_vm4 = vcmask 1040384  }
  0x27   : > { %317 = vst [vmem:[#allocation2 + $0x88] sm:$0xf] %v23626_v2  ;;  %318 = vst [vmem:[#allocation2 + $0x8c] sm:$0x1] %v23626_v2  ;;  %20131 = vmatpush3.bf16.msra.mxu0 %v23142_v6  ;;  %20186 = vmatprep.mubr.bf16.mxu1 %v23170_v33  ;;  %v23796_v34 = vld [vmem:[%s29000_s3 + $0x40] sm:$0xff]   ;;  %v29146_v0 = vmov 0 }
  0x28   : > { %319 = vst [vmem:[#allocation2 + $0x90] sm:$0xf] %v23626_v2  ;;  %320 = vst [vmem:[#allocation2 + $0x94] sm:$0xf] %v23626_v2  ;;  %20132 = vmatprep.subr.bf16.mxu0 %v23143_v7  ;;  %v23802_v35 = vld [vmem:[%s28999_s2] ss:$0 sm:$0xff] }
  0x29   : > { %321 = vst [vmem:[#allocation2 + $0x98] sm:$0x1] %v23626_v2  ;;  %322 = vst [vmem:[#allocation2 + $0x9c] sm:$0xf] %v23626_v2  ;;  %20177 = vmatpush3.bf16.msra.mxu1 %v23165_v28  ;;  %vm1150_vm0 = vsmask.f32 7938 }
  0x2a   : > { %323 = vst [vmem:[#allocation2 + $0xa0] sm:$0xf] %v23626_v2  ;;  %324 = vst [vmem:[#allocation2 + $0xa4] sm:$0x1] %v23626_v2  ;;  %20178 = vmatprep.subr.bf16.mxu1 %v23166_v29  ;;  %vm825_vm1 = vsmask.f32 256 }
  0x2b   : > { %325 = vst [vmem:[#allocation2 + $0xa8] sm:$0xf] %v23626_v2  ;;  %326 = vst [vmem:[#allocation2 + $0xac] sm:$0xf] %v23626_v2  ;;  %20133 = vmatpush3.bf16.msra.mxu0 %v23143_v7  ;;  %vm826_vm2 = vsmask.f32 4368 }
  0x2c   : > { %327 = vst [vmem:[#allocation2 + $0xb0] sm:$0x1] %v23626_v2  ;;  %328 = vst [vmem:[#allocation2 + $0xb4] sm:$0xf] %v23626_v2  ;;  %20134 = vmatprep.subr.bf16.mxu0 %v23144_v8  ;;  %v1161_v53 = vld [vmem:[#allocation2 + $0x18] sm:$0xf] }
  0x2d   : > { %329 = vst [vmem:[#allocation2 + $0xb8] sm:$0xf] %v23626_v2  ;;  %330 = vst [vmem:[#allocation2 + $0xbc] sm:$0x1] %v23626_v2  ;;  %20179 = vmatpush3.bf16.msra.mxu1 %v23166_v29  ;;  %v1152_v59 = vld [vmem:[#allocation2 + $0xc] sm:$0xf] }
  0x2e   : > { %331 = vst [vmem:[#allocation2 + $0xc0] sm:$0xf] %v23626_v2  ;;  %332 = vst [vmem:[#allocation2 + $0xc4] sm:$0xf] %v23626_v2  ;;  %20180 = vmatprep.subr.bf16.mxu1 %v23167_v30  ;;  %v1158_v11 = vld [vmem:[#allocation2 + $0x14] sm:$0x1] }
  0x2f   : > { %333 = vst [vmem:[#allocation2 + $0xc8] sm:$0x1] %v23626_v2  ;;  %334 = vst [vmem:[#allocation2 + $0xcc] sm:$0xf] %v23626_v2  ;;  %20135 = vmatpush3.bf16.msra.mxu0 %v23144_v8  ;;  %v1175_v33 = vld [vmem:[#allocation2 + $0x30] sm:$0xf] }
  0x30   : > { %335 = vst [vmem:[#allocation2 + $0xd0] sm:$0xf] %v23626_v2  ;;  %336 = vst [vmem:[#allocation2 + $0xd4] sm:$0x1] %v23626_v2  ;;  %20136 = vmatprep.subr.bf16.mxu0 %v23145_v9  ;;  %v1165_v2 = vld [vmem:[#allocation2 + $0x20] sm:$0x1] }
  0x31   : > { %20181 = vmatpush3.bf16.msra.mxu1 %v23167_v30  ;;  %vm23811_vm5 = vmand %vm1149_vm3, %vm1150_vm0  ;;  %vm2244_vm8 = vsmask.f32 3328  ;;  %vm2245_vm9 = vsmask.f32 7440  ;;  %vm3591_vm11 = vcmask 1042432   ;;  %vm3592_vm12 = vcmask 1046532  }
  0x32   : > { %20182 = vmatprep.subr.bf16.mxu1 %v23168_v31  ;;  %v29147_v0 = vsel %vm23811_vm5, 4294967295, %v29146_v0  ;;  %vm23818_vm6 = vmor %vm825_vm1, %vm826_vm2  ;;  %s272_s14 = sand.u32 1, %s23616_s25   ;;  %s19078_s13 = sshll.u32 %s23689_s28, 5 }
  0x33   : > { %20137 = vmatpush3.bf16.msra.mxu0 %v23145_v9  ;;  %29148 = vst [vmem:[#allocation6_spill] sm:$0xff] %v29147_v0  ;;  %v29149_v9 = vmov 0  ;;  %vm23824_vm7 = vmand %vm1156_vm4, %vm825_vm1  ;;  %s17771_s15 = sshll.u32 %s272_s14, 1  ;;  %s28952_s19 = scalar_lea.hbm %s29004_s7, %s19078_s13 }
  0x34   : > { %v29150_v9 = vsel %vm23818_vm6, 4294967295, %v29149_v9  ;;  %vm24192_vm10 = vmor %vm2244_vm8, %vm2245_vm9  ;;  %s27331_s16 = scalar_lea.vmem [#allocation3], %s17771_s15  ;;  %s23627_s28 = smov [#allocation3]  }
  0x35   : > { %20183 = vmatpush3.bf16.msra.mxu1 %v23168_v31  ;;  %29151 = vst [vmem:[#allocation7_spill] sm:$0xff] %v29150_v9  ;;  %vm24568_vm13 = vmor %vm3591_vm11, %vm3592_vm12  ;;  %s17708_s15 = sshll.u32 %s27331_s16, 4  ;;  %s23566_s21 = sshll.u32 %s23627_s28, 4  ;;  %s28954_s15 = int_to_ptr.vmem [resolvable:$true] %s17708_s15  ;;  %s23567_s21 = int_to_ptr.vmem [resolvable:$false] %s23566_s21 }
  0x36   : > { %20139 = vmatmul.mubr.bf16.vlgmr.msra.gmra.mrb[0].mxu0 %v23147_v12  ;;  %20184 = vmatprep.subr.bf16.mxu1 %v23169_v32  ;;  %s23562_s20 = scalar_lea.vmem %s28954_s15, 32  ;;  %s23568_s22 = scalar_lea.vmem %s23567_s21, 64 }
  0x37   : > { %20142 = vmatprep.mubr.bf16.mxu0 %v23148_v13  ;;  %p23563_p11 = scmp.ne.s32.totalorder %s28954_s15, %s23562_s20  ;;  %p23569_p0 = scmp.lt.s32.totalorder %s28954_s15, %s23567_s21 }
  0x38   : > { %p23570_p1 = scmp.lt.s32.totalorder %s23568_s22, %s23562_s20 }
  0x39   : > { %20185 = vmatpush3.bf16.msra.mxu1 %v23169_v32  ;;  %p23564_p12 = pnand %p23563_p11, %p23706_p5 }
  0x3a   : > { %20218 = vmatprep.subr.bf16.mxu1 %v23796_v34  ;;  %p23571_p2 = por %p23570_p1, %p23569_p0 }
  0x3b   : > { %p23565_p13 = pneg %p23564_p12 }
  0x3d   : > { %p23572_p3 = pnand %p23571_p2, %p23565_p13 }
  0x3e   : > { %20143 = vmatmul.mubr.bf16.gmra.mrb[4].mxu0 %v23149_v14 }
  0x3f   : > { %20146 = vmatprep.mubr.bf16.mxu0 %v23150_v15 }
  0x46   : > { %20147 = vmatmul.mubr.bf16.gmra.mrb[8].mxu0 %v23151_v16  ;;  %v29152_v16 = vmov 0 }
  0x47   : > { %20150 = vmatprep.mubr.bf16.mxu0 %v23152_v17  ;;  %v29153_v16 = vsel %vm23824_vm7, 4294967295, %v29152_v16 }
  0x48   : > { %29154 = vst [vmem:[#allocation8_spill] sm:$0xff] %v29153_v16 }
  0x4e   : > { %20151 = vmatmul.mubr.bf16.gmra.mrb[12].mxu0 %v23153_v18 }
  0x4f   : > { %20154 = vmatprep.mubr.bf16.mxu0 %v23154_v19 }
  0x56   : > { %20155 = vmatmul.mubr.bf16.gmra.mrb[16].mxu0 %v23155_v20 }
  0x57   : > { %20158 = vmatprep.mubr.bf16.mxu0 %v23156_v21 }
  0x5e   : > { %20159 = vmatmul.mubr.bf16.gmra.mrb[20].mxu0 %v23157_v22 }
  0x5f   : > { %20162 = vmatprep.mubr.bf16.mxu0 %v23158_v23 }
  0x66   : > { %20163 = vmatmul.mubr.bf16.gmra.mrb[24].mxu0 %v23159_v24 }
  0x67   : > { %20166 = vmatprep.mubr.bf16.mxu0 %v23160_v25 }
  0x6e   : > { %20167 = vmatmul.mubr.bf16.gmra.mrb[28].mxu0 %v23161_v26 }
 0x109   : > { %v20140_v36 = vpop.f32.mrb[0].mxu0 }
 0x10a   : > { %v579_v37 = vadd.f32 %v20140_v36, %v23802_v35  ;;  %v570_v38 = vpop.f32.mrb[1].mxu0 }
 0x10b   : > { %v571_v39 = vadd.f32 %v23802_v35, %v570_v38  ;;  %v20141_v40 = vpop.f32.mrb[2].mxu0 }
 0x10c   : > { %v699_v41 = vmax.f32 %v579_v37, 0.0  ;;  %v582_v42 = vadd.f32 %v20141_v40, %v23802_v35  ;;  %v573_v43 = vpop.f32.mrb[3].mxu0  ;;  %v1168_v40 = vld [vmem:[#allocation2 + $0x24] sm:$0xf] }
 0x10d   : > { %v697_v44 = vmax.f32 %v571_v39, 0.0  ;;  %v574_v45 = vadd.f32 %v23802_v35, %v573_v43 }
 0x10e   : > { %v19084_v46 = vpack.c.bf16 %v699_v41, %v699_v41  ;;  %v700_v47 = vmax.f32 %v582_v42, 0.0 }
 0x10f   : > { %v19082_v48 = vpack.c.bf16 %v697_v44, %v697_v44  ;;  %v698_v49 = vmax.f32 %v574_v45, 0.0 }
 0x110   : > { %v846_v50 = vshrl.u32 %v19084_v46, 16  ;;  %v19085_v51 = vpack.c.bf16 %v700_v47, %v700_v47  ;;  %v849_v52 = vshll.u32 %v19084_v46, 16 }
 0x111   : > { %v829_v54 = vshrl.u32 %v19082_v48, 16  ;;  %v832_v55 = vshll.u32 %v19082_v48, 16  ;;  %v19083_v56 = vpack.c.bf16 %v698_v49, %v698_v49  ;;  %v20144_v57 = vpop.f32.mrb[4].mxu0 }
 0x112   : > { %v848_v58 = vrot.slane %v846_v50, 7  ;;  %v854_v60 = vshrl.u32 %v19085_v51, 16  ;;  %v857_v61 = vshll.u32 %v19085_v51, 16  ;;  %v595_v62 = vadd.f32 %v20144_v57, %v23802_v35  ;;  %v586_v63 = vpop.f32.mrb[5].mxu0 }
 0x113   : > { %v831_v1 = vrot.slane %v829_v54, 7  ;;  %v837_v3 = vshrl.u32 %v19083_v56, 16  ;;  %v840_v4 = vshll.u32 %v19083_v56, 16  ;;  %v587_v5 = vadd.f32 %v23802_v35, %v586_v63  ;;  %v20145_v6 = vpop.f32.mrb[6].mxu0 }
 0x114   : > { %v851_v7 = vor.u32 %v849_v52, %v848_v58  ;;  %v852_v8 = vrot.slane %v848_v58, 4  ;;  %v856_v10 = vrot.slane %v854_v60, 7  ;;  %v703_v12 = vmax.f32 %v595_v62, 0.0  ;;  %v589_v13 = vpop.f32.mrb[7].mxu0 }
 0x115   : > { %v834_v14 = vor.u32 %v832_v55, %v831_v1  ;;  %v835_v15 = vrot.slane %v831_v1, 4  ;;  %v839_v17 = vrot.slane %v837_v3, 7  ;;  %v701_v18 = vmax.f32 %v587_v5, 0.0 }
 0x116   : > { %v1162_v19 = vsel %vm23811_vm5, %v851_v7, %v1161_v53  ;;  %v859_v20 = vor.u32 %v857_v61, %v856_v10  ;;  %v861_v21 = vrot.slane %v856_v10, 4  ;;  %v19088_v22 = vpack.c.bf16 %v703_v12, %v703_v12  ;;  %v1179_v7 = vld [vmem:[#allocation2 + $0x38] sm:$0x1] }
 0x117   : > { %1163 = vst [vmem:[#allocation2 + $0x18] sm:$0xf] %v1162_v19  ;;  %v1153_v23 = vsel %vm23811_vm5, %v834_v14, %v1152_v59  ;;  %v842_v24 = vor.u32 %v840_v4, %v839_v17  ;;  %v844_v25 = vrot.slane %v839_v17, 4  ;;  %v19086_v26 = vpack.c.bf16 %v701_v18, %v701_v18  ;;  %v1189_v19 = vld [vmem:[#allocation2 + $0x48] sm:$0xf] }
 0x118   : > { %1154 = vst [vmem:[#allocation2 + $0xc] sm:$0xf] %v1153_v23  ;;  %v860_v27 = vsel %vm23818_vm6, %v852_v8, %v859_v20  ;;  %v1166_v28 = vsel %vm23824_vm7, %v861_v21, %v1165_v2  ;;  %v880_v29 = vshrl.u32 %v19088_v22, 16  ;;  %v883_v30 = vshll.u32 %v19088_v22, 16  ;;  %v23174_v2 = vld [vmem:[%s29000_s3 + $0x48] sm:$0xff]  }
 0x119   : > { %1164 = vst [vmem:[#allocation2 + $0x1c] sm:$0xf] %v860_v27  ;;  %1167 = vst [vmem:[#allocation2 + $0x20] sm:$0x1] %v1166_v28  ;;  %v843_v31 = vsel %vm23818_vm6, %v835_v15, %v842_v24  ;;  %v1159_v32 = vsel %vm23824_vm7, %v844_v25, %v1158_v11  ;;  %v863_v36 = vshrl.u32 %v19086_v26, 16  ;;  %v866_v37 = vshll.u32 %v19086_v26, 16 }
 0x11a   : > { %v20148_v38 = vpop.f32.mrb[8].mxu0  ;;  %1155 = vst [vmem:[#allocation2 + $0x10] sm:$0xf] %v843_v31  ;;  %1160 = vst [vmem:[#allocation2 + $0x14] sm:$0x1] %v1159_v32  ;;  %v23840_v39 = vrot.slane %v880_v29, 7  ;;  %v598_v41 = vadd.f32 %v20145_v6, %v23802_v35  ;;  %v590_v42 = vadd.f32 %v23802_v35, %v589_v13 }
 0x11b   : > { %v611_v43 = vadd.f32 %v20148_v38, %v23802_v35  ;;  %v602_v44 = vpop.f32.mrb[9].mxu0  ;;  %v23845_v45 = vrot.slane %v863_v36, 7  ;;  %v1172_v8 = vld [vmem:[#allocation2 + $0x2c] sm:$0x1] }
 0x11c   : > { %v603_v46 = vadd.f32 %v23802_v35, %v602_v44  ;;  %v20149_v47 = vpop.f32.mrb[10].mxu0  ;;  %v885_v48 = vor.u32 %v883_v30, %v23840_v39  ;;  %v886_v49 = vrot.slane %v23840_v39, 4  ;;  %v704_v50 = vmax.f32 %v598_v41, 0.0  ;;  %v23177_v41 = vld [vmem:[%s29000_s3 + $0x50] sm:$0xff]  }
 0x11d   : > { %v702_v51 = vmax.f32 %v590_v42, 0.0  ;;  %v605_v52 = vpop.f32.mrb[11].mxu0  ;;  %v868_v53 = vor.u32 %v866_v37, %v23845_v45  ;;  %v869_v54 = vrot.slane %v23845_v45, 4  ;;  %v707_v55 = vmax.f32 %v611_v43, 0.0 }
 0x11e   : > { %v705_v56 = vmax.f32 %v603_v46, 0.0  ;;  %v1176_v57 = vsel %vm23811_vm5, %v885_v48, %v1175_v33  ;;  %v19089_v58 = vpack.c.bf16 %v704_v50, %v704_v50  ;;  %v614_v60 = vadd.f32 %v20149_v47, %v23802_v35  ;;  %v1182_v33 = vld [vmem:[#allocation2 + $0x3c] sm:$0xf] }
 0x11f   : > { %v19087_v59 = vpack.c.bf16 %v702_v51, %v702_v51  ;;  %1177 = vst [vmem:[#allocation2 + $0x30] sm:$0xf] %v1176_v57  ;;  %v1169_v61 = vsel %vm23811_vm5, %v868_v53, %v1168_v40  ;;  %v19092_v62 = vpack.c.bf16 %v707_v55, %v707_v55  ;;  %v606_v1 = vadd.f32 %v23802_v35, %v605_v52 }
 0x120   : > { %v19090_v63 = vpack.c.bf16 %v705_v56, %v705_v56  ;;  %1170 = vst [vmem:[#allocation2 + $0x24] sm:$0xf] %v1169_v61  ;;  %v888_v3 = vshrl.u32 %v19089_v58, 16  ;;  %v891_v4 = vshll.u32 %v19089_v58, 16  ;;  %v708_v20 = vmax.f32 %v614_v60, 0.0  ;;  %v23863_v23 = vld [vmem:[#allocation2 + $0x18] sm:$0xff]  }
 0x121   : > { %v871_v5 = vshrl.u32 %v19087_v59, 16  ;;  %v874_v6 = vshll.u32 %v19087_v59, 16  ;;  %v914_v10 = vshrl.u32 %v19092_v62, 16  ;;  %v917_v11 = vshll.u32 %v19092_v62, 16  ;;  %v20152_v14 = vpop.f32.mrb[12].mxu0  ;;  %v23861_v15 = vld [vmem:[#allocation2 + $0xc] sm:$0xff]  }
 0x122   : > { %v897_v12 = vshrl.u32 %v19090_v63, 16  ;;  %v900_v13 = vshll.u32 %v19090_v63, 16  ;;  %v890_v17 = vrot.slane %v888_v3, 7  ;;  %v706_v21 = vmax.f32 %v606_v1, 0.0  ;;  %v618_v22 = vpop.f32.mrb[13].mxu0  ;;  %20187 = vmatmul.mubr.bf16.vlgmr.msra.gmra.mrb[0].mxu1 %v23861_v15  ;;  %v23180_v58 = vld [vmem:[%s29000_s3 + $0x58] sm:$0xff]  }
 0x123   : > { %v873_v18 = vrot.slane %v871_v5, 7  ;;  %v23865_v24 = vrot.slane %v914_v10, 7  ;;  %v627_v26 = vadd.f32 %v20152_v14, %v23802_v35  ;;  %v619_v27 = vadd.f32 %v23802_v35, %v618_v22  ;;  %v20153_v28 = vpop.f32.mrb[14].mxu0  ;;  %20219 = vmatpush3.bf16.msra.mxu1 %v23796_v34  ;;  %20190 = vmatprep.mubr.bf16.mxu1 %v23863_v23  ;;  %v1193_v59 = vld [vmem:[#allocation2 + $0x50] sm:$0x1]  ;;  %v23183_v22 = vld [vmem:[%s29000_s3 + $0x60] sm:$0xff]  }
 0x124   : > { %v23867_v25 = vrot.slane %v897_v12, 7  ;;  %v893_v29 = vor.u32 %v891_v4, %v890_v17  ;;  %v895_v30 = vrot.slane %v890_v17, 4  ;;  %v621_v36 = vpop.f32.mrb[15].mxu0  ;;  %20220 = vmatprep.subr.bf16.mxu1 %v23174_v2  ;;  %v19093_v47 = vpack.c.bf16 %v708_v20, %v708_v20  ;;  %v1186_v5 = vld [vmem:[#allocation2 + $0x44] sm:$0x1] }
 0x125   : > { %v876_v31 = vor.u32 %v874_v6, %v873_v18  ;;  %v878_v32 = vrot.slane %v873_v18, 4  ;;  %v919_v37 = vor.u32 %v917_v11, %v23865_v24  ;;  %v920_v38 = vrot.slane %v23865_v24, 4  ;;  %v1203_v20 = vld [vmem:[#allocation2 + $0x60] sm:$0xf] }
 0x126   : > { %v902_v39 = vor.u32 %v900_v13, %v23867_v25  ;;  %v903_v40 = vrot.slane %v23867_v25, 4  ;;  %v894_v42 = vsel %vm23818_vm6, %v886_v49, %v893_v29  ;;  %v1180_v34 = vsel %vm23824_vm7, %v895_v30, %v1179_v7 }
 0x127   : > { %v877_v43 = vsel %vm23818_vm6, %v869_v54, %v876_v31  ;;  %v1173_v44 = vsel %vm23824_vm7, %v878_v32, %v1172_v8  ;;  %1178 = vst [vmem:[#allocation2 + $0x34] sm:$0xf] %v894_v42  ;;  %1181 = vst [vmem:[#allocation2 + $0x38] sm:$0x1] %v1180_v34  ;;  %v1190_v45 = vsel %vm23811_vm5, %v919_v37, %v1189_v19  ;;  %v711_v49 = vmax.f32 %v627_v26, 0.0 }
 0x128   : > { %1171 = vst [vmem:[#allocation2 + $0x28] sm:$0xf] %v877_v43  ;;  %1174 = vst [vmem:[#allocation2 + $0x2c] sm:$0x1] %v1173_v44  ;;  %v1183_v46 = vsel %vm23811_vm5, %v902_v39, %v1182_v33  ;;  %v19091_v48 = vpack.c.bf16 %v706_v21, %v706_v21  ;;  %v709_v50 = vmax.f32 %v619_v27, 0.0  ;;  %v630_v51 = vadd.f32 %v20153_v28, %v23802_v35 }
 0x129   : > { %1191 = vst [vmem:[#allocation2 + $0x48] sm:$0xf] %v1190_v45  ;;  %1184 = vst [vmem:[#allocation2 + $0x3c] sm:$0xf] %v1183_v46  ;;  %v622_v52 = vadd.f32 %v23802_v35, %v621_v36  ;;  %20221 = vmatpush3.bf16.msra.mxu1 %v23174_v2  ;;  %v922_v53 = vshrl.u32 %v19093_v47, 16  ;;  %v925_v54 = vshll.u32 %v19093_v47, 16  ;;  %v19096_v60 = vpack.c.bf16 %v711_v49, %v711_v49 }
 0x12a   : > { %v905_v55 = vshrl.u32 %v19091_v48, 16  ;;  %v908_v56 = vshll.u32 %v19091_v48, 16  ;;  %v20156_v57 = vpop.f32.mrb[16].mxu0  ;;  %20222 = vmatprep.subr.bf16.mxu1 %v23177_v41  ;;  %v19094_v61 = vpack.c.bf16 %v709_v50, %v709_v50  ;;  %v712_v62 = vmax.f32 %v630_v51, 0.0  ;;  %v1196_v21 = vld [vmem:[#allocation2 + $0x54] sm:$0xf] }
 0x12b   : > { %v710_v63 = vmax.f32 %v622_v52, 0.0  ;;  %v634_v1 = vpop.f32.mrb[17].mxu0  ;;  %v924_v3 = vrot.slane %v922_v53, 7  ;;  %v643_v2 = vadd.f32 %v20156_v57, %v23802_v35  ;;  %v948_v8 = vshrl.u32 %v19096_v60, 16  ;;  %v23186_v49 = vld [vmem:[%s29000_s3 + $0x68] sm:$0xff]  }
 0x12c   : > { %v907_v4 = vrot.slane %v905_v55, 7  ;;  %v635_v6 = vadd.f32 %v23802_v35, %v634_v1  ;;  %v20157_v7 = vpop.f32.mrb[18].mxu0  ;;  %v951_v10 = vshll.u32 %v19096_v60, 16  ;;  %v931_v11 = vshrl.u32 %v19094_v61, 16  ;;  %v1207_v55 = vld [vmem:[#allocation2 + $0x68] sm:$0x1] }
 0x12d   : > { %v934_v12 = vshll.u32 %v19094_v61, 16  ;;  %v637_v13 = vpop.f32.mrb[19].mxu0  ;;  %20223 = vmatpush3.bf16.msra.mxu1 %v23177_v41  ;;  %v927_v14 = vor.u32 %v925_v54, %v924_v3  ;;  %v929_v17 = vrot.slane %v924_v3, 4  ;;  %v950_v26 = vrot.slane %v948_v8, 7 }
 0x12e   : > { %v910_v18 = vor.u32 %v908_v56, %v907_v4  ;;  %v912_v19 = vrot.slane %v907_v4, 4  ;;  %20224 = vmatprep.subr.bf16.mxu1 %v23180_v58  ;;  %v933_v27 = vrot.slane %v931_v11, 7  ;;  %v19097_v28 = vpack.c.bf16 %v712_v62, %v712_v62  ;;  %v23905_v31 = vld [vmem:[#allocation2 + $0x30] sm:$0xff]   ;;  %v1200_v56 = vld [vmem:[#allocation2 + $0x5c] sm:$0x1] }
 0x12f   : > { %v19095_v29 = vpack.c.bf16 %v710_v63, %v710_v63  ;;  %v23903_v30 = vld [vmem:[#allocation2 + $0x24] sm:$0xff]   ;;  %v928_v32 = vsel %vm23818_vm6, %v920_v38, %v927_v14  ;;  %v1194_v33 = vsel %vm23824_vm7, %v929_v17, %v1193_v59  ;;  %v953_v39 = vor.u32 %v951_v10, %v950_v26 }
 0x130   : > { %v911_v36 = vsel %vm23818_vm6, %v903_v40, %v910_v18  ;;  %v1187_v37 = vsel %vm23824_vm7, %v912_v19, %v1186_v5  ;;  %1192 = vst [vmem:[#allocation2 + $0x4c] sm:$0xf] %v928_v32  ;;  %1195 = vst [vmem:[#allocation2 + $0x50] sm:$0x1] %v1194_v33  ;;  %v954_v24 = vrot.slane %v950_v26, 4  ;;  %v936_v41 = vor.u32 %v934_v12, %v933_v27 }
 0x131   : > { %1185 = vst [vmem:[#allocation2 + $0x40] sm:$0xf] %v911_v36  ;;  %1188 = vst [vmem:[#allocation2 + $0x44] sm:$0x1] %v1187_v37  ;;  %v937_v42 = vrot.slane %v933_v27, 4  ;;  %20191 = vmatmul.mubr.bf16.gmra.mrb[4].mxu1 %v23903_v30  ;;  %v956_v38 = vshrl.u32 %v19097_v28, 16  ;;  %v1204_v44 = vsel %vm23811_vm5, %v953_v39, %v1203_v20  ;;  %v646_v52 = vadd.f32 %v20157_v7, %v23802_v35 }
 0x132   : > { %v959_v34 = vshll.u32 %v19097_v28, 16  ;;  %v939_v43 = vshrl.u32 %v19095_v29, 16  ;;  %v942_v25 = vshll.u32 %v19095_v29, 16  ;;  %20194 = vmatprep.mubr.bf16.mxu1 %v23905_v31  ;;  %v20160_v40 = vpop.f32.mrb[20].mxu0  ;;  %20225 = vmatpush3.bf16.msra.mxu1 %v23180_v58  ;;  %v1197_v45 = vsel %vm23811_vm5, %v936_v41, %v1196_v21  ;;  %1205 = vst [vmem:[#allocation2 + $0x60] sm:$0xf] %v1204_v44 }
 0x133   : > { %v715_v46 = vmax.f32 %v643_v2, 0.0  ;;  %v713_v47 = vmax.f32 %v635_v6, 0.0  ;;  %v650_v48 = vpop.f32.mrb[21].mxu0  ;;  %20226 = vmatprep.subr.bf16.mxu1 %v23183_v22  ;;  %1198 = vst [vmem:[#allocation2 + $0x54] sm:$0xf] %v1197_v45  ;;  %v958_v50 = vrot.slane %v956_v38, 7  ;;  %v638_v53 = vadd.f32 %v23802_v35, %v637_v13 }
 0x134   : > { %v941_v51 = vrot.slane %v939_v43, 7  ;;  %v20161_v54 = vpop.f32.mrb[22].mxu0  ;;  %v659_v59 = vadd.f32 %v20160_v40, %v23802_v35  ;;  %v651_v60 = vadd.f32 %v23802_v35, %v650_v48  ;;  %v23189_v7 = vld [vmem:[%s29000_s3 + $0x70] sm:$0xff]   ;;  %v1217_v13 = vld [vmem:[#allocation2 + $0x78] sm:$0xf]  ;;  %v716_v19 = vmax.f32 %v646_v52, 0.0 }
 0x135   : > { %v19100_v57 = vpack.c.bf16 %v715_v46, %v715_v46  ;;  %v19098_v58 = vpack.c.bf16 %v713_v47, %v713_v47  ;;  %v653_v61 = vpop.f32.mrb[23].mxu0  ;;  %v961_v62 = vor.u32 %v959_v34, %v958_v50  ;;  %v963_v63 = vrot.slane %v958_v50, 4  ;;  %v1221_v52 = vld [vmem:[#allocation2 + $0x80] sm:$0x1] }
 0x136   : > { %v944_v1 = vor.u32 %v942_v25, %v941_v51  ;;  %v946_v3 = vrot.slane %v941_v51, 4  ;;  %20227 = vmatpush3.bf16.msra.mxu1 %v23183_v22  ;;  %v714_v20 = vmax.f32 %v638_v53, 0.0  ;;  %v1210_v22 = vld [vmem:[#allocation2 + $0x6c] sm:$0xf]  ;;  %v719_v26 = vmax.f32 %v659_v59, 0.0  ;;  %v23192_v25 = vld [vmem:[%s29000_s3 + $0x78] sm:$0xff]  }
 0x137   : > { %v982_v4 = vshrl.u32 %v19100_v57, 16  ;;  %v985_v5 = vshll.u32 %v19100_v57, 16  ;;  %v965_v2 = vshrl.u32 %v19098_v58, 16  ;;  %v968_v6 = vshll.u32 %v19098_v58, 16  ;;  %20228 = vmatprep.subr.bf16.mxu1 %v23186_v49  ;;  %v23949_v21 = vld [vmem:[#allocation2 + $0x48] sm:$0xff]  }
 0x138   : > { %v962_v8 = vsel %vm23818_vm6, %v954_v24, %v961_v62  ;;  %v1208_v10 = vsel %vm23824_vm7, %v963_v63, %v1207_v55  ;;  %v945_v11 = vsel %vm23818_vm6, %v937_v42, %v944_v1  ;;  %v1201_v12 = vsel %vm23824_vm7, %v946_v3, %v1200_v56  ;;  %v23943_v14 = vld [vmem:[#allocation2 + $0x3c] sm:$0xff]   ;;  %v1214_v53 = vld [vmem:[#allocation2 + $0x74] sm:$0x1] }
 0x139   : > { %1206 = vst [vmem:[#allocation2 + $0x64] sm:$0xf] %v962_v8  ;;  %1209 = vst [vmem:[#allocation2 + $0x68] sm:$0x1] %v1208_v10  ;;  %v23945_v17 = vrot.slane %v982_v4, 7  ;;  %v23947_v18 = vrot.slane %v965_v2, 7  ;;  %v662_v28 = vadd.f32 %v20161_v54, %v23802_v35  ;;  %v654_v29 = vadd.f32 %v23802_v35, %v653_v61  ;;  %20195 = vmatmul.mubr.bf16.gmra.mrb[8].mxu1 %v23943_v14 }
 0x13a   : > { %1199 = vst [vmem:[#allocation2 + $0x58] sm:$0xf] %v945_v11  ;;  %1202 = vst [vmem:[#allocation2 + $0x5c] sm:$0x1] %v1201_v12  ;;  %v717_v27 = vmax.f32 %v651_v60, 0.0  ;;  %v20164_v32 = vpop.f32.mrb[24].mxu0  ;;  %20198 = vmatprep.mubr.bf16.mxu1 %v23949_v21  ;;  %20229 = vmatpush3.bf16.msra.mxu1 %v23186_v49  ;;  %v19101_v41 = vpack.c.bf16 %v716_v19, %v716_v19  ;;  %v19099_v42 = vpack.c.bf16 %v714_v20, %v714_v20 }
 0x13b   : > { %v987_v33 = vor.u32 %v985_v5, %v23945_v17  ;;  %v988_v36 = vrot.slane %v23945_v17, 4  ;;  %v970_v37 = vor.u32 %v968_v6, %v23947_v18  ;;  %v971_v39 = vrot.slane %v23947_v18, 4  ;;  %v666_v24 = vpop.f32.mrb[25].mxu0  ;;  %20230 = vmatprep.subr.bf16.mxu1 %v23189_v7  ;;  %v1231_v60 = vld [vmem:[#allocation2 + $0x90] sm:$0xf]  ;;  %v23975_v1 = vld [vmem:[%s29000_s3 + $0x80] sm:$0xff]  }
 0x13c   : > { %v19104_v38 = vpack.c.bf16 %v719_v26, %v719_v26  ;;  %v19102_v34 = vpack.c.bf16 %v717_v27, %v717_v27  ;;  %v23959_v43 = vpop.f32.mrb[26].mxu0  ;;  %v720_v45 = vmax.f32 %v662_v28, 0.0  ;;  %v718_v46 = vmax.f32 %v654_v29, 0.0  ;;  %v1224_v12 = vld [vmem:[#allocation2 + $0x84] sm:$0xf] }
 0x13d   : > { %v1218_v40 = vsel %vm23811_vm5, %v987_v33, %v1217_v13  ;;  %v1211_v44 = vsel %vm23811_vm5, %v970_v37, %v1210_v22  ;;  %v23968_v47 = vpop.f32.mrb[27].mxu0  ;;  %v990_v48 = vshrl.u32 %v19101_v41, 16  ;;  %v993_v49 = vshll.u32 %v19101_v41, 16 }
 0x13e   : > { %1219 = vst [vmem:[#allocation2 + $0x78] sm:$0xf] %v1218_v40  ;;  %1212 = vst [vmem:[#allocation2 + $0x6c] sm:$0xf] %v1211_v44  ;;  %v973_v50 = vshrl.u32 %v19099_v42, 16  ;;  %v976_v51 = vshll.u32 %v19099_v42, 16  ;;  %20231 = vmatpush3.bf16.msra.mxu1 %v23189_v7  ;;  %v19105_v61 = vpack.c.bf16 %v720_v45, %v720_v45  ;;  %v19103_v62 = vpack.c.bf16 %v718_v46, %v718_v46 }
 0x13f   : > { %v1016_v54 = vshrl.u32 %v19104_v38, 16  ;;  %v1019_v55 = vshll.u32 %v19104_v38, 16  ;;  %v999_v56 = vshrl.u32 %v19102_v34, 16  ;;  %v1002_v57 = vshll.u32 %v19102_v34, 16  ;;  %20232 = vmatprep.subr.bf16.mxu1 %v23192_v25  ;;  %v1235_v46 = vld [vmem:[#allocation2 + $0x98] sm:$0x1] }
 0x140   : > { %v992_v58 = vrot.slane %v990_v48, 7  ;;  %v975_v59 = vrot.slane %v973_v50, 7  ;;  %v675_v5 = vadd.f32 %v20164_v32, %v23802_v35  ;;  %v667_v2 = vadd.f32 %v23802_v35, %v666_v24  ;;  %v23981_v6 = vld [vmem:[#allocation2 + $0x60] sm:$0xff]  }
 0x141   : > { %v23970_v63 = vld [vmem:[#allocation2 + $0x54] sm:$0xff]   ;;  %v1018_v3 = vrot.slane %v1016_v54, 7  ;;  %v23977_v4 = vrot.slane %v999_v56, 7  ;;  %v20168_v13 = vpop.f32.mrb[28].mxu0  ;;  %v1024_v37 = vshrl.u32 %v19105_v61, 16  ;;  %v1027_v24 = vshll.u32 %v19105_v61, 16 }
 0x142   : > { %v995_v7 = vor.u32 %v993_v49, %v992_v58  ;;  %v997_v8 = vrot.slane %v992_v58, 4  ;;  %v978_v10 = vor.u32 %v976_v51, %v975_v59  ;;  %v980_v11 = vrot.slane %v975_v59, 4  ;;  %20199 = vmatmul.mubr.bf16.gmra.mrb[12].mxu1 %v23970_v63  ;;  %v682_v22 = vpop.f32.mrb[29].mxu0  ;;  %v1228_v54 = vld [vmem:[#allocation2 + $0x8c] sm:$0x1] }
 0x143   : > { %v1021_v17 = vor.u32 %v1019_v55, %v1018_v3  ;;  %v1022_v18 = vrot.slane %v1018_v3, 4  ;;  %v1004_v19 = vor.u32 %v1002_v57, %v23977_v4  ;;  %v1005_v20 = vrot.slane %v23977_v4, 4  ;;  %20202 = vmatprep.mubr.bf16.mxu1 %v23981_v6  ;;  %20233 = vmatpush3.bf16.msra.mxu1 %v23192_v25  ;;  %v23995_v32 = vpop.f32.mrb[30].mxu0  ;;  %v1245_v61 = vld [vmem:[#allocation2 + $0xa8] sm:$0xf] }
 0x144   : > { %v996_v26 = vsel %vm23818_vm6, %v988_v36, %v995_v7  ;;  %v1222_v27 = vsel %vm23824_vm7, %v997_v8, %v1221_v52  ;;  %v979_v28 = vsel %vm23818_vm6, %v971_v39, %v978_v10  ;;  %v1215_v29 = vsel %vm23824_vm7, %v980_v11, %v1214_v53  ;;  %20266 = vmatprep.subr.bf16.mxu1 %v23975_v1  ;;  %v24002_v39 = vpop.f32.mrb[31].mxu0  ;;  %v1238_v7 = vld [vmem:[#allocation2 + $0x9c] sm:$0xf] }
 0x145   : > { %1220 = vst [vmem:[#allocation2 + $0x7c] sm:$0xf] %v996_v26  ;;  %1223 = vst [vmem:[#allocation2 + $0x80] sm:$0x1] %v1222_v27  ;;  %v1232_v33 = vsel %vm23811_vm5, %v1021_v17, %v1231_v60  ;;  %v1225_v36 = vsel %vm23811_vm5, %v1004_v19, %v1224_v12  ;;  %v1007_v41 = vshrl.u32 %v19103_v62, 16  ;;  %v1010_v42 = vshll.u32 %v19103_v62, 16 }
 0x146   : > { %1213 = vst [vmem:[#allocation2 + $0x70] sm:$0xf] %v979_v28  ;;  %1216 = vst [vmem:[#allocation2 + $0x74] sm:$0x1] %v1215_v29  ;;  %v723_v38 = vmax.f32 %v675_v5, 0.0  ;;  %v721_v34 = vmax.f32 %v667_v2, 0.0  ;;  %v678_v40 = vadd.f32 %v23959_v43, %v23802_v35  ;;  %v670_v44 = vadd.f32 %v23802_v35, %v23968_v47 }
 0x147   : > { %1233 = vst [vmem:[#allocation2 + $0x90] sm:$0xf] %v1232_v33  ;;  %1226 = vst [vmem:[#allocation2 + $0x84] sm:$0xf] %v1225_v36  ;;  %v1026_v25 = vrot.slane %v1024_v37, 7  ;;  %v691_v45 = vadd.f32 %v20168_v13, %v23802_v35  ;;  %v1009_v48 = vrot.slane %v1007_v41, 7  ;;  %v683_v51 = vadd.f32 %v23802_v35, %v682_v22 }
 0x148   : > { %v19108_v49 = vpack.c.bf16 %v723_v38, %v723_v38  ;;  %v19106_v50 = vpack.c.bf16 %v721_v34, %v721_v34  ;;  %v724_v55 = vmax.f32 %v678_v40, 0.0  ;;  %v722_v56 = vmax.f32 %v670_v44, 0.0  ;;  %v1249_v38 = vld [vmem:[#allocation2 + $0xb0] sm:$0x1] }
 0x149   : > { %v1029_v52 = vor.u32 %v1027_v24, %v1026_v25  ;;  %v1031_v53 = vrot.slane %v1026_v25, 4  ;;  %v1012_v57 = vor.u32 %v1010_v42, %v1009_v48  ;;  %v1014_v58 = vrot.slane %v1009_v48, 4 }
 0x14a   : > { %v1050_v59 = vshrl.u32 %v19108_v49, 16  ;;  %v1053_v43 = vshll.u32 %v19108_v49, 16  ;;  %v1033_v62 = vshrl.u32 %v19106_v50, 16  ;;  %v1036_v3 = vshll.u32 %v19106_v50, 16 }
 0x14b   : > { %v1030_v47 = vsel %vm23818_vm6, %v1022_v18, %v1029_v52  ;;  %v1236_v60 = vsel %vm23824_vm7, %v1031_v53, %v1235_v46  ;;  %v1013_v4 = vsel %vm23818_vm6, %v1005_v20, %v1012_v57  ;;  %v1229_v5 = vsel %vm23824_vm7, %v1014_v58, %v1228_v54  ;;  %v1242_v46 = vld [vmem:[#allocation2 + $0xa4] sm:$0x1]  ;;  %v1259_v58 = vld [vmem:[#allocation2 + $0xc0] sm:$0xf] }
 0x14c   : > { %1234 = vst [vmem:[#allocation2 + $0x94] sm:$0xf] %v1030_v47  ;;  %1237 = vst [vmem:[#allocation2 + $0x98] sm:$0x1] %v1236_v60  ;;  %v1052_v2 = vrot.slane %v1050_v59, 7  ;;  %v19109_v8 = vpack.c.bf16 %v724_v55, %v724_v55  ;;  %v1035_v11 = vrot.slane %v1033_v62, 7  ;;  %v19107_v12 = vpack.c.bf16 %v722_v56, %v722_v56 }
 0x14d   : > { %v24018_v10 = vld [vmem:[#allocation2 + $0x6c] sm:$0xff]   ;;  %1227 = vst [vmem:[#allocation2 + $0x88] sm:$0xf] %v1013_v4  ;;  %1230 = vst [vmem:[#allocation2 + $0x8c] sm:$0x1] %v1229_v5  ;;  %v727_v13 = vmax.f32 %v691_v45, 0.0  ;;  %v694_v25 = vadd.f32 %v23995_v32, %v23802_v35  ;;  %v686_v40 = vadd.f32 %v23802_v35, %v24002_v39 }
 0x14e   : > { %v725_v17 = vmax.f32 %v683_v51, 0.0  ;;  %v24020_v18 = vld [vmem:[#allocation2 + $0x78] sm:$0xff]   ;;  %v1055_v19 = vor.u32 %v1053_v43, %v1052_v2  ;;  %v1056_v22 = vrot.slane %v1052_v2, 4  ;;  %v1058_v26 = vshrl.u32 %v19109_v8, 16  ;;  %20203 = vmatmul.mubr.bf16.gmra.mrb[16].mxu1 %v24018_v10 }
 0x14f   : > { %v1061_v20 = vshll.u32 %v19109_v8, 16  ;;  %v1038_v27 = vor.u32 %v1036_v3, %v1035_v11  ;;  %v1039_v28 = vrot.slane %v1035_v11, 4  ;;  %v1041_v29 = vshrl.u32 %v19107_v12, 16  ;;  %20206 = vmatprep.mubr.bf16.mxu1 %v24020_v18 }
 0x150   : > { %v1044_v33 = vshll.u32 %v19107_v12, 16  ;;  %v1246_v36 = vsel %vm23811_vm5, %v1055_v19, %v1245_v61  ;;  %v1060_v37 = vrot.slane %v1058_v26, 7  ;;  %v19112_v24 = vpack.c.bf16 %v727_v13, %v727_v13  ;;  %v1252_v61 = vld [vmem:[#allocation2 + $0xb4] sm:$0xf]  ;;  %v1263_v13 = vld [vmem:[#allocation2 + $0xc8] sm:$0x1] }
 0x151   : > { %v19110_v41 = vpack.c.bf16 %v725_v17, %v725_v17  ;;  %1247 = vst [vmem:[#allocation2 + $0xa8] sm:$0xf] %v1246_v36  ;;  %v1239_v42 = vsel %vm23811_vm5, %v1038_v27, %v1238_v7  ;;  %v1043_v34 = vrot.slane %v1041_v29, 7  ;;  %v728_v56 = vmax.f32 %v694_v25, 0.0  ;;  %v1256_v27 = vld [vmem:[#allocation2 + $0xbc] sm:$0x1] }
 0x152   : > { %1240 = vst [vmem:[#allocation2 + $0x9c] sm:$0xf] %v1239_v42  ;;  %v1063_v44 = vor.u32 %v1061_v20, %v1060_v37  ;;  %v1065_v45 = vrot.slane %v1060_v37, 4  ;;  %v1084_v48 = vshrl.u32 %v19112_v24, 16  ;;  %v1087_v49 = vshll.u32 %v19112_v24, 16  ;;  %v23195_v25 = vld [vmem:[%s29000_s3 + $0x88] sm:$0xff]  }
 0x153   : > { %v1046_v50 = vor.u32 %v1044_v33, %v1043_v34  ;;  %v1048_v51 = vrot.slane %v1043_v34, 4  ;;  %v1067_v52 = vshrl.u32 %v19110_v41, 16  ;;  %v1070_v53 = vshll.u32 %v19110_v41, 16  ;;  %v24042_v47 = vld [vmem:[#allocation2 + $0x90] sm:$0xff]  }
 0x154   : > { %v1064_v54 = vsel %vm23818_vm6, %v1056_v22, %v1063_v44  ;;  %v1250_v55 = vsel %vm23824_vm7, %v1065_v45, %v1249_v38  ;;  %v1086_v32 = vrot.slane %v1084_v48, 7  ;;  %v24036_v57 = vld [vmem:[#allocation2 + $0x84] sm:$0xff]   ;;  %v726_v43 = vmax.f32 %v686_v40, 0.0  ;;  %v23196_v40 = vld [vmem:[%s29000_s3 + $0x90] sm:$0xff]  }
 0x155   : > { %1248 = vst [vmem:[#allocation2 + $0xac] sm:$0xf] %v1064_v54  ;;  %1251 = vst [vmem:[#allocation2 + $0xb0] sm:$0x1] %v1250_v55  ;;  %v1047_v35 = vsel %vm23818_vm6, %v1039_v28, %v1046_v50  ;;  %v1243_v39 = vsel %vm23824_vm7, %v1048_v51, %v1242_v46  ;;  %v1069_v59 = vrot.slane %v1067_v52, 7  ;;  %v19113_v62 = vpack.c.bf16 %v728_v56, %v728_v56  ;;  %v23199_v44 = vld [vmem:[%s29000_s3 + $0xa8] sm:$0xff]  }
 0x156   : > { %1241 = vst [vmem:[#allocation2 + $0xa0] sm:$0xf] %v1047_v35  ;;  %1244 = vst [vmem:[#allocation2 + $0xa4] sm:$0x1] %v1243_v39  ;;  %v1089_v60 = vor.u32 %v1087_v49, %v1086_v32  ;;  %20207 = vmatmul.mubr.bf16.gmra.mrb[20].mxu1 %v24036_v57  ;;  %v19111_v4 = vpack.c.bf16 %v726_v43, %v726_v43  ;;  %v1090_v22 = vrot.slane %v1086_v32, 4  ;;  %v23200_v45 = vld [vmem:[%s29000_s3 + $0xb0] sm:$0xff]  }
 0x157   : > { %v1072_v3 = vor.u32 %v1070_v53, %v1069_v59  ;;  %20210 = vmatprep.mubr.bf16.mxu1 %v24042_v47  ;;  %v1092_v2 = vshrl.u32 %v19113_v62, 16  ;;  %v1095_v12 = vshll.u32 %v19113_v62, 16  ;;  %v1073_v28 = vrot.slane %v1069_v59, 4  ;;  %v23201_v46 = vld [vmem:[%s29000_s3 + $0xb8] sm:$0xff]   ;;  %v23203_v48 = vld [vmem:[%s29000_s3 + $0xc0] sm:$0xff]   ;;  %v23204_v50 = vld [vmem:[%s29000_s3 + $0xc8] sm:$0xff]  }
 0x158   : > { %v1260_v5 = vsel %vm23811_vm5, %v1089_v60, %v1259_v58  ;;  %v1075_v8 = vshrl.u32 %v19111_v4, 16  ;;  %v1078_v19 = vshll.u32 %v19111_v4, 16  ;;  %v23205_v51 = vld [vmem:[%s29000_s3 + $0xd0] sm:$0xff]   ;;  %v24146_v52 = vld [vmem:[#allocation2 + $0x4] sm:$0xf] }
 0x159   : > { %1261 = vst [vmem:[#allocation2 + $0xc0] sm:$0xf] %v1260_v5  ;;  %v1253_v7 = vsel %vm23811_vm5, %v1072_v3, %v1252_v61  ;;  %v1094_v11 = vrot.slane %v1092_v2, 7  ;;  %v2261_v54 = vshrl.u32 %v24146_v52, 16  ;;  %v2193_v55 = vld [vmem:[#allocation2 + $0xc] sm:$0xf] }
 0x15a   : > { %1254 = vst [vmem:[#allocation2 + $0xb4] sm:$0xf] %v1253_v7  ;;  %v1077_v17 = vrot.slane %v1075_v8, 7  ;;  %v24152_v32 = vld [vmem:[#allocation2 + $0x10] sm:$0xf]  ;;  %v2272_v61 = vshrl.u32 %v2193_v55, 16 }
 0x15b   : > { %v1097_v26 = vor.u32 %v1095_v12, %v1094_v11  ;;  %v1099_v20 = vrot.slane %v1094_v11, 4  ;;  %v2196_v56 = vld [vmem:[#allocation2 + $0x18] sm:$0xf]  ;;  %v24154_v35 = vld [vmem:[#allocation2 + $0x1c] sm:$0xf]  ;;  %v2275_v62 = vshll.u32 %v2193_v55, 16 }
 0x15c   : > { %v1080_v29 = vor.u32 %v1078_v19, %v1077_v17  ;;  %v1082_v33 = vrot.slane %v1077_v17, 4  ;;  %v24056_v41 = vld [vmem:[#allocation2 + $0xa8] sm:$0xff]   ;;  %v2199_v39 = vld [vmem:[#allocation2 + $0x24] sm:$0xf]  ;;  %v2281_v3 = vshll.u32 %v24152_v32, 16  ;;  %v2285_v4 = vshrl.u32 %v24152_v32, 16 }
 0x15d   : > { %v24050_v36 = vld [vmem:[#allocation2 + $0x9c] sm:$0xff]   ;;  %v1098_v37 = vsel %vm23818_vm6, %v1090_v22, %v1097_v26  ;;  %v1264_v24 = vsel %vm23824_vm7, %v1099_v20, %v1263_v13  ;;  %v24160_v60 = vld [vmem:[#allocation2 + $0x8] sm:$0x1]  ;;  %v2296_v5 = vshrl.u32 %v2196_v56, 16  ;;  %v2299_v2 = vshll.u32 %v2196_v56, 16 }
 0x15e   : > { %1262 = vst [vmem:[#allocation2 + $0xc4] sm:$0xf] %v1098_v37  ;;  %1265 = vst [vmem:[#allocation2 + $0xc8] sm:$0x1] %v1264_v24  ;;  %v1081_v42 = vsel %vm23818_vm6, %v1073_v28, %v1080_v29  ;;  %v1257_v38 = vsel %vm23824_vm7, %v1082_v33, %v1256_v27  ;;  %20211 = vmatmul.mubr.bf16.gmra.mrb[24].mxu1 %v24050_v36  ;;  %v2305_v7 = vshll.u32 %v24154_v35, 16  ;;  %v2309_v8 = vshrl.u32 %v24154_v35, 16 }
 0x15f   : > { %1255 = vst [vmem:[#allocation2 + $0xb8] sm:$0xf] %v1081_v42  ;;  %1258 = vst [vmem:[#allocation2 + $0xbc] sm:$0x1] %v1257_v38  ;;  %20214 = vmatprep.mubr.bf16.mxu1 %v24056_v41  ;;  %v2320_v11 = vshrl.u32 %v2199_v39, 16  ;;  %v2323_v12 = vshll.u32 %v2199_v39, 16 }
 0x160   : > { %v2267_v26 = vshll.u32 %v24160_v60, 16  ;;  %v2274_v20 = vrot.slane %v2272_v61, 4  ;;  %v2277_v27 = vrot.slane %v2275_v62, 5  ;;  %v24172_v28 = vrot.slane %v2281_v3, 5  ;;  %v2205_v62 = vld [vmem:[#allocation2 + $0x3c] sm:$0xf] }
 0x161   : > { %v2287_v29 = vrot.slane %v2285_v4, 4  ;;  %v2298_v33 = vrot.slane %v2296_v5, 4  ;;  %v24174_v37 = vrot.slane %v2305_v7, 5  ;;  %v2311_v24 = vrot.slane %v2309_v8, 4  ;;  %v24209_v7 = vld [vmem:[#allocation2 + $0x38] sm:$0x1] }
 0x162   : > { %v2325_v42 = vrot.slane %v2323_v12, 5 }
 0x165   : > { %v24107_v49 = vld [vmem:[#allocation2 + $0xc0] sm:$0xff]  }
 0x166   : > { %v24064_v34 = vld [vmem:[#allocation2 + $0xb4] sm:$0xff]  }
 0x167   : > { %20215 = vmatmul.mubr.bf16.gmra.mrb[28].mxu1 %v24064_v34 }
 0x168   : > { %20234 = vmatprep.mubr.bf16.mxu1 %v23861_v15  ;;  %v23197_v15 = vld [vmem:[%s29000_s3 + $0x98] sm:$0xff]  }
 0x16f   : > { %20235 = vmatmul.mubr.bf16.vlgmr.msra.gmra.mrb[0].mxu1 %v23863_v23 }
 0x170   : > { %20267 = vmatpush3.bf16.msra.mxu1 %v23975_v1  ;;  %20238 = vmatprep.mubr.bf16.mxu1 %v23903_v30  ;;  %v23198_v1 = vld [vmem:[%s29000_s3 + $0xa0] sm:$0xff]  }
 0x171   : > { %20268 = vmatprep.subr.bf16.mxu1 %v23195_v25 }
 0x174   : > { %20269 = vmatpush3.bf16.msra.mxu1 %v23195_v25 }
 0x175   : > { %20270 = vmatprep.subr.bf16.mxu1 %v23196_v40 }
 0x177   : > { %20239 = vmatmul.mubr.bf16.gmra.mrb[4].mxu1 %v23905_v31 }
 0x178   : > { %20242 = vmatprep.mubr.bf16.mxu1 %v23943_v14  ;;  %20271 = vmatpush3.bf16.msra.mxu1 %v23196_v40 }
 0x179   : > { %20272 = vmatprep.subr.bf16.mxu1 %v23197_v15 }
 0x17c   : > { %20273 = vmatpush3.bf16.msra.mxu1 %v23197_v15 }
 0x17d   : > { %20274 = vmatprep.subr.bf16.mxu1 %v23198_v1 }
 0x17f   : > { %20243 = vmatmul.mubr.bf16.gmra.mrb[8].mxu1 %v23949_v21 }
 0x180   : > { %20246 = vmatprep.mubr.bf16.mxu1 %v23970_v63  ;;  %20275 = vmatpush3.bf16.msra.mxu1 %v23198_v1  ;;  %v2269_v1 = vrot.slane %v2267_v26, 5 }
 0x181   : > { %20276 = vmatprep.subr.bf16.mxu1 %v23199_v44 }
 0x184   : > { %20277 = vmatpush3.bf16.msra.mxu1 %v23199_v44  ;;  %v2202_v44 = vld [vmem:[#allocation2 + $0x30] sm:$0xf] }
 0x185   : > { %20278 = vmatprep.subr.bf16.mxu1 %v23200_v45 }
 0x187   : > { %20247 = vmatmul.mubr.bf16.gmra.mrb[12].mxu1 %v23981_v6 }
 0x188   : > { %20250 = vmatprep.mubr.bf16.mxu1 %v24018_v10  ;;  %20279 = vmatpush3.bf16.msra.mxu1 %v23200_v45  ;;  %v2278_v45 = vor.u32 %v2277_v27, %v2274_v20  ;;  %v2208_v20 = vld [vmem:[#allocation2 + $0x48] sm:$0xf]  ;;  %v2368_v27 = vshrl.u32 %v2205_v62, 16 }
 0x189   : > { %20280 = vmatprep.subr.bf16.mxu1 %v23201_v46 }
 0x18a   : > { %v2279_v55 = vrot.slane %v2278_v45, 4  ;;  %v24234_v45 = vld [vmem:[#allocation2 + $0x44] sm:$0x1] }
 0x18c   : > { %20281 = vmatpush3.bf16.msra.mxu1 %v23201_v46  ;;  %v24178_v46 = vld [vmem:[#allocation2 + $0x34] sm:$0xf] }
 0x18d   : > { %20314 = vmatprep.subr.bf16.mxu1 %v23203_v48 }
 0x18f   : > { %20251 = vmatmul.mubr.bf16.gmra.mrb[16].mxu1 %v24020_v18 }
 0x190   : > { %20254 = vmatprep.mubr.bf16.mxu1 %v24036_v57 }
 0x197   : > { %20255 = vmatmul.mubr.bf16.gmra.mrb[20].mxu1 %v24042_v47 }
 0x198   : > { %20258 = vmatprep.mubr.bf16.mxu1 %v24050_v36 }
 0x19f   : > { %20259 = vmatmul.mubr.bf16.gmra.mrb[24].mxu1 %v24056_v41 }
 0x1a0   : > { %20262 = vmatprep.mubr.bf16.mxu1 %v24064_v34 }
 0x1a7   : > { %20263 = vmatmul.mubr.bf16.gmra.mrb[28].mxu1 %v24107_v49 }
 0x1a8   : > { %20282 = vmatprep.mubr.bf16.mxu1 %v23863_v23  ;;  %v23206_v23 = vld [vmem:[%s29000_s3 + $0xd8] sm:$0xff]  }
 0x1af   : > { %20283 = vmatmul.mubr.bf16.vlgmr.msra.gmra.mrb[0].mxu1 %v23903_v30  ;;  %v23207_v30 = vld [vmem:[%s29000_s3 + $0xe0] sm:$0xff]  }
 0x1b0   : > { %20315 = vmatpush3.bf16.msra.mxu1 %v23203_v48  ;;  %20286 = vmatprep.mubr.bf16.mxu1 %v23905_v31  ;;  %v23208_v31 = vld [vmem:[%s29000_s3 + $0xe8] sm:$0xff]   ;;  %v24181_v48 = vld [vmem:[#allocation2 + $0x14] sm:$0x1] }
 0x1b1   : > { %20316 = vmatprep.subr.bf16.mxu1 %v23204_v50  ;;  %v2291_v56 = vshll.u32 %v24181_v48, 16 }
 0x1b4   : > { %20317 = vmatpush3.bf16.msra.mxu1 %v23204_v50  ;;  %v2288_v50 = vor.u32 %v2287_v29, %v24172_v28  ;;  %v2371_v29 = vshll.u32 %v2205_v62, 16 }
 0x1b5   : > { %20318 = vmatprep.subr.bf16.mxu1 %v23205_v51 }
 0x1b7   : > { %20287 = vmatmul.mubr.bf16.gmra.mrb[4].mxu1 %v23943_v14  ;;  %v23209_v14 = vld [vmem:[%s29000_s3 + $0xf0] sm:$0xff]  }
 0x1b8   : > { %20290 = vmatprep.mubr.bf16.mxu1 %v23949_v21  ;;  %20319 = vmatpush3.bf16.msra.mxu1 %v23205_v51  ;;  %v23210_v21 = vld [vmem:[%s29000_s3 + $0xf8] sm:$0xff]   ;;  %v24184_v51 = vld [vmem:[#allocation2 + $0x20] sm:$0x1] }
 0x1b9   : > { %20320 = vmatprep.subr.bf16.mxu1 %v23206_v23  ;;  %v2315_v39 = vshll.u32 %v24184_v51, 16 }
 0x1bc   : > { %20321 = vmatpush3.bf16.msra.mxu1 %v23206_v23 }
 0x1bd   : > { %20322 = vmatprep.subr.bf16.mxu1 %v23207_v30 }
 0x1bf   : > { %20291 = vmatmul.mubr.bf16.gmra.mrb[8].mxu1 %v23970_v63  ;;  %v24143_v63 = vld [vmem:[%s29000_s3 + $0x100] sm:$0xff]  }
 0x1c0   : > { %20294 = vmatprep.mubr.bf16.mxu1 %v23981_v6  ;;  %20323 = vmatpush3.bf16.msra.mxu1 %v23207_v30  ;;  %v2190_v6 = vld [vmem:[#allocation2] sm:$0xf]  ;;  %v2312_v30 = vor.u32 %v2311_v24, %v24174_v37  ;;  %v24218_v24 = vld [vmem:[#allocation2 + $0x4c] sm:$0xf] }
 0x1c1   : > { %20324 = vmatprep.subr.bf16.mxu1 %v23208_v31  ;;  %v2251_v53 = vshll.u32 %v2190_v6, 16 }
 0x1c3   : > { %v2253_v59 = vrot.slane %v2251_v53, 5 }
 0x1c4   : > { %20325 = vmatpush3.bf16.msra.mxu1 %v23208_v31  ;;  %v24187_v31 = vld [vmem:[#allocation2 + $0x2c] sm:$0x1] }
 0x1c5   : > { %20326 = vmatprep.subr.bf16.mxu1 %v23209_v14 }
 0x1c7   : > { %20295 = vmatmul.mubr.bf16.gmra.mrb[12].mxu1 %v24018_v10  ;;  %v2248_v10 = vshrl.u32 %v2190_v6, 16  ;;  %v2344_v6 = vshrl.u32 %v2202_v44, 16 }
 0x1c8   : > { %20298 = vmatprep.mubr.bf16.mxu1 %v24020_v18  ;;  %20327 = vmatpush3.bf16.msra.mxu1 %v23209_v14  ;;  %v2257_v18 = vshll.u32 %v24146_v52, 16  ;;  %v29155_v14 = vmov 0 }
 0x1c9   : > { %20328 = vmatprep.subr.bf16.mxu1 %v23210_v21  ;;  %v2250_v58 = vrot.slane %v2248_v10, 4  ;;  %v29156_v14 = vsel %vm24192_vm10, 4294967295, %v29155_v14  ;;  %v2347_v10 = vshll.u32 %v2202_v44, 16  ;;  %v2346_v8 = vrot.slane %v2344_v6, 4 }
 0x1ca   : > { %v24156_v43 = vrot.slane %v2257_v18, 5  ;;  %29157 = vst [vmem:[#allocation9_spill] sm:$0xff] %v29156_v14  ;;  %v2363_v44 = vshll.u32 %v24209_v7, 16 }
 0x1cb   : > { %v2254_v19 = vor.u32 %v2253_v59, %v2250_v58  ;;  %v2339_v58 = vshll.u32 %v24187_v31, 16  ;;  %v23211_v59 = vld [vmem:[#allocation2 + $0xcc] sm:$0xff]  }
 0x1cc   : > { %20329 = vmatpush3.bf16.msra.mxu1 %v23210_v21 }
 0x1cd   : > { %20362 = vmatprep.subr.bf16.mxu1 %v24143_v63  ;;  %v2255_v40 = vrot.slane %v2254_v19, 4  ;;  %v2293_v19 = vrot.slane %v2291_v56, 5  ;;  %v2341_v26 = vrot.slane %v2339_v58, 5  ;;  %v23213_v56 = vld [vmem:[%s29000_s3 + $0x108] sm:$0xff]  }
 0x1cf   : > { %20299 = vmatmul.mubr.bf16.gmra.mrb[16].mxu1 %v24036_v57  ;;  %v2263_v57 = vrot.slane %v2261_v54, 4  ;;  %v2260_v53 = vsel %vm24192_vm10, %v2255_v40, %v24156_v43  ;;  %v2357_v54 = vshrl.u32 %v24178_v46, 16 }
 0x1d0   : > { %20302 = vmatprep.mubr.bf16.mxu1 %v24042_v47  ;;  %v24158_v47 = vld [vmem:[#allocation2 + $0x28] sm:$0xf] }
 0x1d1   : > { %v2329_v13 = vshll.u32 %v24158_v47, 16  ;;  %v2333_v17 = vshrl.u32 %v24158_v47, 16  ;;  %v2264_v22 = vor.u32 %v2263_v57, %v24156_v43  ;;  %v2289_v57 = vrot.slane %v2288_v50, 4 }
 0x1d2   : > { %v2313_v43 = vrot.slane %v2312_v30, 4  ;;  %v2392_v50 = vshrl.u32 %v2208_v20, 16  ;;  %v2405_v30 = vshrl.u32 %v24218_v24, 16 }
 0x1d3   : > { %v24176_v38 = vrot.slane %v2329_v13, 5  ;;  %v2335_v25 = vrot.slane %v2333_v17, 4  ;;  %v2265_v15 = vrot.slane %v2264_v22, 4  ;;  %v2359_v13 = vrot.slane %v2357_v54, 4  ;;  %v24246_v54 = vld [vmem:[#allocation2 + $0x58] sm:$0xf] }
 0x1d4   : > { %v2284_v17 = vsel %vm24192_vm10, %v2279_v55, %v24172_v28  ;;  %v2317_v22 = vrot.slane %v2315_v39, 5  ;;  %v2214_v55 = vld [vmem:[#allocation2 + $0x60] sm:$0xf] }
 0x1d5   : > { %v2336_v21 = vor.u32 %v2335_v25, %v24176_v38  ;;  %v2270_v18 = vsel %vm24192_vm10, %v2265_v15, %v2269_v1 }
 0x1d6   : > { %v17923_v3 = vcombine.low %v2260_v53, %v2270_v18 }
 0x1d7   : > { %20303 = vmatmul.mubr.bf16.gmra.mrb[20].mxu1 %v24050_v36  ;;  %v2301_v36 = vrot.slane %v2299_v2, 5  ;;  %v2337_v5 = vrot.slane %v2336_v21, 4  ;;  %v24207_v2 = vld [vmem:[#allocation2 + $0x40] sm:$0xf]  ;;  %v2373_v21 = vrot.slane %v2371_v29, 5  ;;  %v23214_v29 = vld [vmem:[%s29000_s3 + $0x110] sm:$0xff]  }
 0x1d8   : > { %20306 = vmatprep.mubr.bf16.mxu1 %v24056_v41  ;;  %v2322_v41 = vrot.slane %v2320_v11, 4  ;;  %v2349_v11 = vrot.slane %v2347_v10, 5 }
 0x1d9   : > { %v2302_v23 = vor.u32 %v2301_v36, %v2298_v33  ;;  %v2377_v33 = vshll.u32 %v24207_v2, 16  ;;  %v2381_v36 = vshrl.u32 %v24207_v2, 16  ;;  %v2342_v40 = vsel %vm24192_vm10, %v2337_v5, %v2341_v26 }
 0x1da   : > { %v2350_v15 = vor.u32 %v2349_v11, %v2346_v8  ;;  %v24258_v11 = vld [vmem:[#allocation2 + $0x50] sm:$0x1]  ;;  %v2440_v26 = vshrl.u32 %v2214_v55, 16 }
 0x1db   : > { %v2303_v61 = vrot.slane %v2302_v23, 4  ;;  %v2395_v23 = vshll.u32 %v2208_v20, 16  ;;  %v24238_v6 = vrot.slane %v2377_v33, 5  ;;  %v2443_v20 = vshll.u32 %v2214_v55, 16 }
 0x1dc   : > { %v2351_v39 = vrot.slane %v2350_v15, 4 }
 0x1dd   : > { %v2308_v28 = vsel %vm24192_vm10, %v2303_v61, %v24174_v37  ;;  %v2401_v37 = vshll.u32 %v24218_v24, 16  ;;  %v2394_v61 = vrot.slane %v2392_v50, 4  ;;  %v2397_v62 = vrot.slane %v2395_v23, 5 }
 0x1df   : > { %20307 = vmatmul.mubr.bf16.gmra.mrb[24].mxu1 %v24064_v34  ;;  %v2326_v34 = vor.u32 %v2325_v42, %v2322_v41  ;;  %v2294_v41 = vsel %vm24192_vm10, %v2289_v57, %v2293_v19  ;;  %v2318_v42 = vsel %vm24192_vm10, %v2313_v43, %v2317_v22  ;;  %v2387_v57 = vshll.u32 %v24234_v45, 16 }
 0x1e0   : > { %20310 = vmatprep.mubr.bf16.mxu1 %v24107_v49  ;;  %v2353_v49 = vshll.u32 %v24178_v46, 16  ;;  %v24240_v10 = vcombine.low %v2284_v17, %v2294_v41  ;;  %v24242_v53 = vcombine.low %v2308_v28, %v2318_v42  ;;  %v2407_v43 = vrot.slane %v2405_v30, 4 }
 0x1e1   : > { %v2327_v4 = vrot.slane %v2326_v34, 4  ;;  %v2370_v34 = vrot.slane %v2368_v27, 4  ;;  %v2425_v19 = vshll.u32 %v24246_v54, 16  ;;  %v2429_v22 = vshrl.u32 %v24246_v54, 16 }
 0x1e2   : > { %v24211_v12 = vrot.slane %v2353_v49, 5  ;;  %v2211_v49 = vld [vmem:[#allocation2 + $0x54] sm:$0xf]  ;;  %v2389_v33 = vrot.slane %v2387_v57, 5  ;;  %v2398_v28 = vor.u32 %v2397_v62, %v2394_v61  ;;  %v2445_v30 = vrot.slane %v2443_v20, 5 }
 0x1e3   : > { %v2332_v25 = vsel %vm24192_vm10, %v2327_v4, %v24176_v38  ;;  %v2383_v38 = vrot.slane %v2381_v36, 4  ;;  %v24254_v4 = vld [vmem:[#allocation2 + $0x64] sm:$0xf]  ;;  %v2374_v5 = vor.u32 %v2373_v21, %v2370_v34  ;;  %v2419_v17 = vshll.u32 %v2211_v49, 16  ;;  %v2217_v34 = vld [vmem:[#allocation2 + $0x6c] sm:$0xf] }
 0x1e4   : > { %v2360_v1 = vor.u32 %v2359_v13, %v24211_v12  ;;  %v24244_v18 = vcombine.low %v2332_v25, %v2342_v40  ;;  %v2416_v13 = vshrl.u32 %v2211_v49, 16  ;;  %v2356_v27 = vsel %vm24192_vm10, %v2351_v39, %v24211_v12  ;;  %v24276_v40 = vld [vmem:[#allocation2 + $0x70] sm:$0xf]  ;;  %v23215_v21 = vld [vmem:[%s29000_s3 + $0x118] sm:$0xff]  }
 0x1e5   : > { %v2384_v8 = vor.u32 %v2383_v38, %v24238_v6  ;;  %v2453_v36 = vshrl.u32 %v24254_v4, 16  ;;  %v2411_v25 = vshll.u32 %v24258_v11, 16  ;;  %v2375_v12 = vrot.slane %v2374_v5, 4  ;;  %v24292_v62 = vld [vmem:[#allocation2 + $0x5c] sm:$0x1] }
 0x1e6   : > { %v2361_v58 = vrot.slane %v2360_v1, 4  ;;  %v2418_v1 = vrot.slane %v2416_v13, 4  ;;  %v24278_v50 = vrot.slane %v2425_v19, 5  ;;  %v2431_v23 = vrot.slane %v2429_v22, 4  ;;  %v24299_v13 = vld [vmem:[#allocation2 + $0x68] sm:$0x1] }
 0x1e7   : > { %20311 = vmatmul.mubr.bf16.gmra.mrb[28].mxu1 %v23211_v59  ;;  %v2365_v59 = vrot.slane %v2363_v44, 5  ;;  %v2385_v15 = vrot.slane %v2384_v8, 4  ;;  %v2421_v44 = vrot.slane %v2419_v17, 5  ;;  %v2455_v49 = vrot.slane %v2453_v36, 4  ;;  %v24301_v22 = vld [vmem:[#allocation2 + $0x7c] sm:$0xf] }
 0x1e8   : > { %20330 = vmatprep.mubr.bf16.mxu1 %v17923_v3  ;;  %v24252_v3 = vrot.slane %v2401_v37, 5  ;;  %v2442_v37 = vrot.slane %v2440_v26, 4  ;;  %v2473_v55 = vshll.u32 %v24276_v40, 16  ;;  %v2477_v39 = vshrl.u32 %v24276_v40, 16 }
 0x1e9   : > { %v2366_v41 = vsel %vm24192_vm10, %v2361_v58, %v2365_v59  ;;  %v2390_v57 = vsel %vm24192_vm10, %v2385_v15, %v2389_v33  ;;  %v2413_v61 = vrot.slane %v2411_v25, 5  ;;  %v2380_v5 = vsel %vm24192_vm10, %v2375_v12, %v24238_v6 }
 0x1ea   : > { %v2408_v42 = vor.u32 %v2407_v43, %v24252_v3  ;;  %v24287_v58 = vcombine.low %v2356_v27, %v2366_v41  ;;  %v2422_v43 = vor.u32 %v2421_v44, %v2418_v1  ;;  %v2432_v8 = vor.u32 %v2431_v23, %v24278_v50  ;;  %v23216_v27 = vld [vmem:[%s29000_s3 + $0x120] sm:$0xff]   ;;  %v24320_v1 = vld [vmem:[#allocation2 + $0x74] sm:$0x1] }
 0x1eb   : > { %v2464_v17 = vshrl.u32 %v2217_v34, 16  ;;  %v2467_v19 = vshll.u32 %v2217_v34, 16  ;;  %v2446_v26 = vor.u32 %v2445_v30, %v2442_v37  ;;  %v24307_v33 = vrot.slane %v2473_v55, 5  ;;  %29158 = vst [vmem:[#allocation10_spill] sm:$0xff] %v24320_v1 }
 0x1ec   : > { %v2409_v59 = vrot.slane %v2408_v42, 4  ;;  %v2479_v6 = vrot.slane %v2477_v39, 4  ;;  %v2423_v42 = vrot.slane %v2422_v43, 4  ;;  %v2459_v25 = vshll.u32 %v24299_v13, 16  ;;  %v23217_v39 = vld [vmem:[%s29000_s3 + $0x128] sm:$0xff]  }
 0x1ed   : > { %v2497_v12 = vshll.u32 %v24301_v22, 16  ;;  %v2501_v15 = vshrl.u32 %v24301_v22, 16  ;;  %v2466_v44 = vrot.slane %v2464_v17, 4  ;;  %v2469_v23 = vrot.slane %v2467_v19, 5 }
 0x1ee   : > { %v2414_v41 = vsel %vm24192_vm10, %v2409_v59, %v2413_v61  ;;  %v2447_v34 = vrot.slane %v2446_v26, 4  ;;  %v2480_v55 = vor.u32 %v2479_v6, %v24307_v33  ;;  %v2483_v61 = vshll.u32 %v24320_v1, 16  ;;  %v24338_v6 = vld [vmem:[#allocation2 + $0x94] sm:$0xf] }
 0x1ef   : > { %20331 = vmatmul.mubr.bf16.vlgmr.msra.gmra.mrb[0].mxu1 %v24240_v10  ;;  %v24330_v43 = vrot.slane %v2497_v12, 5  ;;  %v2428_v17 = vsel %vm24192_vm10, %v2423_v42, %v24278_v50  ;;  %v2470_v19 = vor.u32 %v2469_v23, %v2466_v44  ;;  %29160 = vst [vmem:[#allocation12_spill] sm:$0xff] %v24338_v6  ;;  %v23218_v50 = vld [vmem:[%s29000_s3 + $0x130] sm:$0xff]  }
 0x1f0   : > { %20363 = vmatpush3.bf16.msra.mxu1 %v24143_v63  ;;  %20334 = vmatprep.mubr.bf16.mxu1 %v24242_v53  ;;  %v2449_v63 = vshll.u32 %v24254_v4, 16  ;;  %v2226_v44 = vld [vmem:[#allocation2 + $0x90] sm:$0xf]  ;;  %v2485_v23 = vrot.slane %v2483_v61, 5 }
 0x1f1   : > { %20364 = vmatprep.subr.bf16.mxu1 %v23213_v56  ;;  %v2539_v61 = vshll.u32 %v2226_v44, 16 }
 0x1f2   : > { %v24283_v38 = vrot.slane %v2449_v63, 5  ;;  %v24309_v63 = vcombine.low %v2380_v5, %v2390_v57  ;;  %v2461_v57 = vrot.slane %v2459_v25, 5  ;;  %v2503_v5 = vrot.slane %v2501_v15, 4  ;;  %v24347_v25 = vld [vmem:[#allocation2 + $0x80] sm:$0x1] }
 0x1f3   : > { %29161 = vst [vmem:[#allocation13_spill] sm:$0xff] %v24347_v25 }
 0x1f4   : > { %20365 = vmatpush3.bf16.msra.mxu1 %v23213_v56  ;;  %v2399_v56 = vrot.slane %v2398_v28, 4  ;;  %v2456_v20 = vor.u32 %v2455_v49, %v24283_v38  ;;  %v2435_v28 = vshll.u32 %v24292_v62, 16 }
 0x1f5   : > { %20366 = vmatprep.subr.bf16.mxu1 %v23214_v29 }
 0x1f6   : > { %v2404_v36 = vsel %vm24192_vm10, %v2399_v56, %v24252_v3  ;;  %v2433_v3 = vrot.slane %v2432_v8, 4  ;;  %v2457_v49 = vrot.slane %v2456_v20, 4  ;;  %v2437_v59 = vrot.slane %v2435_v28, 5  ;;  %v24332_v8 = vld [vmem:[#allocation2 + $0x88] sm:$0xf] }
 0x1f7   : > { %20335 = vmatmul.mubr.bf16.gmra.mrb[4].mxu1 %v24244_v18  ;;  %v24326_v56 = vcombine.low %v2404_v36, %v2414_v41  ;;  %29159 = vst [vmem:[#allocation11_spill] sm:$0xff] %v24332_v8  ;;  %v2452_v36 = vsel %vm24192_vm10, %v2447_v34, %v24283_v38  ;;  %v2481_v28 = vrot.slane %v2480_v55, 4  ;;  %v2521_v12 = vshll.u32 %v24332_v8, 16 }
 0x1f8   : > { %20338 = vmatprep.mubr.bf16.mxu1 %v24287_v58  ;;  %20367 = vmatpush3.bf16.msra.mxu1 %v23214_v29  ;;  %v2220_v29 = vld [vmem:[#allocation2 + $0x78] sm:$0xf]  ;;  %v2462_v41 = vsel %vm24192_vm10, %v2457_v49, %v2461_v57  ;;  %v2525_v15 = vshrl.u32 %v24332_v8, 16  ;;  %v2504_v38 = vor.u32 %v2503_v5, %v24330_v43  ;;  %v2471_v49 = vrot.slane %v2470_v19, 4 }
 0x1f9   : > { %20368 = vmatprep.subr.bf16.mxu1 %v23215_v21  ;;  %v2488_v37 = vshrl.u32 %v2220_v29, 16  ;;  %v2491_v30 = vshll.u32 %v2220_v29, 16  ;;  %v2438_v29 = vsel %vm24192_vm10, %v2433_v3, %v2437_v59  ;;  %v24359_v34 = vcombine.low %v2452_v36, %v2462_v41  ;;  %v23219_v5 = vld [vmem:[%s29000_s3 + $0x138] sm:$0xff]  }
 0x1fa   : > { %v24357_v3 = vcombine.low %v2428_v17, %v2438_v29  ;;  %v2486_v59 = vsel %vm24192_vm10, %v2481_v28, %v2485_v23  ;;  %v2536_v57 = vshrl.u32 %v2226_v44, 16  ;;  %v24367_v29 = vrot.slane %v2521_v12, 5 }
 0x1fb   : > { %v2490_v26 = vrot.slane %v2488_v37, 4  ;;  %v2493_v20 = vrot.slane %v2491_v30, 5  ;;  %v2545_v37 = vshll.u32 %v24338_v6, 16  ;;  %v2549_v30 = vshrl.u32 %v24338_v6, 16 }
 0x1fc   : > { %20369 = vmatpush3.bf16.msra.mxu1 %v23215_v21  ;;  %v2223_v21 = vld [vmem:[#allocation2 + $0x84] sm:$0xf]  ;;  %v2527_v36 = vrot.slane %v2525_v15, 4  ;;  %v2476_v41 = vsel %vm24192_vm10, %v2471_v49, %v24307_v33  ;;  %v2538_v44 = vrot.slane %v2536_v57, 4  ;;  %v2541_v23 = vrot.slane %v2539_v61, 5 }
 0x1fd   : > { %20370 = vmatprep.subr.bf16.mxu1 %v23216_v27  ;;  %v2515_v42 = vshll.u32 %v2223_v21, 16  ;;  %v2494_v55 = vor.u32 %v2493_v20, %v2490_v26  ;;  %v24370_v19 = vrot.slane %v2545_v37, 5  ;;  %v2551_v26 = vrot.slane %v2549_v30, 4  ;;  %v24372_v20 = vld [vmem:[#allocation2 + $0xa0] sm:$0xf] }
 0x1fe   : > { %29162 = vst [vmem:[#allocation14_spill] sm:$0xff] %v24372_v20  ;;  %v24382_v12 = vcombine.low %v2476_v41, %v2486_v59  ;;  %v24387_v37 = vld [vmem:[%s29000_s3 + $0x140] sm:$0xff]   ;;  %v2528_v33 = vor.u32 %v2527_v36, %v24367_v29  ;;  %v24390_v49 = vld [vmem:[#allocation2 + $0x98] sm:$0x1]  ;;  %v2232_v59 = vld [vmem:[#allocation2 + $0xa8] sm:$0xf]  ;;  %v2542_v0 = vor.u32 %v2541_v23, %v2538_v44 }
 0x1ff   : > { %20339 = vmatmul.mubr.bf16.gmra.mrb[8].mxu1 %v24309_v63  ;;  %v2517_v17 = vrot.slane %v2515_v42, 5  ;;  %v2495_v28 = vrot.slane %v2494_v55, 4  ;;  %v24380_v42 = vld [vmem:[#allocation2 + $0xac] sm:$0xf]  ;;  %29165 = vst [vmem:[#allocation17_spill] sm:$0xff] %v24390_v49  ;;  %v2573_v55 = vshrl.u32 %v24372_v20, 16  ;;  %v2552_v57 = vor.u32 %v2551_v26, %v24370_v19 }
 0x200   : > { %20342 = vmatprep.mubr.bf16.mxu1 %v24326_v56  ;;  %20371 = vmatpush3.bf16.msra.mxu1 %v23216_v27  ;;  %v2512_v27 = vshrl.u32 %v2223_v21, 16  ;;  %v2507_v21 = vshll.u32 %v24347_v25, 16  ;;  %29164 = vst [vmem:[#allocation16_spill] sm:$0xff] %v24380_v42  ;;  %v2593_v61 = vshll.u32 %v24380_v42, 16  ;;  %v2597_v41 = vshrl.u32 %v24380_v42, 16 }
 0x201   : > { %20372 = vmatprep.subr.bf16.mxu1 %v23217_v39  ;;  %v2584_v6 = vshrl.u32 %v2232_v59, 16  ;;  %v2575_v8 = vrot.slane %v2573_v55, 4  ;;  %v24411_v44 = vld [vmem:[#allocation2 + $0xa4] sm:$0x1]  ;;  %v2235_v55 = vld [vmem:[#allocation2 + $0xb4] sm:$0xf] }
 0x202   : > { %v2514_v16 = vrot.slane %v2512_v27, 4  ;;  %v24378_v27 = vld [vmem:[#allocation2 + $0x8c] sm:$0x1]  ;;  %v2509_v15 = vrot.slane %v2507_v21, 5  ;;  %v2599_v25 = vrot.slane %v2597_v41, 4 }
 0x203   : > { %29163 = vst [vmem:[#allocation15_spill] sm:$0xff] %v24378_v27 }
 0x204   : > { %20373 = vmatpush3.bf16.msra.mxu1 %v23217_v39  ;;  %v2505_v39 = vrot.slane %v2504_v38, 4  ;;  %v2229_v38 = vld [vmem:[#allocation2 + $0x9c] sm:$0xf]  ;;  %v2518_v30 = vor.u32 %v2517_v17, %v2514_v16  ;;  %v2500_v16 = vsel %vm24192_vm10, %v2495_v28, %v24330_v43  ;;  %v2531_v17 = vshll.u32 %v24378_v27, 16 }
 0x205   : > { %20374 = vmatprep.subr.bf16.mxu1 %v23218_v50  ;;  %v2560_v36 = vshrl.u32 %v2229_v38, 16  ;;  %v2563_v9 = vshll.u32 %v2229_v38, 16  ;;  %v2553_v28 = vrot.slane %v2552_v57, 4  ;;  %v2595_v27 = vrot.slane %v2593_v61, 5  ;;  %v24408_v38 = vld [vmem:[#allocation2 + $0xb8] sm:$0xf] }
 0x206   : > { %v2510_v21 = vsel %vm24192_vm10, %v2505_v39, %v2509_v15  ;;  %v2587_v39 = vshll.u32 %v2232_v59, 16  ;;  %v2529_v15 = vrot.slane %v2528_v33, 4  ;;  %v2519_v43 = vrot.slane %v2518_v30, 4  ;;  %29166 = vst [vmem:[#allocation18_spill] sm:$0xff] %v24408_v38  ;;  %v24415_v61 = vld [vmem:[#allocation2 + $0xb0] sm:$0x1] }
 0x207   : > { %20343 = vmatmul.mubr.bf16.gmra.mrb[12].mxu1 %v24357_v3  ;;  %v24405_v26 = vcombine.low %v2500_v16, %v2510_v21  ;;  %v2562_v23 = vrot.slane %v2560_v36, 4  ;;  %v2565_v59 = vrot.slane %v2563_v9, 5  ;;  %v2543_v21 = vrot.slane %v2542_v0, 4 }
 0x208   : > { %20346 = vmatprep.mubr.bf16.mxu1 %v24359_v34  ;;  %20375 = vmatpush3.bf16.msra.mxu1 %v23218_v50  ;;  %v2569_v50 = vshll.u32 %v24372_v20, 16  ;;  %v2555_v20 = vshll.u32 %v24390_v49, 16  ;;  %v2586_v33 = vrot.slane %v2584_v6, 4  ;;  %v2617_v41 = vshll.u32 %v24408_v38, 16 }
 0x209   : > { %20376 = vmatprep.subr.bf16.mxu1 %v23219_v5  ;;  %v2621_v49 = vshrl.u32 %v24408_v38, 16  ;;  %v2600_v9 = vor.u32 %v2599_v25, %v2595_v27  ;;  %v2566_v6 = vor.u32 %v2565_v59, %v2562_v23  ;;  %v2608_v36 = vshrl.u32 %v2235_v55, 16 }
 0x20a   : > { %v2571_v42 = vrot.slane %v2569_v50, 5  ;;  %v2557_v16 = vrot.slane %v2555_v20, 5  ;;  %v2589_v50 = vrot.slane %v2587_v39, 5  ;;  %v2579_v20 = vshll.u32 %v24411_v44, 16 }
 0x20b   : > { %v2611_v39 = vshll.u32 %v2235_v55, 16  ;;  %v2603_v38 = vshll.u32 %v24415_v61, 16  ;;  %v2601_v25 = vrot.slane %v2600_v9, 4  ;;  %v2567_v23 = vrot.slane %v2566_v6, 4 }
 0x20c   : > { %20377 = vmatpush3.bf16.msra.mxu1 %v23219_v5  ;;  %v2533_v5 = vrot.slane %v2531_v17, 5  ;;  %v2576_v57 = vor.u32 %v2575_v8, %v2571_v42  ;;  %v2524_v17 = vsel %vm24192_vm10, %v2519_v43, %v24367_v29  ;;  %v2558_v0 = vsel %vm24192_vm10, %v2553_v28, %v2557_v16 }
 0x20d   : > { %20410 = vmatprep.subr.bf16.mxu1 %v24387_v37  ;;  %v2619_v43 = vrot.slane %v2617_v41, 5  ;;  %v2623_v28 = vrot.slane %v2621_v49, 4  ;;  %v2581_v59 = vrot.slane %v2579_v20, 5  ;;  %v2610_v16 = vrot.slane %v2608_v36, 4 }
 0x20e   : > { %v2534_v30 = vsel %vm24192_vm10, %v2529_v15, %v2533_v5  ;;  %v2548_v15 = vsel %vm24192_vm10, %v2543_v21, %v24370_v19  ;;  %v2590_v5 = vor.u32 %v2589_v50, %v2586_v33  ;;  %v2577_v29 = vrot.slane %v2576_v57, 4  ;;  %v24435_v19 = vld [vmem:[#allocation2 + $0xbc] sm:$0x1] }
 0x20f   : > { %20347 = vmatmul.mubr.bf16.gmra.mrb[16].mxu1 %v24382_v12  ;;  %v24425_v8 = vcombine.low %v2524_v17, %v2534_v30  ;;  %v24431_v1 = vcombine.low %v2548_v15, %v2558_v0  ;;  %v2613_v55 = vrot.slane %v2611_v39, 5  ;;  %v2605_v17 = vrot.slane %v2603_v38, 5 }
 0x210   : > { %20350 = vmatprep.mubr.bf16.mxu1 %v24405_v26  ;;  %v2591_v30 = vrot.slane %v2590_v5, 4  ;;  %v2582_v21 = vsel %vm24192_vm10, %v2577_v29, %v2581_v59  ;;  %v2624_v33 = vor.u32 %v2623_v28, %v2619_v43  ;;  %v2572_v50 = vsel %vm24192_vm10, %v2567_v23, %v2571_v42  ;;  %v23222_v5 = vld [vmem:[%s29000_s3 + $0x150] sm:$0xff]   ;;  %v23225_v29 = vld [vmem:[%s29000_s3 + $0x168] sm:$0xff]   ;;  %v23227_v28 = vld [vmem:[%s29000_s3 + $0x178] sm:$0xff]  }
 0x211   : > { %v2606_v49 = vsel %vm24192_vm10, %v2601_v25, %v2605_v17  ;;  %v2614_v57 = vor.u32 %v2613_v55, %v2610_v16  ;;  %v2627_v41 = vshll.u32 %v24435_v19, 16  ;;  %v24444_v0 = vcombine.low %v2572_v50, %v2582_v21  ;;  %v23228_v25 = vld [vmem:[%s29000_s3 + $0x180] sm:$0xff]  }
 0x212   : > { %v2596_v38 = vsel %vm24192_vm10, %v2591_v30, %v2595_v27  ;;  %v2625_v6 = vrot.slane %v2624_v33, 4  ;;  %v23221_v27 = vld [vmem:[%s29000_s3 + $0x148] sm:$0xff]   ;;  %v24494_v23 = vld [vmem:[#allocation2 + $0xc4] sm:$0xf]  ;;  %v2238_v59 = vld [vmem:[#allocation2 + $0xc0] sm:$0xf] }
 0x213   : > { %v24448_v9 = vcombine.low %v2596_v38, %v2606_v49  ;;  %v2615_v20 = vrot.slane %v2614_v57, 4  ;;  %v2629_v36 = vrot.slane %v2627_v41, 5  ;;  %v2963_v16 = vshll.u32 %v24494_v23, 16  ;;  %v24501_v57 = vld [vmem:[#allocation2 + $0xc8] sm:$0x1] }
 0x214   : > { %v2967_v55 = vshrl.u32 %v24494_v23, 16  ;;  %v2954_v30 = vshrl.u32 %v2238_v59, 16  ;;  %v2957_v17 = vshll.u32 %v2238_v59, 16 }
 0x215   : > { %v2630_v42 = vsel %vm24192_vm10, %v2625_v6, %v2629_v36  ;;  %v2620_v39 = vsel %vm24192_vm10, %v2615_v20, %v2619_v43  ;;  %v23226_v43 = vld [vmem:[%s29000_s3 + $0x170] sm:$0xff]   ;;  %v2965_v21 = vrot.slane %v2963_v16, 5  ;;  %v2973_v6 = vshll.u32 %v24501_v57, 16 }
 0x216   : > { %v24456_v15 = vcombine.low %v2620_v39, %v2630_v42  ;;  %v2969_v33 = vrot.slane %v2967_v55, 4  ;;  %v2956_v49 = vrot.slane %v2954_v30, 4  ;;  %v2959_v50 = vrot.slane %v2957_v17, 5  ;;  %v24555_v30 = vld [vmem:[#allocation2 + $0xd4] sm:$0x1] }
 0x217   : > { %20351 = vmatmul.mubr.bf16.gmra.mrb[20].mxu1 %v24425_v8  ;;  %v2975_v42 = vrot.slane %v2973_v6, 5 }
 0x218   : > { %20354 = vmatprep.mubr.bf16.mxu1 %v24431_v1  ;;  %v2970_v41 = vor.u32 %v2969_v33, %v2965_v21  ;;  %v2960_v38 = vor.u32 %v2959_v50, %v2956_v49  ;;  %v3525_v33 = vld [vmem:[#allocation2] sm:$0xe] }
 0x21a   : > { %v2971_v20 = vrot.slane %v2970_v41, 4  ;;  %v2961_v36 = vrot.slane %v2960_v38, 4  ;;  %v17997_v38 = vrot.slane %v3525_v33, 9 }
 0x21c   : > { %v2976_v39 = vsel %vm24192_vm10, %v2971_v20, %v2975_v42  ;;  %v3599_v20 = vrot.slane %v24160_v60, 5 }
 0x21f   : > { %20355 = vmatmul.mubr.bf16.gmra.mrb[24].mxu1 %v24444_v0 }
 0x220   : > { %20358 = vmatprep.mubr.bf16.mxu1 %v24448_v9 }
 0x227   : > { %20359 = vmatmul.mubr.bf16.gmra.mrb[28].mxu1 %v24456_v15 }
 0x228   : > { %20378 = vmatprep.mubr.bf16.mxu1 %v24240_v10  ;;  %v23223_v10 = vld [vmem:[%s29000_s3 + $0x158] sm:$0xff]  }
 0x22f   : > { %20379 = vmatmul.mubr.bf16.vlgmr.msra.gmra.mrb[0].mxu1 %v24242_v53 }
 0x230   : > { %20411 = vmatpush3.bf16.msra.mxu1 %v24387_v37  ;;  %20382 = vmatprep.mubr.bf16.mxu1 %v24244_v18  ;;  %v23224_v37 = vld [vmem:[%s29000_s3 + $0x160] sm:$0xff]  }
 0x231   : > { %20412 = vmatprep.subr.bf16.mxu1 %v23221_v27 }
 0x234   : > { %20413 = vmatpush3.bf16.msra.mxu1 %v23221_v27  ;;  %v2966_v27 = vsel %vm24192_vm10, %v2961_v36, %v2965_v21  ;;  %v3596_v21 = vrot.slane %v24146_v52, 5 }
 0x235   : > { %20414 = vmatprep.subr.bf16.mxu1 %v23222_v5 }
 0x236   : > { %v3598_v6 = vrot.slane %v3596_v21, 4  ;;  %v3597_v36 = vsel %vm24568_vm13, %v17997_v38, %v3596_v21  ;;  %v3631_v21 = vrot.slane %v24207_v2, 5  ;;  %v23239_v2 = vld [vmem:[%s29000_s3 + $0x1d8] sm:$0xff]  }
 0x237   : > { %20383 = vmatmul.mubr.bf16.gmra.mrb[4].mxu1 %v24287_v58 }
 0x238   : > { %20386 = vmatprep.mubr.bf16.mxu1 %v24309_v63  ;;  %20415 = vmatpush3.bf16.msra.mxu1 %v23222_v5  ;;  %v24510_v5 = vcombine.low %v2966_v27, %v2976_v39  ;;  %v3600_v60 = vsel %vm24568_vm13, %v3598_v6, %v3599_v20  ;;  %v3610_v39 = vrot.slane %v24154_v35, 5  ;;  %v3633_v38 = vrot.slane %v3631_v21, 4 }
 0x239   : > { %20416 = vmatprep.subr.bf16.mxu1 %v23223_v10  ;;  %v18029_v27 = vcombine.low %v3597_v36, %v3600_v60  ;;  %v3634_v20 = vrot.slane %v24234_v45, 5  ;;  %v23240_v36 = vld [vmem:[%s29000_s3 + $0x1e0] sm:$0xff]   ;;  %v3652_v45 = vrot.slane %v24254_v4, 5  ;;  %v3532_v4 = vld [vmem:[#allocation2 + $0x54] sm:$0xe] }
 0x23c   : > { %20417 = vmatpush3.bf16.msra.mxu1 %v23223_v10  ;;  %v23229_v10 = vld [vmem:[%s29000_s3 + $0x188] sm:$0xff]  }
 0x23d   : > { %20418 = vmatprep.subr.bf16.mxu1 %v23224_v37 }
 0x23f   : > { %20387 = vmatmul.mubr.bf16.gmra.mrb[8].mxu1 %v24326_v56 }
 0x240   : > { %20390 = vmatprep.mubr.bf16.mxu1 %v24357_v3  ;;  %20419 = vmatpush3.bf16.msra.mxu1 %v23224_v37  ;;  %v23230_v37 = vld [vmem:[%s29000_s3 + $0x190] sm:$0xff]  }
 0x241   : > { %20420 = vmatprep.subr.bf16.mxu1 %v23225_v29 }
 0x244   : > { %20421 = vmatpush3.bf16.msra.mxu1 %v23225_v29  ;;  %v24548_v29 = vld [vmem:[#allocation2 + $0xd0] sm:$0xf] }
 0x245   : > { %20422 = vmatprep.subr.bf16.mxu1 %v23226_v43 }
 0x247   : > { %20391 = vmatmul.mubr.bf16.gmra.mrb[12].mxu1 %v24359_v34 }
 0x248   : > { %20394 = vmatprep.mubr.bf16.mxu1 %v24382_v12  ;;  %20423 = vmatpush3.bf16.msra.mxu1 %v23226_v43 }
 0x249   : > { %20424 = vmatprep.subr.bf16.mxu1 %v23227_v28 }
 0x24c   : > { %20425 = vmatpush3.bf16.msra.mxu1 %v23227_v28  ;;  %v3253_v28 = vshrl.u32 %v24548_v29, 16 }
 0x24d   : > { %20458 = vmatprep.subr.bf16.mxu1 %v23228_v25 }
 0x24e   : > { %v3255_v55 = vrot.slane %v3253_v28, 4 }
 0x24f   : > { %20395 = vmatmul.mubr.bf16.gmra.mrb[16].mxu1 %v24405_v26 }
 0x250   : > { %20398 = vmatprep.mubr.bf16.mxu1 %v24425_v8 }
 0x257   : > { %20399 = vmatmul.mubr.bf16.gmra.mrb[20].mxu1 %v24431_v1 }
 0x258   : > { %20402 = vmatprep.mubr.bf16.mxu1 %v24444_v0 }
 0x25f   : > { %20403 = vmatmul.mubr.bf16.gmra.mrb[24].mxu1 %v24448_v9 }
 0x260   : > { %20406 = vmatprep.mubr.bf16.mxu1 %v24456_v15 }
 0x267   : > { %20407 = vmatmul.mubr.bf16.gmra.mrb[28].mxu1 %v24510_v5 }
 0x268   : > { %20426 = vmatprep.mubr.bf16.mxu1 %v24242_v53  ;;  %v23231_v53 = vld [vmem:[%s29000_s3 + $0x198] sm:$0xff]  }
 0x26f   : > { %20427 = vmatmul.mubr.bf16.vlgmr.msra.gmra.mrb[0].mxu1 %v24244_v18  ;;  %v23232_v18 = vld [vmem:[%s29000_s3 + $0x1a0] sm:$0xff]  }
 0x270   : > { %20459 = vmatpush3.bf16.msra.mxu1 %v23228_v25  ;;  %20430 = vmatprep.mubr.bf16.mxu1 %v24287_v58  ;;  %v23233_v58 = vld [vmem:[%s29000_s3 + $0x1a8] sm:$0xff]  }
 0x271   : > { %20460 = vmatprep.subr.bf16.mxu1 %v23229_v10 }
 0x274   : > { %20461 = vmatpush3.bf16.msra.mxu1 %v23229_v10  ;;  %v3526_v10 = vld [vmem:[#allocation2 + $0xc] sm:$0xe] }
 0x275   : > { %20462 = vmatprep.subr.bf16.mxu1 %v23230_v37 }
 0x277   : > { %20431 = vmatmul.mubr.bf16.gmra.mrb[4].mxu1 %v24309_v63  ;;  %v23234_v63 = vld [vmem:[%s29000_s3 + $0x1b0] sm:$0xff]  }
 0x278   : > { %20434 = vmatprep.mubr.bf16.mxu1 %v24326_v56  ;;  %20463 = vmatpush3.bf16.msra.mxu1 %v23230_v37  ;;  %v23235_v56 = vld [vmem:[%s29000_s3 + $0x1b8] sm:$0xff]   ;;  %v3612_v37 = vrot.slane %v3610_v39, 4 }
 0x279   : > { %20464 = vmatprep.subr.bf16.mxu1 %v23231_v53 }
 0x27c   : > { %20465 = vmatpush3.bf16.msra.mxu1 %v23231_v53  ;;  %v3606_v53 = vrot.slane %v24181_v48, 5 }
 0x27d   : > { %20466 = vmatprep.subr.bf16.mxu1 %v23232_v18 }
 0x27f   : > { %20435 = vmatmul.mubr.bf16.gmra.mrb[8].mxu1 %v24357_v3  ;;  %v24546_v3 = vld [vmem:[%s29000_s3 + $0x1c0] sm:$0xff]  }
 0x280   : > { %20438 = vmatprep.mubr.bf16.mxu1 %v24359_v34  ;;  %20467 = vmatpush3.bf16.msra.mxu1 %v23232_v18  ;;  %v2241_v34 = vld [vmem:[#allocation2 + $0xcc] sm:$0xf]  ;;  %v3527_v18 = vld [vmem:[#allocation2 + $0x18] sm:$0xe] }
 0x281   : > { %20468 = vmatprep.subr.bf16.mxu1 %v23233_v58  ;;  %v3243_v43 = vshll.u32 %v2241_v34, 16 }
 0x283   : > { %v3245_v59 = vrot.slane %v3243_v43, 5 }
 0x284   : > { %20469 = vmatpush3.bf16.msra.mxu1 %v23233_v58  ;;  %v3613_v58 = vrot.slane %v24184_v51, 5  ;;  %v23237_v51 = vld [vmem:[%s29000_s3 + $0x1c8] sm:$0xff]  }
 0x285   : > { %20470 = vmatprep.subr.bf16.mxu1 %v23234_v63 }
 0x286   : > { %v3614_v35 = vsel %vm24568_vm13, %v3612_v37, %v3613_v58  ;;  %v3648_v58 = vrot.slane %v24292_v62, 5  ;;  %v3666_v62 = vrot.slane %v24301_v22, 5  ;;  %v3534_v22 = vld [vmem:[#allocation2 + $0x6c] sm:$0xe] }
 0x287   : > { %20439 = vmatmul.mubr.bf16.gmra.mrb[12].mxu1 %v24382_v12  ;;  %v3240_v12 = vshrl.u32 %v2241_v34, 16  ;;  %v17999_v34 = vrot.slane %v3527_v18, 9  ;;  %v3654_v18 = vrot.slane %v3652_v45, 4 }
 0x288   : > { %20442 = vmatprep.mubr.bf16.mxu1 %v24405_v26  ;;  %20471 = vmatpush3.bf16.msra.mxu1 %v23234_v63  ;;  %v3249_v26 = vshll.u32 %v24548_v29, 16  ;;  %v17998_v63 = vrot.slane %v3526_v10, 9 }
 0x289   : > { %20472 = vmatprep.subr.bf16.mxu1 %v23235_v56  ;;  %v3242_v25 = vrot.slane %v3240_v12, 4  ;;  %v3624_v12 = vrot.slane %v24178_v46, 5  ;;  %v3611_v48 = vsel %vm24568_vm13, %v17999_v34, %v3610_v39  ;;  %v3620_v46 = vrot.slane %v24187_v31, 5 }
 0x28a   : > { %v3251_v16 = vrot.slane %v3249_v26, 5  ;;  %v24595_v28 = vcombine.low %v3611_v48, %v3614_v35  ;;  %v3638_v31 = vrot.slane %v24218_v24, 5  ;;  %v3530_v24 = vld [vmem:[#allocation2 + $0x3c] sm:$0xe]  ;;  %v18004_v34 = vrot.slane %v3532_v4, 9 }
 0x28b   : > { %v3246_v17 = vor.u32 %v3245_v59, %v3242_v25  ;;  %v3528_v25 = vld [vmem:[#allocation2 + $0x24] sm:$0xe]  ;;  %v3626_v59 = vrot.slane %v3624_v12, 4  ;;  %v18002_v60 = vrot.slane %v3530_v24, 9 }
 0x28c   : > { %20473 = vmatpush3.bf16.msra.mxu1 %v23235_v56  ;;  %v3640_v6 = vrot.slane %v3638_v31, 4 }
 0x28d   : > { %20506 = vmatprep.subr.bf16.mxu1 %v24546_v3  ;;  %v3247_v49 = vrot.slane %v3246_v17, 4  ;;  %v23238_v17 = vld [vmem:[%s29000_s3 + $0x1d0] sm:$0xff]  }
 0x28f   : > { %20443 = vmatmul.mubr.bf16.gmra.mrb[16].mxu1 %v24425_v8  ;;  %v3256_v8 = vor.u32 %v3255_v55, %v3251_v16  ;;  %v3627_v55 = vrot.slane %v24209_v7, 5 }
 0x290   : > { %20446 = vmatprep.mubr.bf16.mxu1 %v24431_v1  ;;  %v3259_v1 = vshll.u32 %v24555_v30, 16 }
 0x291   : > { %v3257_v50 = vrot.slane %v3256_v8, 4  ;;  %v18000_v8 = vrot.slane %v3528_v25, 9 }
 0x292   : > { %v3261_v41 = vrot.slane %v3259_v1, 5 }
 0x294   : > { %v3262_v52 = vsel %vm24192_vm10, %v3257_v50, %v3261_v41 }
 0x297   : > { %20447 = vmatmul.mubr.bf16.gmra.mrb[20].mxu1 %v24444_v0  ;;  %v3252_v0 = vsel %vm24192_vm10, %v3247_v49, %v3251_v16  ;;  %v3529_v16 = vld [vmem:[#allocation2 + $0x30] sm:$0xe] }
 0x298   : > { %20450 = vmatprep.mubr.bf16.mxu1 %v24448_v9  ;;  %v29167_v9 = vmov 0  ;;  %v17988_v42 = vcombine.low %v3252_v0, %v3262_v52  ;;  %v18001_v33 = vrot.slane %v3529_v16, 9  ;;  %v3531_v0 = vld [vmem:[#allocation2 + $0x48] sm:$0xe]  ;;  %v3641_v52 = vrot.slane %v24258_v11, 5  ;;  %v29170_v16 = vld [vmem:[#allocation10_spill] sm:$0xff] }
 0x299   : > { %v29168_v9 = vsel %vm24568_vm13, 4294967295, %v29167_v9  ;;  %v18003_v39 = vrot.slane %v3531_v0, 9  ;;  %v3632_v11 = vsel %vm24568_vm13, %v18002_v60, %v3631_v21  ;;  %v23244_v21 = vld [vmem:[%s29000_s3 + $0x200] sm:$0xff]  }
 0x29a   : > { %29169 = vst [vmem:[#allocation19_spill] sm:$0xff] %v29168_v9  ;;  %v3625_v50 = vsel %vm24568_vm13, %v18001_v33, %v3624_v12  ;;  %v3659_v12 = vrot.slane %v24276_v40, 5  ;;  %v23243_v40 = vld [vmem:[%s29000_s3 + $0x1f8] sm:$0xff]   ;;  %v18006_v33 = vrot.slane %v3534_v22, 9  ;;  %v3536_v60 = vld [vmem:[#allocation2 + $0x84] sm:$0xe] }
 0x29b   : > { %v3639_v10 = vsel %vm24568_vm13, %v18003_v39, %v3638_v31  ;;  %v29172_v31 = vld [vmem:[#allocation11_spill] sm:$0xff] }
 0x29f   : > { %20451 = vmatmul.mubr.bf16.gmra.mrb[24].mxu1 %v24456_v15  ;;  %v3603_v15 = vrot.slane %v24152_v32, 5  ;;  %v3617_v32 = vrot.slane %v24158_v47, 5 }
 0x2a0   : > { %20454 = vmatprep.mubr.bf16.mxu1 %v24510_v5 }
 0x2a1   : > { %v3605_v5 = vrot.slane %v3603_v15, 4  ;;  %v3604_v43 = vsel %vm24568_vm13, %v17998_v63, %v3603_v15  ;;  %v3619_v47 = vrot.slane %v3617_v32, 4  ;;  %v3618_v49 = vsel %vm24568_vm13, %v18000_v8, %v3617_v32  ;;  %v3533_v63 = vld [vmem:[#allocation2 + $0x60] sm:$0xe]  ;;  %v23242_v32 = vld [vmem:[%s29000_s3 + $0x1f0] sm:$0xff]  }
 0x2a2   : > { %v3635_v15 = vsel %vm24568_vm13, %v3633_v38, %v3634_v20  ;;  %v29171_v8 = vld [vmem:[#allocation13_spill] sm:$0xff]  ;;  %v29173_v38 = vld [vmem:[#allocation12_spill] sm:$0xff] }
 0x2a3   : > { %v3607_v56 = vsel %vm24568_vm13, %v3605_v5, %v3606_v53  ;;  %v3621_v1 = vsel %vm24568_vm13, %v3619_v47, %v3620_v46  ;;  %v24637_v5 = vcombine.low %v3632_v11, %v3635_v15  ;;  %v3668_v46 = vrot.slane %v3666_v62, 4 }
 0x2a4   : > { %v24588_v26 = vcombine.low %v3604_v43, %v3607_v56  ;;  %v24613_v7 = vcombine.low %v3618_v49, %v3621_v1  ;;  %v3655_v56 = vrot.slane %v24299_v13, 5  ;;  %v18005_v43 = vrot.slane %v3533_v63, 9  ;;  %v29177_v63 = vld [vmem:[#allocation16_spill] sm:$0xff] }
 0x2a5   : > { %v3669_v1 = vrot.slane %v29171_v8, 5  ;;  %v3673_v49 = vrot.slane %v29172_v31, 5  ;;  %v3680_v24 = vrot.slane %v29173_v38, 5  ;;  %v3704_v31 = vrot.slane %v24435_v19, 5  ;;  %v23246_v19 = vld [vmem:[%s29000_s3 + $0x210] sm:$0xff]  }
 0x2a6   : > { %v3656_v48 = vsel %vm24568_vm13, %v3654_v18, %v3655_v56  ;;  %v3653_v47 = vsel %vm24568_vm13, %v18005_v43, %v3652_v45  ;;  %v29175_v45 = vld [vmem:[#allocation17_spill] sm:$0xff]  ;;  %v3694_v56 = vrot.slane %v29177_v63, 5  ;;  %v23257_v63 = vld [vmem:[%s28998_s1 + $0x28] sm:$0xff]  }
 0x2a7   : > { %20455 = vmatmul.mubr.bf16.gmra.mrb[28].mxu1 %v17988_v42  ;;  %v3645_v42 = vrot.slane %v24246_v54, 5  ;;  %v23241_v54 = vld [vmem:[%s29000_s3 + $0x1e8] sm:$0xff]   ;;  %v24668_v25 = vcombine.low %v3653_v47, %v3656_v48  ;;  %v3682_v15 = vrot.slane %v3680_v24, 4  ;;  %v3683_v11 = vrot.slane %v29175_v45, 5  ;;  %v3538_v48 = vld [vmem:[#allocation2 + $0x9c] sm:$0xe] }
 0x2a8   : > { %20474 = vmatprep.mubr.bf16.mxu1 %v18029_v27  ;;  %v3642_v27 = vsel %vm24568_vm13, %v3640_v6, %v3641_v52  ;;  %v3660_v6 = vsel %vm24568_vm13, %v18006_v33, %v3659_v12  ;;  %v3539_v47 = vld [vmem:[#allocation2 + $0xa8] sm:$0xe] }
 0x2a9   : > { %v24644_v37 = vcombine.low %v3639_v10, %v3642_v27  ;;  %v3647_v53 = vrot.slane %v3645_v42, 4  ;;  %v3646_v13 = vsel %vm24568_vm13, %v18004_v34, %v3645_v42  ;;  %v29174_v42 = vld [vmem:[#allocation15_spill] sm:$0xff]  ;;  %v3537_v27 = vld [vmem:[#allocation2 + $0x90] sm:$0xe]  ;;  %v18008_v10 = vrot.slane %v3536_v60, 9 }
 0x2aa   : > { %v3676_v39 = vrot.slane %v29174_v42, 5  ;;  %v18009_v18 = vrot.slane %v3537_v27, 9  ;;  %v23252_v60 = vld [vmem:[%s28998_s1] sm:$0xff]   ;;  %v4036_v27 = vrot.slane %v24501_v57, 5  ;;  %v23278_v57 = vld [vmem:[%s29002_s5 + $0x10] sm:$0xff]  }
 0x2ab   : > { %v3649_v35 = vsel %vm24568_vm13, %v3647_v53, %v3648_v58  ;;  %v29176_v53 = vld [vmem:[#allocation14_spill] sm:$0xff]  ;;  %v3684_v58 = vsel %vm24568_vm13, %v3682_v15, %v3683_v11  ;;  %v4033_v15 = vrot.slane %v24494_v23, 5 }
 0x2ac   : > { %v3687_v4 = vrot.slane %v29176_v53, 5  ;;  %v23276_v23 = vld [vmem:[%s29002_s5] sm:$0xff]   ;;  %v23277_v53 = vld [vmem:[%s29002_s5 + $0x8] sm:$0xff]  }
 0x2ad   : > { %v4035_v42 = vrot.slane %v4033_v15, 4  ;;  %20602 = vmatprep.subr.bf16.mxu0 %v23276_v23 }
 0x2ae   : > { %v3689_v43 = vrot.slane %v3687_v4, 4  ;;  %20603 = vmatpush3.bf16.msra.mxu0 %v23276_v23 }
 0x2af   : > { %20475 = vmatmul.mubr.bf16.vlgmr.msra.gmra.mrb[0].mxu1 %v24588_v26  ;;  %v4037_v11 = vsel %vm24568_vm13, %v4035_v42, %v4036_v27  ;;  %20604 = vmatprep.subr.bf16.mxu0 %v23277_v53 }
 0x2b0   : > { %20507 = vmatpush3.bf16.msra.mxu1 %v24546_v3  ;;  %20478 = vmatprep.mubr.bf16.mxu1 %v24595_v28  ;;  %v3628_v3 = vsel %vm24568_vm13, %v3626_v59, %v3627_v55  ;;  %v3661_v59 = vrot.slane %v3659_v12, 4  ;;  %v3662_v55 = vrot.slane %v29170_v16, 5 }
 0x2b1   : > { %20508 = vmatprep.subr.bf16.mxu1 %v23237_v51  ;;  %v24620_v41 = vcombine.low %v3625_v50, %v3628_v3 }
 0x2b2   : > { %v3663_v3 = vsel %vm24568_vm13, %v3661_v59, %v3662_v55  ;;  %v18010_v59 = vrot.slane %v3538_v48, 9  ;;  %v18011_v55 = vrot.slane %v3539_v47, 9  ;;  %20605 = vmatpush3.bf16.msra.mxu0 %v23277_v53  ;;  %v23264_v48 = vld [vmem:[%s23735_s23 + $0xa0] sm:$0xff]   ;;  %v23267_v47 = vld [vmem:[%s23735_s23 + $0xb8] sm:$0xff]  }
 0x2b3   : > { %v24685_v20 = vcombine.low %v3660_v6, %v3663_v3  ;;  %v3540_v3 = vld [vmem:[#allocation2 + $0xb4] sm:$0xe]  ;;  %v23249_v6 = vld [vmem:[%s29000_s3 + $0x228] sm:$0xff]   ;;  %20606 = vmatprep.subr.bf16.mxu0 %v23278_v57 }
 0x2b4   : > { %20509 = vmatpush3.bf16.msra.mxu1 %v23237_v51  ;;  %v24661_v51 = vcombine.low %v3646_v13, %v3649_v35  ;;  %v3681_v35 = vsel %vm24568_vm13, %v18009_v18, %v3680_v24  ;;  %v3690_v13 = vrot.slane %v24411_v44, 5  ;;  %v3688_v8 = vsel %vm24568_vm13, %v18010_v59, %v3687_v4  ;;  %v23245_v24 = vld [vmem:[%s29000_s3 + $0x208] sm:$0xff]   ;;  %v23279_v18 = vld [vmem:[%s29002_s5 + $0x18] sm:$0xff]  }
 0x2b5   : > { %20510 = vmatprep.subr.bf16.mxu1 %v23238_v17  ;;  %v24707_v12 = vcombine.low %v3681_v35, %v3684_v58  ;;  %v3695_v44 = vsel %vm24568_vm13, %v18011_v55, %v3694_v56  ;;  %v23253_v4 = vld [vmem:[%s28998_s1 + $0x8] sm:$0xff]   ;;  %v23280_v58 = vld [vmem:[%s29002_s5 + $0x20] sm:$0xff]  }
 0x2b6   : > { %v3691_v22 = vsel %vm24568_vm13, %v3689_v43, %v3690_v13  ;;  %20607 = vmatpush3.bf16.msra.mxu0 %v23278_v57  ;;  %v23263_v43 = vld [vmem:[%s23735_s23 + $0x98] sm:$0xff]   ;;  %v23266_v13 = vld [vmem:[%s23735_s23 + $0xb0] sm:$0xff]   ;;  %v23269_v59 = vld [vmem:[%s23735_s23 + $0xc8] sm:$0xff]  }
 0x2b7   : > { %20479 = vmatmul.mubr.bf16.gmra.mrb[4].mxu1 %v24613_v7  ;;  %20608 = vmatprep.subr.bf16.mxu0 %v23279_v18  ;;  %v23272_v55 = vld [vmem:[%s23735_s23 + $0xe0] sm:$0xff]  }
 0x2b8   : > { %20482 = vmatprep.mubr.bf16.mxu1 %v24620_v41  ;;  %20511 = vmatpush3.bf16.msra.mxu1 %v23238_v17  ;;  %v3535_v17 = vld [vmem:[#allocation2 + $0x78] sm:$0xe] }
 0x2b9   : > { %20512 = vmatprep.subr.bf16.mxu1 %v23239_v2  ;;  %v18007_v50 = vrot.slane %v3535_v17, 9 }
 0x2ba   : > { %20609 = vmatpush3.bf16.msra.mxu0 %v23279_v18 }
 0x2bb   : > { %v3667_v0 = vsel %vm24568_vm13, %v18007_v50, %v3666_v62  ;;  %v3696_v62 = vrot.slane %v3694_v56, 4  ;;  %20610 = vmatprep.subr.bf16.mxu0 %v23280_v58  ;;  %v4308_v56 = vrot.slane %v24555_v30, 5  ;;  %v23262_v30 = vld [vmem:[%s23735_s23 + $0x90] sm:$0xff]  }
 0x2bc   : > { %20513 = vmatpush3.bf16.msra.mxu1 %v23239_v2  ;;  %v3670_v2 = vsel %vm24568_vm13, %v3668_v46, %v3669_v1  ;;  %v29178_v46 = vld [vmem:[#allocation18_spill] sm:$0xff]  ;;  %v24720_v1 = vcombine.low %v3688_v8, %v3691_v22  ;;  %v23270_v22 = vld [vmem:[%s23735_s23 + $0xd0] sm:$0xff]  }
 0x2bd   : > { %20514 = vmatprep.subr.bf16.mxu1 %v23240_v36  ;;  %v24689_v52 = vcombine.low %v3667_v0, %v3670_v2  ;;  %v3701_v16 = vrot.slane %v29178_v46, 5  ;;  %v23250_v0 = vld [vmem:[%s29000_s3 + $0x230] sm:$0xff]   ;;  %v23281_v46 = vld [vmem:[%s29002_s5 + $0x28] sm:$0xff]  }
 0x2be   : > { %20611 = vmatpush3.bf16.msra.mxu0 %v23280_v58  ;;  %v23274_v8 = vld [vmem:[%s23735_s23 + $0xf0] sm:$0xff]  }
 0x2bf   : > { %20483 = vmatmul.mubr.bf16.gmra.mrb[8].mxu1 %v24637_v5  ;;  %20612 = vmatprep.subr.bf16.mxu0 %v23281_v46 }
 0x2c0   : > { %20486 = vmatprep.mubr.bf16.mxu1 %v24644_v37  ;;  %20515 = vmatpush3.bf16.msra.mxu1 %v23240_v36  ;;  %v3675_v36 = vrot.slane %v3673_v49, 4 }
 0x2c1   : > { %20516 = vmatprep.subr.bf16.mxu1 %v23241_v54 }
 0x2c2   : > { %20613 = vmatpush3.bf16.msra.mxu0 %v23281_v46  ;;  %v5494_v46 = vld [vmem:[#allocation2 + $0x20] sm:$0x1] }
 0x2c4   : > { %20517 = vmatpush3.bf16.msra.mxu1 %v23241_v54  ;;  %v3677_v54 = vsel %vm24568_vm13, %v3675_v36, %v3676_v39  ;;  %v23251_v36 = vld [vmem:[%s29000_s3 + $0x238] sm:$0xff]   ;;  %v3541_v39 = vld [vmem:[#allocation2 + $0xc0] sm:$0xe] }
 0x2c5   : > { %20518 = vmatprep.subr.bf16.mxu1 %v23242_v32  ;;  %v18053_v45 = vrot.slane %v3541_v39, 9 }
 0x2c7   : > { %20487 = vmatmul.mubr.bf16.gmra.mrb[12].mxu1 %v24661_v51 }
 0x2c8   : > { %20490 = vmatprep.mubr.bf16.mxu1 %v24668_v25  ;;  %20519 = vmatpush3.bf16.msra.mxu1 %v23242_v32  ;;  %v3674_v32 = vsel %vm24568_vm13, %v18008_v10, %v3673_v49  ;;  %v18012_v49 = vrot.slane %v3540_v3, 9  ;;  %v4034_v10 = vsel %vm24568_vm13, %v18053_v45, %v4033_v15  ;;  %v24865_v3 = vld [vmem:[%s29002_s5 + $0x40] sm:$0xff]  }
 0x2c9   : > { %20520 = vmatprep.subr.bf16.mxu1 %v23243_v40  ;;  %v24703_v34 = vcombine.low %v3674_v32, %v3677_v54  ;;  %v18070_v54 = vcombine.low %v4034_v10, %v4037_v11 }
 0x2ca   : > { %v3702_v2 = vsel %vm24568_vm13, %v18012_v49, %v3701_v16 }
 0x2cc   : > { %20521 = vmatpush3.bf16.msra.mxu1 %v23243_v40  ;;  %v3697_v40 = vrot.slane %v24415_v61, 5  ;;  %v3703_v61 = vrot.slane %v3701_v16, 4  ;;  %v23271_v16 = vld [vmem:[%s23735_s23 + $0xd8] sm:$0xff]  }
 0x2cd   : > { %20554 = vmatprep.subr.bf16.mxu1 %v23244_v21 }
 0x2ce   : > { %v3698_v17 = vsel %vm24568_vm13, %v3696_v62, %v3697_v40  ;;  %v3705_v50 = vsel %vm24568_vm13, %v3703_v61, %v3704_v31  ;;  %v23265_v62 = vld [vmem:[%s23735_s23 + $0xa8] sm:$0xff]   ;;  %v23268_v40 = vld [vmem:[%s23735_s23 + $0xc0] sm:$0xff]  }
 0x2cf   : > { %20491 = vmatmul.mubr.bf16.gmra.mrb[16].mxu1 %v24685_v20  ;;  %v24724_v33 = vcombine.low %v3695_v44, %v3698_v17  ;;  %v24733_v38 = vcombine.low %v3702_v2, %v3705_v50  ;;  %v23273_v17 = vld [vmem:[%s23735_s23 + $0xe8] sm:$0xff]   ;;  %v23275_v44 = vld [vmem:[%s23735_s23 + $0xf8] sm:$0xff]   ;;  %v23284_v61 = vld [vmem:[#allocation2] sm:$0xff]  }
 0x2d0   : > { %20494 = vmatprep.mubr.bf16.mxu1 %v24689_v52  ;;  %20618 = vmatprep.mubr.bf16.mxu0 %v23284_v61  ;;  %v24871_v31 = vld [vmem:[%s29001_s4] ss:$0 sm:$0xff]  ;;  %v24896_v61 = vld [vmem:[#allocation2 + $0x10] sm:$0xf] }
 0x2d1   : > { %29186 = vst [vmem:[#allocation15_spill] sm:$0xff] %v24896_v61 }
 0x2d7   : > { %20495 = vmatmul.mubr.bf16.gmra.mrb[20].mxu1 %v24703_v34 }
 0x2d8   : > { %20498 = vmatprep.mubr.bf16.mxu1 %v24707_v12 }
 0x2df   : > { %20499 = vmatmul.mubr.bf16.gmra.mrb[24].mxu1 %v24720_v1 }
 0x2e0   : > { %20502 = vmatprep.mubr.bf16.mxu1 %v24724_v33 }
 0x2e7   : > { %20503 = vmatmul.mubr.bf16.gmra.mrb[28].mxu1 %v24733_v38 }
 0x2e8   : > { %20522 = vmatprep.mubr.bf16.mxu1 %v24588_v26  ;;  %v23247_v26 = vld [vmem:[%s29000_s3 + $0x218] sm:$0xff]  }
 0x2ef   : > { %20523 = vmatmul.mubr.bf16.vlgmr.msra.gmra.mrb[0].mxu1 %v24595_v28 }
 0x2f0   : > { %20555 = vmatpush3.bf16.msra.mxu1 %v23244_v21  ;;  %20526 = vmatprep.mubr.bf16.mxu1 %v24613_v7  ;;  %v23248_v21 = vld [vmem:[%s29000_s3 + $0x220] sm:$0xff]  }
 0x2f1   : > { %20556 = vmatprep.subr.bf16.mxu1 %v23245_v24 }
 0x2f4   : > { %20557 = vmatpush3.bf16.msra.mxu1 %v23245_v24 }
 0x2f5   : > { %20558 = vmatprep.subr.bf16.mxu1 %v23246_v19 }
 0x2f7   : > { %20527 = vmatmul.mubr.bf16.gmra.mrb[4].mxu1 %v24620_v41 }
 0x2f8   : > { %20530 = vmatprep.mubr.bf16.mxu1 %v24637_v5  ;;  %20559 = vmatpush3.bf16.msra.mxu1 %v23246_v19 }
 0x2f9   : > { %20560 = vmatprep.subr.bf16.mxu1 %v23247_v26 }
 0x2fc   : > { %20561 = vmatpush3.bf16.msra.mxu1 %v23247_v26 }
 0x2fd   : > { %20562 = vmatprep.subr.bf16.mxu1 %v23248_v21 }
 0x2ff   : > { %20531 = vmatmul.mubr.bf16.gmra.mrb[8].mxu1 %v24644_v37 }
 0x300   : > { %20534 = vmatprep.mubr.bf16.mxu1 %v24661_v51  ;;  %20563 = vmatpush3.bf16.msra.mxu1 %v23248_v21 }
 0x301   : > { %20564 = vmatprep.subr.bf16.mxu1 %v23249_v6 }
 0x304   : > { %20565 = vmatpush3.bf16.msra.mxu1 %v23249_v6 }
 0x305   : > { %20566 = vmatprep.subr.bf16.mxu1 %v23250_v0 }
 0x307   : > { %20535 = vmatmul.mubr.bf16.gmra.mrb[12].mxu1 %v24668_v25 }
 0x308   : > { %20538 = vmatprep.mubr.bf16.mxu1 %v24685_v20  ;;  %20567 = vmatpush3.bf16.msra.mxu1 %v23250_v0 }
 0x309   : > { %20568 = vmatprep.subr.bf16.mxu1 %v23251_v36 }
 0x30c   : > { %20569 = vmatpush3.bf16.msra.mxu1 %v23251_v36 }
 0x30d   : > { %21034 = vmatprep.subr.bf16.mxu1 %v23252_v60 }
 0x30f   : > { %20539 = vmatmul.mubr.bf16.gmra.mrb[16].mxu1 %v24689_v52 }
 0x310   : > { %20542 = vmatprep.mubr.bf16.mxu1 %v24703_v34 }
 0x317   : > { %20543 = vmatmul.mubr.bf16.gmra.mrb[20].mxu1 %v24707_v12 }
 0x318   : > { %20546 = vmatprep.mubr.bf16.mxu1 %v24720_v1 }
 0x31f   : > { %20547 = vmatmul.mubr.bf16.gmra.mrb[24].mxu1 %v24724_v33 }
 0x320   : > { %20550 = vmatprep.mubr.bf16.mxu1 %v24733_v38 }
 0x327   : > { %20551 = vmatmul.mubr.bf16.gmra.mrb[28].mxu1 %v18070_v54 }
 0x328   : > { %20570 = vmatprep.mubr.bf16.mxu1 %v24595_v28  ;;  %v23254_v28 = vld [vmem:[%s28998_s1 + $0x10] sm:$0xff]  }
 0x32f   : > { %20571 = vmatmul.mubr.bf16.vlgmr.msra.gmra.mrb[0].mxu1 %v24613_v7  ;;  %v23255_v7 = vld [vmem:[%s28998_s1 + $0x18] sm:$0xff]  }
 0x330   : > { %20574 = vmatprep.mubr.bf16.mxu1 %v24620_v41  ;;  %21035 = vmatpush3.bf16.msra.mxu1 %v23252_v60  ;;  %v23256_v41 = vld [vmem:[%s28998_s1 + $0x20] sm:$0xff]  }
 0x331   : > { %21036 = vmatprep.subr.bf16.mxu1 %v23253_v4 }
 0x334   : > { %21037 = vmatpush3.bf16.msra.mxu1 %v23253_v4 }
 0x335   : > { %21038 = vmatprep.subr.bf16.mxu1 %v23254_v28 }
 0x337   : > { %20575 = vmatmul.mubr.bf16.gmra.mrb[4].mxu1 %v24637_v5  ;;  %v23258_v5 = vld [vmem:[%s28998_s1 + $0x30] sm:$0xff]  }
 0x338   : > { %20578 = vmatprep.mubr.bf16.mxu1 %v24644_v37  ;;  %21039 = vmatpush3.bf16.msra.mxu1 %v23254_v28  ;;  %v23259_v37 = vld [vmem:[%s28998_s1 + $0x38] sm:$0xff]  }
 0x339   : > { %21040 = vmatprep.subr.bf16.mxu1 %v23255_v7 }
 0x33c   : > { %21041 = vmatpush3.bf16.msra.mxu1 %v23255_v7 }
 0x33d   : > { %21042 = vmatprep.subr.bf16.mxu1 %v23256_v41 }
 0x33f   : > { %20579 = vmatmul.mubr.bf16.gmra.mrb[8].mxu1 %v24661_v51  ;;  %v4305_v51 = vrot.slane %v24548_v29, 5  ;;  %v23260_v29 = vld [vmem:[%s23735_s23 + $0x80] sm:$0xff]  }
 0x340   : > { %20582 = vmatprep.mubr.bf16.mxu1 %v24668_v25  ;;  %21043 = vmatpush3.bf16.msra.mxu1 %v23256_v41  ;;  %v3542_v25 = vld [vmem:[#allocation2 + $0xcc] sm:$0xe] }
 0x341   : > { %21044 = vmatprep.subr.bf16.mxu1 %v23257_v63 }
 0x344   : > { %21045 = vmatpush3.bf16.msra.mxu1 %v23257_v63 }
 0x345   : > { %21046 = vmatprep.subr.bf16.mxu1 %v23258_v5 }
 0x347   : > { %20583 = vmatmul.mubr.bf16.gmra.mrb[12].mxu1 %v24685_v20  ;;  %v18079_v20 = vrot.slane %v3542_v25, 9 }
 0x348   : > { %20586 = vmatprep.mubr.bf16.mxu1 %v24689_v52  ;;  %21047 = vmatpush3.bf16.msra.mxu1 %v23258_v5  ;;  %v4307_v52 = vrot.slane %v4305_v51, 4 }
 0x349   : > { %21048 = vmatprep.subr.bf16.mxu1 %v23259_v37  ;;  %v4306_v32 = vsel %vm24568_vm13, %v18079_v20, %v4305_v51 }
 0x34c   : > { %21049 = vmatpush3.bf16.msra.mxu1 %v23259_v37  ;;  %v24879_v37 = vld [vmem:[#allocation2 + $0x18] sm:$0xf] }
 0x34d   : > { %29179 = vst [vmem:[#allocation10_spill] sm:$0xff] %v24879_v37 }
 0x34f   : > { %20587 = vmatmul.mubr.bf16.gmra.mrb[16].mxu1 %v24703_v34  ;;  %v4309_v34 = vsel %vm24568_vm13, %v4307_v52, %v4308_v56 }
 0x350   : > { %20590 = vmatprep.mubr.bf16.mxu1 %v24707_v12  ;;  %v18096_v35 = vcombine.low %v4306_v32, %v4309_v34  ;;  %v23261_v12 = vld [vmem:[%s23735_s23 + $0x88] sm:$0xff]   ;;  %v5490_v32 = vld [vmem:[#allocation2 + $0x18] sm:$0xf]  ;;  %s17695_s23 = scalar_lea.sflag [#allocation4], %s272_s14 }
 0x357   : > { %20591 = vmatmul.mubr.bf16.gmra.mrb[20].mxu1 %v24720_v1  ;;  %v23282_v1 = vld [vmem:[%s29002_s5 + $0x30] sm:$0xff]  }
 0x358   : > { %20594 = vmatprep.mubr.bf16.mxu1 %v24724_v33  ;;  %20614 = vmatprep.subr.bf16.mxu0 %v23282_v1  ;;  %v23283_v33 = vld [vmem:[%s29002_s5 + $0x38] sm:$0xff]  }
 0x359   : > { %20615 = vmatpush3.bf16.msra.mxu0 %v23282_v1 }
 0x35a   : > { %20616 = vmatprep.subr.bf16.mxu0 %v23283_v33 }
 0x35d   : > { %20617 = vmatpush3.bf16.msra.mxu0 %v23283_v33 }
 0x35e   : > { %20650 = vmatprep.subr.bf16.mxu0 %v24865_v3 }
 0x35f   : > { %20595 = vmatmul.mubr.bf16.gmra.mrb[24].mxu1 %v24733_v38 }
 0x360   : > { %20598 = vmatprep.mubr.bf16.mxu1 %v18070_v54 }
 0x367   : > { %20599 = vmatmul.mubr.bf16.gmra.mrb[28].mxu1 %v18096_v35 }
 0x368   : > { %21050 = vmatprep.mubr.bf16.mxu1 %v23260_v29 }
 0x36f   : > { %21051 = vmatmul.mubr.bf16.vlgmr.msra.gmra.mrb[32].mxu1 %v23261_v12 }
 0x370   : > { %21054 = vmatprep.mubr.bf16.mxu1 %v23262_v30 }
 0x377   : > { %21055 = vmatmul.mubr.bf16.gmra.mrb[36].mxu1 %v23263_v43 }
 0x378   : > { %21058 = vmatprep.mubr.bf16.mxu1 %v23264_v48  ;;  %v24883_v48 = vld [vmem:[#allocation2 + $0xc] sm:$0xf] }
 0x379   : > { %29181 = vst [vmem:[#allocation13_spill] sm:$0xff] %v24883_v48 }
 0x37f   : > { %21059 = vmatmul.mubr.bf16.gmra.mrb[40].mxu1 %v23265_v62  ;;  %v24885_v62 = vld [vmem:[#allocation2 + $0x1c] sm:$0xf] }
 0x380   : > { %21062 = vmatprep.mubr.bf16.mxu1 %v23266_v13  ;;  %29182 = vst [vmem:[#allocation11_spill] sm:$0xff] %v24885_v62 }
 0x387   : > { %21063 = vmatmul.mubr.bf16.gmra.mrb[44].mxu1 %v23267_v47 }
 0x388   : > { %21066 = vmatprep.mubr.bf16.mxu1 %v23268_v40 }
 0x38f   : > { %21067 = vmatmul.mubr.bf16.gmra.mrb[48].mxu1 %v23269_v59 }
 0x390   : > { %21070 = vmatprep.mubr.bf16.mxu1 %v23270_v22  ;;  %v24890_v22 = vld [vmem:[#allocation2 + $0x20] sm:$0x1] }
 0x391   : > { %29183 = vst [vmem:[#allocation12_spill] sm:$0xff] %v24890_v22 }
 0x397   : > { %21071 = vmatmul.mubr.bf16.gmra.mrb[52].mxu1 %v23271_v16 }
 0x398   : > { %21074 = vmatprep.mubr.bf16.mxu1 %v23272_v55 }
 0x39f   : > { %21075 = vmatmul.mubr.bf16.gmra.mrb[56].mxu1 %v23273_v17 }
 0x3a0   : > { %21078 = vmatprep.mubr.bf16.mxu1 %v23274_v8 }
 0x3a7   : > { %21079 = vmatmul.mubr.bf16.gmra.mrb[60].mxu1 %v23275_v44 }
 0x402   : > { %v20572_v49 = vpop.f32.mrb[0].mxu1 }
 0x403   : > { %v21946_v50 = vadd.f32 %v20572_v49, %v24871_v31  ;;  %v4413_v2 = vpop.f32.mrb[1].mxu1  ;;  %v5487_v49 = vld [vmem:[#allocation2 + $0x14] sm:$0x1] }
 0x404   : > { %v21947_v38 = vadd.f32 %v24871_v31, %v4413_v2  ;;  %v20573_v24 = vpop.f32.mrb[2].mxu1  ;;  %v24898_v2 = vld [vmem:[#allocation2 + $0x14] sm:$0x1] }
 0x405   : > { %v4574_v19 = vmax.f32 %v21946_v50, 0.0  ;;  %v21948_v26 = vadd.f32 %v20573_v24, %v24871_v31  ;;  %v4416_v21 = vpop.f32.mrb[3].mxu1  ;;  %29187 = vst [vmem:[#allocation17_spill] sm:$0xff] %v24898_v2 }
 0x406   : > { %v4572_v6 = vmax.f32 %v21947_v38, 0.0  ;;  %v21949_v0 = vadd.f32 %v24871_v31, %v4416_v21 }
 0x407   : > { %v19116_v36 = vpack.c.bf16 %v4574_v19, %v4574_v19  ;;  %v4575_v60 = vmax.f32 %v21948_v26, 0.0 }
 0x408   : > { %v19114_v15 = vpack.c.bf16 %v4572_v6, %v4572_v6  ;;  %v4573_v42 = vmax.f32 %v21949_v0, 0.0 }
 0x409   : > { %v5182_v39 = vshrl.u32 %v19116_v36, 16  ;;  %v19117_v27 = vpack.c.bf16 %v4575_v60, %v4575_v60  ;;  %v5185_v45 = vshll.u32 %v19116_v36, 16 }
 0x40a   : > { %v5165_v11 = vshrl.u32 %v19114_v15, 16  ;;  %v5168_v10 = vshll.u32 %v19114_v15, 16  ;;  %v19115_v54 = vpack.c.bf16 %v4573_v42, %v4573_v42  ;;  %v20576_v23 = vpop.f32.mrb[4].mxu1 }
 0x40b   : > { %v5184_v53 = vrot.slane %v5182_v39, 7  ;;  %v5190_v57 = vshrl.u32 %v19117_v27, 16  ;;  %v5193_v4 = vshll.u32 %v19117_v27, 16  ;;  %v21950_v18 = vadd.f32 %v20576_v23, %v24871_v31  ;;  %v4429_v28 = vpop.f32.mrb[5].mxu1 }
 0x40c   : > { %v5167_v58 = vrot.slane %v5165_v11, 7  ;;  %v5173_v7 = vshrl.u32 %v19115_v54, 16  ;;  %v5176_v41 = vshll.u32 %v19115_v54, 16  ;;  %v21951_v63 = vadd.f32 %v24871_v31, %v4429_v28  ;;  %v20577_v5 = vpop.f32.mrb[6].mxu1 }
 0x40d   : > { %v5187_v51 = vor.u32 %v5185_v45, %v5184_v53  ;;  %v5188_v25 = vrot.slane %v5184_v53, 4  ;;  %v5192_v20 = vrot.slane %v5190_v57, 7  ;;  %v4578_v52 = vmax.f32 %v21950_v18, 0.0  ;;  %v4432_v56 = vpop.f32.mrb[7].mxu1  ;;  %v5504_v57 = vld [vmem:[#allocation2 + $0x30] sm:$0xf] }
 0x40e   : > { %v5170_v34 = vor.u32 %v5168_v10, %v5167_v58  ;;  %v5171_v35 = vrot.slane %v5167_v58, 4  ;;  %v5175_v29 = vrot.slane %v5173_v7, 7  ;;  %v4576_v12 = vmax.f32 %v21951_v63, 0.0  ;;  %v24916_v7 = vld [vmem:[#allocation2 + $0x30] sm:$0xf] }
 0x40f   : > { %v5491_v43 = vsel %vm23811_vm5, %v5187_v51, %v5490_v32  ;;  %v5195_v13 = vor.u32 %v5193_v4, %v5192_v20  ;;  %v5197_v47 = vrot.slane %v5192_v20, 4  ;;  %v19120_v40 = vpack.c.bf16 %v4578_v52, %v4578_v52  ;;  %29188 = vst [vmem:[#allocation14_spill] sm:$0xff] %v24916_v7  ;;  %v5497_v63 = vld [vmem:[#allocation2 + $0x24] sm:$0xf] }
 0x410   : > { %5492 = vst [vmem:[#allocation2 + $0x18] sm:$0xf] %v5491_v43  ;;  %v5484_v59 = vsel %vm23811_vm5, %v5170_v34, %v24883_v48  ;;  %v5178_v16 = vor.u32 %v5176_v41, %v5175_v29  ;;  %v5180_v55 = vrot.slane %v5175_v29, 4  ;;  %v19118_v17 = vpack.c.bf16 %v4576_v12, %v4576_v12  ;;  %v24923_v20 = vld [vmem:[#allocation2 + $0x24] sm:$0xf] }
 0x411   : > { %5485 = vst [vmem:[#allocation2 + $0xc] sm:$0xf] %v5484_v59  ;;  %v5196_v1 = vsel %vm23818_vm6, %v5188_v25, %v5195_v13  ;;  %v5495_v33 = vsel %vm23824_vm7, %v5197_v47, %v5494_v46  ;;  %v5216_v50 = vshrl.u32 %v19120_v40, 16  ;;  %v5219_v19 = vshll.u32 %v19120_v40, 16  ;;  %29189 = vst [vmem:[#allocation16_spill] sm:$0xff] %v24923_v20 }
 0x412   : > { %5493 = vst [vmem:[#allocation2 + $0x1c] sm:$0xf] %v5196_v1  ;;  %5496 = vst [vmem:[#allocation2 + $0x20] sm:$0x1] %v5495_v33  ;;  %v5179_v38 = vsel %vm23818_vm6, %v5171_v35, %v5178_v16  ;;  %v5488_v24 = vsel %vm23824_vm7, %v5180_v55, %v5487_v49  ;;  %v5199_v26 = vshrl.u32 %v19118_v17, 16  ;;  %v20580_v21 = vpop.f32.mrb[8].mxu1  ;;  %v21952_v0 = vadd.f32 %v20577_v5, %v24871_v31 }
 0x413   : > { %5486 = vst [vmem:[#allocation2 + $0x10] sm:$0xf] %v5179_v38  ;;  %5489 = vst [vmem:[#allocation2 + $0x14] sm:$0x1] %v5488_v24  ;;  %v24904_v6 = vrot.slane %v5216_v50, 7  ;;  %v21953_v36 = vadd.f32 %v24871_v31, %v4432_v56  ;;  %v21954_v60 = vadd.f32 %v20580_v21, %v24871_v31  ;;  %v4445_v15 = vpop.f32.mrb[9].mxu1 }
 0x414   : > { %v24909_v42 = vrot.slane %v5199_v26, 7  ;;  %v5202_v39 = vshll.u32 %v19118_v17, 16  ;;  %v21955_v27 = vadd.f32 %v24871_v31, %v4445_v15  ;;  %v20581_v45 = vpop.f32.mrb[10].mxu1  ;;  %v4579_v54 = vmax.f32 %v21952_v0, 0.0  ;;  %v24931_v35 = vld [vmem:[%s29002_s5 + $0x48] sm:$0xff]  }
 0x415   : > { %v5221_v11 = vor.u32 %v5219_v19, %v24904_v6  ;;  %v5222_v10 = vrot.slane %v24904_v6, 4  ;;  %v4577_v23 = vmax.f32 %v21953_v36, 0.0  ;;  %v4448_v53 = vpop.f32.mrb[11].mxu1  ;;  %v4582_v28 = vmax.f32 %v21954_v60, 0.0  ;;  %v5508_v24 = vld [vmem:[#allocation2 + $0x38] sm:$0x1] }
 0x416   : > { %v5204_v4 = vor.u32 %v5202_v39, %v24909_v42  ;;  %v5205_v18 = vrot.slane %v24909_v42, 4  ;;  %v4580_v58 = vmax.f32 %v21955_v27, 0.0  ;;  %v19121_v5 = vpack.c.bf16 %v4579_v54, %v4579_v54  ;;  %v24945_v60 = vld [vmem:[#allocation2 + $0x34] sm:$0xf]  ;;  %v24947_v15 = vld [vmem:[#allocation2 + $0x38] sm:$0x1] }
 0x417   : > { %v5505_v41 = vsel %vm23811_vm5, %v5221_v11, %v5504_v57  ;;  %v19119_v51 = vpack.c.bf16 %v4577_v23, %v4577_v23  ;;  %v24921_v25 = vadd.f32 %v20581_v45, %v24871_v31  ;;  %v19124_v56 = vpack.c.bf16 %v4582_v28, %v4582_v28  ;;  %29190 = vst [vmem:[#allocation18_spill] sm:$0xff] %v24945_v60  ;;  %v24949_v27 = vld [vmem:[#allocation2 + $0x28] sm:$0xf]  ;;  %v24951_v45 = vld [vmem:[#allocation2 + $0x2c] sm:$0x1] }
 0x418   : > { %5506 = vst [vmem:[#allocation2 + $0x30] sm:$0xf] %v5505_v41  ;;  %v5498_v52 = vsel %vm23811_vm5, %v5204_v4, %v5497_v63  ;;  %v19122_v32 = vpack.c.bf16 %v4580_v58, %v4580_v58  ;;  %v21957_v34 = vadd.f32 %v24871_v31, %v4448_v53  ;;  %v5224_v29 = vshrl.u32 %v19121_v5, 16  ;;  %29191 = vst [vmem:[#allocation20_spill] sm:$0xff] %v24947_v15  ;;  %v5501_v53 = vld [vmem:[#allocation2 + $0x2c] sm:$0x1] }
 0x419   : > { %5499 = vst [vmem:[#allocation2 + $0x24] sm:$0xf] %v5498_v52  ;;  %v5227_v12 = vshll.u32 %v19121_v5, 16  ;;  %v5207_v43 = vshrl.u32 %v19119_v51, 16  ;;  %v5210_v13 = vshll.u32 %v19119_v51, 16  ;;  %v5250_v47 = vshrl.u32 %v19124_v56, 16 }
 0x41a   : > { %v5253_v40 = vshll.u32 %v19124_v56, 16  ;;  %v5233_v59 = vshrl.u32 %v19122_v32, 16  ;;  %v5236_v46 = vshll.u32 %v19122_v32, 16  ;;  %v20584_v16 = vpop.f32.mrb[12].mxu1  ;;  %v24933_v55 = vld [vmem:[#allocation2 + $0xc] sm:$0xff]   ;;  %v5226_v17 = vrot.slane %v5224_v29, 7 }
 0x41b   : > { %v5209_v1 = vrot.slane %v5207_v43, 7  ;;  %v4583_v33 = vmax.f32 %v24921_v25, 0.0  ;;  %v4581_v49 = vmax.f32 %v21957_v34, 0.0  ;;  %v4461_v50 = vpop.f32.mrb[13].mxu1  ;;  %v24936_v38 = vld [vmem:[#allocation2 + $0x18] sm:$0xff]   ;;  %v24938_v19 = vrot.slane %v5250_v47, 7  ;;  %20619 = vmatmul.mubr.bf16.vlgmr.msra.gmra.mrb[32].mxu0 %v24933_v55 }
 0x41c   : > { %v24940_v26 = vrot.slane %v5233_v59, 7  ;;  %v21958_v21 = vadd.f32 %v20584_v16, %v24871_v31  ;;  %v21959_v0 = vadd.f32 %v24871_v31, %v4461_v50  ;;  %v20585_v36 = vpop.f32.mrb[14].mxu1  ;;  %v5229_v42 = vor.u32 %v5227_v12, %v5226_v17  ;;  %29192 = vst [vmem:[#allocation21_spill] sm:$0xff] %v24949_v27  ;;  %29193 = vst [vmem:[#allocation22_spill] sm:$0xff] %v24951_v45  ;;  %v23291_v41 = vld [vmem:[%s29002_s5 + $0x50] sm:$0xff]  }
 0x41d   : > { %v5231_v39 = vrot.slane %v5226_v17, 4  ;;  %v5212_v11 = vor.u32 %v5210_v13, %v5209_v1  ;;  %v5214_v54 = vrot.slane %v5209_v1, 4  ;;  %v4464_v23 = vpop.f32.mrb[15].mxu1  ;;  %20651 = vmatpush3.bf16.msra.mxu0 %v24865_v3  ;;  %20622 = vmatprep.mubr.bf16.mxu0 %v24936_v38  ;;  %v5255_v57 = vor.u32 %v5253_v40, %v24938_v19  ;;  %v5518_v25 = vld [vmem:[#allocation2 + $0x48] sm:$0xf]  ;;  %v23294_v17 = vld [vmem:[%s29002_s5 + $0x58] sm:$0xff]  }
 0x41e   : > { %v5256_v4 = vrot.slane %v24938_v19, 4  ;;  %v5238_v28 = vor.u32 %v5236_v46, %v24940_v26  ;;  %v5239_v58 = vrot.slane %v24940_v26, 4  ;;  %20652 = vmatprep.subr.bf16.mxu0 %v24931_v35  ;;  %v5230_v3 = vsel %vm23818_vm6, %v5222_v10, %v5229_v42  ;;  %v5511_v52 = vld [vmem:[#allocation2 + $0x3c] sm:$0xf]  ;;  %v24973_v56 = vld [vmem:[#allocation2 + $0x48] sm:$0xf] }
 0x41f   : > { %v5509_v63 = vsel %vm23824_vm7, %v5231_v39, %v5508_v24  ;;  %v5213_v5 = vsel %vm23818_vm6, %v5205_v18, %v5212_v11  ;;  %v5502_v51 = vsel %vm23824_vm7, %v5214_v54, %v5501_v53  ;;  %5507 = vst [vmem:[#allocation2 + $0x34] sm:$0xf] %v5230_v3  ;;  %29194 = vst [vmem:[#allocation23_spill] sm:$0xff] %v24973_v56  ;;  %v24977_v10 = vld [vmem:[#allocation2 + $0x3c] sm:$0xf]  ;;  %v4586_v29 = vmax.f32 %v21958_v21, 0.0 }
 0x420   : > { %5510 = vst [vmem:[#allocation2 + $0x38] sm:$0x1] %v5509_v63  ;;  %5500 = vst [vmem:[#allocation2 + $0x28] sm:$0xf] %v5213_v5  ;;  %v5519_v6 = vsel %vm23811_vm5, %v5255_v57, %v5518_v25  ;;  %v5512_v32 = vsel %vm23811_vm5, %v5238_v28, %v5511_v52  ;;  %v19125_v18 = vpack.c.bf16 %v4583_v33, %v4583_v33  ;;  %v4584_v12 = vmax.f32 %v21959_v0, 0.0 }
 0x421   : > { %5503 = vst [vmem:[#allocation2 + $0x2c] sm:$0x1] %v5502_v51  ;;  %29195 = vst [vmem:[#allocation24_spill] sm:$0xff] %v24977_v10  ;;  %v19123_v34 = vpack.c.bf16 %v4581_v49, %v4581_v49  ;;  %v21960_v43 = vadd.f32 %v20585_v36, %v24871_v31  ;;  %v21961_v13 = vadd.f32 %v24871_v31, %v4464_v23  ;;  %20653 = vmatpush3.bf16.msra.mxu0 %v24931_v35  ;;  %v5522_v39 = vld [vmem:[#allocation2 + $0x50] sm:$0x1] }
 0x422   : > { %5520 = vst [vmem:[#allocation2 + $0x48] sm:$0xf] %v5519_v6  ;;  %5513 = vst [vmem:[#allocation2 + $0x3c] sm:$0xf] %v5512_v32  ;;  %v5258_v47 = vshrl.u32 %v19125_v18, 16  ;;  %v5261_v40 = vshll.u32 %v19125_v18, 16  ;;  %20654 = vmatprep.subr.bf16.mxu0 %v23291_v41  ;;  %v19128_v1 = vpack.c.bf16 %v4586_v29, %v4586_v29  ;;  %v19126_v33 = vpack.c.bf16 %v4584_v12, %v4584_v12 }
 0x423   : > { %v5241_v59 = vshrl.u32 %v19123_v34, 16  ;;  %v5244_v46 = vshll.u32 %v19123_v34, 16  ;;  %v20588_v16 = vpop.f32.mrb[16].mxu1  ;;  %v4587_v49 = vmax.f32 %v21960_v43, 0.0  ;;  %v4585_v50 = vmax.f32 %v21961_v13, 0.0  ;;  %v23297_v18 = vld [vmem:[%s29002_s5 + $0x60] sm:$0xff]  }
 0x424   : > { %v4477_v24 = vpop.f32.mrb[17].mxu1  ;;  %v5260_v21 = vrot.slane %v5258_v47, 7  ;;  %v24988_v36 = vadd.f32 %v20588_v16, %v24871_v31  ;;  %v5284_v11 = vshrl.u32 %v19128_v1, 16  ;;  %v5287_v54 = vshll.u32 %v19128_v1, 16  ;;  %v24993_v28 = vld [vmem:[#allocation2 + $0x4c] sm:$0xf] }
 0x425   : > { %v5243_v0 = vrot.slane %v5241_v59, 7  ;;  %v24991_v35 = vadd.f32 %v24871_v31, %v4477_v24  ;;  %v20589_v42 = vpop.f32.mrb[18].mxu1  ;;  %v5267_v23 = vshrl.u32 %v19126_v33, 16  ;;  %v5270_v53 = vshll.u32 %v19126_v33, 16  ;;  %20655 = vmatpush3.bf16.msra.mxu0 %v23291_v41  ;;  %29196 = vst [vmem:[#allocation25_spill] sm:$0xff] %v24993_v28 }
 0x426   : > { %v4480_v57 = vpop.f32.mrb[19].mxu1  ;;  %v24995_v3 = vld [vmem:[#allocation2 + $0x50] sm:$0x1]  ;;  %v5263_v63 = vor.u32 %v5261_v40, %v5260_v21  ;;  %v5265_v5 = vrot.slane %v5260_v21, 4  ;;  %v24997_v51 = vld [vmem:[#allocation2 + $0x40] sm:$0xf]  ;;  %20656 = vmatprep.subr.bf16.mxu0 %v23294_v17  ;;  %v19129_v29 = vpack.c.bf16 %v4587_v49, %v4587_v49  ;;  %v19127_v12 = vpack.c.bf16 %v4585_v50, %v4585_v50 }
 0x427   : > { %29197 = vst [vmem:[#allocation26_spill] sm:$0xff] %v24995_v3  ;;  %29198 = vst [vmem:[#allocation27_spill] sm:$0xff] %v24997_v51  ;;  %v24999_v25 = vld [vmem:[#allocation2 + $0x44] sm:$0x1]  ;;  %v5246_v52 = vor.u32 %v5244_v46, %v5243_v0  ;;  %v5248_v6 = vrot.slane %v5243_v0, 4  ;;  %v25004_v34 = vrot.slane %v5284_v11, 7 }
 0x428   : > { %29199 = vst [vmem:[#allocation28_spill] sm:$0xff] %v24999_v25  ;;  %v5515_v32 = vld [vmem:[#allocation2 + $0x44] sm:$0x1]  ;;  %v25006_v41 = vrot.slane %v5267_v23, 7  ;;  %v25010_v13 = vld [vmem:[#allocation2 + $0x30] sm:$0xff]   ;;  %v5264_v47 = vsel %vm23818_vm6, %v5256_v4, %v5263_v63  ;;  %v5523_v40 = vsel %vm23824_vm7, %v5265_v5, %v5522_v39  ;;  %v5295_v50 = vshll.u32 %v19129_v29, 16 }
 0x429   : > { %v25008_v43 = vld [vmem:[#allocation2 + $0x24] sm:$0xff]   ;;  %v5247_v59 = vsel %vm23818_vm6, %v5239_v58, %v5246_v52  ;;  %v5516_v46 = vsel %vm23824_vm7, %v5248_v6, %v5515_v32  ;;  %5521 = vst [vmem:[#allocation2 + $0x4c] sm:$0xf] %v5264_v47  ;;  %5524 = vst [vmem:[#allocation2 + $0x50] sm:$0x1] %v5523_v40  ;;  %v5289_v19 = vor.u32 %v5287_v54, %v25004_v34  ;;  %v5290_v4 = vrot.slane %v25004_v34, 4 }
 0x42a   : > { %5514 = vst [vmem:[#allocation2 + $0x40] sm:$0xf] %v5247_v59  ;;  %5517 = vst [vmem:[#allocation2 + $0x44] sm:$0x1] %v5516_v46  ;;  %v25024_v16 = vld [vmem:[#allocation2 + $0x60] sm:$0xf]  ;;  %v5272_v33 = vor.u32 %v5270_v53, %v25006_v41  ;;  %20623 = vmatmul.mubr.bf16.gmra.mrb[36].mxu0 %v25008_v43  ;;  %v21964_v6 = vadd.f32 %v20589_v42, %v24871_v31  ;;  %v21965_v32 = vadd.f32 %v24871_v31, %v4480_v57 }
 0x42b   : > { %29200 = vst [vmem:[#allocation29_spill] sm:$0xff] %v25024_v16  ;;  %v5532_v1 = vld [vmem:[#allocation2 + $0x60] sm:$0xf]  ;;  %v5273_v26 = vrot.slane %v25006_v41, 4  ;;  %v5525_v49 = vld [vmem:[#allocation2 + $0x54] sm:$0xf]  ;;  %20626 = vmatprep.mubr.bf16.mxu0 %v25010_v13  ;;  %20657 = vmatpush3.bf16.msra.mxu0 %v23294_v17 }
 0x42c   : > { %v5292_v58 = vshrl.u32 %v19129_v29, 16  ;;  %v5275_v24 = vshrl.u32 %v19127_v12, 16  ;;  %v5278_v21 = vshll.u32 %v19127_v12, 16  ;;  %v20592_v0 = vpop.f32.mrb[20].mxu1  ;;  %v5533_v39 = vsel %vm23811_vm5, %v5289_v19, %v5532_v1  ;;  %v25034_v11 = vld [vmem:[#allocation2 + $0x54] sm:$0xf]  ;;  %20658 = vmatprep.subr.bf16.mxu0 %v23297_v18 }
 0x42d   : > { %29201 = vst [vmem:[#allocation30_spill] sm:$0xff] %v25034_v11  ;;  %v5526_v54 = vsel %vm23811_vm5, %v5272_v33, %v5525_v49  ;;  %v4590_v23 = vmax.f32 %v24988_v36, 0.0  ;;  %v4588_v53 = vmax.f32 %v24991_v35, 0.0  ;;  %v4493_v63 = vpop.f32.mrb[21].mxu1  ;;  %v23300_v5 = vld [vmem:[%s29002_s5 + $0x68] sm:$0xff]   ;;  %v21966_v35 = vadd.f32 %v20592_v0, %v24871_v31 }
 0x42e   : > { %5534 = vst [vmem:[#allocation2 + $0x60] sm:$0xf] %v5533_v39  ;;  %5527 = vst [vmem:[#allocation2 + $0x54] sm:$0xf] %v5526_v54  ;;  %v5294_v17 = vrot.slane %v5292_v58, 7  ;;  %v5277_v52 = vrot.slane %v5275_v24, 7  ;;  %v21967_v12 = vadd.f32 %v24871_v31, %v4493_v63 }
 0x42f   : > { %v20593_v34 = vpop.f32.mrb[22].mxu1  ;;  %v5536_v41 = vld [vmem:[#allocation2 + $0x68] sm:$0x1]  ;;  %v19132_v29 = vpack.c.bf16 %v4590_v23, %v4590_v23  ;;  %v19130_v36 = vpack.c.bf16 %v4588_v53, %v4588_v53  ;;  %v25047_v40 = vld [vmem:[#allocation2 + $0x64] sm:$0xf]  ;;  %20659 = vmatpush3.bf16.msra.mxu0 %v23297_v18  ;;  %v23303_v54 = vld [vmem:[%s29002_s5 + $0x70] sm:$0xff]  }
 0x430   : > { %v4496_v47 = vpop.f32.mrb[23].mxu1  ;;  %29202 = vst [vmem:[#allocation31_spill] sm:$0xff] %v25047_v40  ;;  %v25049_v59 = vld [vmem:[#allocation2 + $0x68] sm:$0x1]  ;;  %v5297_v46 = vor.u32 %v5295_v50, %v5294_v17  ;;  %v5299_v19 = vrot.slane %v5294_v17, 4  ;;  %v5280_v57 = vor.u32 %v5278_v21, %v5277_v52  ;;  %v5282_v33 = vrot.slane %v5277_v52, 4  ;;  %20660 = vmatprep.subr.bf16.mxu0 %v23300_v5 }
 0x431   : > { %29203 = vst [vmem:[#allocation32_spill] sm:$0xff] %v25049_v59  ;;  %v25051_v1 = vld [vmem:[#allocation2 + $0x58] sm:$0xf]  ;;  %v25053_v42 = vld [vmem:[#allocation2 + $0x5c] sm:$0x1]  ;;  %v5318_v58 = vshrl.u32 %v19132_v29, 16 }
 0x432   : > { %29204 = vst [vmem:[#allocation33_spill] sm:$0xff] %v25051_v1  ;;  %29205 = vst [vmem:[#allocation34_spill] sm:$0xff] %v25053_v42  ;;  %v5529_v49 = vld [vmem:[#allocation2 + $0x5c] sm:$0x1]  ;;  %v5321_v24 = vshll.u32 %v19132_v29, 16  ;;  %v5301_v0 = vshrl.u32 %v19130_v36, 16  ;;  %v5298_v50 = vsel %vm23818_vm6, %v5290_v4, %v5297_v46  ;;  %v5537_v23 = vsel %vm23824_vm7, %v5299_v19, %v5536_v41 }
 0x433   : > { %v5304_v39 = vshll.u32 %v19130_v36, 16  ;;  %v5281_v21 = vsel %vm23818_vm6, %v5273_v26, %v5280_v57  ;;  %v5530_v18 = vsel %vm23824_vm7, %v5282_v33, %v5529_v49  ;;  %v25066_v53 = vld [vmem:[#allocation2 + $0x3c] sm:$0xff]   ;;  %5535 = vst [vmem:[#allocation2 + $0x64] sm:$0xf] %v5298_v50  ;;  %5538 = vst [vmem:[#allocation2 + $0x68] sm:$0x1] %v5537_v23  ;;  %v21968_v46 = vadd.f32 %v20593_v34, %v24871_v31 }
 0x434   : > { %5528 = vst [vmem:[#allocation2 + $0x58] sm:$0xf] %v5281_v21  ;;  %5531 = vst [vmem:[#allocation2 + $0x5c] sm:$0x1] %v5530_v18  ;;  %v25068_v63 = vrot.slane %v5318_v58, 7  ;;  %v25070_v17 = vrot.slane %v5301_v0, 7  ;;  %v21969_v19 = vadd.f32 %v24871_v31, %v4496_v47  ;;  %20627 = vmatmul.mubr.bf16.gmra.mrb[40].mxu0 %v25066_v53 }
 0x435   : > { %v4591_v4 = vmax.f32 %v21964_v6, 0.0  ;;  %v4589_v52 = vmax.f32 %v21965_v32, 0.0  ;;  %v25072_v29 = vld [vmem:[#allocation2 + $0x48] sm:$0xff]   ;;  %v5546_v41 = vld [vmem:[#allocation2 + $0x78] sm:$0xf]  ;;  %v4594_v36 = vmax.f32 %v21966_v35, 0.0  ;;  %20661 = vmatpush3.bf16.msra.mxu0 %v23300_v5 }
 0x436   : > { %v4592_v26 = vmax.f32 %v21967_v12, 0.0  ;;  %v20596_v57 = vpop.f32.mrb[24].mxu1  ;;  %v25077_v33 = vld [vmem:[#allocation2 + $0x78] sm:$0xf]  ;;  %v5323_v49 = vor.u32 %v5321_v24, %v25068_v63  ;;  %v5306_v6 = vor.u32 %v5304_v39, %v25070_v17  ;;  %20630 = vmatprep.mubr.bf16.mxu0 %v25072_v29  ;;  %v5539_v34 = vld [vmem:[#allocation2 + $0x6c] sm:$0xf]  ;;  %20662 = vmatprep.subr.bf16.mxu0 %v23303_v54 }
 0x437   : > { %29206 = vst [vmem:[#allocation35_spill] sm:$0xff] %v25077_v33  ;;  %v4509_v35 = vpop.f32.mrb[25].mxu1  ;;  %v19133_v12 = vpack.c.bf16 %v4591_v4, %v4591_v4  ;;  %v19131_v47 = vpack.c.bf16 %v4589_v52, %v4589_v52  ;;  %v19136_v0 = vpack.c.bf16 %v4594_v36, %v4594_v36  ;;  %v23306_v24 = vld [vmem:[%s29002_s5 + $0x78] sm:$0xff]   ;;  %v25091_v21 = vld [vmem:[#allocation2 + $0x6c] sm:$0xf]  ;;  %v4595_v18 = vmax.f32 %v21968_v46, 0.0 }
 0x438   : > { %v19134_v50 = vpack.c.bf16 %v4592_v26, %v4592_v26  ;;  %v25084_v23 = vpop.f32.mrb[26].mxu1  ;;  %v5547_v39 = vsel %vm23811_vm5, %v5323_v49, %v5546_v41  ;;  %29207 = vst [vmem:[#allocation36_spill] sm:$0xff] %v25091_v21  ;;  %v5540_v5 = vsel %vm23811_vm5, %v5306_v6, %v5539_v34  ;;  %v4593_v4 = vmax.f32 %v21969_v19, 0.0  ;;  %v25106_v19 = vld [vmem:[%s29002_s5 + $0x80] sm:$0xff]   ;;  %v25125_v25 = vld [vmem:[#allocation2 + $0x90] sm:$0xf] }
 0x439   : > { %v25095_v52 = vpop.f32.mrb[27].mxu1  ;;  %5548 = vst [vmem:[#allocation2 + $0x78] sm:$0xf] %v5547_v39  ;;  %5541 = vst [vmem:[#allocation2 + $0x6c] sm:$0xf] %v5540_v5  ;;  %v5326_v36 = vshrl.u32 %v19133_v12, 16  ;;  %20663 = vmatpush3.bf16.msra.mxu0 %v23303_v54  ;;  %v25097_v21 = vpack.c.bf16 %v4595_v18, %v4595_v18  ;;  %v21970_v54 = vadd.f32 %v20596_v57, %v24871_v31 }
 0x43a   : > { %v5329_v26 = vshll.u32 %v19133_v12, 16  ;;  %v5309_v32 = vshrl.u32 %v19131_v47, 16  ;;  %v5312_v58 = vshll.u32 %v19131_v47, 16  ;;  %v5352_v42 = vshrl.u32 %v19136_v0, 16  ;;  %20664 = vmatprep.subr.bf16.mxu0 %v23306_v24  ;;  %v5550_v34 = vld [vmem:[#allocation2 + $0x80] sm:$0x1] }
 0x43b   : > { %v5355_v59 = vshll.u32 %v19136_v0, 16  ;;  %v5335_v33 = vshrl.u32 %v19134_v50, 16  ;;  %v5338_v1 = vshll.u32 %v19134_v50, 16  ;;  %v5328_v41 = vrot.slane %v5326_v36, 7  ;;  %v25101_v46 = vld [vmem:[#allocation2 + $0x54] sm:$0xff]   ;;  %v25114_v0 = vld [vmem:[#allocation2 + $0x60] sm:$0xff]  }
 0x43c   : > { %v5311_v49 = vrot.slane %v5309_v32, 7  ;;  %v25099_v6 = vpack.c.bf16 %v4593_v4, %v4593_v4  ;;  %v25108_v12 = vrot.slane %v5352_v42, 7  ;;  %v21971_v32 = vadd.f32 %v24871_v31, %v4509_v35  ;;  %v25116_v50 = vld [vmem:[#allocation2 + $0x7c] sm:$0xf]  ;;  %v25118_v39 = vld [vmem:[#allocation2 + $0x80] sm:$0x1]  ;;  %20631 = vmatmul.mubr.bf16.gmra.mrb[44].mxu0 %v25101_v46 }
 0x43d   : > { %v25110_v47 = vrot.slane %v5335_v33, 7  ;;  %29208 = vst [vmem:[#allocation37_spill] sm:$0xff] %v25116_v50  ;;  %29209 = vst [vmem:[#allocation38_spill] sm:$0xff] %v25118_v39  ;;  %v5331_v5 = vor.u32 %v5329_v26, %v5328_v41  ;;  %v5333_v18 = vrot.slane %v5328_v41, 4  ;;  %v25120_v4 = vld [vmem:[#allocation2 + $0x70] sm:$0xf]  ;;  %20634 = vmatprep.mubr.bf16.mxu0 %v25114_v0  ;;  %20665 = vmatpush3.bf16.msra.mxu0 %v23306_v24 }
 0x43e   : > { %29210 = vst [vmem:[#allocation39_spill] sm:$0xff] %v25120_v4  ;;  %v25122_v36 = vld [vmem:[#allocation2 + $0x74] sm:$0x1]  ;;  %v5314_v42 = vor.u32 %v5312_v58, %v5311_v49  ;;  %v5316_v40 = vrot.slane %v5311_v49, 4  ;;  %v20600_v57 = vpop.f32.mrb[28].mxu1  ;;  %29212 = vst [vmem:[#allocation41_spill] sm:$0xff] %v25125_v25  ;;  %v5357_v35 = vor.u32 %v5355_v59, %v25108_v12  ;;  %20698 = vmatprep.subr.bf16.mxu0 %v25106_v19 }
 0x43f   : > { %29211 = vst [vmem:[#allocation40_spill] sm:$0xff] %v25122_v36  ;;  %v5543_v33 = vld [vmem:[#allocation2 + $0x74] sm:$0x1]  ;;  %v5358_v50 = vrot.slane %v25108_v12, 4  ;;  %v5560_v11 = vld [vmem:[#allocation2 + $0x90] sm:$0xf]  ;;  %v5340_v26 = vor.u32 %v5338_v1, %v25110_v47  ;;  %v5551_v39 = vsel %vm23824_vm7, %v5333_v18, %v5550_v34 }
 0x440   : > { %v5341_v41 = vrot.slane %v25110_v47, 4  ;;  %v4525_v36 = vpop.f32.mrb[29].mxu1  ;;  %v29213_v58 = vrot.slane %v25068_v63, 4  ;;  %v29214_v59 = vrot.slane %v25070_v17, 4  ;;  %v5544_v1 = vsel %vm23824_vm7, %v5316_v40, %v5543_v33  ;;  %v25144_v47 = vld [vmem:[#allocation2 + $0x84] sm:$0xf] }
 0x441   : > { %29215 = vst [vmem:[#allocation42_spill] sm:$0xff] %v25144_v47  ;;  %v5553_v25 = vld [vmem:[#allocation2 + $0x84] sm:$0xf]  ;;  %v25146_v24 = vpop.f32.mrb[30].mxu1  ;;  %5552 = vst [vmem:[#allocation2 + $0x80] sm:$0x1] %v5551_v39  ;;  %v5561_v63 = vsel %vm23811_vm5, %v5357_v35, %v5560_v11  ;;  %v21972_v11 = vadd.f32 %v25084_v23, %v24871_v31  ;;  %v21974_v35 = vadd.f32 %v20600_v57, %v24871_v31 }
 0x442   : > { %v5332_v49 = vsel %vm23818_vm6, %v29213_v58, %v5331_v5  ;;  %v5315_v12 = vsel %vm23818_vm6, %v29214_v59, %v5314_v42  ;;  %5545 = vst [vmem:[#allocation2 + $0x74] sm:$0x1] %v5544_v1  ;;  %v5554_v17 = vsel %vm23811_vm5, %v5340_v26, %v5553_v25  ;;  %v5360_v34 = vshrl.u32 %v25097_v21, 16  ;;  %v25155_v5 = vpop.f32.mrb[31].mxu1  ;;  %5562 = vst [vmem:[#allocation2 + $0x90] sm:$0xf] %v5561_v63 }
 0x443   : > { %5549 = vst [vmem:[#allocation2 + $0x7c] sm:$0xf] %v5332_v49  ;;  %5542 = vst [vmem:[#allocation2 + $0x70] sm:$0xf] %v5315_v12  ;;  %v5363_v40 = vshll.u32 %v25097_v21, 16  ;;  %v5343_v18 = vshrl.u32 %v25099_v6, 16  ;;  %v21973_v25 = vadd.f32 %v24871_v31, %v25095_v52  ;;  %v21975_v59 = vadd.f32 %v24871_v31, %v4525_v36 }
 0x444   : > { %5555 = vst [vmem:[#allocation2 + $0x84] sm:$0xf] %v5554_v17  ;;  %v5346_v39 = vshll.u32 %v25099_v6, 16  ;;  %v4598_v42 = vmax.f32 %v21970_v54, 0.0  ;;  %v4596_v33 = vmax.f32 %v21971_v32, 0.0  ;;  %v5362_v58 = vrot.slane %v5360_v34, 7 }
 0x445   : > { %v5345_v21 = vrot.slane %v5343_v18, 7  ;;  %v25165_v12 = vld [vmem:[#allocation2 + $0x94] sm:$0xf]  ;;  %v25167_v1 = vld [vmem:[#allocation2 + $0x98] sm:$0x1]  ;;  %v4599_v63 = vmax.f32 %v21972_v11, 0.0 }
 0x446   : > { %v19140_v26 = vpack.c.bf16 %v4598_v42, %v4598_v42  ;;  %v19138_v49 = vpack.c.bf16 %v4596_v33, %v4596_v33  ;;  %29216 = vst [vmem:[#allocation43_spill] sm:$0xff] %v25165_v12  ;;  %29217 = vst [vmem:[#allocation44_spill] sm:$0xff] %v25167_v1  ;;  %v5365_v6 = vor.u32 %v5363_v40, %v5362_v58  ;;  %v5367_v54 = vrot.slane %v5362_v58, 4  ;;  %v5564_v32 = vld [vmem:[#allocation2 + $0x98] sm:$0x1]  ;;  %v25173_v33 = vpop.f32.mrb[32].mxu1 }
 0x447   : > { %v4597_v17 = vmax.f32 %v21973_v25, 0.0  ;;  %v25169_v23 = vld [vmem:[#allocation2 + $0x88] sm:$0xf]  ;;  %v25171_v34 = vld [vmem:[#allocation2 + $0x8c] sm:$0x1]  ;;  %v5348_v52 = vor.u32 %v5346_v39, %v5345_v21  ;;  %v5350_v57 = vrot.slane %v5345_v21, 4 }
 0x448   : > { %29218 = vst [vmem:[#allocation45_spill] sm:$0xff] %v25169_v23  ;;  %29219 = vst [vmem:[#allocation46_spill] sm:$0xff] %v25171_v34  ;;  %v5386_v18 = vshrl.u32 %v19140_v26, 16  ;;  %v5389_v42 = vshll.u32 %v19140_v26, 16  ;;  %v5366_v36 = vsel %vm23818_vm6, %v5358_v50, %v5365_v6  ;;  %v5565_v40 = vsel %vm23824_vm7, %v5367_v54, %v5564_v32  ;;  %v5557_v58 = vld [vmem:[#allocation2 + $0x8c] sm:$0x1] }
 0x449   : > { %v5369_v1 = vshrl.u32 %v19138_v49, 16  ;;  %v5372_v11 = vshll.u32 %v19138_v49, 16  ;;  %v25179_v25 = vpop.f32.mrb[33].mxu1  ;;  %5563 = vst [vmem:[#allocation2 + $0x94] sm:$0xf] %v5366_v36  ;;  %v5349_v39 = vsel %vm23818_vm6, %v5341_v41, %v5348_v52  ;;  %v5558_v21 = vsel %vm23824_vm7, %v5350_v57, %v5557_v58 }
 0x44a   : > { %5566 = vst [vmem:[#allocation2 + $0x98] sm:$0x1] %v5565_v40  ;;  %v5388_v26 = vrot.slane %v5386_v18, 7  ;;  %v19141_v34 = vpack.c.bf16 %v4599_v63, %v4599_v63  ;;  %v25185_v23 = vld [vmem:[#allocation2 + $0x6c] sm:$0xff]   ;;  %5556 = vst [vmem:[#allocation2 + $0x88] sm:$0xf] %v5349_v39  ;;  %v19139_v54 = vpack.c.bf16 %v4597_v17, %v4597_v17 }
 0x44b   : > { %5559 = vst [vmem:[#allocation2 + $0x8c] sm:$0x1] %v5558_v21  ;;  %v5574_v50 = vld [vmem:[#allocation2 + $0xa8] sm:$0xf]  ;;  %v5371_v6 = vrot.slane %v5369_v1, 7  ;;  %v4602_v49 = vmax.f32 %v21974_v35, 0.0  ;;  %20635 = vmatmul.mubr.bf16.gmra.mrb[48].mxu0 %v25185_v23 }
 0x44c   : > { %v4600_v32 = vmax.f32 %v21975_v59, 0.0  ;;  %v25187_v47 = vld [vmem:[#allocation2 + $0x78] sm:$0xff]   ;;  %v25189_v36 = vpop.f32.mrb[34].mxu1  ;;  %v5391_v40 = vor.u32 %v5389_v42, %v5388_v26  ;;  %v5392_v41 = vrot.slane %v5388_v26, 4  ;;  %v5394_v52 = vshrl.u32 %v19141_v34, 16 }
 0x44d   : > { %v5397_v12 = vshll.u32 %v19141_v34, 16  ;;  %v25192_v63 = vpop.f32.mrb[35].mxu1  ;;  %v5374_v57 = vor.u32 %v5372_v11, %v5371_v6  ;;  %v5375_v18 = vrot.slane %v5371_v6, 4  ;;  %v5377_v58 = vshrl.u32 %v19139_v54, 16  ;;  %20638 = vmatprep.mubr.bf16.mxu0 %v25187_v47  ;;  %v25195_v35 = vld [vmem:[#allocation2 + $0xa8] sm:$0xf] }
 0x44e   : > { %v5380_v39 = vshll.u32 %v19139_v54, 16  ;;  %29220 = vst [vmem:[#allocation47_spill] sm:$0xff] %v25195_v35  ;;  %v5575_v59 = vsel %vm23811_vm5, %v5391_v40, %v5574_v50  ;;  %v5567_v1 = vld [vmem:[#allocation2 + $0x9c] sm:$0xf]  ;;  %v5396_v17 = vrot.slane %v5394_v52, 7  ;;  %v19144_v42 = vpack.c.bf16 %v4602_v49, %v4602_v49 }
 0x44f   : > { %v19142_v21 = vpack.c.bf16 %v4600_v32, %v4600_v32  ;;  %5576 = vst [vmem:[#allocation2 + $0xa8] sm:$0xf] %v5575_v59  ;;  %v25199_v34 = vld [vmem:[#allocation2 + $0x9c] sm:$0xf]  ;;  %v5568_v11 = vsel %vm23811_vm5, %v5374_v57, %v5567_v1  ;;  %v5578_v26 = vld [vmem:[#allocation2 + $0xb0] sm:$0x1]  ;;  %v21976_v54 = vadd.f32 %v25146_v24, %v24871_v31  ;;  %v21977_v35 = vadd.f32 %v24871_v31, %v25155_v5 }
 0x450   : > { %29221 = vst [vmem:[#allocation48_spill] sm:$0xff] %v25199_v34  ;;  %v5379_v6 = vrot.slane %v5377_v58, 7  ;;  %5569 = vst [vmem:[#allocation2 + $0x9c] sm:$0xf] %v5568_v11  ;;  %v25207_v50 = vld [vmem:[#allocation2 + $0xac] sm:$0xf]  ;;  %v5399_v49 = vor.u32 %v5397_v12, %v5396_v17 }
 0x451   : > { %29222 = vst [vmem:[#allocation49_spill] sm:$0xff] %v25207_v50  ;;  %v25209_v40 = vld [vmem:[#allocation2 + $0xb0] sm:$0x1]  ;;  %v5401_v32 = vrot.slane %v5396_v17, 4  ;;  %v5571_v52 = vld [vmem:[#allocation2 + $0xa4] sm:$0x1] }
 0x452   : > { %29223 = vst [vmem:[#allocation50_spill] sm:$0xff] %v25209_v40  ;;  %v5420_v59 = vshrl.u32 %v19144_v42, 16  ;;  %v5423_v34 = vshll.u32 %v19144_v42, 16  ;;  %v25214_v57 = vld [vmem:[%s28999_s2] ss:$0 sm:$0xff]  ;;  %v21056_v58 = vpop.f32.mrb[36].mxu1  ;;  %v5382_v1 = vor.u32 %v5380_v39, %v5379_v6  ;;  %v5400_v40 = vsel %vm23818_vm6, %v5392_v41, %v5399_v49 }
 0x453   : > { %v25216_v24 = vld [vmem:[#allocation2 + $0xa0] sm:$0xf]  ;;  %v5384_v31 = vrot.slane %v5379_v6, 4  ;;  %v5403_v5 = vshrl.u32 %v19142_v21, 16  ;;  %v5406_v11 = vshll.u32 %v19142_v21, 16  ;;  %v5579_v12 = vsel %vm23824_vm7, %v5401_v32, %v5578_v26  ;;  %v25224_v50 = vld [vmem:[#allocation2 + $0x84] sm:$0xff]  }
 0x454   : > { %29224 = vst [vmem:[#allocation51_spill] sm:$0xff] %v25216_v24  ;;  %v25222_v17 = vrot.slane %v5420_v59, 7  ;;  %v4603_v42 = vmax.f32 %v21976_v54, 0.0  ;;  %v9281_v4 = vpop.f32.mrb[37].mxu1  ;;  %5577 = vst [vmem:[#allocation2 + $0xac] sm:$0xf] %v5400_v40  ;;  %v5383_v39 = vsel %vm23818_vm6, %v5375_v18, %v5382_v1  ;;  %20639 = vmatmul.mubr.bf16.gmra.mrb[52].mxu0 %v25224_v50  ;;  %v9269_v24 = vadd.f32 %v25214_v57, %v25192_v63 }
 0x455   : > { %5580 = vst [vmem:[#allocation2 + $0xb0] sm:$0x1] %v5579_v12  ;;  %v25226_v3 = vld [vmem:[#allocation2 + $0xa4] sm:$0x1]  ;;  %v5572_v21 = vsel %vm23824_vm7, %v5384_v31, %v5571_v52  ;;  %v25232_v41 = vrot.slane %v5403_v5, 7  ;;  %v4601_v6 = vmax.f32 %v21977_v35, 0.0  ;;  %v9274_v52 = vadd.f32 %v25173_v33, %v25214_v57 }
 0x456   : > { %29225 = vst [vmem:[#allocation52_spill] sm:$0xff] %v25226_v3  ;;  %v25234_v26 = vld [vmem:[#allocation2 + $0x90] sm:$0xff]   ;;  %v25236_v49 = vpop.f32.mrb[38].mxu1  ;;  %5570 = vst [vmem:[#allocation2 + $0xa0] sm:$0xf] %v5383_v39  ;;  %v5425_v40 = vor.u32 %v5423_v34, %v25222_v17  ;;  %v5426_v32 = vrot.slane %v25222_v17, 4  ;;  %v19145_v18 = vpack.c.bf16 %v4603_v42, %v4603_v42  ;;  %v9266_v34 = vadd.f32 %v25214_v57, %v25179_v25 }
 0x457   : > { %5573 = vst [vmem:[#allocation2 + $0xa4] sm:$0x1] %v5572_v21  ;;  %v25238_v54 = vld [vmem:[#allocation2 + $0xc0] sm:$0xf]  ;;  %v25245_v35 = vpop.f32.mrb[39].mxu1  ;;  %v5408_v31 = vor.u32 %v5406_v11, %v25232_v41  ;;  %v5409_v5 = vrot.slane %v25232_v41, 4  ;;  %v19143_v39 = vpack.c.bf16 %v4601_v6, %v4601_v6  ;;  %20642 = vmatprep.mubr.bf16.mxu0 %v25234_v26  ;;  %v9277_v25 = vadd.f32 %v25189_v36, %v25214_v57 }
 0x458   : > { %29226 = vst [vmem:[#allocation53_spill] sm:$0xff] %v25238_v54  ;;  %v5588_v59 = vld [vmem:[#allocation2 + $0xc0] sm:$0xf]  ;;  %v25247_v1 = vld [vmem:[#allocation2 + $0xb4] sm:$0xf]  ;;  %v5428_v17 = vshrl.u32 %v19145_v18, 16 }
 0x459   : > { %29227 = vst [vmem:[#allocation54_spill] sm:$0xff] %v25247_v1  ;;  %v5581_v12 = vld [vmem:[#allocation2 + $0xb4] sm:$0xf]  ;;  %v5589_v33 = vsel %vm23811_vm5, %v5425_v40, %v5588_v59  ;;  %v5431_v42 = vshll.u32 %v19145_v18, 16  ;;  %v9394_v21 = vmax.f32 %v9274_v52, 0.0  ;;  %v5411_v11 = vshrl.u32 %v19143_v39, 16 }
 0x45a   : > { %5590 = vst [vmem:[#allocation2 + $0xc0] sm:$0xf] %v5589_v33  ;;  %v5582_v3 = vsel %vm23811_vm5, %v5408_v31, %v5581_v12  ;;  %v5414_v1 = vshll.u32 %v19143_v39, 16  ;;  %v9392_v41 = vmax.f32 %v9266_v34, 0.0  ;;  %v5430_v6 = vrot.slane %v5428_v17, 7  ;;  %v25262_v40 = vpop.f32.mrb[40].mxu1 }
 0x45b   : > { %5583 = vst [vmem:[#allocation2 + $0xb4] sm:$0xf] %v5582_v3  ;;  %v19148_v54 = vpack.c.bf16 %v9394_v21, %v9394_v21  ;;  %v5592_v59 = vld [vmem:[#allocation2 + $0xc8] sm:$0x1]  ;;  %v5413_v18 = vrot.slane %v5411_v11, 7  ;;  %v9290_v33 = vadd.f32 %v21056_v58, %v25214_v57  ;;  %v9282_v31 = vadd.f32 %v25214_v57, %v9281_v4  ;;  %v25266_v12 = vpop.f32.mrb[41].mxu1 }
 0x45c   : > { %v19146_v52 = vpack.c.bf16 %v9392_v41, %v9392_v41  ;;  %v25268_v3 = vld [vmem:[#allocation2 + $0xc4] sm:$0xf]  ;;  %v25270_v39 = vld [vmem:[#allocation2 + $0xc8] sm:$0x1]  ;;  %v5433_v34 = vor.u32 %v5431_v42, %v5430_v6  ;;  %v5435_v36 = vrot.slane %v5430_v6, 4  ;;  %v9395_v42 = vmax.f32 %v9277_v25, 0.0 }
 0x45d   : > { %29228 = vst [vmem:[#allocation55_spill] sm:$0xff] %v25268_v3  ;;  %29229 = vst [vmem:[#allocation56_spill] sm:$0xff] %v25270_v39  ;;  %v9538_v17 = vshrl.u32 %v19148_v54, 16  ;;  %v9541_v21 = vshll.u32 %v19148_v54, 16  ;;  %v25272_v63 = vld [vmem:[#allocation2 + $0xb8] sm:$0xf]  ;;  %v5416_v16 = vor.u32 %v5414_v1, %v5413_v18 }
 0x45e   : > { %29230 = vst [vmem:[#allocation57_spill] sm:$0xff] %v25272_v63  ;;  %v5418_v51 = vrot.slane %v5413_v18, 4  ;;  %v9521_v11 = vshrl.u32 %v19146_v52, 16  ;;  %v9524_v41 = vshll.u32 %v19146_v52, 16  ;;  %v25274_v28 = vld [vmem:[#allocation2 + $0x9c] sm:$0xff]   ;;  %v5434_v4 = vsel %vm23818_vm6, %v5426_v32, %v5433_v34  ;;  %v25282_v6 = vld [vmem:[#allocation2 + $0xa8] sm:$0xff]  }
 0x45f   : > { %v5593_v58 = vsel %vm23824_vm7, %v5435_v36, %v5592_v59  ;;  %v5585_v3 = vld [vmem:[#allocation2 + $0xbc] sm:$0x1]  ;;  %v25280_v39 = vrot.slane %v9538_v17, 7  ;;  %v25284_v54 = vpop.f32.mrb[42].mxu1  ;;  %5591 = vst [vmem:[#allocation2 + $0xc4] sm:$0xf] %v5434_v4  ;;  %v5417_v18 = vsel %vm23818_vm6, %v5409_v5, %v5416_v16  ;;  %20643 = vmatmul.mubr.bf16.gmra.mrb[56].mxu0 %v25274_v28  ;;  %v19149_v4 = vpack.c.bf16 %v9395_v42, %v9395_v42 }
 0x460   : > { %5594 = vst [vmem:[#allocation2 + $0xc8] sm:$0x1] %v5593_v58  ;;  %v25286_v1 = vld [vmem:[#allocation2 + $0xbc] sm:$0x1]  ;;  %v5586_v32 = vsel %vm23824_vm7, %v5418_v51, %v5585_v3  ;;  %v9523_v52 = vrot.slane %v9521_v11, 7  ;;  %v9393_v59 = vmax.f32 %v9269_v24, 0.0  ;;  %20646 = vmatprep.mubr.bf16.mxu0 %v25282_v6 }
 0x461   : > { %29231 = vst [vmem:[#allocation58_spill] sm:$0xff] %v25286_v1  ;;  %v25293_v34 = vpop.f32.mrb[43].mxu1  ;;  %5584 = vst [vmem:[#allocation2 + $0xb8] sm:$0xf] %v5417_v18  ;;  %v25296_v25 = vor.u32 %v9541_v21, %v25280_v39  ;;  %v9544_v36 = vrot.slane %v25280_v39, 4  ;;  %v9398_v16 = vmax.f32 %v9290_v33, 0.0 }
 0x462   : > { %5587 = vst [vmem:[#allocation2 + $0xbc] sm:$0x1] %v5586_v32  ;;  %v25299_v17 = vld [vmem:[#allocation2 + $0x18] sm:$0xf]  ;;  %v9526_v51 = vor.u32 %v9524_v41, %v9523_v52  ;;  %v9527_v5 = vrot.slane %v9523_v52, 4  ;;  %v19147_v3 = vpack.c.bf16 %v9393_v59, %v9393_v59  ;;  %v9396_v11 = vmax.f32 %v9282_v31, 0.0 }
 0x463   : > { %v9840_v24 = vld [vmem:[#allocation2 + $0xc] sm:$0xf]  ;;  %v9546_v21 = vshrl.u32 %v19149_v4, 16  ;;  %v9549_v18 = vshll.u32 %v19149_v4, 16  ;;  %v19152_v32 = vpack.c.bf16 %v9398_v16, %v9398_v16  ;;  %v25306_v39 = vpop.f32.mrb[44].mxu1  ;;  %v9293_v4 = vadd.f32 %v25236_v49, %v25214_v57 }
 0x464   : > { %v25308_v1 = vld [vmem:[#allocation2 + $0xc] sm:$0xf]  ;;  %v9841_v33 = vsel %vm23811_vm5, %v9526_v51, %v9840_v24  ;;  %v9529_v41 = vshrl.u32 %v19147_v3, 16  ;;  %v9532_v42 = vshll.u32 %v19147_v3, 16  ;;  %v19150_v52 = vpack.c.bf16 %v9396_v11, %v9396_v11  ;;  %v25312_v59 = vpop.f32.mrb[45].mxu1 }
 0x465   : > { %v25314_v31 = vld [vmem:[#allocation2 + $0xc] sm:$0xe]  ;;  %v9548_v63 = vrot.slane %v9546_v21, 7  ;;  %v9572_v45 = vshrl.u32 %v19152_v32, 16  ;;  %v9575_v58 = vshll.u32 %v19152_v32, 16  ;;  %v25318_v16 = vpop.f32.mrb[46].mxu1  ;;  %v9285_v24 = vadd.f32 %v25214_v57, %v25245_v35 }
 0x466   : > { %29232 = vst [vmem:[#allocation59_spill] sm:$0xff] %v25314_v31  ;;  %9842 = vst [vmem:[#allocation2 + $0xc] sm:$0xf] %v9841_v33  ;;  %v9851_v10 = vld [vmem:[#allocation2 + $0x20] sm:$0x1]  ;;  %v9531_v15 = vrot.slane %v9529_v41, 7 }
 0x467   : > { %v9555_v2 = vshrl.u32 %v19150_v52, 16  ;;  %v9558_v51 = vshll.u32 %v19150_v52, 16  ;;  %v25322_v3 = vpop.f32.mrb[47].mxu1  ;;  %v9551_v11 = vor.u32 %v9549_v18, %v9548_v63  ;;  %v9553_v56 = vrot.slane %v9548_v63, 4  ;;  %v9844_v21 = vld [vmem:[#allocation2 + $0x14] sm:$0x1] }
 0x468   : > { %v25324_v22 = vrot.slane %v9572_v45, 7  ;;  %v9399_v32 = vmax.f32 %v9293_v4, 0.0  ;;  %v25326_v27 = vld [vmem:[#allocation2 + $0x1c] sm:$0xf]  ;;  %v25328_v49 = vld [vmem:[#allocation2 + $0x10] sm:$0xf]  ;;  %v9534_v33 = vor.u32 %v9532_v42, %v9531_v15 }
 0x469   : > { %29233 = vst [vmem:[#allocation60_spill] sm:$0xff] %v25326_v27  ;;  %29234 = vst [vmem:[#allocation61_spill] sm:$0xff] %v25328_v49  ;;  %v9536_v20 = vrot.slane %v9531_v15, 4  ;;  %v25330_v41 = vrot.slane %v9555_v2, 7  ;;  %v9397_v52 = vmax.f32 %v9285_v24, 0.0  ;;  %v25332_v60 = vld [vmem:[#allocation2 + $0xb4] sm:$0xff]   ;;  %v9552_v35 = vsel %vm23818_vm6, %v9544_v36, %v9551_v11 }
 0x46a   : > { %v9852_v63 = vsel %vm23824_vm7, %v9553_v56, %v9851_v10  ;;  %v25339_v45 = vor.u32 %v9575_v58, %v25324_v22  ;;  %v9578_v18 = vrot.slane %v25324_v22, 4  ;;  %v25342_v4 = vld [vmem:[#allocation2 + $0x20] sm:$0x1]  ;;  %v9535_v2 = vsel %vm23818_vm6, %v9527_v5, %v9534_v33  ;;  %v25348_v42 = vld [vmem:[#allocation2 + $0x30] sm:$0xf]  ;;  %20647 = vmatmul.mubr.bf16.gmra.mrb[60].mxu0 %v25332_v60  ;;  %v25366_v24 = vpop.f32.mrb[48].mxu1 }
 0x46b   : > { %29235 = vst [vmem:[#allocation62_spill] sm:$0xff] %v25342_v4  ;;  %v9845_v15 = vsel %vm23824_vm7, %v9536_v20, %v9844_v21  ;;  %v25351_v36 = vor.u32 %v9558_v51, %v25330_v41  ;;  %v9561_v56 = vrot.slane %v25330_v41, 4  ;;  %v25355_v10 = vld [vmem:[#allocation2 + $0x14] sm:$0x1]  ;;  %9850 = vst [vmem:[#allocation2 + $0x1c] sm:$0xf] %v9552_v35  ;;  %v19153_v5 = vpack.c.bf16 %v9399_v32, %v9399_v32 }
 0x46c   : > { %29236 = vst [vmem:[#allocation63_spill] sm:$0xff] %v25355_v10  ;;  %9853 = vst [vmem:[#allocation2 + $0x20] sm:$0x1] %v9852_v63  ;;  %v25361_v20 = vld [vmem:[#allocation2 + $0x24] sm:$0xf]  ;;  %v19151_v58 = vpack.c.bf16 %v9397_v52, %v9397_v52  ;;  %v9306_v51 = vadd.f32 %v25262_v40, %v25214_v57  ;;  %20666 = vmatprep.mubr.bf16.mxu0 %v24933_v55  ;;  %v9298_v21 = vadd.f32 %v25214_v57, %v25266_v12  ;;  %v25378_v40 = vpop.f32.mrb[49].mxu1 }
 0x46d   : > { %9843 = vst [vmem:[#allocation2 + $0x10] sm:$0xf] %v9535_v2  ;;  %9846 = vst [vmem:[#allocation2 + $0x14] sm:$0x1] %v9845_v15  ;;  %v9309_v32 = vadd.f32 %v25284_v54, %v25214_v57  ;;  %v9301_v33 = vadd.f32 %v25214_v57, %v25293_v34  ;;  %v9580_v55 = vshrl.u32 %v19153_v5, 16  ;;  %v9583_v41 = vshll.u32 %v19153_v5, 16 }
 0x46e   : > { %v9563_v52 = vshrl.u32 %v19151_v58, 16  ;;  %v9566_v35 = vshll.u32 %v19151_v58, 16  ;;  %v25380_v63 = vpop.f32.mrb[50].mxu1  ;;  %v9402_v2 = vmax.f32 %v9306_v51, 0.0  ;;  %v9400_v15 = vmax.f32 %v9298_v21, 0.0  ;;  %v23309_v51 = vld [vmem:[%s29002_s5 + $0x88] sm:$0xff]  }
 0x46f   : > { %v9403_v22 = vmax.f32 %v9309_v32, 0.0  ;;  %v9401_v11 = vmax.f32 %v9301_v33, 0.0  ;;  %v25382_v7 = vpop.f32.mrb[51].mxu1  ;;  %v9582_v12 = vrot.slane %v9580_v55, 7  ;;  %v9322_v54 = vadd.f32 %v25306_v39, %v25214_v57  ;;  %v9865_v62 = vld [vmem:[#allocation2 + $0x38] sm:$0x1] }
 0x470   : > { %v9565_v61 = vrot.slane %v9563_v52, 7  ;;  %v9314_v34 = vadd.f32 %v25214_v57, %v25312_v59  ;;  %v19156_v5 = vpack.c.bf16 %v9402_v2, %v9402_v2  ;;  %v19154_v48 = vpack.c.bf16 %v9400_v15, %v9400_v15  ;;  %v9858_v52 = vld [vmem:[#allocation2 + $0x2c] sm:$0x1]  ;;  %v25391_v31 = vld [vmem:[#allocation2 + $0x28] sm:$0xf] }
 0x471   : > { %v19157_v58 = vpack.c.bf16 %v9403_v22, %v9403_v22  ;;  %v19155_v37 = vpack.c.bf16 %v9401_v11, %v9401_v11  ;;  %v9585_v21 = vor.u32 %v9583_v41, %v9582_v12  ;;  %v9587_v32 = vrot.slane %v9582_v12, 4  ;;  %29237 = vst [vmem:[#allocation64_spill] sm:$0xff] %v25391_v31  ;;  %v25394_v2 = vld [vmem:[#allocation2 + $0x2c] sm:$0x1]  ;;  %v25409_v15 = vld [vmem:[#allocation2 + $0x38] sm:$0x1] }
 0x472   : > { %v9568_v33 = vor.u32 %v9566_v35, %v9565_v61  ;;  %v9570_v55 = vrot.slane %v9565_v61, 4  ;;  %v9606_v39 = vshrl.u32 %v19156_v5, 16  ;;  %v9609_v9 = vshll.u32 %v19156_v5, 16  ;;  %20667 = vmatmul.mubr.bf16.vlgmr.msra.gmra.mrb[32].mxu0 %v24936_v38  ;;  %29238 = vst [vmem:[#allocation65_spill] sm:$0xff] %v25394_v2  ;;  %v25405_v35 = vpop.f32.mrb[52].mxu1  ;;  %29240 = vst [vmem:[#allocation67_spill] sm:$0xff] %v25409_v15 }
 0x473   : > { %v9589_v4 = vshrl.u32 %v19154_v48, 16  ;;  %v9592_v59 = vshll.u32 %v19154_v48, 16  ;;  %v9586_v22 = vsel %vm23818_vm6, %v9578_v18, %v9585_v21  ;;  %v9866_v11 = vsel %vm23824_vm7, %v9587_v32, %v9865_v62  ;;  %20699 = vmatpush3.bf16.msra.mxu0 %v25106_v19  ;;  %v25407_v48 = vld [vmem:[#allocation2 + $0x34] sm:$0xf]  ;;  %20670 = vmatprep.mubr.bf16.mxu0 %v25008_v43  ;;  %v25412_v62 = vpop.f32.mrb[53].mxu1 }
 0x474   : > { %v9569_v61 = vsel %vm23818_vm6, %v9561_v56, %v9568_v33  ;;  %v9859_v41 = vsel %vm23824_vm7, %v9570_v55, %v9858_v52  ;;  %29239 = vst [vmem:[#allocation66_spill] sm:$0xff] %v25407_v48  ;;  %v9608_v12 = vrot.slane %v9606_v39, 7  ;;  %v9614_v18 = vshrl.u32 %v19157_v58, 16  ;;  %20700 = vmatprep.subr.bf16.mxu0 %v23309_v51  ;;  %v23310_v56 = vld [vmem:[%s29002_s5 + $0x90] sm:$0xff]   ;;  %9864 = vst [vmem:[#allocation2 + $0x34] sm:$0xf] %v9586_v22 }
 0x475   : > { %v9591_v5 = vrot.slane %v9589_v4, 7  ;;  %v9617_v21 = vshll.u32 %v19157_v58, 16  ;;  %9857 = vst [vmem:[#allocation2 + $0x28] sm:$0xf] %v9569_v61  ;;  %9860 = vst [vmem:[#allocation2 + $0x2c] sm:$0x1] %v9859_v41 }
 0x476   : > { %9867 = vst [vmem:[#allocation2 + $0x38] sm:$0x1] %v9866_v11  ;;  %v9597_v19 = vshrl.u32 %v19155_v37, 16  ;;  %v9600_v32 = vshll.u32 %v19155_v37, 16  ;;  %v9406_v33 = vmax.f32 %v9322_v54, 0.0  ;;  %v9404_v55 = vmax.f32 %v9314_v34, 0.0 }
 0x477   : > { %v25417_v4 = vpop.f32.mrb[54].mxu1  ;;  %v25419_v58 = vor.u32 %v9609_v9, %v9608_v12  ;;  %v9612_v52 = vrot.slane %v9608_v12, 4  ;;  %v25421_v39 = vor.u32 %v9592_v59, %v9591_v5  ;;  %v9595_v15 = vrot.slane %v9591_v5, 4  ;;  %v25425_v48 = vld [vmem:[#allocation2 + $0x48] sm:$0xf]  ;;  %20701 = vmatpush3.bf16.msra.mxu0 %v23309_v51  ;;  %v23311_v51 = vld [vmem:[%s29002_s5 + $0x98] sm:$0xff]  }
 0x478   : > { %v25423_v2 = vpop.f32.mrb[55].mxu1  ;;  %v25427_v61 = vld [vmem:[#allocation2 + $0x3c] sm:$0xf]  ;;  %v9616_v22 = vrot.slane %v9614_v18, 7  ;;  %v9599_v11 = vrot.slane %v9597_v19, 7  ;;  %v19160_v41 = vpack.c.bf16 %v9406_v33, %v9406_v33  ;;  %v19158_v37 = vpack.c.bf16 %v9404_v55, %v9404_v55  ;;  %20702 = vmatprep.subr.bf16.mxu0 %v23310_v56 }
 0x479   : > { %v9879_v34 = vld [vmem:[#allocation2 + $0x50] sm:$0x1]  ;;  %v9325_v59 = vadd.f32 %v25318_v16, %v25214_v57  ;;  %v9317_v12 = vadd.f32 %v25214_v57, %v25322_v3  ;;  %v9872_v55 = vld [vmem:[#allocation2 + $0x44] sm:$0x1]  ;;  %v25444_v9 = vld [vmem:[#allocation2 + $0x40] sm:$0xf] }
 0x47a   : > { %v9619_v5 = vor.u32 %v9617_v21, %v9616_v22  ;;  %v9621_v18 = vrot.slane %v9616_v22, 4  ;;  %v9602_v19 = vor.u32 %v9600_v32, %v9599_v11  ;;  %v9604_v33 = vrot.slane %v9599_v11, 4  ;;  %29241 = vst [vmem:[#allocation68_spill] sm:$0xff] %v25444_v9  ;;  %20671 = vmatmul.mubr.bf16.gmra.mrb[36].mxu0 %v25010_v13  ;;  %v25447_v16 = vld [vmem:[#allocation2 + $0x44] sm:$0x1]  ;;  %v25458_v11 = vpop.f32.mrb[56].mxu1 }
 0x47b   : > { %v9640_v54 = vshrl.u32 %v19160_v41, 16  ;;  %v9643_v31 = vshll.u32 %v19160_v41, 16  ;;  %v9623_v10 = vshrl.u32 %v19158_v37, 16  ;;  %v9626_v14 = vshll.u32 %v19158_v37, 16  ;;  %29242 = vst [vmem:[#allocation69_spill] sm:$0xff] %v25447_v16  ;;  %20674 = vmatprep.mubr.bf16.mxu0 %v25066_v53  ;;  %20703 = vmatpush3.bf16.msra.mxu0 %v23310_v56 }
 0x47c   : > { %v9620_v3 = vsel %vm23818_vm6, %v9612_v52, %v9619_v5  ;;  %v9880_v21 = vsel %vm23824_vm7, %v9621_v18, %v9879_v34  ;;  %v9603_v32 = vsel %vm23818_vm6, %v9595_v15, %v9602_v19  ;;  %v9873_v22 = vsel %vm23824_vm7, %v9604_v33, %v9872_v55  ;;  %v25460_v41 = vld [vmem:[#allocation2 + $0x4c] sm:$0xf]  ;;  %v25462_v37 = vld [vmem:[#allocation2 + $0x50] sm:$0x1]  ;;  %v25468_v18 = vpop.f32.mrb[57].mxu1  ;;  %20704 = vmatprep.subr.bf16.mxu0 %v23311_v51 }
 0x47d   : > { %29243 = vst [vmem:[#allocation70_spill] sm:$0xff] %v25460_v41  ;;  %29244 = vst [vmem:[#allocation71_spill] sm:$0xff] %v25462_v37  ;;  %v25464_v16 = vrot.slane %v9640_v54, 7  ;;  %v25466_v52 = vrot.slane %v9623_v10, 7  ;;  %v9407_v5 = vmax.f32 %v9325_v59, 0.0  ;;  %v9405_v34 = vmax.f32 %v9317_v12, 0.0 }
 0x47e   : > { %9871 = vst [vmem:[#allocation2 + $0x40] sm:$0xf] %v9603_v32  ;;  %9874 = vst [vmem:[#allocation2 + $0x44] sm:$0x1] %v9873_v22  ;;  %v9338_v15 = vadd.f32 %v25366_v24, %v25214_v57  ;;  %v9330_v19 = vadd.f32 %v25214_v57, %v25378_v40  ;;  %v9341_v54 = vadd.f32 %v25380_v63, %v25214_v57  ;;  %v25478_v56 = vpop.f32.mrb[58].mxu1  ;;  %v23312_v59 = vld [vmem:[%s29002_s5 + $0xa0] sm:$0xff]  }
 0x47f   : > { %9878 = vst [vmem:[#allocation2 + $0x4c] sm:$0xf] %v9620_v3  ;;  %9881 = vst [vmem:[#allocation2 + $0x50] sm:$0x1] %v9880_v21  ;;  %v9333_v10 = vadd.f32 %v25214_v57, %v25382_v7  ;;  %v25484_v12 = vor.u32 %v9643_v31, %v25464_v16  ;;  %v25488_v40 = vor.u32 %v9626_v14, %v25466_v52  ;;  %v25491_v33 = vpop.f32.mrb[59].mxu1  ;;  %v25502_v24 = vld [vmem:[%s29002_s5 + $0xa8] sm:$0xff]   ;;  %20705 = vmatpush3.bf16.msra.mxu0 %v23311_v51 }
 0x480   : > { %v25493_v7 = vld [vmem:[#allocation2 + $0x18] sm:$0xf]  ;;  %v25495_v55 = vld [vmem:[#allocation2 + $0x60] sm:$0xf]  ;;  %v25497_v3 = vld [vmem:[#allocation2 + $0x54] sm:$0xf]  ;;  %v19161_v21 = vpack.c.bf16 %v9407_v5, %v9407_v5  ;;  %v19159_v32 = vpack.c.bf16 %v9405_v34, %v9405_v34  ;;  %20706 = vmatprep.subr.bf16.mxu0 %v23312_v59 }
 0x481   : > { %29245 = vst [vmem:[#allocation72_spill] sm:$0xff] %v25493_v7  ;;  %v9410_v22 = vmax.f32 %v9338_v15, 0.0  ;;  %v9408_v31 = vmax.f32 %v9330_v19, 0.0  ;;  %v25504_v14 = vld [vmem:[#allocation2 + $0x24] sm:$0xf]  ;;  %v9411_v34 = vmax.f32 %v9341_v54, 0.0  ;;  %v29250_v54 = vsel %vm23811_vm5, %v25296_v25, %v25299_v17 }
 0x482   : > { %29246 = vst [vmem:[#allocation73_spill] sm:$0xff] %v25504_v14  ;;  %v9409_v15 = vmax.f32 %v9333_v10, 0.0  ;;  %v25514_v19 = vld [vmem:[#allocation2 + $0x30] sm:$0xf]  ;;  %v25516_v37 = vld [vmem:[#allocation2 + $0x3c] sm:$0xf]  ;;  %20675 = vmatmul.mubr.bf16.gmra.mrb[40].mxu0 %v25072_v29 }
 0x483   : > { %29247 = vst [vmem:[#allocation74_spill] sm:$0xff] %v25516_v37  ;;  %v25518_v41 = vld [vmem:[#allocation2 + $0x48] sm:$0xf]  ;;  %v25520_v9 = vld [vmem:[#allocation2 + $0x18] sm:$0xe]  ;;  %v9648_v14 = vshrl.u32 %v19161_v21, 16  ;;  %v19164_v10 = vpack.c.bf16 %v9410_v22, %v9410_v22  ;;  %v19162_v5 = vpack.c.bf16 %v9408_v31, %v9408_v31  ;;  %v25529_v37 = vpack.c.bf16 %v9411_v34, %v9411_v34  ;;  %20678 = vmatprep.mubr.bf16.mxu0 %v25101_v46 }
 0x484   : > { %29248 = vst [vmem:[#allocation75_spill] sm:$0xff] %v25518_v41  ;;  %29249 = vst [vmem:[#allocation76_spill] sm:$0xff] %v25520_v9  ;;  %v9651_v27 = vshll.u32 %v19161_v21, 16  ;;  %v9631_v7 = vshrl.u32 %v19159_v32, 16  ;;  %v9634_v63 = vshll.u32 %v19159_v32, 16  ;;  %v25531_v41 = vpack.c.bf16 %v9409_v15, %v9409_v15  ;;  %20707 = vmatpush3.bf16.msra.mxu0 %v23312_v59 }
 0x485   : > { %9849 = vst [vmem:[#allocation2 + $0x18] sm:$0xf] %v29250_v54  ;;  %v25527_v51 = vld [vmem:[#allocation2 + $0x24] sm:$0xe]  ;;  %v29252_v21 = vsel %vm23811_vm5, %v25351_v36, %v25361_v20  ;;  %v25539_v32 = vld [vmem:[#allocation2 + $0x30] sm:$0xe]  ;;  %v25547_v34 = vadd.f32 %v25405_v35, %v25214_v57  ;;  %v25551_v15 = vadd.f32 %v25214_v57, %v25412_v62  ;;  %v29256_v20 = vsel %vm23811_vm5, %v25339_v45, %v25348_v42 }
 0x486   : > { %29251 = vst [vmem:[#allocation77_spill] sm:$0xff] %v25527_v51  ;;  %9856 = vst [vmem:[#allocation2 + $0x24] sm:$0xf] %v29252_v21  ;;  %v25541_v25 = vld [vmem:[#allocation2 + $0x3c] sm:$0xe]  ;;  %v9650_v22 = vrot.slane %v9648_v14, 7  ;;  %v29257_v35 = vsel %vm23811_vm5, %v25421_v39, %v25427_v61  ;;  %v29258_v62 = vsel %vm23811_vm5, %v25419_v58, %v25425_v48  ;;  %20708 = vmatprep.subr.bf16.mxu0 %v25502_v24 }
 0x487   : > { %29253 = vst [vmem:[#allocation78_spill] sm:$0xff] %v25539_v32  ;;  %29254 = vst [vmem:[#allocation79_spill] sm:$0xff] %v25541_v25  ;;  %v25543_v17 = vld [vmem:[#allocation2 + $0x48] sm:$0xe]  ;;  %v9633_v31 = vrot.slane %v9631_v7, 7  ;;  %v25554_v36 = vpop.f32.mrb[60].mxu1 }
 0x488   : > { %29255 = vst [vmem:[#allocation80_spill] sm:$0xff] %v25543_v17  ;;  %9863 = vst [vmem:[#allocation2 + $0x30] sm:$0xf] %v29256_v20  ;;  %v9893_v7 = vld [vmem:[#allocation2 + $0x68] sm:$0x1]  ;;  %v9674_v54 = vshrl.u32 %v19164_v10, 16  ;;  %v9653_v42 = vor.u32 %v9651_v27, %v9650_v22  ;;  %20709 = vmatpush3.bf16.msra.mxu0 %v25502_v24 }
 0x489   : > { %9870 = vst [vmem:[#allocation2 + $0x3c] sm:$0xf] %v29257_v35  ;;  %9877 = vst [vmem:[#allocation2 + $0x48] sm:$0xf] %v29258_v62  ;;  %v9886_v14 = vld [vmem:[#allocation2 + $0x5c] sm:$0x1]  ;;  %v9636_v32 = vor.u32 %v9634_v63, %v9633_v31 }
 0x48a   : > { %v9677_v21 = vshll.u32 %v19164_v10, 16  ;;  %v9657_v17 = vshrl.u32 %v19162_v5, 16  ;;  %v9660_v25 = vshll.u32 %v19162_v5, 16  ;;  %v25571_v45 = vpop.f32.mrb[61].mxu1  ;;  %v9655_v20 = vrot.slane %v9650_v22, 4  ;;  %v23314_v48 = vld [vmem:[%s29002_s5 + $0xb0] sm:$0xff]   ;;  %20679 = vmatmul.mubr.bf16.gmra.mrb[44].mxu0 %v25114_v0 }
 0x48b   : > { %v9638_v39 = vrot.slane %v9633_v31, 4  ;;  %v25573_v61 = vpop.f32.mrb[62].mxu1  ;;  %v25579_v58 = vld [vmem:[#allocation2 + $0x54] sm:$0xf]  ;;  %v25581_v10 = vld [vmem:[#allocation2 + $0x58] sm:$0xf]  ;;  %20710 = vmatprep.subr.bf16.mxu0 %v23314_v48  ;;  %20682 = vmatprep.mubr.bf16.mxu0 %v25185_v23 }
 0x48c   : > { %29259 = vst [vmem:[#allocation81_spill] sm:$0xff] %v25581_v10  ;;  %v25583_v5 = vld [vmem:[#allocation2 + $0x5c] sm:$0x1]  ;;  %v25585_v35 = vld [vmem:[#allocation2 + $0x60] sm:$0xf]  ;;  %v9676_v63 = vrot.slane %v9674_v54, 7  ;;  %20711 = vmatpush3.bf16.msra.mxu0 %v23314_v48 }
 0x48d   : > { %29260 = vst [vmem:[#allocation82_spill] sm:$0xff] %v25583_v5  ;;  %29261 = vst [vmem:[#allocation83_spill] sm:$0xff] %v25585_v35  ;;  %v25587_v27 = vld [vmem:[#allocation2 + $0x64] sm:$0xf]  ;;  %v25589_v59 = vld [vmem:[#allocation2 + $0x68] sm:$0x1]  ;;  %v9894_v35 = vsel %vm23824_vm7, %v9655_v20, %v9893_v7  ;;  %v9887_v54 = vsel %vm23824_vm7, %v9638_v39, %v9886_v14  ;;  %v29268_v14 = vsel %vm23811_vm5, %v25488_v40, %v25497_v3 }
 0x48e   : > { %29262 = vst [vmem:[#allocation84_spill] sm:$0xff] %v25587_v27  ;;  %29263 = vst [vmem:[#allocation85_spill] sm:$0xff] %v25589_v59  ;;  %v25591_v22 = vrot.slane %v9657_v17, 7  ;;  %v9682_v31 = vshrl.u32 %v25529_v37, 16  ;;  %v9685_v62 = vshll.u32 %v25529_v37, 16  ;;  %v25595_v51 = vpop.f32.mrb[63].mxu1  ;;  %v9679_v7 = vor.u32 %v9677_v21, %v9676_v63 }
 0x48f   : > { %v29264_v9 = vrot.slane %v25464_v16, 4  ;;  %v29265_v27 = vrot.slane %v25466_v52, 4  ;;  %v9903_v59 = vld [vmem:[#allocation2 + $0x78] sm:$0xf]  ;;  %v25609_v37 = vld [vmem:[#allocation2 + $0x6c] sm:$0xf] }
 0x490   : > { %v25614_v16 = vld [vmem:[%s29002_s5 + $0xb8] sm:$0xff]   ;;  %v9680_v52 = vrot.slane %v9676_v63, 4  ;;  %v25621_v20 = vor.u32 %v9660_v25, %v25591_v22  ;;  %9888 = vst [vmem:[#allocation2 + $0x5c] sm:$0x1] %v9887_v54  ;;  %9895 = vst [vmem:[#allocation2 + $0x68] sm:$0x1] %v9894_v35  ;;  %v29269_v25 = vsel %vm23811_vm5, %v25484_v12, %v25495_v55  ;;  %v9904_v35 = vsel %vm23811_vm5, %v9679_v7, %v9903_v59 }
 0x491   : > { %v9654_v5 = vsel %vm23818_vm6, %v29264_v9, %v9653_v42  ;;  %v9637_v17 = vsel %vm23818_vm6, %v29265_v27, %v9636_v32  ;;  %v25616_v9 = vld [vmem:[#allocation2 + $0x54] sm:$0xe]  ;;  %v25618_v42 = vld [vmem:[#allocation2 + $0x60] sm:$0xe]  ;;  %v9663_v32 = vrot.slane %v25591_v22, 4  ;;  %v9684_v21 = vrot.slane %v9682_v31, 7  ;;  %20712 = vmatprep.subr.bf16.mxu0 %v25614_v16 }
 0x492   : > { %29266 = vst [vmem:[#allocation86_spill] sm:$0xff] %v25616_v9  ;;  %29267 = vst [vmem:[#allocation87_spill] sm:$0xff] %v25618_v42  ;;  %v9665_v39 = vshrl.u32 %v25531_v41, 16  ;;  %v9668_v24 = vshll.u32 %v25531_v41, 16  ;;  %v9897_v40 = vsel %vm23811_vm5, %v25621_v20, %v25609_v37  ;;  %v9907_v3 = vld [vmem:[#allocation2 + $0x80] sm:$0x1]  ;;  %v9357_v55 = vadd.f32 %v25417_v4, %v25214_v57  ;;  %20713 = vmatpush3.bf16.msra.mxu0 %v25614_v16 }
 0x493   : > { %9885 = vst [vmem:[#allocation2 + $0x58] sm:$0xf] %v9637_v17  ;;  %9892 = vst [vmem:[#allocation2 + $0x64] sm:$0xf] %v9654_v5  ;;  %v9414_v5 = vmax.f32 %v25547_v34, 0.0  ;;  %v9412_v12 = vmax.f32 %v25551_v15, 0.0  ;;  %v9687_v41 = vor.u32 %v9685_v62, %v9684_v21  ;;  %v9349_v15 = vadd.f32 %v25214_v57, %v25423_v2  ;;  %20683 = vmatmul.mubr.bf16.gmra.mrb[48].mxu0 %v25187_v47 }
 0x494   : > { %9884 = vst [vmem:[#allocation2 + $0x54] sm:$0xf] %v29268_v14  ;;  %9891 = vst [vmem:[#allocation2 + $0x60] sm:$0xf] %v29269_v25  ;;  %v9689_v27 = vrot.slane %v9684_v21, 4  ;;  %v9667_v34 = vrot.slane %v9665_v39, 7  ;;  %v9370_v4 = vadd.f32 %v25458_v11, %v25214_v57  ;;  %20686 = vmatprep.mubr.bf16.mxu0 %v25224_v50 }
 0x495   : > { %v19168_v63 = vpack.c.bf16 %v9414_v5, %v9414_v5  ;;  %v25649_v59 = vld [vmem:[#allocation2 + $0x7c] sm:$0xf]  ;;  %v25651_v22 = vld [vmem:[#allocation2 + $0x80] sm:$0x1]  ;;  %v9900_v31 = vld [vmem:[#allocation2 + $0x74] sm:$0x1]  ;;  %v19166_v17 = vpack.c.bf16 %v9412_v12, %v9412_v12  ;;  %v9688_v37 = vsel %vm23818_vm6, %v9680_v52, %v9687_v41 }
 0x496   : > { %v9415_v54 = vmax.f32 %v9357_v55, 0.0  ;;  %v25657_v62 = vld [vmem:[#allocation2 + $0x78] sm:$0xf]  ;;  %v9908_v7 = vsel %vm23824_vm7, %v9689_v27, %v9907_v3  ;;  %v9670_v20 = vor.u32 %v9668_v24, %v9667_v34  ;;  %v9672_v14 = vrot.slane %v9667_v34, 4  ;;  %v25667_v2 = vld [vmem:[%s29002_s5 + $0xc0] sm:$0xff]  }
 0x497   : > { %v9708_v25 = vshrl.u32 %v19168_v63, 16  ;;  %v9711_v11 = vshll.u32 %v19168_v63, 16  ;;  %v9691_v48 = vshrl.u32 %v19166_v17, 16  ;;  %v9694_v21 = vshll.u32 %v19166_v17, 16  ;;  %v25669_v39 = vld [vmem:[#allocation2 + $0x6c] sm:$0xf]  ;;  %20746 = vmatprep.subr.bf16.mxu0 %v25667_v2 }
 0x498   : > { %9906 = vst [vmem:[#allocation2 + $0x7c] sm:$0xf] %v9688_v37  ;;  %9909 = vst [vmem:[#allocation2 + $0x80] sm:$0x1] %v9908_v7  ;;  %v25671_v52 = vld [vmem:[#allocation2 + $0x78] sm:$0xe]  ;;  %v9671_v24 = vsel %vm23818_vm6, %v9663_v32, %v9670_v20  ;;  %v9901_v5 = vsel %vm23824_vm7, %v9672_v14, %v9900_v31  ;;  %v19169_v3 = vpack.c.bf16 %v9415_v54, %v9415_v54 }
 0x499   : > { %29270 = vst [vmem:[#allocation88_spill] sm:$0xff] %v25671_v52  ;;  %v9413_v12 = vmax.f32 %v9349_v15, 0.0  ;;  %v25677_v55 = vld [vmem:[#allocation2 + $0x70] sm:$0xf]  ;;  %v25679_v41 = vld [vmem:[#allocation2 + $0x74] sm:$0x1]  ;;  %v9362_v17 = vadd.f32 %v25214_v57, %v25468_v18 }
 0x49a   : > { %29271 = vst [vmem:[#allocation89_spill] sm:$0xff] %v25677_v55  ;;  %9905 = vst [vmem:[#allocation2 + $0x78] sm:$0xf] %v9904_v35  ;;  %v9710_v27 = vrot.slane %v9708_v25, 7  ;;  %v9693_v34 = vrot.slane %v9691_v48, 7  ;;  %v9418_v63 = vmax.f32 %v9370_v4, 0.0  ;;  %v9373_v35 = vadd.f32 %v25478_v56, %v25214_v57 }
 0x49b   : > { %9899 = vst [vmem:[#allocation2 + $0x70] sm:$0xf] %v9671_v24  ;;  %9902 = vst [vmem:[#allocation2 + $0x74] sm:$0x1] %v9901_v5  ;;  %v25684_v32 = vld [vmem:[#allocation2 + $0x6c] sm:$0xe]  ;;  %v19167_v7 = vpack.c.bf16 %v9413_v12, %v9413_v12  ;;  %20687 = vmatmul.mubr.bf16.gmra.mrb[52].mxu0 %v25234_v26 }
 0x49c   : > { %29272 = vst [vmem:[#allocation90_spill] sm:$0xff] %v25684_v32  ;;  %v9917_v31 = vld [vmem:[#allocation2 + $0x90] sm:$0xf]  ;;  %v9910_v54 = vld [vmem:[#allocation2 + $0x84] sm:$0xf]  ;;  %v9716_v15 = vshrl.u32 %v19169_v3, 16  ;;  %v9713_v4 = vor.u32 %v9711_v11, %v9710_v27  ;;  %v9696_v18 = vor.u32 %v9694_v21, %v9693_v34  ;;  %v19172_v24 = vpack.c.bf16 %v9418_v63, %v9418_v63  ;;  %20690 = vmatprep.mubr.bf16.mxu0 %v25274_v28 }
 0x49d   : > { %v9719_v37 = vshll.u32 %v19169_v3, 16  ;;  %9898 = vst [vmem:[#allocation2 + $0x6c] sm:$0xf] %v9897_v40  ;;  %v9714_v20 = vrot.slane %v9710_v27, 4  ;;  %v9697_v14 = vrot.slane %v9693_v34, 4  ;;  %v9699_v25 = vshrl.u32 %v19167_v7, 16 }
 0x49e   : > { %v9718_v16 = vrot.slane %v9716_v15, 7  ;;  %v9702_v48 = vshll.u32 %v19167_v7, 16  ;;  %v9918_v5 = vsel %vm23811_vm5, %v9713_v4, %v9917_v31  ;;  %v9911_v56 = vsel %vm23811_vm5, %v9696_v18, %v9910_v54  ;;  %v9921_v3 = vld [vmem:[#allocation2 + $0x98] sm:$0x1]  ;;  %v25695_v12 = vld [vmem:[#allocation2 + $0x90] sm:$0xf] }
 0x49f   : > { %v9416_v40 = vmax.f32 %v9362_v17, 0.0  ;;  %v9419_v11 = vmax.f32 %v9373_v35, 0.0  ;;  %v9701_v34 = vrot.slane %v9699_v25, 7  ;;  %v9742_v15 = vshrl.u32 %v19172_v24, 16  ;;  %v25697_v52 = vld [vmem:[#allocation2 + $0x84] sm:$0xf] }
 0x4a0   : > { %v9721_v21 = vor.u32 %v9719_v37, %v9718_v16  ;;  %v9723_v27 = vrot.slane %v9718_v16, 4  ;;  %v25699_v63 = vld [vmem:[#allocation2 + $0x94] sm:$0xf]  ;;  %v9914_v7 = vld [vmem:[#allocation2 + $0x8c] sm:$0x1]  ;;  %v9745_v32 = vshll.u32 %v19172_v24, 16  ;;  %v9365_v54 = vadd.f32 %v25214_v57, %v25491_v33 }
 0x4a1   : > { %v19170_v42 = vpack.c.bf16 %v9416_v40, %v9416_v40  ;;  %v19173_v31 = vpack.c.bf16 %v9419_v11, %v9419_v11  ;;  %v25703_v4 = vld [vmem:[#allocation2 + $0x90] sm:$0xe]  ;;  %v9704_v35 = vor.u32 %v9702_v48, %v9701_v34  ;;  %v9706_v18 = vrot.slane %v9701_v34, 4  ;;  %v25709_v16 = vld [vmem:[#allocation2 + $0x88] sm:$0xf] }
 0x4a2   : > { %29273 = vst [vmem:[#allocation91_spill] sm:$0xff] %v25703_v4  ;;  %v9722_v17 = vsel %vm23818_vm6, %v9714_v20, %v9721_v21  ;;  %v9922_v37 = vsel %vm23824_vm7, %v9723_v27, %v9921_v3  ;;  %v25711_v25 = vld [vmem:[#allocation2 + $0x8c] sm:$0x1]  ;;  %v25713_v24 = vld [vmem:[#allocation2 + $0x98] sm:$0x1]  ;;  %v9744_v57 = vrot.slane %v9742_v15, 7 }
 0x4a3   : > { %29274 = vst [vmem:[#allocation92_spill] sm:$0xff] %v25713_v24  ;;  %v25715_v40 = vld [vmem:[#allocation2 + $0x84] sm:$0xe]  ;;  %9919 = vst [vmem:[#allocation2 + $0x90] sm:$0xf] %v9918_v5  ;;  %v9725_v33 = vshrl.u32 %v19170_v42, 16  ;;  %v9705_v20 = vsel %vm23818_vm6, %v9697_v14, %v9704_v35  ;;  %v9915_v48 = vsel %vm23824_vm7, %v9706_v18, %v9914_v7  ;;  %20691 = vmatmul.mubr.bf16.gmra.mrb[56].mxu0 %v25282_v6 }
 0x4a4   : > { %29275 = vst [vmem:[#allocation93_spill] sm:$0xff] %v25715_v40  ;;  %v9728_v11 = vshll.u32 %v19170_v42, 16  ;;  %v9750_v4 = vshrl.u32 %v19173_v31, 16  ;;  %9920 = vst [vmem:[#allocation2 + $0x94] sm:$0xf] %v9722_v17  ;;  %v9753_v3 = vshll.u32 %v19173_v31, 16  ;;  %v9747_v27 = vor.u32 %v9745_v32, %v9744_v57  ;;  %20694 = vmatprep.mubr.bf16.mxu0 %v25332_v60 }
 0x4a5   : > { %9923 = vst [vmem:[#allocation2 + $0x98] sm:$0x1] %v9922_v37  ;;  %9912 = vst [vmem:[#allocation2 + $0x84] sm:$0xf] %v9911_v56  ;;  %v9417_v21 = vmax.f32 %v9365_v54, 0.0  ;;  %v9748_v34 = vrot.slane %v9744_v57, 4 }
 0x4a6   : > { %v9727_v9 = vrot.slane %v9725_v33, 7  ;;  %v9752_v40 = vrot.slane %v9750_v4, 7  ;;  %9913 = vst [vmem:[#allocation2 + $0x88] sm:$0xf] %v9705_v20  ;;  %9916 = vst [vmem:[#allocation2 + $0x8c] sm:$0x1] %v9915_v48 }
 0x4a7   : > { %v9931_v42 = vld [vmem:[#allocation2 + $0xa8] sm:$0xf]  ;;  %v9924_v5 = vld [vmem:[#allocation2 + $0x9c] sm:$0xf]  ;;  %v19171_v15 = vpack.c.bf16 %v9417_v21, %v9417_v21  ;;  %v23546_v14 = vld [vmem:[%s28999_s2] ss:$0 sm:$0xff] }
 0x4a8   : > { %v9386_v56 = vadd.f32 %v23546_v14, %v25554_v36  ;;  %v9378_v7 = vadd.f32 %v23546_v14, %v25571_v45  ;;  %v9389_v32 = vadd.f32 %v23546_v14, %v25573_v61  ;;  %v9932_v31 = vsel %vm23811_vm5, %v9747_v27, %v9931_v42  ;;  %v9935_v37 = vld [vmem:[#allocation2 + $0xb0] sm:$0x1]  ;;  %v25731_v35 = vld [vmem:[#allocation2 + $0xa8] sm:$0xf]  ;;  %v25733_v36 = vld [vmem:[#allocation2 + $0x9c] sm:$0xf] }
 0x4a9   : > { %v9730_v54 = vor.u32 %v9728_v11, %v9727_v9  ;;  %v9731_v4 = vrot.slane %v9727_v9, 4  ;;  %v9755_v17 = vor.u32 %v9753_v3, %v9752_v40  ;;  %v9757_v18 = vrot.slane %v9752_v40, 4  ;;  %v25735_v45 = vld [vmem:[#allocation2 + $0xac] sm:$0xf]  ;;  %v25741_v3 = vld [vmem:[#allocation2 + $0xa8] sm:$0xe] }
 0x4aa   : > { %v9733_v57 = vshrl.u32 %v19171_v15, 16  ;;  %v9736_v33 = vshll.u32 %v19171_v15, 16  ;;  %v9422_v20 = vmax.f32 %v9386_v56, 0.0  ;;  %29276 = vst [vmem:[#allocation94_spill] sm:$0xff] %v25735_v45  ;;  %v9420_v11 = vmax.f32 %v9378_v7, 0.0  ;;  %29277 = vst [vmem:[#allocation95_spill] sm:$0xff] %v25741_v3 }
 0x4ab   : > { %v9925_v61 = vsel %vm23811_vm5, %v9730_v54, %v9924_v5  ;;  %v9756_v48 = vsel %vm23818_vm6, %v9748_v34, %v9755_v17  ;;  %v9423_v9 = vmax.f32 %v9389_v32, 0.0  ;;  %v9936_v40 = vsel %vm23824_vm7, %v9757_v18, %v9935_v37  ;;  %v25746_v15 = vld [vmem:[#allocation2 + $0xb0] sm:$0x1]  ;;  %v25748_v56 = vld [vmem:[#allocation2 + $0x9c] sm:$0xe] }
 0x4ac   : > { %v9735_v21 = vrot.slane %v9733_v57, 7  ;;  %v19176_v27 = vpack.c.bf16 %v9422_v20, %v9422_v20  ;;  %v9381_v42 = vadd.f32 %v23546_v14, %v25595_v51  ;;  %29278 = vst [vmem:[#allocation96_spill] sm:$0xff] %v25746_v15  ;;  %9934 = vst [vmem:[#allocation2 + $0xac] sm:$0xf] %v9756_v48  ;;  %v19174_v5 = vpack.c.bf16 %v9420_v11, %v9420_v11  ;;  %v9928_v32 = vld [vmem:[#allocation2 + $0xa4] sm:$0x1] }
 0x4ad   : > { %29279 = vst [vmem:[#allocation97_spill] sm:$0xff] %v25748_v56  ;;  %9933 = vst [vmem:[#allocation2 + $0xa8] sm:$0xf] %v9932_v31  ;;  %v19177_v54 = vpack.c.bf16 %v9423_v9, %v9423_v9  ;;  %v9945_v11 = vld [vmem:[#allocation2 + $0xc0] sm:$0xf] }
 0x4ae   : > { %9937 = vst [vmem:[#allocation2 + $0xb0] sm:$0x1] %v9936_v40  ;;  %9926 = vst [vmem:[#allocation2 + $0x9c] sm:$0xf] %v9925_v61  ;;  %v9738_v34 = vor.u32 %v9736_v33, %v9735_v21  ;;  %v9740_v7 = vrot.slane %v9735_v21, 4  ;;  %v9776_v17 = vshrl.u32 %v19176_v27, 16 }
 0x4af   : > { %v9779_v3 = vshll.u32 %v19176_v27, 16  ;;  %v9759_v37 = vshrl.u32 %v19174_v5, 16  ;;  %v9762_v18 = vshll.u32 %v19174_v5, 16  ;;  %v9784_v57 = vshrl.u32 %v19177_v54, 16  ;;  %v25756_v33 = vld [vmem:[#allocation2 + $0xa0] sm:$0xf] }
 0x4b0   : > { %v9787_v20 = vshll.u32 %v19177_v54, 16  ;;  %v9739_v51 = vsel %vm23818_vm6, %v9731_v4, %v9738_v34  ;;  %v9929_v14 = vsel %vm23824_vm7, %v9740_v7, %v9928_v32  ;;  %v9778_v31 = vrot.slane %v9776_v17, 7  ;;  %29280 = vst [vmem:[#allocation98_spill] sm:$0xff] %v25756_v33  ;;  %v25758_v61 = vld [vmem:[#allocation2 + $0xa4] sm:$0x1] }
 0x4b1   : > { %v9421_v48 = vmax.f32 %v9381_v42, 0.0  ;;  %v9761_v9 = vrot.slane %v9759_v37, 7  ;;  %v9786_v40 = vrot.slane %v9784_v57, 7  ;;  %9927 = vst [vmem:[#allocation2 + $0xa0] sm:$0xf] %v9739_v51  ;;  %v25762_v17 = vld [vmem:[#allocation2 + $0xc0] sm:$0xff]  }
 0x4b2   : > { %9930 = vst [vmem:[#allocation2 + $0xa4] sm:$0x1] %v9929_v14  ;;  %v9781_v21 = vor.u32 %v9779_v3, %v9778_v31  ;;  %v9782_v27 = vrot.slane %v9778_v31, 4  ;;  %v9938_v5 = vld [vmem:[#allocation2 + $0xb4] sm:$0xf]  ;;  %20695 = vmatmul.mubr.bf16.gmra.mrb[60].mxu0 %v25762_v17 }
 0x4b3   : > { %v9949_v4 = vld [vmem:[#allocation2 + $0xc8] sm:$0x1]  ;;  %v19175_v54 = vpack.c.bf16 %v9421_v48, %v9421_v48  ;;  %v25760_v34 = vld [vmem:[#allocation2 + $0xc0] sm:$0xf]  ;;  %v9764_v7 = vor.u32 %v9762_v18, %v9761_v9  ;;  %v9789_v42 = vor.u32 %v9787_v20, %v9786_v40  ;;  %v9791_v32 = vrot.slane %v9786_v40, 4  ;;  %20714 = vmatprep.mubr.bf16.mxu0 %v24936_v38  ;;  %v23319_v38 = vld [vmem:[%s29002_s5 + $0xd0] sm:$0xff]  }
 0x4b4   : > { %v25764_v56 = vld [vmem:[#allocation2 + $0xb4] sm:$0xf]  ;;  %v25766_v15 = vld [vmem:[#allocation2 + $0xc4] sm:$0xf]  ;;  %v9946_v37 = vsel %vm23811_vm5, %v9781_v21, %v9945_v11  ;;  %v25770_v51 = vld [vmem:[#allocation2 + $0xc8] sm:$0x1] }
 0x4b5   : > { %v9767_v57 = vshrl.u32 %v19175_v54, 16  ;;  %v9770_v3 = vshll.u32 %v19175_v54, 16  ;;  %v25772_v14 = vld [vmem:[#allocation2 + $0xc0] sm:$0xe]  ;;  %v9939_v18 = vsel %vm23811_vm5, %v9764_v7, %v9938_v5  ;;  %v9790_v20 = vsel %vm23818_vm6, %v9782_v27, %v9789_v42  ;;  %v25780_v48 = vld [vmem:[#allocation2 + $0xb4] sm:$0xe] }
 0x4b6   : > { %29281 = vst [vmem:[#allocation99_spill] sm:$0xff] %v25772_v14  ;;  %v9950_v31 = vsel %vm23824_vm7, %v9791_v32, %v9949_v4  ;;  %29282 = vst [vmem:[#allocation100_spill] sm:$0xff] %v25780_v48  ;;  %v9765_v40 = vrot.slane %v9761_v9, 4  ;;  %v9942_v5 = vld [vmem:[#allocation2 + $0xbc] sm:$0x1]  ;;  %v23318_v42 = vld [vmem:[%s29002_s5 + $0xc8] sm:$0xff]  }
 0x4b7   : > { %9947 = vst [vmem:[#allocation2 + $0xc0] sm:$0xf] %v9946_v37  ;;  %v9769_v11 = vrot.slane %v9767_v57, 7  ;;  %9948 = vst [vmem:[#allocation2 + $0xc4] sm:$0xf] %v9790_v20  ;;  %v23320_v32 = vld [vmem:[%s29002_s5 + $0xd8] sm:$0xff]  }
 0x4b8   : > { %9951 = vst [vmem:[#allocation2 + $0xc8] sm:$0x1] %v9950_v31  ;;  %9940 = vst [vmem:[#allocation2 + $0xb4] sm:$0xf] %v9939_v18  ;;  %v25788_v7 = vld [vmem:[#allocation2 + $0xb8] sm:$0xf] }
 0x4b9   : > { %v9772_v21 = vor.u32 %v9770_v3, %v9769_v11  ;;  %v9774_v54 = vrot.slane %v9769_v11, 4  ;;  %v25790_v9 = vld [vmem:[#allocation2 + $0xbc] sm:$0x1]  ;;  %v25834_v20 = vld [vmem:[#allocation2 + $0x8] sm:$0x1] }
 0x4ba   : > { %20715 = vmatmul.mubr.bf16.vlgmr.msra.gmra.mrb[32].mxu0 %v25008_v43  ;;  %v23321_v43 = vld [vmem:[%s29002_s5 + $0xe0] sm:$0xff]   ;;  %29283 = vst [vmem:[#allocation101_spill] sm:$0xff] %v25834_v20 }
 0x4bb   : > { %v9773_v27 = vsel %vm23818_vm6, %v9765_v40, %v9772_v21  ;;  %v9943_v4 = vsel %vm23824_vm7, %v9774_v54, %v9942_v5  ;;  %20747 = vmatpush3.bf16.msra.mxu0 %v25667_v2  ;;  %20718 = vmatprep.mubr.bf16.mxu0 %v25010_v13  ;;  %v23322_v13 = vld [vmem:[%s29002_s5 + $0xe8] sm:$0xff]   ;;  %v25827_v2 = vld [vmem:[#allocation2 + $0x4] sm:$0xf]  ;;  %v6657_v21 = vshll.u32 %v25834_v20, 16  ;;  %v6662_v54 = vshrl.u32 %v25308_v1, 16 }
 0x4bc   : > { %9941 = vst [vmem:[#allocation2 + $0xb8] sm:$0xf] %v9773_v27  ;;  %9944 = vst [vmem:[#allocation2 + $0xbc] sm:$0x1] %v9943_v4  ;;  %20748 = vmatprep.subr.bf16.mxu0 %v23318_v42  ;;  %v6647_v3 = vshll.u32 %v25827_v2, 16  ;;  %v6651_v18 = vshrl.u32 %v25827_v2, 16 }
 0x4bd   : > { %v6665_v27 = vshll.u32 %v25308_v1, 16  ;;  %v6671_v4 = vshll.u32 %v25328_v49, 16  ;;  %v29287_v14 = vld [vmem:[#allocation63_spill] sm:$0xff]  ;;  %v29292_v20 = vld [vmem:[#allocation68_spill] sm:$0xff] }
 0x4be   : > { %v6649_v31 = vrot.slane %v6647_v3, 5  ;;  %v6653_v40 = vrot.slane %v6651_v18, 4 }
 0x4bf   : > { %20749 = vmatpush3.bf16.msra.mxu0 %v23318_v42  ;;  %v29284_v42 = vld [vmem:[#allocation72_spill] sm:$0xff] }
 0x4c0   : > { %20750 = vmatprep.subr.bf16.mxu0 %v23319_v38  ;;  %v6654_v5 = vor.u32 %v6653_v40, %v6649_v31 }
 0x4c2   : > { %20719 = vmatmul.mubr.bf16.gmra.mrb[36].mxu0 %v25066_v53  ;;  %v23323_v53 = vld [vmem:[%s29002_s5 + $0xf0] sm:$0xff]   ;;  %v6655_v1 = vrot.slane %v6654_v5, 4 }
 0x4c3   : > { %20722 = vmatprep.mubr.bf16.mxu0 %v25072_v29  ;;  %20751 = vmatpush3.bf16.msra.mxu0 %v23319_v38  ;;  %v23324_v29 = vld [vmem:[%s29002_s5 + $0xf8] sm:$0xff]   ;;  %v6689_v38 = vshll.u32 %v29284_v42, 16 }
 0x4c4   : > { %20752 = vmatprep.subr.bf16.mxu0 %v23320_v32 }
 0x4c7   : > { %20753 = vmatpush3.bf16.msra.mxu0 %v23320_v32  ;;  %v29285_v32 = vld [vmem:[#allocation60_spill] sm:$0xff] }
 0x4c8   : > { %20754 = vmatprep.subr.bf16.mxu0 %v23321_v43 }
 0x4ca   : > { %20723 = vmatmul.mubr.bf16.gmra.mrb[40].mxu0 %v25101_v46  ;;  %v6583_v46 = vld [vmem:[#allocation2] sm:$0xf] }
 0x4cb   : > { %20726 = vmatprep.mubr.bf16.mxu0 %v25114_v0  ;;  %20755 = vmatpush3.bf16.msra.mxu0 %v23321_v43  ;;  %v25825_v0 = vld [vmem:[%s29002_s5 + $0x100] sm:$0xff]   ;;  %v6638_v37 = vshrl.u32 %v6583_v46, 16  ;;  %v6641_v57 = vshll.u32 %v6583_v46, 16  ;;  %v6695_v43 = vshll.u32 %v29285_v32, 16  ;;  %v6664_v46 = vrot.slane %v6662_v54, 4 }
 0x4cc   : > { %20756 = vmatprep.subr.bf16.mxu0 %v23322_v13  ;;  %v29288_v54 = vld [vmem:[#allocation62_spill] sm:$0xff] }
 0x4cd   : > { %v6705_v5 = vshll.u32 %v29288_v54, 16 }
 0x4cf   : > { %20757 = vmatpush3.bf16.msra.mxu0 %v23322_v13  ;;  %v6699_v13 = vshrl.u32 %v29285_v32, 16 }
 0x4d0   : > { %20758 = vmatprep.subr.bf16.mxu0 %v23323_v53 }
 0x4d1   : > { %v6701_v40 = vrot.slane %v6699_v13, 4  ;;  %v6737_v13 = vshll.u32 %v25514_v19, 16 }
 0x4d2   : > { %20727 = vmatmul.mubr.bf16.gmra.mrb[44].mxu0 %v25185_v23  ;;  %v6643_v23 = vrot.slane %v6641_v57, 5  ;;  %v6673_v57 = vrot.slane %v6671_v4, 5 }
 0x4d3   : > { %20730 = vmatprep.mubr.bf16.mxu0 %v25187_v47  ;;  %20759 = vmatpush3.bf16.msra.mxu0 %v23323_v53  ;;  %v6640_v47 = vrot.slane %v6638_v37, 4  ;;  %v6667_v37 = vrot.slane %v6665_v27, 5  ;;  %v29289_v27 = vld [vmem:[#allocation73_spill] sm:$0xff]  ;;  %v6739_v32 = vrot.slane %v6737_v13, 5  ;;  %v29295_v13 = vld [vmem:[#allocation67_spill] sm:$0xff] }
 0x4d4   : > { %20760 = vmatprep.subr.bf16.mxu0 %v23324_v29  ;;  %v6710_v4 = vshrl.u32 %v29289_v27, 16 }
 0x4d5   : > { %v6644_v11 = vor.u32 %v6643_v23, %v6640_v47  ;;  %v6691_v47 = vrot.slane %v6689_v38, 5  ;;  %v6697_v23 = vrot.slane %v6695_v43, 5  ;;  %v6668_v8 = vor.u32 %v6667_v37, %v6664_v46 }
 0x4d6   : > { %v6734_v43 = vshrl.u32 %v25514_v19, 16  ;;  %v6712_v48 = vrot.slane %v6710_v4, 4  ;;  %v29294_v4 = vld [vmem:[#allocation74_spill] sm:$0xff] }
 0x4d7   : > { %20761 = vmatpush3.bf16.msra.mxu0 %v23324_v29  ;;  %v6645_v53 = vrot.slane %v6644_v11, 4  ;;  %v6659_v29 = vrot.slane %v6657_v21, 5  ;;  %v6702_v21 = vor.u32 %v6701_v40, %v6697_v23  ;;  %v6707_v40 = vrot.slane %v6705_v5, 5 }
 0x4d8   : > { %20794 = vmatprep.subr.bf16.mxu0 %v25825_v0 }
 0x4d9   : > { %v6650_v44 = vsel %vm24192_vm10, %v6645_v53, %v6649_v31  ;;  %v29291_v53 = vld [vmem:[#allocation66_spill] sm:$0xff] }
 0x4da   : > { %20731 = vmatmul.mubr.bf16.gmra.mrb[48].mxu0 %v25224_v50  ;;  %v6675_v50 = vshrl.u32 %v25328_v49, 16  ;;  %v6747_v46 = vshrl.u32 %v29291_v53, 16 }
 0x4db   : > { %20734 = vmatprep.mubr.bf16.mxu0 %v25234_v26  ;;  %v6686_v26 = vshrl.u32 %v29284_v42, 16 }
 0x4dc   : > { %v6677_v3 = vrot.slane %v6675_v50, 4  ;;  %v6713_v50 = vshll.u32 %v29289_v27, 16  ;;  %v23325_v27 = vld [vmem:[#allocation2 + $0xcc] sm:$0xff]   ;;  %v6749_v49 = vrot.slane %v6747_v46, 4 }
 0x4dd   : > { %v6688_v18 = vrot.slane %v6686_v26, 4  ;;  %v29290_v26 = vld [vmem:[#allocation64_spill] sm:$0xff] }
 0x4de   : > { %v6678_v30 = vor.u32 %v6677_v3, %v6673_v57  ;;  %v6719_v38 = vshll.u32 %v29290_v26, 16  ;;  %v6723_v31 = vshrl.u32 %v29290_v26, 16  ;;  %v6715_v26 = vrot.slane %v6713_v50, 5 }
 0x4df   : > { %v6692_v11 = vor.u32 %v6691_v47, %v6688_v18  ;;  %v6703_v47 = vrot.slane %v6702_v21, 4  ;;  %v6758_v50 = vshrl.u32 %v29294_v4, 16 }
 0x4e0   : > { %v25863_v54 = vrot.slane %v6719_v38, 5  ;;  %v6716_v21 = vor.u32 %v6715_v26, %v6712_v48  ;;  %v6761_v38 = vshll.u32 %v29294_v4, 16 }
 0x4e1   : > { %v6693_v18 = vrot.slane %v6692_v11, 4 }
 0x4e2   : > { %20735 = vmatmul.mubr.bf16.gmra.mrb[52].mxu0 %v25274_v28  ;;  %v6681_v28 = vshll.u32 %v29287_v14, 16  ;;  %v6736_v14 = vrot.slane %v6734_v43, 4 }
 0x4e3   : > { %20738 = vmatprep.mubr.bf16.mxu0 %v25282_v6  ;;  %v6660_v6 = vsel %vm24192_vm10, %v6655_v1, %v6659_v29  ;;  %v6743_v29 = vshll.u32 %v29291_v53, 16  ;;  %v6669_v1 = vrot.slane %v6668_v8, 4  ;;  %v6767_v53 = vshll.u32 %v29292_v20, 16 }
 0x4e4   : > { %v6683_v37 = vrot.slane %v6681_v28, 5  ;;  %v18228_v3 = vcombine.low %v6650_v44, %v6660_v6  ;;  %v6708_v28 = vsel %vm24192_vm10, %v6703_v47, %v6707_v40  ;;  %v29293_v6 = vld [vmem:[#allocation65_spill] sm:$0xff]  ;;  %v6717_v40 = vrot.slane %v6716_v21, 4 }
 0x4e5   : > { %v25865_v19 = vrot.slane %v6743_v29, 5  ;;  %v6674_v8 = vsel %vm24192_vm10, %v6669_v1, %v6673_v57  ;;  %v6729_v11 = vshll.u32 %v29293_v6, 16  ;;  %v6698_v57 = vsel %vm24192_vm10, %v6693_v18, %v6697_v23  ;;  %v29297_v18 = vld [vmem:[#allocation75_spill] sm:$0xff] }
 0x4e6   : > { %v6753_v29 = vshll.u32 %v29295_v13, 16  ;;  %v25883_v46 = vrot.slane %v6767_v53, 5  ;;  %v25889_v47 = vcombine.low %v6698_v57, %v6708_v28  ;;  %v6760_v23 = vrot.slane %v6758_v50, 4 }
 0x4e7   : > { %v6750_v43 = vor.u32 %v6749_v49, %v25865_v19  ;;  %v6785_v53 = vshll.u32 %v29297_v18, 16  ;;  %v6809_v21 = vshll.u32 %v25579_v58, 16  ;;  %v6819_v50 = vshrl.u32 %v25581_v10, 16 }
 0x4e8   : > { %v6755_v4 = vrot.slane %v6753_v29, 5 }
 0x4e9   : > { %v6751_v49 = vrot.slane %v6750_v43, 4  ;;  %v29298_v43 = vld [vmem:[#allocation69_spill] sm:$0xff] }
 0x4ea   : > { %20739 = vmatmul.mubr.bf16.gmra.mrb[56].mxu0 %v25332_v60  ;;  %v6679_v60 = vrot.slane %v6678_v30, 4  ;;  %v6771_v30 = vshrl.u32 %v29292_v20, 16  ;;  %v6777_v29 = vshll.u32 %v29298_v43, 16 }
 0x4eb   : > { %20742 = vmatprep.mubr.bf16.mxu0 %v25762_v17  ;;  %v6725_v17 = vrot.slane %v6723_v31, 4  ;;  %v6740_v31 = vor.u32 %v6739_v32, %v6736_v14  ;;  %v6763_v14 = vrot.slane %v6761_v38, 5  ;;  %v6722_v38 = vsel %vm24192_vm10, %v6717_v40, %v25863_v54 }
 0x4ec   : > { %v6684_v44 = vsel %vm24192_vm10, %v6679_v60, %v6683_v37  ;;  %v6773_v1 = vrot.slane %v6771_v30, 4  ;;  %v29296_v60 = vld [vmem:[#allocation70_spill] sm:$0xff]  ;;  %v23327_v30 = vld [vmem:[%s29002_s5 + $0x108] sm:$0xff]  }
 0x4ed   : > { %v6726_v5 = vor.u32 %v6725_v17, %v25863_v54  ;;  %v6791_v48 = vshll.u32 %v29296_v60, 16  ;;  %v6795_v26 = vshrl.u32 %v29296_v60, 16  ;;  %v25887_v37 = vcombine.low %v6674_v8, %v6684_v44  ;;  %v23328_v54 = vld [vmem:[%s29002_s5 + $0x110] sm:$0xff]  }
 0x4ee   : > { %v6741_v32 = vrot.slane %v6740_v31, 4  ;;  %v6782_v17 = vshrl.u32 %v29297_v18, 16  ;;  %v6774_v8 = vor.u32 %v6773_v1, %v25883_v46  ;;  %v6764_v31 = vor.u32 %v6763_v14, %v6760_v23 }
 0x4ef   : > { %v25897_v44 = vrot.slane %v6791_v48, 5  ;;  %v6797_v28 = vrot.slane %v6795_v26, 4  ;;  %v6756_v1 = vsel %vm24192_vm10, %v6751_v49, %v6755_v4  ;;  %v6787_v26 = vrot.slane %v6785_v53, 5  ;;  %v29300_v53 = vld [vmem:[#allocation83_spill] sm:$0xff] }
 0x4f0   : > { %v6784_v48 = vrot.slane %v6782_v17, 4  ;;  %v6811_v18 = vrot.slane %v6809_v21, 5  ;;  %v6765_v49 = vrot.slane %v6764_v31, 4  ;;  %v6779_v17 = vrot.slane %v6777_v29, 5 }
 0x4f1   : > { %v6798_v40 = vor.u32 %v6797_v28, %v25897_v44  ;;  %v6830_v4 = vshrl.u32 %v29300_v53, 16  ;;  %v29301_v28 = vld [vmem:[#allocation71_spill] sm:$0xff] }
 0x4f2   : > { %20743 = vmatmul.mubr.bf16.gmra.mrb[60].mxu0 %v23325_v27  ;;  %v6727_v27 = vrot.slane %v6726_v5, 4  ;;  %v6815_v5 = vshll.u32 %v25581_v10, 16  ;;  %v6833_v10 = vshll.u32 %v29300_v53, 16  ;;  %v6801_v60 = vshll.u32 %v29301_v28, 16 }
 0x4f3   : > { %20762 = vmatprep.mubr.bf16.mxu0 %v18228_v3  ;;  %v6731_v3 = vrot.slane %v6729_v11, 5  ;;  %v6806_v11 = vshrl.u32 %v25579_v58, 16  ;;  %v6746_v58 = vsel %vm24192_vm10, %v6741_v32, %v25865_v19  ;;  %v6821_v32 = vrot.slane %v6819_v50, 4 }
 0x4f4   : > { %v25923_v19 = vrot.slane %v6815_v5, 5  ;;  %v6788_v21 = vor.u32 %v6787_v26, %v6784_v48  ;;  %v23329_v5 = vld [vmem:[%s29002_s5 + $0x118] sm:$0xff]   ;;  %v6799_v29 = vrot.slane %v6798_v40, 4  ;;  %v6832_v48 = vrot.slane %v6830_v4, 4 }
 0x4f5   : > { %v6732_v57 = vsel %vm24192_vm10, %v6727_v27, %v6731_v3  ;;  %v6775_v3 = vrot.slane %v6774_v8, 4  ;;  %v6808_v14 = vrot.slane %v6806_v11, 4  ;;  %v25929_v8 = vcombine.low %v6746_v58, %v6756_v1 }
 0x4f6   : > { %v25927_v43 = vcombine.low %v6722_v38, %v6732_v57  ;;  %v29302_v57 = vld [vmem:[#allocation82_spill] sm:$0xff]  ;;  %v6770_v1 = vsel %vm24192_vm10, %v6765_v49, %v25883_v46  ;;  %v6835_v26 = vrot.slane %v6833_v10, 5  ;;  %v6854_v40 = vshrl.u32 %v25669_v39, 16 }
 0x4f7   : > { %v6780_v11 = vsel %vm24192_vm10, %v6775_v3, %v6779_v17  ;;  %v6812_v38 = vor.u32 %v6811_v18, %v6808_v14  ;;  %v6825_v58 = vshll.u32 %v29302_v57, 16  ;;  %v6789_v14 = vrot.slane %v6788_v21, 4  ;;  %v23330_v46 = vld [vmem:[%s29002_s5 + $0x120] sm:$0xff]  }
 0x4f8   : > { %v25946_v3 = vcombine.low %v6770_v1, %v6780_v11  ;;  %v6863_v10 = vshll.u32 %v25677_v55, 16  ;;  %v6836_v53 = vor.u32 %v6835_v26, %v6832_v48  ;;  %v6887_v11 = vshll.u32 %v25649_v59, 16  ;;  %v23331_v48 = vld [vmem:[%s29002_s5 + $0x128] sm:$0xff]  }
 0x4f9   : > { %v6827_v17 = vrot.slane %v6825_v58, 5  ;;  %v6891_v21 = vshrl.u32 %v25649_v59, 16  ;;  %v6878_v57 = vshrl.u32 %v25657_v62, 16 }
 0x4fa   : > { %20763 = vmatmul.mubr.bf16.vlgmr.msra.gmra.mrb[32].mxu0 %v25887_v37 }
 0x4fb   : > { %20795 = vmatpush3.bf16.msra.mxu0 %v25825_v0  ;;  %20766 = vmatprep.mubr.bf16.mxu0 %v25889_v47  ;;  %v29299_v0 = vld [vmem:[#allocation84_spill] sm:$0xff] }
 0x4fc   : > { %20796 = vmatprep.subr.bf16.mxu0 %v23327_v30  ;;  %v6839_v27 = vshll.u32 %v29299_v0, 16  ;;  %v6843_v23 = vshrl.u32 %v29299_v0, 16 }
 0x4fe   : > { %v25937_v50 = vrot.slane %v6839_v27, 5  ;;  %v6845_v31 = vrot.slane %v6843_v23, 4  ;;  %v6803_v27 = vrot.slane %v6801_v60, 5  ;;  %v6857_v23 = vshll.u32 %v25669_v39, 16  ;;  %v29303_v39 = vld [vmem:[#allocation85_spill] sm:$0xff] }
 0x4ff   : > { %20797 = vmatpush3.bf16.msra.mxu0 %v23327_v30  ;;  %v6822_v30 = vor.u32 %v6821_v32, %v25923_v19  ;;  %v6867_v32 = vshrl.u32 %v25677_v55, 16  ;;  %v6813_v60 = vrot.slane %v6812_v38, 4  ;;  %v6849_v4 = vshll.u32 %v29303_v39, 16 }
 0x500   : > { %20798 = vmatprep.subr.bf16.mxu0 %v23328_v54  ;;  %v6846_v18 = vor.u32 %v6845_v31, %v25937_v50  ;;  %v6856_v31 = vrot.slane %v6854_v40, 4  ;;  %v6859_v1 = vrot.slane %v6857_v23, 5  ;;  %v6881_v55 = vshll.u32 %v25657_v62, 16 }
 0x501   : > { %v6823_v49 = vrot.slane %v6822_v30, 4  ;;  %v25966_v30 = vrot.slane %v6863_v10, 5  ;;  %v6869_v58 = vrot.slane %v6867_v32, 4  ;;  %v6818_v62 = vsel %vm24192_vm10, %v6813_v60, %v25923_v19  ;;  %v23332_v19 = vld [vmem:[%s29002_s5 + $0x130] sm:$0xff]  }
 0x502   : > { %20767 = vmatmul.mubr.bf16.gmra.mrb[36].mxu0 %v25927_v43  ;;  %v6847_v38 = vrot.slane %v6846_v18, 4  ;;  %v6893_v40 = vrot.slane %v6891_v21, 4  ;;  %v6837_v23 = vrot.slane %v6836_v53, 4  ;;  %v6880_v18 = vrot.slane %v6878_v57, 4 }
 0x503   : > { %20770 = vmatprep.mubr.bf16.mxu0 %v25929_v8  ;;  %20799 = vmatpush3.bf16.msra.mxu0 %v23328_v54  ;;  %v6804_v54 = vsel %vm24192_vm10, %v6799_v29, %v6803_v27  ;;  %v6794_v29 = vsel %vm24192_vm10, %v6789_v14, %v25897_v44  ;;  %v6828_v26 = vsel %vm24192_vm10, %v6823_v49, %v6827_v17  ;;  %v6851_v44 = vrot.slane %v6849_v4, 5 }
 0x504   : > { %20800 = vmatprep.subr.bf16.mxu0 %v23329_v5  ;;  %v25979_v27 = vrot.slane %v6887_v11, 5  ;;  %v6860_v14 = vor.u32 %v6859_v1, %v6856_v31  ;;  %v6883_v10 = vrot.slane %v6881_v55, 5  ;;  %v25982_v32 = vcombine.low %v6818_v62, %v6828_v26  ;;  %v23333_v62 = vld [vmem:[%s29002_s5 + $0x138] sm:$0xff]  }
 0x505   : > { %v6870_v49 = vor.u32 %v6869_v58, %v25966_v30  ;;  %v6902_v60 = vshrl.u32 %v25697_v52, 16  ;;  %v6905_v17 = vshll.u32 %v25697_v52, 16  ;;  %v6915_v55 = vshrl.u32 %v25709_v16, 16 }
 0x506   : > { %v6873_v57 = vshll.u32 %v25679_v41, 16  ;;  %v6894_v53 = vor.u32 %v6893_v40, %v25979_v27  ;;  %v6935_v4 = vshll.u32 %v25699_v63, 16  ;;  %v6939_v11 = vshrl.u32 %v25699_v63, 16 }
 0x507   : > { %20801 = vmatpush3.bf16.msra.mxu0 %v23329_v5  ;;  %v25971_v5 = vcombine.low %v6794_v29, %v6804_v54  ;;  %v6852_v54 = vsel %vm24192_vm10, %v6847_v38, %v6851_v44  ;;  %v6842_v21 = vsel %vm24192_vm10, %v6837_v23, %v25937_v50  ;;  %v6861_v31 = vrot.slane %v6860_v14, 4 }
 0x508   : > { %20802 = vmatprep.subr.bf16.mxu0 %v23330_v46  ;;  %v6884_v1 = vor.u32 %v6883_v10, %v6880_v18  ;;  %v6897_v52 = vshll.u32 %v25651_v22, 16  ;;  %v26002_v29 = vcombine.low %v6842_v21, %v6852_v54  ;;  %v6871_v38 = vrot.slane %v6870_v49, 4 }
 0x509   : > { %v6926_v58 = vshrl.u32 %v25695_v12, 16  ;;  %v6929_v26 = vshll.u32 %v25695_v12, 16  ;;  %v6904_v44 = vrot.slane %v6902_v60, 4  ;;  %v6907_v40 = vrot.slane %v6905_v17, 5 }
 0x50a   : > { %20771 = vmatmul.mubr.bf16.gmra.mrb[40].mxu0 %v25946_v3  ;;  %v6917_v23 = vrot.slane %v6915_v55, 4  ;;  %v6895_v14 = vrot.slane %v6894_v53, 4  ;;  %v26012_v18 = vrot.slane %v6935_v4, 5  ;;  %v6941_v10 = vrot.slane %v6939_v11, 4 }
 0x50b   : > { %20774 = vmatprep.mubr.bf16.mxu0 %v25971_v5  ;;  %20803 = vmatpush3.bf16.msra.mxu0 %v23330_v46  ;;  %v6911_v46 = vshll.u32 %v25709_v16, 16  ;;  %v6866_v12 = vsel %vm24192_vm10, %v6861_v31, %v25966_v30  ;;  %v6885_v54 = vrot.slane %v6884_v1, 4  ;;  %v6899_v49 = vrot.slane %v6897_v52, 5 }
 0x50c   : > { %20804 = vmatprep.subr.bf16.mxu0 %v23331_v48  ;;  %v6921_v17 = vshll.u32 %v25711_v25, 16  ;;  %v6931_v55 = vrot.slane %v6929_v26, 5  ;;  %v6908_v53 = vor.u32 %v6907_v40, %v6904_v44  ;;  %v6959_v30 = vshll.u32 %v25756_v33, 16 }
 0x50d   : > { %v26009_v50 = vrot.slane %v6911_v46, 5  ;;  %v6928_v46 = vrot.slane %v6926_v58, 4  ;;  %v6900_v11 = vsel %vm24192_vm10, %v6895_v14, %v6899_v49  ;;  %v6942_v21 = vor.u32 %v6941_v10, %v26012_v18 }
 0x50e   : > { %v6983_v31 = vshll.u32 %v25735_v45, 16  ;;  %v6987_v1 = vshrl.u32 %v25735_v45, 16  ;;  %v6950_v58 = vshrl.u32 %v25733_v36, 16  ;;  %v6953_v26 = vshll.u32 %v25733_v36, 16 }
 0x50f   : > { %20805 = vmatpush3.bf16.msra.mxu0 %v23331_v48  ;;  %v6875_v48 = vrot.slane %v6873_v57, 5  ;;  %v26024_v57 = vld [vmem:[%s29002_s5 + $0x140] sm:$0xff]   ;;  %v6918_v4 = vor.u32 %v6917_v23, %v26009_v50  ;;  %v6932_v44 = vor.u32 %v6931_v55, %v6928_v46  ;;  %v6945_v40 = vshll.u32 %v25713_v24, 16 }
 0x510   : > { %20806 = vmatprep.subr.bf16.mxu0 %v23332_v19  ;;  %v6974_v23 = vshrl.u32 %v25731_v35, 16  ;;  %v6985_v36 = vrot.slane %v6983_v31, 5  ;;  %v6952_v46 = vrot.slane %v6950_v58, 4  ;;  %v6955_v55 = vrot.slane %v6953_v26, 5 }
 0x511   : > { %v6876_v60 = vsel %vm24192_vm10, %v6871_v38, %v6875_v48  ;;  %v6890_v38 = vsel %vm24192_vm10, %v6885_v54, %v25979_v27  ;;  %v6977_v48 = vshll.u32 %v25731_v35, 16  ;;  %v6919_v10 = vrot.slane %v6918_v4, 4 }
 0x512   : > { %20775 = vmatmul.mubr.bf16.gmra.mrb[44].mxu0 %v25982_v32  ;;  %v26034_v52 = vcombine.low %v6866_v12, %v6876_v60  ;;  %v26045_v14 = vcombine.low %v6890_v38, %v6900_v11  ;;  %v6961_v12 = vrot.slane %v6959_v30, 5  ;;  %v6909_v27 = vrot.slane %v6908_v53, 4 }
 0x513   : > { %20778 = vmatprep.mubr.bf16.mxu0 %v26002_v29  ;;  %20807 = vmatpush3.bf16.msra.mxu0 %v23332_v19  ;;  %v6963_v19 = vshrl.u32 %v25756_v33, 16  ;;  %v6943_v54 = vrot.slane %v6942_v21, 4  ;;  %v6923_v60 = vrot.slane %v6921_v17, 5  ;;  %v6933_v45 = vrot.slane %v6932_v44, 4 }
 0x514   : > { %20808 = vmatprep.subr.bf16.mxu0 %v23333_v62  ;;  %v6947_v35 = vrot.slane %v6945_v40, 5  ;;  %v6976_v33 = vrot.slane %v6974_v23, 4  ;;  %v6979_v24 = vrot.slane %v6977_v48, 5  ;;  %v7011_v53 = vshrl.u32 %v25788_v7, 16  ;;  %v29304_v23 = vld [vmem:[#allocation96_spill] sm:$0xff] }
 0x515   : > { %v6965_v49 = vrot.slane %v6963_v19, 4  ;;  %v6924_v4 = vsel %vm24192_vm10, %v6919_v10, %v6923_v60  ;;  %v7007_v19 = vshll.u32 %v25788_v7, 16  ;;  %v6914_v11 = vsel %vm24192_vm10, %v6909_v27, %v26009_v50 }
 0x516   : > { %v6948_v17 = vsel %vm24192_vm10, %v6943_v54, %v6947_v35  ;;  %v6956_v31 = vor.u32 %v6955_v55, %v6952_v46  ;;  %v6998_v38 = vshrl.u32 %v25764_v56, 16  ;;  %v7001_v58 = vshll.u32 %v25764_v56, 16 }
 0x517   : > { %20809 = vmatpush3.bf16.msra.mxu0 %v23333_v62  ;;  %v6989_v62 = vrot.slane %v6987_v1, 4  ;;  %v6966_v30 = vor.u32 %v6965_v49, %v6961_v12  ;;  %v6969_v1 = vshll.u32 %v25758_v61, 16  ;;  %v26061_v26 = vcombine.low %v6914_v11, %v6924_v4 }
 0x518   : > { %20842 = vmatprep.subr.bf16.mxu0 %v26024_v57  ;;  %v6938_v44 = vsel %vm24192_vm10, %v6933_v45, %v26012_v18  ;;  %v6980_v40 = vor.u32 %v6979_v24, %v6976_v33  ;;  %v6993_v50 = vshll.u32 %v29304_v23, 16  ;;  %v7009_v49 = vrot.slane %v7007_v19, 5 }
 0x519   : > { %v6990_v21 = vor.u32 %v6989_v62, %v6985_v36  ;;  %v26067_v48 = vcombine.low %v6938_v44, %v6948_v17  ;;  %v6967_v10 = vrot.slane %v6966_v30, 4  ;;  %v7013_v27 = vrot.slane %v7011_v53, 4  ;;  %v23339_v44 = vld [vmem:[%s29002_s5 + $0x168] sm:$0xff]  }
 0x51a   : > { %20779 = vmatmul.mubr.bf16.gmra.mrb[48].mxu0 %v26034_v52  ;;  %v6957_v56 = vrot.slane %v6956_v31, 4  ;;  %v6971_v62 = vrot.slane %v6969_v1, 5  ;;  %v7000_v60 = vrot.slane %v6998_v38, 4  ;;  %v7003_v46 = vrot.slane %v7001_v58, 5  ;;  %v23336_v58 = vld [vmem:[%s29002_s5 + $0x150] sm:$0xff]  }
 0x51b   : > { %20782 = vmatprep.mubr.bf16.mxu0 %v26045_v14  ;;  %v6991_v54 = vrot.slane %v6990_v21, 4  ;;  %v6981_v55 = vrot.slane %v6980_v40, 4  ;;  %v6995_v35 = vrot.slane %v6993_v50, 5  ;;  %v7014_v45 = vor.u32 %v7013_v27, %v7009_v49  ;;  %v23340_v40 = vld [vmem:[%s29002_s5 + $0x170] sm:$0xff]   ;;  %v23341_v50 = vld [vmem:[%s29002_s5 + $0x178] sm:$0xff]  }
 0x51c   : > { %v6972_v24 = vsel %vm24192_vm10, %v6967_v10, %v6971_v62  ;;  %v6962_v18 = vsel %vm24192_vm10, %v6957_v56, %v6961_v12  ;;  %v7004_v4 = vor.u32 %v7003_v46, %v7000_v60  ;;  %v7017_v30 = vshll.u32 %v25790_v9, 16  ;;  %v23342_v10 = vld [vmem:[%s29002_s5 + $0x180] sm:$0xff]  }
 0x51d   : > { %v6996_v33 = vsel %vm24192_vm10, %v6991_v54, %v6995_v35  ;;  %v26078_v19 = vcombine.low %v6962_v18, %v6972_v24  ;;  %v6986_v53 = vsel %vm24192_vm10, %v6981_v55, %v6985_v36  ;;  %v7015_v17 = vrot.slane %v7014_v45, 4  ;;  %v23335_v36 = vld [vmem:[%s29002_s5 + $0x148] sm:$0xff]  }
 0x51e   : > { %v26082_v11 = vcombine.low %v6986_v53, %v6996_v33  ;;  %v7005_v21 = vrot.slane %v7004_v4, 4  ;;  %v7019_v31 = vrot.slane %v7017_v30, 5  ;;  %v7357_v27 = vshrl.u32 %v25766_v15, 16 }
 0x51f   : > { %v7344_v54 = vshrl.u32 %v25760_v34, 16  ;;  %v7347_v56 = vshll.u32 %v25760_v34, 16  ;;  %v7363_v45 = vshll.u32 %v25770_v51, 16 }
 0x520   : > { %v7020_v12 = vsel %vm24192_vm10, %v7015_v17, %v7019_v31  ;;  %v7010_v1 = vsel %vm24192_vm10, %v7005_v21, %v7009_v49  ;;  %v7353_v49 = vshll.u32 %v25766_v15, 16  ;;  %v7359_v60 = vrot.slane %v7357_v27, 4  ;;  %v23343_v17 = vld [vmem:[%s29002_s5 + $0x188] sm:$0xff]   ;;  %v23344_v21 = vld [vmem:[%s29002_s5 + $0x190] sm:$0xff]  }
 0x521   : > { %v26090_v38 = vcombine.low %v7010_v1, %v7020_v12  ;;  %v7346_v46 = vrot.slane %v7344_v54, 4  ;;  %v7349_v55 = vrot.slane %v7347_v56, 5  ;;  %v7365_v4 = vrot.slane %v7363_v45, 5  ;;  %v26175_v31 = vld [vmem:[#allocation2 + $0xd0] sm:$0xf] }
 0x522   : > { %20783 = vmatmul.mubr.bf16.gmra.mrb[52].mxu0 %v26061_v26  ;;  %v7355_v62 = vrot.slane %v7353_v49, 5 }
 0x523   : > { %20786 = vmatprep.mubr.bf16.mxu0 %v26067_v48  ;;  %v7350_v24 = vor.u32 %v7349_v55, %v7346_v46 }
 0x524   : > { %v7360_v35 = vor.u32 %v7359_v60, %v7355_v62  ;;  %v29305_v60 = vld [vmem:[#allocation101_spill] sm:$0xff] }
 0x525   : > { %v7351_v18 = vrot.slane %v7350_v24, 4  ;;  %v7986_v46 = vrot.slane %v29305_v60, 5  ;;  %v29307_v24 = vld [vmem:[#allocation61_spill] sm:$0xff]  ;;  %v8018_v60 = vrot.slane %v29292_v20, 5 }
 0x526   : > { %v7361_v33 = vrot.slane %v7360_v35, 4  ;;  %v7990_v45 = vrot.slane %v29307_v24, 5  ;;  %v23353_v20 = vld [vmem:[%s29002_s5 + $0x1d8] sm:$0xff]  }
 0x527   : > { %v7356_v30 = vsel %vm24192_vm10, %v7351_v18, %v7355_v62  ;;  %v29308_v18 = vld [vmem:[#allocation60_spill] sm:$0xff] }
 0x528   : > { %v7366_v34 = vsel %vm24192_vm10, %v7361_v33, %v7365_v4  ;;  %v7997_v4 = vrot.slane %v29308_v18, 5  ;;  %v29318_v18 = vld [vmem:[#allocation69_spill] sm:$0xff] }
 0x529   : > { %v18268_v53 = vcombine.low %v7356_v30, %v7366_v34 }
 0x52a   : > { %20787 = vmatmul.mubr.bf16.gmra.mrb[56].mxu0 %v26078_v19  ;;  %v7999_v30 = vrot.slane %v7997_v4, 4 }
 0x52b   : > { %20790 = vmatprep.mubr.bf16.mxu0 %v26082_v11 }
 0x532   : > { %20791 = vmatmul.mubr.bf16.gmra.mrb[60].mxu0 %v26090_v38 }
 0x533   : > { %20810 = vmatprep.mubr.bf16.mxu0 %v25887_v37  ;;  %v23337_v37 = vld [vmem:[%s29002_s5 + $0x158] sm:$0xff]  }
 0x53a   : > { %20811 = vmatmul.mubr.bf16.vlgmr.msra.gmra.mrb[32].mxu0 %v25889_v47 }
 0x53b   : > { %20843 = vmatpush3.bf16.msra.mxu0 %v26024_v57  ;;  %20814 = vmatprep.mubr.bf16.mxu0 %v25927_v43  ;;  %v23338_v57 = vld [vmem:[%s29002_s5 + $0x160] sm:$0xff]  }
 0x53c   : > { %20844 = vmatprep.subr.bf16.mxu0 %v23335_v36 }
 0x53f   : > { %20845 = vmatpush3.bf16.msra.mxu0 %v23335_v36 }
 0x540   : > { %20846 = vmatprep.subr.bf16.mxu0 %v23336_v58 }
 0x542   : > { %20815 = vmatmul.mubr.bf16.gmra.mrb[36].mxu0 %v25929_v8 }
 0x543   : > { %20818 = vmatprep.mubr.bf16.mxu0 %v25946_v3  ;;  %20847 = vmatpush3.bf16.msra.mxu0 %v23336_v58 }
 0x544   : > { %20848 = vmatprep.subr.bf16.mxu0 %v23337_v37 }
 0x547   : > { %20849 = vmatpush3.bf16.msra.mxu0 %v23337_v37 }
 0x548   : > { %20850 = vmatprep.subr.bf16.mxu0 %v23338_v57 }
 0x54a   : > { %20819 = vmatmul.mubr.bf16.gmra.mrb[40].mxu0 %v25971_v5 }
 0x54b   : > { %20822 = vmatprep.mubr.bf16.mxu0 %v25982_v32  ;;  %20851 = vmatpush3.bf16.msra.mxu0 %v23338_v57 }
 0x54c   : > { %20852 = vmatprep.subr.bf16.mxu0 %v23339_v44 }
 0x54f   : > { %20853 = vmatpush3.bf16.msra.mxu0 %v23339_v44  ;;  %v26181_v44 = vld [vmem:[#allocation2 + $0xd4] sm:$0x1] }
 0x550   : > { %20854 = vmatprep.subr.bf16.mxu0 %v23340_v40 }
 0x552   : > { %20823 = vmatmul.mubr.bf16.gmra.mrb[44].mxu0 %v26002_v29 }
 0x553   : > { %20826 = vmatprep.mubr.bf16.mxu0 %v26034_v52  ;;  %20855 = vmatpush3.bf16.msra.mxu0 %v23340_v40 }
 0x554   : > { %20856 = vmatprep.subr.bf16.mxu0 %v23341_v50 }
 0x557   : > { %20857 = vmatpush3.bf16.msra.mxu0 %v23341_v50  ;;  %v7983_v50 = vrot.slane %v25827_v2, 5 }
 0x558   : > { %20890 = vmatprep.subr.bf16.mxu0 %v23342_v10 }
 0x559   : > { %v7985_v62 = vrot.slane %v7983_v50, 4 }
 0x55a   : > { %20827 = vmatmul.mubr.bf16.gmra.mrb[48].mxu0 %v26045_v14 }
 0x55b   : > { %20830 = vmatprep.mubr.bf16.mxu0 %v26061_v26  ;;  %v7987_v35 = vsel %vm24568_vm13, %v7985_v62, %v7986_v46  ;;  %v29316_v46 = vld [vmem:[#allocation78_spill] sm:$0xff] }
 0x562   : > { %20831 = vmatmul.mubr.bf16.gmra.mrb[52].mxu0 %v26067_v48 }
 0x563   : > { %20834 = vmatprep.mubr.bf16.mxu0 %v26078_v19 }
 0x56a   : > { %20835 = vmatmul.mubr.bf16.gmra.mrb[56].mxu0 %v26082_v11 }
 0x56b   : > { %20838 = vmatprep.mubr.bf16.mxu0 %v26090_v38 }
 0x572   : > { %20839 = vmatmul.mubr.bf16.gmra.mrb[60].mxu0 %v18268_v53 }
 0x573   : > { %20858 = vmatprep.mubr.bf16.mxu0 %v25889_v47  ;;  %v23345_v47 = vld [vmem:[%s29002_s5 + $0x198] sm:$0xff]  }
 0x57a   : > { %20859 = vmatmul.mubr.bf16.vlgmr.msra.gmra.mrb[32].mxu0 %v25927_v43  ;;  %v23346_v43 = vld [vmem:[%s29002_s5 + $0x1a0] sm:$0xff]  }
 0x57b   : > { %20891 = vmatpush3.bf16.msra.mxu0 %v23342_v10  ;;  %20862 = vmatprep.mubr.bf16.mxu0 %v25929_v8  ;;  %v23347_v8 = vld [vmem:[%s29002_s5 + $0x1a8] sm:$0xff]   ;;  %v7915_v10 = vld [vmem:[#allocation2] sm:$0xe] }
 0x57c   : > { %20892 = vmatprep.subr.bf16.mxu0 %v23343_v17  ;;  %v18302_v56 = vrot.slane %v7915_v10, 9  ;;  %v8007_v10 = vrot.slane %v29293_v6, 5  ;;  %v29317_v6 = vld [vmem:[#allocation70_spill] sm:$0xff] }
 0x57e   : > { %v7984_v2 = vsel %vm24568_vm13, %v18302_v56, %v7983_v50 }
 0x57f   : > { %20893 = vmatpush3.bf16.msra.mxu0 %v23343_v17  ;;  %v18334_v34 = vcombine.low %v7984_v2, %v7987_v35 }
 0x580   : > { %20894 = vmatprep.subr.bf16.mxu0 %v23344_v21 }
 0x582   : > { %20863 = vmatmul.mubr.bf16.gmra.mrb[36].mxu0 %v25946_v3  ;;  %v23348_v3 = vld [vmem:[%s29002_s5 + $0x1b0] sm:$0xff]  }
 0x583   : > { %20866 = vmatprep.mubr.bf16.mxu0 %v25971_v5  ;;  %20895 = vmatpush3.bf16.msra.mxu0 %v23344_v21  ;;  %v23349_v5 = vld [vmem:[%s29002_s5 + $0x1b8] sm:$0xff]  }
 0x584   : > { %20896 = vmatprep.subr.bf16.mxu0 %v23345_v47  ;;  %v29310_v21 = vld [vmem:[#allocation62_spill] sm:$0xff] }
 0x587   : > { %20897 = vmatpush3.bf16.msra.mxu0 %v23345_v47  ;;  %v8000_v47 = vrot.slane %v29310_v21, 5  ;;  %v29320_v21 = vld [vmem:[#allocation81_spill] sm:$0xff] }
 0x588   : > { %20898 = vmatprep.subr.bf16.mxu0 %v23346_v43 }
 0x58a   : > { %20867 = vmatmul.mubr.bf16.gmra.mrb[40].mxu0 %v25982_v32  ;;  %v23350_v32 = vld [vmem:[%s29002_s5 + $0x1c0] sm:$0xff]  }
 0x58b   : > { %20870 = vmatprep.mubr.bf16.mxu0 %v26002_v29  ;;  %20899 = vmatpush3.bf16.msra.mxu0 %v23346_v43  ;;  %v6634_v29 = vld [vmem:[#allocation2 + $0xcc] sm:$0xf]  ;;  %v29311_v43 = vld [vmem:[#allocation59_spill] sm:$0xff] }
 0x58c   : > { %20900 = vmatprep.subr.bf16.mxu0 %v23347_v8  ;;  %v7630_v12 = vshrl.u32 %v6634_v29, 16  ;;  %v7633_v1 = vshll.u32 %v6634_v29, 16 }
 0x58e   : > { %v7632_v36 = vrot.slane %v7630_v12, 4  ;;  %v7635_v58 = vrot.slane %v7633_v1, 5  ;;  %v29313_v12 = vld [vmem:[#allocation76_spill] sm:$0xff] }
 0x58f   : > { %20901 = vmatpush3.bf16.msra.mxu0 %v23347_v8  ;;  %v18303_v8 = vrot.slane %v29311_v43, 9  ;;  %v18304_v1 = vrot.slane %v29313_v12, 9  ;;  %v29321_v43 = vld [vmem:[#allocation80_spill] sm:$0xff] }
 0x590   : > { %20902 = vmatprep.subr.bf16.mxu0 %v23348_v3  ;;  %v7636_v40 = vor.u32 %v7635_v58, %v7632_v36 }
 0x591   : > { %v7991_v58 = vsel %vm24568_vm13, %v18303_v8, %v7990_v45  ;;  %v18308_v8 = vrot.slane %v29321_v43, 9  ;;  %v29328_v43 = vld [vmem:[#allocation92_spill] sm:$0xff] }
 0x592   : > { %20871 = vmatmul.mubr.bf16.gmra.mrb[44].mxu0 %v26034_v52  ;;  %v7639_v52 = vshll.u32 %v26175_v31, 16  ;;  %v7637_v49 = vrot.slane %v7636_v40, 4  ;;  %v23351_v40 = vld [vmem:[%s29002_s5 + $0x1c8] sm:$0xff]  }
 0x593   : > { %20874 = vmatprep.mubr.bf16.mxu0 %v26045_v14  ;;  %20903 = vmatpush3.bf16.msra.mxu0 %v23348_v3  ;;  %v7643_v14 = vshrl.u32 %v26175_v31, 16 }
 0x594   : > { %20904 = vmatprep.subr.bf16.mxu0 %v23349_v5  ;;  %v7641_v37 = vrot.slane %v7639_v52, 5  ;;  %v8001_v52 = vsel %vm24568_vm13, %v7999_v30, %v8000_v47  ;;  %v29319_v30 = vld [vmem:[#allocation79_spill] sm:$0xff]  ;;  %v8032_v47 = vrot.slane %v29320_v21, 5 }
 0x595   : > { %v7645_v57 = vrot.slane %v7643_v14, 4  ;;  %v29314_v14 = vld [vmem:[#allocation66_spill] sm:$0xff] }
 0x596   : > { %v8011_v36 = vrot.slane %v29314_v14, 5  ;;  %v8034_v14 = vrot.slane %v8032_v47, 4 }
 0x597   : > { %20905 = vmatpush3.bf16.msra.mxu0 %v23349_v5  ;;  %v29312_v5 = vld [vmem:[#allocation64_spill] sm:$0xff] }
 0x598   : > { %20938 = vmatprep.subr.bf16.mxu0 %v23350_v32  ;;  %v8004_v29 = vrot.slane %v29312_v5, 5  ;;  %v8013_v50 = vrot.slane %v8011_v36, 4  ;;  %v8039_v5 = vrot.slane %v29299_v0, 5 }
 0x59a   : > { %20875 = vmatmul.mubr.bf16.gmra.mrb[48].mxu0 %v26061_v26  ;;  %v7646_v26 = vor.u32 %v7645_v57, %v7641_v37  ;;  %v7998_v57 = vsel %vm24568_vm13, %v18304_v1, %v7997_v4  ;;  %v8021_v4 = vrot.slane %v29318_v18, 5  ;;  %v23355_v1 = vld [vmem:[%s29002_s5 + $0x1e8] sm:$0xff]   ;;  %v8041_v0 = vrot.slane %v8039_v5, 4 }
 0x59b   : > { %20878 = vmatprep.mubr.bf16.mxu0 %v26067_v48  ;;  %v7649_v48 = vshll.u32 %v26181_v44, 16 }
 0x59c   : > { %v7647_v27 = vrot.slane %v7646_v26, 4  ;;  %v26218_v26 = vcombine.low %v7998_v57, %v8001_v52  ;;  %v8042_v57 = vrot.slane %v29303_v39, 5 }
 0x59d   : > { %v7651_v54 = vrot.slane %v7649_v48, 5  ;;  %v8006_v48 = vrot.slane %v8004_v29, 4 }
 0x59f   : > { %v8008_v62 = vsel %vm24568_vm13, %v8006_v48, %v8007_v10  ;;  %v29323_v48 = vld [vmem:[#allocation86_spill] sm:$0xff] }
 0x5a2   : > { %20879 = vmatmul.mubr.bf16.gmra.mrb[52].mxu0 %v26078_v19  ;;  %v7642_v19 = vsel %vm24192_vm10, %v7637_v49, %v7641_v37  ;;  %v8014_v49 = vrot.slane %v29295_v13, 5 }
 0x5a3   : > { %20882 = vmatprep.mubr.bf16.mxu0 %v26082_v11  ;;  %v7652_v11 = vsel %vm24192_vm10, %v7647_v27, %v7651_v54  ;;  %v23352_v27 = vld [vmem:[%s29002_s5 + $0x1d0] sm:$0xff]  }
 0x5a4   : > { %v18293_v33 = vcombine.low %v7642_v19, %v7652_v11  ;;  %v29315_v54 = vld [vmem:[#allocation77_spill] sm:$0xff]  ;;  %v8015_v19 = vsel %vm24568_vm13, %v8013_v50, %v8014_v49  ;;  %v8025_v11 = vrot.slane %v29317_v6, 5  ;;  %v18309_v50 = vrot.slane %v29323_v48, 9 }
 0x5a5   : > { %v18305_v56 = vrot.slane %v29315_v54, 9  ;;  %v29324_v49 = vld [vmem:[#allocation89_spill] sm:$0xff]  ;;  %v29325_v54 = vld [vmem:[#allocation87_spill] sm:$0xff] }
 0x5a6   : > { %v8026_v12 = vsel %vm24568_vm13, %v18308_v8, %v8025_v11  ;;  %v8033_v39 = vsel %vm24568_vm13, %v18309_v50, %v8032_v47  ;;  %v8070_v8 = vrot.slane %v29328_v43, 5  ;;  %v29336_v43 = vld [vmem:[#allocation99_spill] sm:$0xff] }
 0x5a7   : > { %v8005_v13 = vsel %vm24568_vm13, %v18305_v56, %v8004_v29  ;;  %v18310_v56 = vrot.slane %v29325_v54, 9  ;;  %v8084_v54 = vrot.slane %v29304_v23, 5 }
 0x5a8   : > { %v26237_v2 = vcombine.low %v8005_v13, %v8008_v62  ;;  %v8043_v62 = vsel %vm24568_vm13, %v8041_v0, %v8042_v57  ;;  %v8049_v13 = vrot.slane %v25679_v41, 5 }
 0x5aa   : > { %20883 = vmatmul.mubr.bf16.gmra.mrb[56].mxu0 %v26090_v38  ;;  %v7992_v38 = vrot.slane %v7990_v45, 4  ;;  %v8020_v45 = vrot.slane %v8018_v60, 4 }
 0x5ab   : > { %20886 = vmatprep.mubr.bf16.mxu0 %v18268_v53  ;;  %v29309_v53 = vld [vmem:[#allocation63_spill] sm:$0xff] }
 0x5ac   : > { %v7993_v17 = vrot.slane %v29309_v53, 5  ;;  %v18307_v53 = vrot.slane %v29319_v30, 9  ;;  %v8067_v30 = vrot.slane %v25699_v63, 5  ;;  %v8063_v63 = vrot.slane %v25711_v25, 5 }
 0x5ae   : > { %v7994_v3 = vsel %vm24568_vm13, %v7992_v38, %v7993_v17  ;;  %v23354_v38 = vld [vmem:[%s29002_s5 + $0x1e0] sm:$0xff]   ;;  %v8022_v17 = vsel %vm24568_vm13, %v8020_v45, %v8021_v4  ;;  %v8060_v4 = vrot.slane %v25709_v16, 5  ;;  %v8069_v47 = vrot.slane %v8067_v30, 4 }
 0x5af   : > { %v26211_v37 = vcombine.low %v7991_v58, %v7994_v3  ;;  %v29326_v45 = vld [vmem:[#allocation90_spill] sm:$0xff] }
 0x5b0   : > { %v8062_v16 = vrot.slane %v8060_v4, 4 }
 0x5b2   : > { %20887 = vmatmul.mubr.bf16.gmra.mrb[60].mxu0 %v18293_v33  ;;  %v8027_v33 = vrot.slane %v8025_v11, 4 }
 0x5b3   : > { %20906 = vmatprep.mubr.bf16.mxu0 %v18334_v34  ;;  %v8028_v34 = vrot.slane %v29301_v28, 5  ;;  %v8019_v28 = vsel %vm24568_vm13, %v18307_v53, %v8018_v60  ;;  %v8053_v60 = vrot.slane %v25649_v59, 5 }
 0x5b4   : > { %v26263_v29 = vcombine.low %v8019_v28, %v8022_v17  ;;  %v8064_v28 = vsel %vm24568_vm13, %v8062_v16, %v8063_v63  ;;  %v8420_v16 = vrot.slane %v25766_v15, 5  ;;  %v8423_v63 = vrot.slane %v25770_v51, 5  ;;  %v23367_v15 = vld [vmem:[%s29000_s3 + $0x8] sm:$0xff]   ;;  %v23368_v51 = vld [vmem:[%s29000_s3 + $0x10] sm:$0xff]  }
 0x5b5   : > { %v8029_v3 = vsel %vm24568_vm13, %v8027_v33, %v8028_v34  ;;  %v8055_v59 = vrot.slane %v8053_v60, 4  ;;  %v18311_v33 = vrot.slane %v29326_v45, 9  ;;  %v29327_v34 = vld [vmem:[#allocation88_spill] sm:$0xff] }
 0x5b6   : > { %v26270_v52 = vcombine.low %v8026_v12, %v8029_v3  ;;  %v29329_v3 = vld [vmem:[#allocation93_spill] sm:$0xff]  ;;  %v29330_v12 = vld [vmem:[#allocation98_spill] sm:$0xff]  ;;  %v29335_v45 = vld [vmem:[#allocation100_spill] sm:$0xff] }
 0x5ba   : > { %20907 = vmatmul.mubr.bf16.vlgmr.msra.gmra.mrb[32].mxu0 %v26211_v37 }
 0x5bb   : > { %20939 = vmatpush3.bf16.msra.mxu0 %v23350_v32  ;;  %20910 = vmatprep.mubr.bf16.mxu0 %v26218_v26  ;;  %v18306_v32 = vrot.slane %v29316_v46, 9 }
 0x5bc   : > { %20940 = vmatprep.subr.bf16.mxu0 %v23351_v40 }
 0x5bd   : > { %v8012_v35 = vsel %vm24568_vm13, %v18306_v32, %v8011_v36  ;;  %v29322_v36 = vld [vmem:[#allocation82_spill] sm:$0xff]  ;;  %v8040_v32 = vsel %vm24568_vm13, %v18310_v56, %v8039_v5  ;;  %v18313_v5 = vrot.slane %v29329_v3, 9  ;;  %v29333_v56 = vld [vmem:[#allocation97_spill] sm:$0xff] }
 0x5be   : > { %v26244_v24 = vcombine.low %v8012_v35, %v8015_v19  ;;  %v8035_v58 = vrot.slane %v29322_v36, 5  ;;  %v23357_v19 = vld [vmem:[%s29002_s5 + $0x1f8] sm:$0xff]   ;;  %v26296_v6 = vcombine.low %v8040_v32, %v8043_v62  ;;  %v8056_v35 = vrot.slane %v25651_v22, 5  ;;  %v29334_v32 = vld [vmem:[#allocation95_spill] sm:$0xff] }
 0x5bf   : > { %20941 = vmatpush3.bf16.msra.mxu0 %v23351_v40  ;;  %v23356_v40 = vld [vmem:[%s29002_s5 + $0x1f0] sm:$0xff]   ;;  %v8071_v36 = vsel %vm24568_vm13, %v8069_v47, %v8070_v8  ;;  %v18315_v62 = vrot.slane %v29333_v56, 9  ;;  %v8422_v47 = vrot.slane %v8420_v16, 4  ;;  %v18358_v8 = vrot.slane %v29336_v43, 9 }
 0x5c0   : > { %20942 = vmatprep.subr.bf16.mxu0 %v23352_v27  ;;  %v8036_v10 = vsel %vm24568_vm13, %v8034_v14, %v8035_v58  ;;  %v8057_v41 = vsel %vm24568_vm13, %v8055_v59, %v8056_v35  ;;  %v29331_v14 = vld [vmem:[#allocation91_spill] sm:$0xff]  ;;  %v29332_v58 = vld [vmem:[#allocation94_spill] sm:$0xff]  ;;  %v23393_v56 = vld [vmem:[%s29000_s3 + $0x70] sm:$0xff]  }
 0x5c1   : > { %v26289_v46 = vcombine.low %v8033_v39, %v8036_v10  ;;  %v18314_v0 = vrot.slane %v29331_v14, 9  ;;  %v8081_v57 = vrot.slane %v29332_v58, 5  ;;  %v8088_v39 = vrot.slane %v25788_v7, 5  ;;  %v23374_v58 = vld [vmem:[#allocation2] sm:$0xff]  }
 0x5c2   : > { %20911 = vmatmul.mubr.bf16.gmra.mrb[36].mxu0 %v26237_v2  ;;  %v8091_v7 = vrot.slane %v25790_v9, 5  ;;  %v23360_v9 = vld [vmem:[%s29002_s5 + $0x210] sm:$0xff]   ;;  %v8424_v3 = vsel %vm24568_vm13, %v8422_v47, %v8423_v63 }
 0x5c3   : > { %20914 = vmatprep.mubr.bf16.mxu0 %v26244_v24  ;;  %20943 = vmatpush3.bf16.msra.mxu0 %v23352_v27  ;;  %v8046_v27 = vrot.slane %v29324_v49, 5  ;;  %v8068_v48 = vsel %vm24568_vm13, %v18314_v0, %v8067_v30  ;;  %v8083_v49 = vrot.slane %v8081_v57, 4  ;;  %v8090_v35 = vrot.slane %v8088_v39, 4  ;;  %v23364_v30 = vld [vmem:[%s29002_s5 + $0x230] sm:$0xff]  }
 0x5c4   : > { %20944 = vmatprep.subr.bf16.mxu0 %v23353_v20  ;;  %v26339_v50 = vcombine.low %v8068_v48, %v8071_v36  ;;  %v23384_v48 = vld [vmem:[%s29000_s3 + $0x58] sm:$0xff]   ;;  %v23400_v63 = vld [vmem:[%s29000_s3 + $0x90] sm:$0xff]  }
 0x5c5   : > { %v8048_v11 = vrot.slane %v8046_v27, 4  ;;  %v8047_v22 = vsel %vm24568_vm13, %v18311_v33, %v8046_v27  ;;  %v8077_v27 = vrot.slane %v25758_v61, 5  ;;  %v18317_v33 = vrot.slane %v29335_v45, 9 }
 0x5c7   : > { %20945 = vmatpush3.bf16.msra.mxu0 %v23353_v20  ;;  %v23358_v20 = vld [vmem:[%s29002_s5 + $0x200] sm:$0xff]   ;;  %v8050_v18 = vsel %vm24568_vm13, %v8048_v11, %v8049_v13  ;;  %v8085_v11 = vsel %vm24568_vm13, %v8083_v49, %v8084_v54  ;;  %v26487_v54 = vld [vmem:[#allocation2 + $0x48] sm:$0xff]  }
 0x5c8   : > { %20946 = vmatprep.subr.bf16.mxu0 %v23354_v38  ;;  %v26315_v53 = vcombine.low %v8047_v22, %v8050_v18  ;;  %v8092_v18 = vsel %vm24568_vm13, %v8090_v35, %v8091_v7  ;;  %v23365_v22 = vld [vmem:[%s29002_s5 + $0x238] sm:$0xff]  }
 0x5c9   : > { %v26482_v49 = vld [vmem:[#allocation2 + $0x3c] sm:$0xff]   ;;  %v26524_v35 = vld [vmem:[#allocation2 + $0xb4] sm:$0xff]  }
 0x5ca   : > { %20915 = vmatmul.mubr.bf16.gmra.mrb[40].mxu0 %v26263_v29  ;;  %v29337_v7 = vld [vmem:[#allocation10_spill] sm:$0xff] }
 0x5cb   : > { %20918 = vmatprep.mubr.bf16.mxu0 %v26270_v52  ;;  %20947 = vmatpush3.bf16.msra.mxu0 %v23354_v38  ;;  %v18312_v38 = vrot.slane %v29327_v34, 9  ;;  %v4677_v45 = vshrl.u32 %v29337_v7, 16 }
 0x5cc   : > { %20948 = vmatprep.subr.bf16.mxu0 %v23355_v1 }
 0x5cd   : > { %v8054_v17 = vsel %vm24568_vm13, %v18312_v38, %v8053_v60  ;;  %v23359_v38 = vld [vmem:[%s29002_s5 + $0x208] sm:$0xff]  }
 0x5ce   : > { %v26319_v21 = vcombine.low %v8054_v17, %v8057_v41  ;;  %v23363_v41 = vld [vmem:[%s29002_s5 + $0x228] sm:$0xff]   ;;  %v23366_v17 = vld [vmem:[%s29000_s3] sm:$0xff]  }
 0x5cf   : > { %20949 = vmatpush3.bf16.msra.mxu0 %v23355_v1  ;;  %v8074_v1 = vrot.slane %v29330_v12, 5 }
 0x5d0   : > { %20950 = vmatprep.subr.bf16.mxu0 %v23356_v40 }
 0x5d1   : > { %v8076_v10 = vrot.slane %v8074_v1, 4  ;;  %v8075_v59 = vsel %vm24568_vm13, %v18315_v62, %v8074_v1  ;;  %v8695_v1 = vrot.slane %v26181_v44, 5  ;;  %v23381_v44 = vld [vmem:[%s29000_s3 + $0x50] sm:$0xff]  }
 0x5d2   : > { %20919 = vmatmul.mubr.bf16.gmra.mrb[44].mxu0 %v26289_v46  ;;  %v26494_v62 = vld [vmem:[#allocation2 + $0x54] sm:$0xff]  }
 0x5d3   : > { %20922 = vmatprep.mubr.bf16.mxu0 %v26296_v6  ;;  %20951 = vmatpush3.bf16.msra.mxu0 %v23356_v40  ;;  %v8061_v40 = vsel %vm24568_vm13, %v18313_v5, %v8060_v4  ;;  %v8078_v60 = vsel %vm24568_vm13, %v8076_v10, %v8077_v27  ;;  %v8089_v4 = vsel %vm24568_vm13, %v18317_v33, %v8088_v39  ;;  %v23387_v10 = vld [vmem:[%s29000_s3 + $0x60] sm:$0xff]   ;;  %v23390_v27 = vld [vmem:[%s29000_s3 + $0x68] sm:$0xff]   ;;  %v4680_v33 = vshll.u32 %v29337_v7, 16 }
 0x5d4   : > { %20952 = vmatprep.subr.bf16.mxu0 %v23357_v19  ;;  %v26335_v25 = vcombine.low %v8061_v40, %v8064_v28  ;;  %v26354_v13 = vcombine.low %v8075_v59, %v8078_v60  ;;  %v26368_v34 = vcombine.low %v8089_v4, %v8092_v18  ;;  %v8421_v5 = vsel %vm24568_vm13, %v18358_v8, %v8420_v16  ;;  %v26464_v40 = vld [vmem:[#allocation2 + $0x18] sm:$0xff]   ;;  %v26499_v39 = vld [vmem:[#allocation2 + $0x60] sm:$0xff]  }
 0x5d5   : > { %v18375_v28 = vcombine.low %v8421_v5, %v8424_v3  ;;  %v23396_v60 = vld [vmem:[%s29000_s3 + $0x78] sm:$0xff]   ;;  %v26512_v59 = vld [vmem:[#allocation2 + $0x84] sm:$0xff]   ;;  %v4679_v18 = vrot.slane %v4677_v45, 4  ;;  %v4682_v4 = vrot.slane %v4680_v33, 5 }
 0x5d6   : > { %v29341_v3 = vld [vmem:[#allocation14_spill] sm:$0xff]  ;;  %v29346_v7 = vld [vmem:[#allocation23_spill] sm:$0xff] }
 0x5d7   : > { %20953 = vmatpush3.bf16.msra.mxu0 %v23357_v19  ;;  %v18316_v19 = vrot.slane %v29334_v32, 9  ;;  %v23398_v32 = vld [vmem:[%s29000_s3 + $0x80] sm:$0xff]   ;;  %v4725_v5 = vshrl.u32 %v29341_v3, 16  ;;  %v4773_v45 = vshrl.u32 %v29346_v7, 16  ;;  %v4776_v33 = vshll.u32 %v29346_v7, 16 }
 0x5d8   : > { %20986 = vmatprep.subr.bf16.mxu0 %v23358_v20 }
 0x5d9   : > { %v8082_v61 = vsel %vm24568_vm13, %v18316_v19, %v8081_v57  ;;  %v23376_v57 = vld [vmem:[#allocation2 + $0xc] sm:$0xff]  }
 0x5da   : > { %20923 = vmatmul.mubr.bf16.gmra.mrb[48].mxu0 %v26315_v53  ;;  %v26358_v23 = vcombine.low %v8082_v61, %v8085_v11  ;;  %v26506_v19 = vld [vmem:[#allocation2 + $0x6c] sm:$0xff]   ;;  %v26508_v11 = vld [vmem:[#allocation2 + $0x78] sm:$0xff]  }
 0x5db   : > { %20926 = vmatprep.mubr.bf16.mxu0 %v26319_v21  ;;  %v26518_v61 = vld [vmem:[#allocation2 + $0x9c] sm:$0xff]  }
 0x5e2   : > { %20927 = vmatmul.mubr.bf16.gmra.mrb[52].mxu0 %v26335_v25 }
 0x5e3   : > { %20930 = vmatprep.mubr.bf16.mxu0 %v26339_v50 }
 0x5ea   : > { %20931 = vmatmul.mubr.bf16.gmra.mrb[56].mxu0 %v26354_v13 }
 0x5eb   : > { %20934 = vmatprep.mubr.bf16.mxu0 %v26358_v23 }
 0x5f2   : > { %20935 = vmatmul.mubr.bf16.gmra.mrb[60].mxu0 %v26368_v34 }
 0x5f3   : > { %20954 = vmatprep.mubr.bf16.mxu0 %v26211_v37  ;;  %v23361_v37 = vld [vmem:[%s29002_s5 + $0x218] sm:$0xff]  }
 0x5fa   : > { %20955 = vmatmul.mubr.bf16.vlgmr.msra.gmra.mrb[32].mxu0 %v26218_v26 }
 0x5fb   : > { %20987 = vmatpush3.bf16.msra.mxu0 %v23358_v20  ;;  %20958 = vmatprep.mubr.bf16.mxu0 %v26237_v2  ;;  %v23362_v20 = vld [vmem:[%s29002_s5 + $0x220] sm:$0xff]  }
 0x5fc   : > { %20988 = vmatprep.subr.bf16.mxu0 %v23359_v38 }
 0x5ff   : > { %20989 = vmatpush3.bf16.msra.mxu0 %v23359_v38 }
 0x600   : > { %20990 = vmatprep.subr.bf16.mxu0 %v23360_v9 }
 0x602   : > { %20959 = vmatmul.mubr.bf16.gmra.mrb[36].mxu0 %v26244_v24 }
 0x603   : > { %20962 = vmatprep.mubr.bf16.mxu0 %v26263_v29  ;;  %20991 = vmatpush3.bf16.msra.mxu0 %v23360_v9  ;;  %v23399_v9 = vld [vmem:[%s29000_s3 + $0x88] sm:$0xff]  }
 0x604   : > { %20992 = vmatprep.subr.bf16.mxu0 %v23361_v37 }
 0x607   : > { %20993 = vmatpush3.bf16.msra.mxu0 %v23361_v37 }
 0x608   : > { %20994 = vmatprep.subr.bf16.mxu0 %v23362_v20 }
 0x60a   : > { %20963 = vmatmul.mubr.bf16.gmra.mrb[40].mxu0 %v26270_v52 }
 0x60b   : > { %20966 = vmatprep.mubr.bf16.mxu0 %v26289_v46  ;;  %20995 = vmatpush3.bf16.msra.mxu0 %v23362_v20  ;;  %v29339_v20 = vld [vmem:[#allocation11_spill] sm:$0xff] }
 0x60c   : > { %20996 = vmatprep.subr.bf16.mxu0 %v23363_v41  ;;  %v4690_v47 = vshrl.u32 %v29339_v20, 16 }
 0x60f   : > { %20997 = vmatpush3.bf16.msra.mxu0 %v23363_v41  ;;  %v4686_v41 = vshll.u32 %v29339_v20, 16  ;;  %v29347_v20 = vld [vmem:[#allocation17_spill] sm:$0xff] }
 0x610   : > { %20998 = vmatprep.subr.bf16.mxu0 %v23364_v30 }
 0x612   : > { %20967 = vmatmul.mubr.bf16.gmra.mrb[44].mxu0 %v26296_v6 }
 0x613   : > { %20970 = vmatprep.mubr.bf16.mxu0 %v26315_v53  ;;  %20999 = vmatpush3.bf16.msra.mxu0 %v23364_v30  ;;  %v4683_v30 = vor.u32 %v4682_v4, %v4679_v18  ;;  %v23402_v4 = vld [vmem:[%s29000_s3 + $0xa0] sm:$0xff]  }
 0x614   : > { %21000 = vmatprep.subr.bf16.mxu0 %v23365_v22 }
 0x617   : > { %21001 = vmatpush3.bf16.msra.mxu0 %v23365_v22 }
 0x618   : > { %21082 = vmatprep.subr.bf16.mxu0 %v23366_v17 }
 0x61a   : > { %20971 = vmatmul.mubr.bf16.gmra.mrb[48].mxu0 %v26319_v21 }
 0x61b   : > { %20974 = vmatprep.mubr.bf16.mxu0 %v26335_v25 }
 0x622   : > { %20975 = vmatmul.mubr.bf16.gmra.mrb[52].mxu0 %v26339_v50 }
 0x623   : > { %20978 = vmatprep.mubr.bf16.mxu0 %v26354_v13 }
 0x62a   : > { %20979 = vmatmul.mubr.bf16.gmra.mrb[56].mxu0 %v26358_v23 }
 0x62b   : > { %20982 = vmatprep.mubr.bf16.mxu0 %v26368_v34 }
 0x632   : > { %20983 = vmatmul.mubr.bf16.gmra.mrb[60].mxu0 %v18375_v28 }
 0x633   : > { %21002 = vmatprep.mubr.bf16.mxu0 %v26218_v26  ;;  %v23369_v26 = vld [vmem:[%s29000_s3 + $0x18] sm:$0xff]  }
 0x63a   : > { %21003 = vmatmul.mubr.bf16.vlgmr.msra.gmra.mrb[32].mxu0 %v26237_v2  ;;  %v23370_v2 = vld [vmem:[%s29000_s3 + $0x20] sm:$0xff]  }
 0x63b   : > { %21083 = vmatpush3.bf16.msra.mxu0 %v23366_v17  ;;  %21006 = vmatprep.mubr.bf16.mxu0 %v26244_v24  ;;  %v23371_v24 = vld [vmem:[%s29000_s3 + $0x28] sm:$0xff]  }
 0x63c   : > { %21084 = vmatprep.subr.bf16.mxu0 %v23367_v15  ;;  %v29340_v17 = vld [vmem:[#allocation15_spill] sm:$0xff] }
 0x63d   : > { %v4662_v16 = vshll.u32 %v29340_v17, 16  ;;  %v4666_v8 = vshrl.u32 %v29340_v17, 16 }
 0x63f   : > { %21085 = vmatpush3.bf16.msra.mxu0 %v23367_v15  ;;  %v29342_v15 = vld [vmem:[#allocation18_spill] sm:$0xff] }
 0x640   : > { %21086 = vmatprep.subr.bf16.mxu0 %v23368_v51 }
 0x642   : > { %21007 = vmatmul.mubr.bf16.gmra.mrb[36].mxu0 %v26263_v29  ;;  %v23372_v29 = vld [vmem:[%s29000_s3 + $0x30] sm:$0xff]  }
 0x643   : > { %21010 = vmatprep.mubr.bf16.mxu0 %v26270_v52  ;;  %21087 = vmatpush3.bf16.msra.mxu0 %v23368_v51  ;;  %v23373_v52 = vld [vmem:[%s29000_s3 + $0x38] sm:$0xff]   ;;  %v4734_v51 = vshll.u32 %v29342_v15, 16 }
 0x644   : > { %21088 = vmatprep.subr.bf16.mxu0 %v23369_v26 }
 0x647   : > { %21089 = vmatpush3.bf16.msra.mxu0 %v23369_v26  ;;  %v29343_v26 = vld [vmem:[#allocation16_spill] sm:$0xff] }
 0x648   : > { %21090 = vmatprep.subr.bf16.mxu0 %v23370_v2 }
 0x64a   : > { %21011 = vmatmul.mubr.bf16.gmra.mrb[40].mxu0 %v26289_v46  ;;  %v23375_v46 = vld [vmem:[%s29000_s3 + $0x40] sm:$0xff]  }
 0x64b   : > { %21014 = vmatprep.mubr.bf16.mxu0 %v26296_v6  ;;  %21091 = vmatpush3.bf16.msra.mxu0 %v23370_v2  ;;  %v8692_v6 = vrot.slane %v26175_v31, 5  ;;  %v23378_v31 = vld [vmem:[%s29000_s3 + $0x48] sm:$0xff]   ;;  %v4701_v2 = vshrl.u32 %v29343_v26, 16 }
 0x64c   : > { %21092 = vmatprep.subr.bf16.mxu0 %v23371_v24 }
 0x64d   : > { %v8694_v12 = vrot.slane %v8692_v6, 4 }
 0x64f   : > { %21093 = vmatpush3.bf16.msra.mxu0 %v23371_v24  ;;  %v8696_v0 = vsel %vm24568_vm13, %v8694_v12, %v8695_v1  ;;  %v4704_v24 = vshll.u32 %v29343_v26, 16  ;;  %v4664_v12 = vrot.slane %v4662_v16, 5  ;;  %v4692_v1 = vrot.slane %v4690_v47, 4 }
 0x650   : > { %21094 = vmatprep.subr.bf16.mxu0 %v23372_v29  ;;  %v4775_v47 = vrot.slane %v4773_v45, 4 }
 0x652   : > { %21015 = vmatmul.mubr.bf16.gmra.mrb[44].mxu0 %v26315_v53  ;;  %v7932_v53 = vld [vmem:[#allocation2 + $0xcc] sm:$0xe] }
 0x653   : > { %21018 = vmatprep.mubr.bf16.mxu0 %v26319_v21  ;;  %21095 = vmatpush3.bf16.msra.mxu0 %v23372_v29  ;;  %v18384_v21 = vrot.slane %v7932_v53, 9  ;;  %v4738_v29 = vshrl.u32 %v29342_v15, 16 }
 0x654   : > { %21096 = vmatprep.subr.bf16.mxu0 %v23373_v52 }
 0x655   : > { %v8693_v14 = vsel %vm24568_vm13, %v18384_v21, %v8692_v6  ;;  %v4684_v21 = vrot.slane %v4683_v30, 4 }
 0x656   : > { %v18401_v36 = vcombine.low %v8693_v14, %v8696_v0  ;;  %v29345_v14 = vld [vmem:[#allocation12_spill] sm:$0xff] }
 0x657   : > { %21097 = vmatpush3.bf16.msra.mxu0 %v23373_v52  ;;  %v4688_v52 = vrot.slane %v4686_v41, 5  ;;  %v4696_v0 = vshll.u32 %v29345_v14, 16  ;;  %v4672_v41 = vshll.u32 %v29347_v20, 16 }
 0x658   : > { %21130 = vmatprep.subr.bf16.mxu0 %v23375_v46 }
 0x659   : > { %v4693_v18 = vor.u32 %v4692_v1, %v4688_v52  ;;  %v4689_v17 = vsel %vm24192_vm10, %v4684_v21, %v4688_v52  ;;  %v29351_v21 = vld [vmem:[#allocation25_spill] sm:$0xff] }
 0x65a   : > { %21019 = vmatmul.mubr.bf16.gmra.mrb[48].mxu0 %v26335_v25  ;;  %v26470_v25 = vld [vmem:[#allocation2 + $0x24] sm:$0xff]   ;;  %v4782_v1 = vshll.u32 %v29351_v21, 16  ;;  %v5597_v14 = vunpack.c.l.bf16 %v4689_v17 }
 0x65b   : > { %21022 = vmatprep.mubr.bf16.mxu0 %v26339_v50  ;;  %v26475_v50 = vld [vmem:[#allocation2 + $0x30] sm:$0xff]  }
 0x662   : > { %21023 = vmatmul.mubr.bf16.gmra.mrb[52].mxu0 %v26354_v13  ;;  %v26514_v13 = vld [vmem:[#allocation2 + $0x90] sm:$0xff]  }
 0x663   : > { %21026 = vmatprep.mubr.bf16.mxu0 %v26358_v23  ;;  %v26520_v23 = vld [vmem:[#allocation2 + $0xa8] sm:$0xff]  }
 0x66a   : > { %21027 = vmatmul.mubr.bf16.gmra.mrb[56].mxu0 %v26368_v34  ;;  %v29338_v34 = vld [vmem:[#allocation13_spill] sm:$0xff] }
 0x66b   : > { %21030 = vmatprep.mubr.bf16.mxu0 %v18375_v28  ;;  %v4653_v38 = vshrl.u32 %v29338_v34, 16  ;;  %v4656_v37 = vshll.u32 %v29338_v34, 16  ;;  %v4728_v28 = vshll.u32 %v29341_v3, 16 }
 0x66d   : > { %v4655_v22 = vrot.slane %v4653_v38, 4  ;;  %v4658_v43 = vrot.slane %v4656_v37, 5  ;;  %v4698_v37 = vrot.slane %v4696_v0, 5 }
 0x672   : > { %21031 = vmatmul.mubr.bf16.gmra.mrb[60].mxu0 %v18401_v36  ;;  %v23401_v36 = vld [vmem:[%s29000_s3 + $0x98] sm:$0xff]  }
 0x673   : > { %21098 = vmatprep.mubr.bf16.mxu0 %v23374_v58  ;;  %v4659_v58 = vor.u32 %v4658_v43, %v4655_v22  ;;  %v4694_v43 = vrot.slane %v4693_v18, 4 }
 0x675   : > { %v4660_v34 = vrot.slane %v4659_v58, 4  ;;  %v4786_v58 = vshrl.u32 %v29351_v21, 16 }
 0x677   : > { %v4665_v26 = vsel %vm24192_vm10, %v4660_v34, %v4664_v12  ;;  %v29352_v34 = vld [vmem:[#allocation27_spill] sm:$0xff]  ;;  %v4788_v20 = vrot.slane %v4786_v58, 4 }
 0x67a   : > { %21099 = vmatmul.mubr.bf16.vlgmr.msra.gmra.mrb[64].mxu0 %v23376_v57 }
 0x67b   : > { %21131 = vmatpush3.bf16.msra.mxu0 %v23375_v46  ;;  %21102 = vmatprep.mubr.bf16.mxu0 %v26464_v40  ;;  %v29344_v46 = vld [vmem:[#allocation21_spill] sm:$0xff] }
 0x67c   : > { %21132 = vmatprep.subr.bf16.mxu0 %v23378_v31  ;;  %v4710_v6 = vshll.u32 %v29344_v46, 16  ;;  %v4714_v53 = vshrl.u32 %v29344_v46, 16  ;;  %v4674_v46 = vrot.slane %v4672_v41, 5  ;;  %v4762_v41 = vshrl.u32 %v29352_v34, 16 }
 0x67f   : > { %21133 = vmatpush3.bf16.msra.mxu0 %v23378_v31  ;;  %v4727_v31 = vrot.slane %v4725_v5, 4  ;;  %v29349_v5 = vld [vmem:[#allocation24_spill] sm:$0xff] }
 0x680   : > { %21134 = vmatprep.subr.bf16.mxu0 %v23381_v44  ;;  %v4752_v15 = vshll.u32 %v29349_v5, 16 }
 0x682   : > { %21103 = vmatmul.mubr.bf16.gmra.mrb[68].mxu0 %v26470_v25 }
 0x683   : > { %21106 = vmatprep.mubr.bf16.mxu0 %v26475_v50  ;;  %21135 = vmatpush3.bf16.msra.mxu0 %v23381_v44  ;;  %v4730_v44 = vrot.slane %v4728_v28, 5  ;;  %v4749_v28 = vshrl.u32 %v29349_v5, 16 }
 0x684   : > { %21136 = vmatprep.subr.bf16.mxu0 %v23384_v48 }
 0x687   : > { %21137 = vmatpush3.bf16.msra.mxu0 %v23384_v48  ;;  %v26555_v48 = vrot.slane %v4734_v51, 5  ;;  %v23403_v51 = vld [vmem:[%s29000_s3 + $0xa8] sm:$0xff]  }
 0x688   : > { %21138 = vmatprep.subr.bf16.mxu0 %v23387_v10 }
 0x68a   : > { %21107 = vmatmul.mubr.bf16.gmra.mrb[72].mxu0 %v26482_v49 }
 0x68b   : > { %21110 = vmatprep.mubr.bf16.mxu0 %v26487_v54  ;;  %21139 = vmatpush3.bf16.msra.mxu0 %v23387_v10  ;;  %v4703_v10 = vrot.slane %v4701_v2, 4 }
 0x68c   : > { %21140 = vmatprep.subr.bf16.mxu0 %v23390_v27 }
 0x68f   : > { %21141 = vmatpush3.bf16.msra.mxu0 %v23390_v27  ;;  %v4706_v27 = vrot.slane %v4704_v24, 5 }
 0x690   : > { %21142 = vmatprep.subr.bf16.mxu0 %v23393_v56 }
 0x691   : > { %v4707_v30 = vor.u32 %v4706_v27, %v4703_v10  ;;  %v23404_v10 = vld [vmem:[%s29000_s3 + $0xb0] sm:$0xff]   ;;  %v26590_v27 = vld [vmem:[%s29003_s6] ss:$0 sm:$0xff] }
 0x692   : > { %21111 = vmatmul.mubr.bf16.gmra.mrb[76].mxu0 %v26494_v62 }
 0x693   : > { %21114 = vmatprep.mubr.bf16.mxu0 %v26499_v39  ;;  %21143 = vmatpush3.bf16.msra.mxu0 %v23393_v56  ;;  %v4740_v56 = vrot.slane %v4738_v29, 4  ;;  %v29350_v29 = vld [vmem:[#allocation22_spill] sm:$0xff] }
 0x694   : > { %21144 = vmatprep.subr.bf16.mxu0 %v23396_v60  ;;  %v4720_v52 = vshll.u32 %v29350_v29, 16  ;;  %v4764_v29 = vrot.slane %v4762_v41, 4 }
 0x695   : > { %v4741_v22 = vor.u32 %v4740_v56, %v26555_v48  ;;  %v4699_v56 = vsel %vm24192_vm10, %v4694_v43, %v4698_v37 }
 0x696   : > { %v4722_v45 = vrot.slane %v4720_v52, 5 }
 0x697   : > { %21145 = vmatpush3.bf16.msra.mxu0 %v23396_v60  ;;  %v26558_v60 = vrot.slane %v4710_v6, 5  ;;  %v4708_v6 = vrot.slane %v4707_v30, 4 }
 0x698   : > { %21178 = vmatprep.subr.bf16.mxu0 %v23398_v32 }
 0x69a   : > { %21115 = vmatmul.mubr.bf16.gmra.mrb[80].mxu0 %v26506_v19 }
 0x69b   : > { %21118 = vmatprep.mubr.bf16.mxu0 %v26508_v11 }
 0x6a2   : > { %21119 = vmatmul.mubr.bf16.gmra.mrb[84].mxu0 %v26512_v59 }
 0x6a3   : > { %21122 = vmatprep.mubr.bf16.mxu0 %v26514_v13 }
 0x6aa   : > { %21123 = vmatmul.mubr.bf16.gmra.mrb[88].mxu0 %v26518_v61 }
 0x6ab   : > { %21126 = vmatprep.mubr.bf16.mxu0 %v26520_v23 }
 0x6b2   : > { %21127 = vmatmul.mubr.bf16.gmra.mrb[92].mxu0 %v26524_v35 }
 0x6b3   : > { %21146 = vmatprep.mubr.bf16.mxu0 %v23376_v57  ;;  %v4668_v57 = vrot.slane %v4666_v8, 4  ;;  %v29348_v8 = vld [vmem:[#allocation20_spill] sm:$0xff] }
 0x6b4   : > { %v4744_v3 = vshll.u32 %v29348_v8, 16 }
 0x6b5   : > { %v4669_v38 = vor.u32 %v4668_v57, %v4664_v12  ;;  %v5595_v12 = vunpack.c.l.bf16 %v4665_v26 }
 0x6b6   : > { %v4746_v57 = vrot.slane %v4744_v3, 5 }
 0x6b7   : > { %v4670_v2 = vrot.slane %v4669_v38, 4  ;;  %v4758_v38 = vshll.u32 %v29352_v34, 16 }
 0x6ba   : > { %21147 = vmatmul.mubr.bf16.vlgmr.msra.gmra.mrb[64].mxu0 %v26464_v40 }
 0x6bb   : > { %21179 = vmatpush3.bf16.msra.mxu0 %v23398_v32  ;;  %21150 = vmatprep.mubr.bf16.mxu0 %v26470_v25  ;;  %v4716_v32 = vrot.slane %v4714_v53, 4  ;;  %v4742_v53 = vrot.slane %v4741_v22, 4  ;;  %v29353_v22 = vld [vmem:[#allocation29_spill] sm:$0xff] }
 0x6bc   : > { %21180 = vmatprep.subr.bf16.mxu0 %v23399_v9  ;;  %v4824_v17 = vshll.u32 %v29353_v22, 16 }
 0x6bd   : > { %v4717_v16 = vor.u32 %v4716_v32, %v26558_v60  ;;  %v4675_v32 = vsel %vm24192_vm10, %v4670_v2, %v4674_v46  ;;  %v4747_v18 = vsel %vm24192_vm10, %v4742_v53, %v4746_v57  ;;  %v29354_v2 = vld [vmem:[#allocation26_spill] sm:$0xff] }
 0x6be   : > { %v5596_v43 = vunpack.c.l.bf16 %v4675_v32  ;;  %v5602_v5 = vunpack.c.l.bf16 %v4747_v18  ;;  %v29355_v53 = vld [vmem:[#allocation30_spill] sm:$0xff] }
 0x6bf   : > { %21181 = vmatpush3.bf16.msra.mxu0 %v23399_v9  ;;  %v4731_v9 = vor.u32 %v4730_v44, %v4727_v31  ;;  %v4718_v0 = vrot.slane %v4717_v16, 4  ;;  %v4751_v31 = vrot.slane %v4749_v28, 4  ;;  %v4754_v44 = vrot.slane %v4752_v15, 5  ;;  %v23405_v16 = vld [vmem:[%s29000_s3 + $0xb8] sm:$0xff]  }
 0x6c0   : > { %21182 = vmatprep.subr.bf16.mxu0 %v23400_v63  ;;  %v4760_v15 = vrot.slane %v4758_v38, 5  ;;  %v4797_v21 = vshrl.u32 %v29355_v53, 16  ;;  %v4800_v58 = vshll.u32 %v29355_v53, 16  ;;  %v26644_v57 = vadd.f32 %v26590_v27, %v5602_v5 }
 0x6c1   : > { %v4732_v24 = vrot.slane %v4731_v9, 4  ;;  %v4723_v9 = vsel %vm24192_vm10, %v4718_v0, %v4722_v45  ;;  %v4755_v30 = vor.u32 %v4754_v44, %v4751_v31  ;;  %v26634_v0 = vadd.f32 %v26590_v27, %v5596_v43  ;;  %v29356_v44 = vld [vmem:[#allocation28_spill] sm:$0xff] }
 0x6c2   : > { %21151 = vmatmul.mubr.bf16.gmra.mrb[68].mxu0 %v26475_v50  ;;  %v5600_v28 = vunpack.c.l.bf16 %v4723_v9  ;;  %v4765_v45 = vor.u32 %v4764_v29, %v4760_v15  ;;  %v4799_v38 = vrot.slane %v4797_v21, 4  ;;  %v4802_v9 = vrot.slane %v4800_v58, 5 }
 0x6c3   : > { %21154 = vmatprep.mubr.bf16.mxu0 %v26482_v49  ;;  %21183 = vmatpush3.bf16.msra.mxu0 %v23400_v63  ;;  %v4778_v63 = vrot.slane %v4776_v33, 5  ;;  %v4737_v7 = vsel %vm24192_vm10, %v4732_v24, %v26555_v48  ;;  %v4713_v33 = vsel %vm24192_vm10, %v4708_v6, %v26558_v60  ;;  %v26609_v48 = vadd.f32 %v26590_v27, %v5597_v14 }
 0x6c4   : > { %21184 = vmatprep.subr.bf16.mxu0 %v23401_v36  ;;  %v4821_v60 = vshrl.u32 %v29353_v22, 16  ;;  %v5601_v8 = vunpack.c.l.bf16 %v4737_v7  ;;  %v5599_v3 = vunpack.c.l.bf16 %v4713_v33  ;;  %v4792_v24 = vshll.u32 %v29354_v2, 16  ;;  %v29359_v22 = vld [vmem:[#allocation35_spill] sm:$0xff] }
 0x6c5   : > { %v4756_v52 = vrot.slane %v4755_v30, 4  ;;  %v4826_v6 = vrot.slane %v4824_v17, 5  ;;  %v26647_v31 = vadd.f32 %v26590_v27, %v5600_v28  ;;  %v4872_v17 = vshll.u32 %v29359_v22, 16 }
 0x6c6   : > { %v4823_v46 = vrot.slane %v4821_v60, 4  ;;  %v4794_v7 = vrot.slane %v4792_v24, 5  ;;  %v4869_v60 = vshrl.u32 %v29359_v22, 16  ;;  %v4766_v5 = vrot.slane %v4765_v45, 4 }
 0x6c7   : > { %21185 = vmatpush3.bf16.msra.mxu0 %v23401_v36  ;;  %v4779_v36 = vor.u32 %v4778_v63, %v4775_v47  ;;  %v26617_v47 = vadd.f32 %v26590_v27, %v5595_v12  ;;  %v5598_v63 = vunpack.c.l.bf16 %v4699_v56  ;;  %v26641_v12 = vadd.f32 %v26590_v27, %v5599_v3 }
 0x6c8   : > { %21186 = vmatprep.subr.bf16.mxu0 %v23402_v4  ;;  %v4761_v33 = vsel %vm24192_vm10, %v4756_v52, %v4760_v15  ;;  %v4827_v18 = vor.u32 %v4826_v6, %v4823_v46  ;;  %v4803_v29 = vor.u32 %v4802_v9, %v4799_v38  ;;  %v4871_v53 = vrot.slane %v4869_v60, 4 }
 0x6c9   : > { %v4780_v37 = vrot.slane %v4779_v36, 4  ;;  %v26631_v14 = vadd.f32 %v26590_v27, %v5598_v63  ;;  %v26637_v36 = vadd.f32 %v26590_v27, %v5601_v8  ;;  %v5603_v8 = vunpack.c.l.bf16 %v4761_v33  ;;  %v29363_v33 = vld [vmem:[#allocation39_spill] sm:$0xff] }
 0x6ca   : > { %21155 = vmatmul.mubr.bf16.gmra.mrb[72].mxu0 %v26487_v54  ;;  %v4828_v15 = vrot.slane %v4827_v18, 4  ;;  %v4874_v21 = vrot.slane %v4872_v17, 5  ;;  %v4854_v18 = vshll.u32 %v29363_v33, 16  ;;  %v4858_v9 = vshrl.u32 %v29363_v33, 16 }
 0x6cb   : > { %21158 = vmatprep.mubr.bf16.mxu0 %v26494_v62  ;;  %21187 = vmatpush3.bf16.msra.mxu0 %v23402_v4  ;;  %v4784_v4 = vrot.slane %v4782_v1, 5  ;;  %v26628_v1 = vld [vmem:[%s29000_s3 + $0xc0] sm:$0xff]  }
 0x6cc   : > { %21188 = vmatprep.subr.bf16.mxu0 %v23403_v51  ;;  %v4875_v17 = vor.u32 %v4874_v21, %v4871_v53 }
 0x6cd   : > { %v4789_v26 = vor.u32 %v4788_v20, %v4784_v4 }
 0x6ce   : > { %v4876_v53 = vrot.slane %v4875_v17, 4 }
 0x6cf   : > { %21189 = vmatpush3.bf16.msra.mxu0 %v23403_v51  ;;  %v4785_v51 = vsel %vm24192_vm10, %v4780_v37, %v4784_v4  ;;  %v4790_v32 = vrot.slane %v4789_v26, 4  ;;  %v29357_v4 = vld [vmem:[#allocation31_spill] sm:$0xff]  ;;  %v29358_v37 = vld [vmem:[#allocation33_spill] sm:$0xff] }
 0x6d0   : > { %21190 = vmatprep.subr.bf16.mxu0 %v23404_v10  ;;  %v5605_v56 = vunpack.c.l.bf16 %v4785_v51  ;;  %v4830_v34 = vshll.u32 %v29357_v4, 16  ;;  %v4806_v20 = vshll.u32 %v29358_v37, 16  ;;  %v4834_v41 = vshrl.u32 %v29357_v4, 16  ;;  %v29361_v26 = vld [vmem:[#allocation37_spill] sm:$0xff] }
 0x6d1   : > { %v4810_v30 = vshrl.u32 %v29358_v37, 16  ;;  %v4795_v3 = vsel %vm24192_vm10, %v4790_v32, %v4794_v7  ;;  %v4878_v2 = vshll.u32 %v29361_v26, 16  ;;  %v4882_v24 = vshrl.u32 %v29361_v26, 16  ;;  %v29362_v7 = vld [vmem:[#allocation32_spill] sm:$0xff]  ;;  %v29365_v26 = vld [vmem:[#allocation41_spill] sm:$0xff] }
 0x6d2   : > { %21159 = vmatmul.mubr.bf16.gmra.mrb[76].mxu0 %v26499_v39  ;;  %v4832_v51 = vrot.slane %v4830_v34, 5  ;;  %v4808_v52 = vrot.slane %v4806_v20, 5  ;;  %v4836_v46 = vrot.slane %v4834_v41, 4  ;;  %v26668_v32 = vadd.f32 %v26590_v27, %v5605_v56  ;;  %v29364_v56 = vld [vmem:[#allocation34_spill] sm:$0xff] }
 0x6d3   : > { %21162 = vmatprep.mubr.bf16.mxu0 %v26506_v19  ;;  %21191 = vmatpush3.bf16.msra.mxu0 %v23404_v10  ;;  %v4768_v10 = vshll.u32 %v29356_v44, 16  ;;  %v4812_v6 = vrot.slane %v4810_v30, 4  ;;  %v4840_v45 = vshll.u32 %v29362_v7, 16  ;;  %v26674_v34 = vrot.slane %v4878_v2, 5  ;;  %v29368_v7 = vld [vmem:[#allocation42_spill] sm:$0xff] }
 0x6d4   : > { %21192 = vmatprep.subr.bf16.mxu0 %v23405_v16  ;;  %v4884_v38 = vrot.slane %v4882_v24, 4  ;;  %v26678_v37 = vadd.f32 %v26590_v27, %v5603_v8  ;;  %v4804_v20 = vrot.slane %v4803_v29, 4  ;;  %v4837_v41 = vor.u32 %v4836_v46, %v4832_v51 }
 0x6d5   : > { %v4770_v28 = vrot.slane %v4768_v10, 5  ;;  %v5606_v10 = vunpack.c.l.bf16 %v4795_v3  ;;  %v4816_v30 = vshll.u32 %v29364_v56, 16  ;;  %v4833_v22 = vsel %vm24192_vm10, %v4828_v15, %v4832_v51 }
 0x6d6   : > { %v4813_v60 = vor.u32 %v4812_v6, %v4808_v52  ;;  %v4842_v3 = vrot.slane %v4840_v45, 5  ;;  %v4885_v8 = vor.u32 %v4884_v38, %v26674_v34  ;;  %v4917_v2 = vshrl.u32 %v29365_v26, 16 }
 0x6d7   : > { %21193 = vmatpush3.bf16.msra.mxu0 %v23405_v16  ;;  %v29360_v16 = vld [vmem:[#allocation36_spill] sm:$0xff]  ;;  %v4771_v4 = vsel %vm24192_vm10, %v4766_v5, %v4770_v28  ;;  %v4856_v5 = vrot.slane %v4854_v18, 5  ;;  %v4860_v28 = vrot.slane %v4858_v9, 4  ;;  %v4920_v15 = vshll.u32 %v29365_v26, 16 }
 0x6d8   : > { %21226 = vmatprep.subr.bf16.mxu0 %v26628_v1  ;;  %v4845_v63 = vshrl.u32 %v29360_v16, 16  ;;  %v4848_v43 = vshll.u32 %v29360_v16, 16  ;;  %v5609_v51 = vunpack.c.l.bf16 %v4833_v22  ;;  %v4809_v24 = vsel %vm24192_vm10, %v4804_v20, %v4808_v52 }
 0x6d9   : > { %v4838_v29 = vrot.slane %v4837_v41, 4  ;;  %v4818_v46 = vrot.slane %v4816_v30, 5  ;;  %v4814_v6 = vrot.slane %v4813_v60, 4  ;;  %v4893_v45 = vshrl.u32 %v29368_v7, 16 }
 0x6da   : > { %21163 = vmatmul.mubr.bf16.gmra.mrb[80].mxu0 %v26508_v11  ;;  %v4847_v58 = vrot.slane %v4845_v63, 4  ;;  %v4850_v44 = vrot.slane %v4848_v43, 5  ;;  %v26685_v63 = vadd.f32 %v26590_v27, %v5606_v10  ;;  %v5604_v43 = vunpack.c.l.bf16 %v4771_v4  ;;  %v29367_v10 = vld [vmem:[#allocation43_spill] sm:$0xff] }
 0x6db   : > { %21166 = vmatprep.mubr.bf16.mxu0 %v26512_v59  ;;  %v4896_v33 = vshll.u32 %v29368_v7, 16  ;;  %v4930_v18 = vshrl.u32 %v29367_v10, 16  ;;  %v4886_v4 = vrot.slane %v4885_v8, 4  ;;  %v4861_v38 = vor.u32 %v4860_v28, %v4856_v5 }
 0x6dc   : > { %v4851_v16 = vor.u32 %v4850_v44, %v4847_v58  ;;  %v29366_v58 = vld [vmem:[#allocation38_spill] sm:$0xff]  ;;  %v4919_v9 = vrot.slane %v4917_v2, 4  ;;  %v4922_v56 = vrot.slane %v4920_v15, 5  ;;  %v26699_v52 = vadd.f32 %v26590_v27, %v5604_v43 }
 0x6dd   : > { %v4888_v44 = vshll.u32 %v29366_v58, 16  ;;  %v26702_v20 = vadd.f32 %v26590_v27, %v5609_v51  ;;  %v5607_v41 = vunpack.c.l.bf16 %v4809_v24  ;;  %v4843_v30 = vsel %vm24192_vm10, %v4838_v29, %v4842_v3  ;;  %v29370_v24 = vld [vmem:[#allocation45_spill] sm:$0xff] }
 0x6de   : > { %v4852_v21 = vrot.slane %v4851_v16, 4  ;;  %v4819_v22 = vsel %vm24192_vm10, %v4814_v6, %v4818_v46  ;;  %v4881_v60 = vsel %vm24192_vm10, %v4876_v53, %v26674_v34  ;;  %v29369_v16 = vld [vmem:[#allocation40_spill] sm:$0xff]  ;;  %v4895_v28 = vrot.slane %v4893_v45, 4 }
 0x6df   : > { %v4890_v17 = vrot.slane %v4888_v44, 5  ;;  %v4864_v8 = vshll.u32 %v29369_v16, 16  ;;  %v4898_v26 = vrot.slane %v4896_v33, 5  ;;  %v4932_v2 = vrot.slane %v4930_v18, 4  ;;  %v29373_v16 = vld [vmem:[#allocation48_spill] sm:$0xff] }
 0x6e0   : > { %v4857_v3 = vsel %vm24192_vm10, %v4852_v21, %v4856_v5  ;;  %v4862_v51 = vrot.slane %v4861_v38, 4  ;;  %v4923_v34 = vor.u32 %v4922_v56, %v4919_v9  ;;  %v4902_v29 = vshll.u32 %v29370_v24, 16  ;;  %v26731_v9 = vld [vmem:[#allocation2 + $0xc0] sm:$0xff]  }
 0x6e1   : > { %v4891_v15 = vsel %vm24192_vm10, %v4886_v4, %v4890_v17  ;;  %v4906_v46 = vshrl.u32 %v29370_v24, 16  ;;  %v26725_v58 = vadd.f32 %v26590_v27, %v5607_v41  ;;  %v5608_v44 = vunpack.c.l.bf16 %v4819_v22  ;;  %v29372_v4 = vld [vmem:[#allocation44_spill] sm:$0xff] }
 0x6e2   : > { %21167 = vmatmul.mubr.bf16.gmra.mrb[84].mxu0 %v26514_v13  ;;  %v5613_v5 = vunpack.c.l.bf16 %v4881_v60  ;;  %v5611_v21 = vunpack.c.l.bf16 %v4857_v3  ;;  %v5614_v45 = vunpack.c.l.bf16 %v4891_v15  ;;  %v4924_v18 = vrot.slane %v4923_v34, 4  ;;  %v29375_v15 = vld [vmem:[#allocation49_spill] sm:$0xff] }
 0x6e3   : > { %21170 = vmatprep.mubr.bf16.mxu0 %v26518_v61  ;;  %v4926_v61 = vshll.u32 %v29367_v10, 16  ;;  %v4866_v10 = vrot.slane %v4864_v8, 5  ;;  %v4936_v38 = vshll.u32 %v29372_v4, 16  ;;  %v4904_v56 = vrot.slane %v4902_v29, 5 }
 0x6e4   : > { %v4908_v41 = vrot.slane %v4906_v46, 4  ;;  %v26737_v60 = vadd.f32 %v26590_v27, %v5608_v44  ;;  %v4941_v8 = vshrl.u32 %v29373_v16, 16  ;;  %v26748_v34 = vadd.f32 %v26590_v27, %v5611_v21 }
 0x6e5   : > { %v26713_v43 = vrot.slane %v4926_v61, 5  ;;  %v4899_v61 = vor.u32 %v4898_v26, %v4895_v28  ;;  %v4867_v33 = vsel %vm24192_vm10, %v4862_v51, %v4866_v10  ;;  %v4944_v28 = vshll.u32 %v29373_v16, 16  ;;  %v23408_v16 = vld [vmem:[%s29000_s3 + $0xc8] sm:$0xff]  }
 0x6e6   : > { %v26743_v26 = vadd.f32 %v26590_v27, %v5613_v5  ;;  %v4974_v51 = vshll.u32 %v29375_v15, 16  ;;  %v26751_v24 = vadd.f32 %v26590_v27, %v5614_v45  ;;  %v5612_v29 = vunpack.c.l.bf16 %v4867_v33  ;;  %v29378_v45 = vld [vmem:[#allocation46_spill] sm:$0xff] }
 0x6e7   : > { %v4933_v7 = vor.u32 %v4932_v2, %v26713_v43  ;;  %v4900_v2 = vrot.slane %v4899_v61, 4  ;;  %v4938_v46 = vrot.slane %v4936_v38, 5  ;;  %v4943_v10 = vrot.slane %v4941_v8, 4 }
 0x6e8   : > { %29374 = vst [vmem:[#allocation72_spill] sm:$0xff] %v26743_v26  ;;  %29376 = vst [vmem:[#allocation9_spill] sm:$0xff] %v26751_v24  ;;  %v4946_v5 = vrot.slane %v4944_v28, 5  ;;  %v4912_v33 = vshll.u32 %v29378_v45, 16  ;;  %v4976_v4 = vrot.slane %v4974_v51, 5  ;;  %v29381_v28 = vld [vmem:[#allocation55_spill] sm:$0xff] }
 0x6e9   : > { %v4934_v3 = vrot.slane %v4933_v7, 4  ;;  %v4905_v61 = vsel %vm24192_vm10, %v4900_v2, %v4904_v56  ;;  %v5022_v2 = vshll.u32 %v29381_v28, 16 }
 0x6ea   : > { %21171 = vmatmul.mubr.bf16.gmra.mrb[88].mxu0 %v26520_v23  ;;  %v29371_v23 = vld [vmem:[#allocation47_spill] sm:$0xff] }
 0x6eb   : > { %21174 = vmatprep.mubr.bf16.mxu0 %v26524_v35  ;;  %v4965_v6 = vshrl.u32 %v29371_v23, 16  ;;  %v4968_v53 = vshll.u32 %v29371_v23, 16  ;;  %v5610_v35 = vunpack.c.l.bf16 %v4843_v30  ;;  %v4929_v23 = vsel %vm24192_vm10, %v4924_v18, %v26713_v43  ;;  %v29379_v43 = vld [vmem:[#allocation53_spill] sm:$0xff] }
 0x6ec   : > { %v4939_v7 = vsel %vm24192_vm10, %v4934_v3, %v4938_v46  ;;  %v5013_v18 = vshrl.u32 %v29379_v43, 16  ;;  %v5016_v38 = vshll.u32 %v29379_v43, 16  ;;  %v5026_v3 = vshrl.u32 %v29381_v28, 16 }
 0x6ed   : > { %v4967_v17 = vrot.slane %v4965_v6, 4  ;;  %v4970_v30 = vrot.slane %v4968_v53, 5  ;;  %v26734_v22 = vadd.f32 %v26590_v27, %v5610_v35  ;;  %v4909_v6 = vor.u32 %v4908_v41, %v4904_v56  ;;  %v29377_v35 = vld [vmem:[#allocation51_spill] sm:$0xff]  ;;  %v29380_v41 = vld [vmem:[#allocation54_spill] sm:$0xff] }
 0x6ee   : > { %v4950_v44 = vshll.u32 %v29377_v35, 16  ;;  %v4954_v21 = vshrl.u32 %v29377_v35, 16  ;;  %v5617_v45 = vunpack.c.l.bf16 %v4929_v23  ;;  %v5615_v43 = vunpack.c.l.bf16 %v4905_v61 }
 0x6ef   : > { %v4971_v53 = vor.u32 %v4970_v30, %v4967_v17  ;;  %v4989_v17 = vshrl.u32 %v29380_v41, 16  ;;  %v4992_v30 = vshll.u32 %v29380_v41, 16  ;;  %v4910_v8 = vrot.slane %v4909_v6, 4 }
 0x6f0   : > { %v4952_v51 = vrot.slane %v4950_v44, 5  ;;  %v4956_v35 = vrot.slane %v4954_v21, 4  ;;  %v5618_v55 = vunpack.c.l.bf16 %v4939_v7  ;;  %v4914_v41 = vrot.slane %v4912_v33, 5  ;;  %v23409_v44 = vld [vmem:[%s29000_s3 + $0xd0] sm:$0xff]  }
 0x6f1   : > { %v4972_v56 = vrot.slane %v4971_v53, 4  ;;  %v5015_v6 = vrot.slane %v5013_v18, 4  ;;  %v5018_v53 = vrot.slane %v5016_v38, 5  ;;  %v4991_v24 = vrot.slane %v4989_v17, 4  ;;  %v29382_v21 = vld [vmem:[#allocation57_spill] sm:$0xff] }
 0x6f2   : > { %21175 = vmatmul.mubr.bf16.gmra.mrb[92].mxu0 %v26731_v9  ;;  %v4994_v26 = vrot.slane %v4992_v30, 5  ;;  %v4998_v61 = vshll.u32 %v29382_v21, 16  ;;  %v26787_v7 = vadd.f32 %v26590_v27, %v5612_v29  ;;  %v26790_v33 = vadd.f32 %v26590_v27, %v5617_v45  ;;  %v10878_v17 = vld [vmem:[#allocation2 + $0x10] sm:$0xf]  ;;  %v29383_v30 = vld [vmem:[#allocation50_spill] sm:$0xff] }
 0x6f3   : > { %21194 = vmatprep.mubr.bf16.mxu0 %v26464_v40  ;;  %v4978_v40 = vshrl.u32 %v29375_v15, 16  ;;  %v4947_v15 = vor.u32 %v4946_v5, %v4943_v10  ;;  %v4977_v23 = vsel %vm24192_vm10, %v4972_v56, %v4976_v4  ;;  %v26783_v10 = vrot.slane %v5022_v2, 5  ;;  %v29384_v56 = vld [vmem:[#allocation52_spill] sm:$0xff]  ;;  %v23410_v29 = vld [vmem:[%s29000_s3 + $0xd8] sm:$0xff]  }
 0x6f4   : > { %v26793_v18 = vadd.f32 %v26590_v27, %v5615_v43  ;;  %v5002_v38 = vshrl.u32 %v29382_v21, 16  ;;  %v5019_v28 = vor.u32 %v5018_v53, %v5015_v6  ;;  %v4995_v2 = vor.u32 %v4994_v26, %v4991_v24  ;;  %v10877_v26 = vld [vmem:[#allocation2 + $0xc] sm:$0xf] }
 0x6f5   : > { %v4980_v46 = vrot.slane %v4978_v40, 4  ;;  %v4948_v5 = vrot.slane %v4947_v15, 4  ;;  %v4957_v40 = vor.u32 %v4956_v35, %v4952_v51  ;;  %v10962_v24 = vshll.u32 %v10878_v17, 16  ;;  %v29385_v53 = vld [vmem:[#allocation56_spill] sm:$0xff] }
 0x6f6   : > { %v10966_v6 = vshrl.u32 %v10878_v17, 16  ;;  %v5032_v21 = vshll.u32 %v29385_v53, 16 }
 0x6f7   : > { %v4958_v43 = vrot.slane %v4957_v40, 4 }
 0x6fa   : > { %21195 = vmatmul.mubr.bf16.vlgmr.msra.gmra.mrb[64].mxu0 %v26470_v25  ;;  %v4915_v25 = vsel %vm24192_vm10, %v4910_v8, %v4914_v41  ;;  %v4984_v8 = vshll.u32 %v29383_v30, 16  ;;  %v5000_v41 = vrot.slane %v4998_v61, 5  ;;  %v5004_v30 = vrot.slane %v5002_v38, 4  ;;  %v10880_v38 = vld [vmem:[#allocation2 + $0x18] sm:$0xf] }
 0x6fb   : > { %21227 = vmatpush3.bf16.msra.mxu0 %v26628_v1  ;;  %21198 = vmatprep.mubr.bf16.mxu0 %v26475_v50  ;;  %v5028_v1 = vrot.slane %v5026_v3, 4  ;;  %v4981_v50 = vor.u32 %v4980_v46, %v4976_v4  ;;  %v4960_v4 = vshll.u32 %v29384_v56, 16  ;;  %v26802_v3 = vadd.f32 %v26590_v27, %v5618_v55 }
 0x6fc   : > { %21228 = vmatprep.subr.bf16.mxu0 %v23408_v16  ;;  %v5616_v15 = vunpack.c.l.bf16 %v4915_v25  ;;  %v5621_v46 = vunpack.c.l.bf16 %v4977_v23  ;;  %v4986_v55 = vrot.slane %v4984_v8, 5  ;;  %v5020_v23 = vrot.slane %v5019_v28, 4 }
 0x6fd   : > { %v5029_v35 = vor.u32 %v5028_v1, %v26783_v10  ;;  %v4982_v45 = vrot.slane %v4981_v50, 4  ;;  %v4962_v25 = vrot.slane %v4960_v4, 5  ;;  %v4996_v1 = vrot.slane %v4995_v2, 4 }
 0x6fe   : > { %v26817_v50 = vadd.f32 %v26590_v27, %v5621_v46  ;;  %v26823_v56 = vrot.slane %v10962_v24, 5  ;;  %v10968_v4 = vrot.slane %v10966_v6, 4  ;;  %v5034_v28 = vrot.slane %v5032_v21, 5 }
 0x6ff   : > { %21229 = vmatpush3.bf16.msra.mxu0 %v23408_v16  ;;  %v4953_v16 = vsel %vm24192_vm10, %v4948_v5, %v4952_v51  ;;  %v23411_v51 = vld [vmem:[%s29000_s3 + $0xe0] sm:$0xff]   ;;  %v10881_v5 = vld [vmem:[#allocation2 + $0x1c] sm:$0xf]  ;;  %v5030_v61 = vrot.slane %v5029_v35, 4  ;;  %v4987_v17 = vsel %vm24192_vm10, %v4982_v45, %v4986_v55  ;;  %v4963_v8 = vsel %vm24192_vm10, %v4958_v43, %v4962_v25  ;;  %v23412_v45 = vld [vmem:[%s29000_s3 + $0xe8] sm:$0xff]  }
 0x700   : > { %21230 = vmatprep.subr.bf16.mxu0 %v23409_v44  ;;  %v5619_v40 = vunpack.c.l.bf16 %v4953_v16  ;;  %v5005_v2 = vor.u32 %v5004_v30, %v5000_v41  ;;  %v10990_v46 = vshrl.u32 %v10881_v5, 16  ;;  %v5025_v35 = vsel %vm24192_vm10, %v5020_v23, %v26783_v10  ;;  %v10879_v43 = vld [vmem:[#allocation2 + $0x14] sm:$0x1]  ;;  %v10883_v55 = vld [vmem:[#allocation2 + $0x24] sm:$0xf]  ;;  %v29386_v10 = vld [vmem:[#allocation58_spill] sm:$0xff] }
 0x701   : > { %v5001_v16 = vsel %vm24192_vm10, %v4996_v1, %v5000_v41  ;;  %v10980_v24 = vshll.u32 %v10880_v38, 16  ;;  %v5622_v6 = vunpack.c.l.bf16 %v4987_v17  ;;  %v5620_v30 = vunpack.c.l.bf16 %v4963_v8 }
 0x702   : > { %21199 = vmatmul.mubr.bf16.gmra.mrb[68].mxu0 %v26482_v49  ;;  %v26814_v49 = vadd.f32 %v26590_v27, %v5616_v15  ;;  %v10986_v15 = vshll.u32 %v10881_v5, 16  ;;  %v5008_v25 = vshll.u32 %v29386_v10, 16  ;;  %v10969_v41 = vor.u32 %v10968_v4, %v26823_v56 }
 0x703   : > { %21202 = vmatprep.mubr.bf16.mxu0 %v26487_v54  ;;  %21231 = vmatpush3.bf16.msra.mxu0 %v23409_v44  ;;  %v10953_v54 = vshrl.u32 %v10877_v26, 16  ;;  %v10956_v44 = vshll.u32 %v10877_v26, 16  ;;  %v10977_v26 = vshrl.u32 %v10880_v38, 16  ;;  %v5625_v23 = vunpack.c.l.bf16 %v5025_v35 }
 0x704   : > { %21232 = vmatprep.subr.bf16.mxu0 %v23410_v29  ;;  %v5623_v1 = vunpack.c.l.bf16 %v5001_v16  ;;  %v5006_v5 = vrot.slane %v5005_v2, 4  ;;  %v10972_v38 = vshll.u32 %v10879_v43, 16  ;;  %v26839_v17 = vrot.slane %v10986_v15, 5  ;;  %v10882_v43 = vld [vmem:[#allocation2 + $0x20] sm:$0x1] }
 0x705   : > { %v10955_v53 = vrot.slane %v10953_v54, 4  ;;  %v10958_v21 = vrot.slane %v10956_v44, 5  ;;  %v23413_v44 = vld [vmem:[%s29000_s3 + $0xf0] sm:$0xff]   ;;  %v10979_v8 = vrot.slane %v10977_v26, 4  ;;  %v11004_v4 = vshll.u32 %v10883_v55, 16 }
 0x706   : > { %v26845_v2 = vadd.f32 %v26590_v27, %v5619_v40  ;;  %v26854_v26 = vadd.f32 %v26590_v27, %v5625_v23 }
 0x707   : > { %21233 = vmatpush3.bf16.msra.mxu0 %v23410_v29  ;;  %v5035_v29 = vsel %vm24192_vm10, %v5030_v61, %v5034_v28  ;;  %v10992_v61 = vrot.slane %v10990_v46, 4  ;;  %v11001_v28 = vshrl.u32 %v10883_v55, 16  ;;  %v10959_v16 = vor.u32 %v10958_v21, %v10955_v53  ;;  %v10884_v21 = vld [vmem:[#allocation2 + $0x28] sm:$0xf] }
 0x708   : > { %21234 = vmatprep.subr.bf16.mxu0 %v23411_v51  ;;  %v5626_v54 = vunpack.c.l.bf16 %v5035_v29  ;;  %v10970_v46 = vrot.slane %v10969_v41, 4  ;;  %v26851_v29 = vadd.f32 %v26590_v27, %v5620_v30  ;;  %29387 = vst [vmem:[#allocation73_spill] sm:$0xff] %v26854_v26  ;;  %v10974_v41 = vrot.slane %v10972_v38, 5  ;;  %v26871_v26 = vld [vmem:[#allocation2 + $0x30] sm:$0xf] }
 0x70a   : > { %21203 = vmatmul.mubr.bf16.gmra.mrb[72].mxu0 %v26494_v62  ;;  %v10982_v62 = vrot.slane %v10980_v24, 5  ;;  %v26857_v24 = vadd.f32 %v26590_v27, %v5623_v1  ;;  %v26862_v55 = vadd.f32 %v26590_v27, %v5626_v54  ;;  %v11006_v1 = vrot.slane %v11004_v4, 5 }
 0x70b   : > { %21206 = vmatprep.mubr.bf16.mxu0 %v26499_v39  ;;  %21235 = vmatpush3.bf16.msra.mxu0 %v23411_v51  ;;  %v26848_v39 = vadd.f32 %v26590_v27, %v5622_v6  ;;  %v5010_v51 = vrot.slane %v5008_v25, 5  ;;  %v10993_v6 = vor.u32 %v10992_v61, %v26839_v17  ;;  %v23414_v25 = vld [vmem:[%s29000_s3 + $0xf8] sm:$0xff]   ;;  %v10996_v54 = vshll.u32 %v10882_v43, 16 }
 0x70c   : > { %21236 = vmatprep.subr.bf16.mxu0 %v23412_v45  ;;  %29388 = vst [vmem:[#allocation68_spill] sm:$0xff] %v26857_v24  ;;  %29389 = vst [vmem:[#allocation65_spill] sm:$0xff] %v26862_v55  ;;  %v10983_v23 = vor.u32 %v10982_v62, %v10979_v8  ;;  %v10885_v55 = vld [vmem:[#allocation2 + $0x2c] sm:$0x1]  ;;  %v11014_v24 = vshrl.u32 %v10884_v21, 16 }
 0x70d   : > { %v21004_v35 = vpop.f32.mrb[32].mxu0  ;;  %v5011_v30 = vsel %vm24192_vm10, %v5006_v5, %v5010_v51  ;;  %v10975_v5 = vsel %vm24192_vm10, %v10970_v46, %v10974_v41  ;;  %v11010_v51 = vshll.u32 %v10884_v21, 16 }
 0x70e   : > { %v8800_v15 = vpop.f32.mrb[33].mxu0  ;;  %v5624_v38 = vunpack.c.l.bf16 %v5011_v30  ;;  %v11016_v21 = vrot.slane %v11014_v24, 4 }
 0x70f   : > { %v21979_v53 = vadd.f32 %v8800_v15, %v26617_v47  ;;  %v21005_v40 = vpop.f32.mrb[34].mxu0  ;;  %21237 = vmatpush3.bf16.msra.mxu0 %v23412_v45  ;;  %v11003_v47 = vrot.slane %v11001_v28, 4  ;;  %v21978_v45 = vadd.f32 %v21004_v35, %v26609_v48  ;;  %v10960_v15 = vrot.slane %v10959_v16, 4 }
 0x710   : > { %v8803_v10 = vpop.f32.mrb[35].mxu0  ;;  %21238 = vmatprep.subr.bf16.mxu0 %v23413_v44  ;;  %v21980_v62 = vadd.f32 %v21005_v40, %v26631_v14  ;;  %v10994_v48 = vrot.slane %v10993_v6, 4  ;;  %v11020_v35 = vshll.u32 %v10885_v55, 16  ;;  %v11025_v16 = vshrl.u32 %v26871_v26, 16 }
 0x711   : > { %v21981_v61 = vadd.f32 %v8803_v10, %v26634_v0  ;;  %v8959_v8 = vmax.f32 %v21979_v53, 0.0  ;;  %v26881_v0 = vld [vmem:[%s29000_s3 + $0x100] sm:$0xff]   ;;  %v11007_v4 = vor.u32 %v11006_v1, %v11003_v47  ;;  %v8961_v46 = vmax.f32 %v21978_v45, 0.0 }
 0x712   : > { %21207 = vmatmul.mubr.bf16.gmra.mrb[76].mxu0 %v26506_v19  ;;  %v10984_v19 = vrot.slane %v10983_v23, 4  ;;  %v10998_v14 = vrot.slane %v10996_v54, 5  ;;  %v26889_v6 = vrot.slane %v11010_v51, 5  ;;  %v26892_v30 = vadd.f32 %v26590_v27, %v5624_v38  ;;  %v10875_v51 = vld [vmem:[#allocation2 + $0x4] sm:$0xf] }
 0x713   : > { %v8960_v28 = vmax.f32 %v21981_v61, 0.0  ;;  %21210 = vmatprep.mubr.bf16.mxu0 %v26508_v11  ;;  %21239 = vmatpush3.bf16.msra.mxu0 %v23413_v44  ;;  %v10965_v11 = vsel %vm24192_vm10, %v10960_v15, %v26823_v56  ;;  %v8962_v55 = vmax.f32 %v21980_v62, 0.0  ;;  %v10887_v56 = vld [vmem:[#allocation2 + $0x34] sm:$0xf]  ;;  %v26901_v45 = vrot.slane %v11007_v4, 4 }
 0x714   : > { %21240 = vmatprep.subr.bf16.mxu0 %v23414_v25  ;;  %v26887_v40 = vcombine.low %v10965_v11, %v10975_v5  ;;  %v10999_v47 = vsel %vm24192_vm10, %v10994_v48, %v10998_v14  ;;  %v10989_v24 = vsel %vm24192_vm10, %v10984_v19, %v26839_v17  ;;  %v26903_v27 = vrot.slane %v11020_v35, 5  ;;  %v10874_v5 = vld [vmem:[#allocation2] sm:$0xf] }
 0x715   : > { %v8991_v43 = vadd.f32 %v8960_v28, %v8959_v8  ;;  %v21008_v53 = vpop.f32.mrb[36].mxu0  ;;  %v26905_v61 = vrot.slane %v11025_v16, 4  ;;  %v26910_v38 = vcombine.low %v10989_v24, %v10999_v47  ;;  %v11017_v17 = vor.u32 %v11016_v21, %v26889_v6  ;;  %v10888_v8 = vld [vmem:[#allocation2 + $0x38] sm:$0x1] }
 0x716   : > { %v8816_v44 = vpop.f32.mrb[37].mxu0  ;;  %v11028_v62 = vshll.u32 %v26871_v26, 16  ;;  %v11034_v28 = vshll.u32 %v10887_v56, 16  ;;  %v11038_v4 = vshrl.u32 %v10887_v56, 16  ;;  %v10929_v35 = vshrl.u32 %v10874_v5, 16 }
 0x717   : > { %v8992_v10 = vadd.f32 %v8991_v43, %v8961_v46  ;;  %v21983_v41 = vadd.f32 %v8816_v44, %v26641_v12  ;;  %v21009_v23 = vpop.f32.mrb[38].mxu0  ;;  %21241 = vmatpush3.bf16.msra.mxu0 %v23414_v25  ;;  %v21982_v12 = vadd.f32 %v21008_v53, %v26637_v36  ;;  %v10932_v16 = vshll.u32 %v10874_v5, 16 }
 0x718   : > { %v8819_v1 = vpop.f32.mrb[39].mxu0  ;;  %21274 = vmatprep.subr.bf16.mxu0 %v26881_v0  ;;  %v21984_v19 = vadd.f32 %v21009_v23, %v26644_v57  ;;  %v10938_v46 = vshll.u32 %v10875_v51, 16  ;;  %v11013_v26 = vsel %vm24192_vm10, %v26901_v45, %v26889_v6  ;;  %v11044_v14 = vshll.u32 %v10888_v8, 16 }
 0x719   : > { %v8963_v25 = vmax.f32 %v21983_v41, 0.0  ;;  %v8993_v15 = vadd.f32 %v8992_v10, %v8962_v55  ;;  %v21985_v54 = vadd.f32 %v8819_v1, %v26647_v31  ;;  %v10889_v31 = vld [vmem:[#allocation2 + $0x3c] sm:$0xf]  ;;  %v8965_v43 = vmax.f32 %v21982_v12, 0.0  ;;  %v10890_v1 = vld [vmem:[#allocation2 + $0x40] sm:$0xf] }
 0x71a   : > { %21211 = vmatmul.mubr.bf16.gmra.mrb[80].mxu0 %v26512_v59  ;;  %v10942_v59 = vshrl.u32 %v10875_v51, 16  ;;  %v26920_v57 = vrot.slane %v11017_v17, 4  ;;  %v26922_v21 = vrot.slane %v11028_v62, 5  ;;  %v11049_v55 = vshrl.u32 %v10889_v31, 16  ;;  %v26931_v62 = vld [vmem:[#allocation2 + $0x8] sm:$0x1] }
 0x71b   : > { %v8994_v48 = vadd.f32 %v8993_v15, %v8963_v25  ;;  %v8964_v36 = vmax.f32 %v21985_v54, 0.0  ;;  %21214 = vmatprep.mubr.bf16.mxu0 %v26514_v13  ;;  %v26924_v13 = vrot.slane %v11034_v28, 5  ;;  %v8966_v10 = vmax.f32 %v21984_v19, 0.0  ;;  %v23547_v28 = vld [vmem:[#allocation2 + $0x9c] sm:$0xff]  }
 0x71c   : > { %v11040_v56 = vrot.slane %v11038_v4, 4  ;;  %v10931_v12 = vrot.slane %v10929_v35, 4  ;;  %v10934_v25 = vrot.slane %v10932_v16, 5  ;;  %v26927_v15 = vrot.slane %v10938_v46, 5  ;;  %v23548_v46 = vld [vmem:[#allocation2 + $0xa8] sm:$0xff]  }
 0x71d   : > { %v8995_v53 = vadd.f32 %v8994_v48, %v8964_v36  ;;  %v21012_v11 = vpop.f32.mrb[40].mxu0  ;;  %v10944_v54 = vrot.slane %v10942_v59, 4  ;;  %v11052_v48 = vshll.u32 %v10889_v31, 16  ;;  %v11058_v19 = vshll.u32 %v10890_v1, 16  ;;  %v26938_v59 = vld [vmem:[#allocation2 + $0x44] sm:$0x1] }
 0x71e   : > { %v8832_v44 = vpop.f32.mrb[41].mxu0  ;;  %v21986_v5 = vadd.f32 %v21012_v11, %v26668_v32  ;;  %v11062_v36 = vshrl.u32 %v10890_v1, 16  ;;  %v11031_v32 = vor.u32 %v26922_v21, %v26905_v61  ;;  %v11051_v11 = vrot.slane %v11049_v55, 4  ;;  %v10892_v31 = vld [vmem:[#allocation2 + $0x48] sm:$0xf] }
 0x71f   : > { %v8996_v41 = vadd.f32 %v8995_v53, %v8965_v43  ;;  %v21987_v23 = vadd.f32 %v8832_v44, %v26678_v37  ;;  %v21013_v47 = vpop.f32.mrb[42].mxu0  ;;  %v26933_v37 = vrot.slane %v11044_v14, 5  ;;  %v10945_v43 = vor.u32 %v10944_v54, %v26927_v15  ;;  %v10893_v54 = vld [vmem:[#allocation2 + $0x4c] sm:$0xf] }
 0x720   : > { %v8835_v24 = vpop.f32.mrb[43].mxu0  ;;  %v21988_v35 = vadd.f32 %v21013_v47, %v26685_v63  ;;  %v10948_v53 = vshll.u32 %v26931_v62, 16  ;;  %v8969_v14 = vmax.f32 %v21986_v5, 0.0  ;;  %v11023_v63 = vsel %vm24192_vm10, %v26920_v57, %v26903_v27 }
 0x721   : > { %v8967_v51 = vmax.f32 %v21987_v23, 0.0  ;;  %v8997_v17 = vadd.f32 %v8996_v41, %v8966_v10  ;;  %v21989_v8 = vadd.f32 %v8835_v24, %v26699_v52  ;;  %v10935_v52 = vor.u32 %v10934_v25, %v10931_v12 }
 0x722   : > { %21215 = vmatmul.mubr.bf16.gmra.mrb[84].mxu0 %v23547_v28  ;;  %v11041_v41 = vor.u32 %v11040_v56, %v26924_v13  ;;  %v11054_v21 = vrot.slane %v11052_v48, 5  ;;  %v26947_v23 = vrot.slane %v11058_v19, 5  ;;  %v11064_v47 = vrot.slane %v11062_v36, 4  ;;  %v23549_v36 = vld [vmem:[#allocation2 + $0xb4] sm:$0xff]  }
 0x723   : > { %v8998_v4 = vadd.f32 %v8997_v17, %v8967_v51  ;;  %v8968_v16 = vmax.f32 %v21989_v8, 0.0  ;;  %21218 = vmatprep.mubr.bf16.mxu0 %v23548_v46  ;;  %v11068_v1 = vshll.u32 %v26938_v59, 16  ;;  %v8970_v24 = vmax.f32 %v21988_v35, 0.0 }
 0x724   : > { %v11073_v5 = vshrl.u32 %v10892_v31, 16  ;;  %v10936_v17 = vrot.slane %v10935_v52, 4  ;;  %v10946_v8 = vrot.slane %v10945_v43, 4  ;;  %v10950_v27 = vrot.slane %v10948_v53, 5 }
 0x725   : > { %v8999_v44 = vadd.f32 %v8998_v4, %v8968_v16  ;;  %v21016_v10 = vpop.f32.mrb[44].mxu0  ;;  %v11076_v57 = vshll.u32 %v10892_v31, 16  ;;  %v11042_v4 = vrot.slane %v11041_v41, 4  ;;  %v11055_v35 = vor.u32 %v11054_v21, %v11051_v11 }
 0x726   : > { %v8848_v61 = vpop.f32.mrb[45].mxu0  ;;  %v21990_v56 = vadd.f32 %v21016_v10, %v26702_v20  ;;  %v11082_v16 = vshll.u32 %v10893_v54, 16  ;;  %v11075_v43 = vrot.slane %v11073_v5, 4  ;;  %v10941_v20 = vsel %vm24192_vm10, %v10936_v17, %v26927_v15  ;;  %v10895_v10 = vld [vmem:[#allocation2 + $0x54] sm:$0xf] }
 0x727   : > { %v9000_v55 = vadd.f32 %v8999_v44, %v8969_v14  ;;  %v21991_v12 = vadd.f32 %v8848_v61, %v26725_v58  ;;  %v21017_v25 = vpop.f32.mrb[46].mxu0  ;;  %v11065_v58 = vor.u32 %v11064_v47, %v26947_v23  ;;  %v11078_v53 = vrot.slane %v11076_v57, 5  ;;  %v23415_v61 = vld [vmem:[#allocation2 + $0xcc] sm:$0xff]  }
 0x728   : > { %v8851_v51 = vpop.f32.mrb[47].mxu0  ;;  %v21992_v59 = vadd.f32 %v21017_v25, %v26734_v22  ;;  %v11086_v31 = vshrl.u32 %v10893_v54, 16  ;;  %v8973_v11 = vmax.f32 %v21990_v56, 0.0  ;;  %v26966_v22 = vcombine.low %v11013_v26, %v11023_v63 }
 0x729   : > { %v8971_v28 = vmax.f32 %v21991_v12, 0.0  ;;  %v9001_v48 = vadd.f32 %v9000_v55, %v8970_v24  ;;  %v21993_v19 = vadd.f32 %v8851_v51, %v26737_v60  ;;  %v10951_v60 = vsel %vm24192_vm10, %v10946_v8, %v10950_v27 }
 0x72a   : > { %21219 = vmatmul.mubr.bf16.gmra.mrb[88].mxu0 %v23549_v36  ;;  %v11047_v15 = vsel %vm24192_vm10, %v11042_v4, %v26933_v37  ;;  %v26971_v21 = vrot.slane %v11055_v35, 4  ;;  %v26973_v47 = vrot.slane %v11065_v58, 4  ;;  %v26975_v24 = vrot.slane %v11082_v16, 5  ;;  %v29390_v37 = vld [vmem:[#allocation72_spill] sm:$0xff]  ;;  %v29391_v36 = vld [vmem:[#allocation9_spill] sm:$0xff] }
 0x72b   : > { %v9002_v46 = vadd.f32 %v9001_v48, %v8971_v28  ;;  %v8972_v52 = vmax.f32 %v21993_v19, 0.0  ;;  %21222 = vmatprep.mubr.bf16.mxu0 %v26731_v9  ;;  %v11032_v9 = vrot.slane %v11031_v32, 4  ;;  %v8974_v55 = vmax.f32 %v21992_v59, 0.0  ;;  %v26978_v32 = vld [vmem:[#allocation2 + $0x58] sm:$0xf] }
 0x72c   : > { %v18590_v26 = vcombine.low %v10941_v20, %v10951_v60  ;;  %v11079_v25 = vor.u32 %v11078_v53, %v11075_v43  ;;  %v11088_v54 = vrot.slane %v11086_v31, 4  ;;  %v11097_v5 = vshrl.u32 %v10895_v10, 16  ;;  %v26990_v16 = vld [vmem:[#allocation2 + $0x50] sm:$0x1]  ;;  %v27002_v31 = vld [vmem:[#allocation2 + $0x64] sm:$0xf] }
 0x72d   : > { %v9003_v14 = vadd.f32 %v9002_v46, %v8972_v52  ;;  %v21020_v44 = vpop.f32.mrb[48].mxu0  ;;  %v11100_v51 = vshll.u32 %v10895_v10, 16  ;;  %v11070_v56 = vrot.slane %v11068_v1, 5  ;;  %v11106_v28 = vshll.u32 %v26978_v32, 16 }
 0x72e   : > { %v8864_v41 = vpop.f32.mrb[49].mxu0  ;;  %v21994_v17 = vadd.f32 %v21020_v44, %v29390_v37  ;;  %v11110_v48 = vshrl.u32 %v26978_v32, 16  ;;  %v11089_v1 = vor.u32 %v11088_v54, %v26975_v24  ;;  %v11099_v46 = vrot.slane %v11097_v5, 4 }
 0x72f   : > { %v9004_v12 = vadd.f32 %v9003_v14, %v8973_v11  ;;  %v21995_v6 = vadd.f32 %v8864_v41, %v26748_v34  ;;  %v21021_v45 = vpop.f32.mrb[50].mxu0  ;;  %v11037_v34 = vsel %vm24192_vm10, %v11032_v9, %v26924_v13  ;;  %v11061_v13 = vsel %vm24192_vm10, %v26971_v21, %v26947_v23  ;;  %v27008_v21 = vld [vmem:[#allocation2 + $0x5c] sm:$0x1] }
 0x730   : > { %v8867_v63 = vpop.f32.mrb[51].mxu0  ;;  %v21996_v4 = vadd.f32 %v21021_v45, %v29391_v36  ;;  %v26988_v58 = vcombine.low %v11037_v34, %v11047_v15  ;;  %v11102_v59 = vrot.slane %v11100_v51, 5  ;;  %v8977_v52 = vmax.f32 %v21994_v17, 0.0 }
 0x731   : > { %v8975_v8 = vmax.f32 %v21995_v6, 0.0  ;;  %v9005_v27 = vadd.f32 %v9004_v12, %v8974_v55  ;;  %v21997_v57 = vadd.f32 %v8867_v63, %v26787_v7  ;;  %v10898_v7 = vld [vmem:[#allocation2 + $0x60] sm:$0xf]  ;;  %v11071_v60 = vsel %vm24192_vm10, %v26973_v47, %v11070_v56  ;;  %v23417_v12 = vld [vmem:[%s29000_s3 + $0x108] sm:$0xff]  }
 0x732   : > { %21223 = vmatmul.mubr.bf16.gmra.mrb[92].mxu0 %v23415_v61  ;;  %v27000_v53 = vrot.slane %v11079_v25, 4  ;;  %v11092_v14 = vshll.u32 %v26990_v16, 16  ;;  %v27005_v44 = vrot.slane %v11106_v28, 5  ;;  %v11112_v23 = vrot.slane %v11110_v48, 4  ;;  %v23418_v28 = vld [vmem:[%s29000_s3 + $0x110] sm:$0xff]  }
 0x733   : > { %v9006_v19 = vadd.f32 %v9005_v27, %v8975_v8  ;;  %v8976_v35 = vmax.f32 %v21997_v57, 0.0  ;;  %21242 = vmatprep.mubr.bf16.mxu0 %v18590_v26  ;;  %v11121_v9 = vshrl.u32 %v10898_v7, 16  ;;  %v8978_v10 = vmax.f32 %v21996_v4, 0.0 }
 0x734   : > { %v11124_v55 = vshll.u32 %v10898_v7, 16  ;;  %v11090_v6 = vrot.slane %v11089_v1, 4  ;;  %v11103_v45 = vor.u32 %v11102_v59, %v11099_v46  ;;  %v11130_v26 = vshll.u32 %v27002_v31, 16  ;;  %v27038_v46 = vld [vmem:[#allocation2 + $0x70] sm:$0xf] }
 0x735   : > { %v9007_v43 = vadd.f32 %v9006_v19, %v8976_v35  ;;  %v21024_v20 = vpop.f32.mrb[52].mxu0  ;;  %v11134_v63 = vshrl.u32 %v27002_v31, 16  ;;  %v11094_v51 = vrot.slane %v11092_v14, 5  ;;  %v11113_v37 = vor.u32 %v11112_v23, %v27005_v44 }
 0x736   : > { %v8880_v11 = vpop.f32.mrb[53].mxu0  ;;  %v21998_v25 = vadd.f32 %v21024_v20, %v26790_v33  ;;  %v11116_v17 = vshll.u32 %v27008_v21, 16  ;;  %v11123_v8 = vrot.slane %v11121_v9, 4  ;;  %v27023_v33 = vld [vmem:[#allocation2 + $0x68] sm:$0x1]  ;;  %v11126_v56 = vrot.slane %v11124_v55, 5 }
 0x737   : > { %v9008_v41 = vadd.f32 %v9007_v43, %v8977_v52  ;;  %v21999_v61 = vadd.f32 %v8880_v11, %v26793_v18  ;;  %v21025_v15 = vpop.f32.mrb[54].mxu0  ;;  %v27028_v48 = vcombine.low %v11061_v13, %v11071_v60  ;;  %v27034_v19 = vrot.slane %v11130_v26, 5  ;;  %v23419_v9 = vld [vmem:[%s29000_s3 + $0x118] sm:$0xff]  }
 0x738   : > { %v8883_v47 = vpop.f32.mrb[55].mxu0  ;;  %v22000_v57 = vadd.f32 %v21025_v15, %v26802_v3  ;;  %v11085_v3 = vsel %vm24192_vm10, %v27000_v53, %v26975_v24  ;;  %v8981_v36 = vmax.f32 %v21998_v25, 0.0  ;;  %v11095_v7 = vsel %vm24192_vm10, %v11090_v6, %v11094_v51  ;;  %v27064_v51 = vld [vmem:[#allocation2 + $0x7c] sm:$0xf] }
 0x739   : > { %v8979_v54 = vmax.f32 %v21999_v61, 0.0  ;;  %v9009_v5 = vadd.f32 %v9008_v41, %v8978_v10  ;;  %v22001_v18 = vadd.f32 %v8883_v47, %v26814_v49  ;;  %v10901_v49 = vld [vmem:[#allocation2 + $0x6c] sm:$0xf]  ;;  %v11104_v1 = vrot.slane %v11103_v45, 4 }
 0x73a   : > { %21243 = vmatmul.mubr.bf16.vlgmr.msra.gmra.mrb[64].mxu0 %v26887_v40  ;;  %v11114_v13 = vrot.slane %v11113_v37, 4  ;;  %v11118_v52 = vrot.slane %v11116_v17, 5  ;;  %v11140_v43 = vshll.u32 %v27023_v33, 16  ;;  %v11145_v20 = vshrl.u32 %v10901_v49, 16  ;;  %v23420_v37 = vld [vmem:[%s29000_s3 + $0x120] sm:$0xff]  }
 0x73b   : > { %v9010_v27 = vadd.f32 %v9009_v5, %v8979_v54  ;;  %v8980_v34 = vmax.f32 %v22001_v18, 0.0  ;;  %21275 = vmatpush3.bf16.msra.mxu0 %v26881_v0  ;;  %21246 = vmatprep.mubr.bf16.mxu0 %v26910_v38  ;;  %v11136_v0 = vrot.slane %v11134_v63, 4  ;;  %v8982_v60 = vmax.f32 %v22000_v57, 0.0  ;;  %v27058_v63 = vld [vmem:[#allocation2 + $0x74] sm:$0x1] }
 0x73c   : > { %21276 = vmatprep.subr.bf16.mxu0 %v23417_v12  ;;  %v11127_v14 = vor.u32 %v11126_v56, %v11123_v8  ;;  %v11148_v41 = vshll.u32 %v10901_v49, 16  ;;  %v11154_v61 = vshll.u32 %v27038_v46, 16  ;;  %v11158_v15 = vshrl.u32 %v27038_v46, 16  ;;  %v10904_v18 = vld [vmem:[#allocation2 + $0x78] sm:$0xf] }
 0x73d   : > { %v9011_v4 = vadd.f32 %v9010_v27, %v8980_v34  ;;  %v21028_v35 = vpop.f32.mrb[56].mxu0  ;;  %v11137_v10 = vor.u32 %v11136_v0, %v27034_v19  ;;  %v27051_v6 = vcombine.low %v11085_v3, %v11095_v7  ;;  %v11109_v45 = vsel %vm24192_vm10, %v11104_v1, %v27005_v44  ;;  %v29392_v1 = vld [vmem:[#allocation68_spill] sm:$0xff] }
 0x73e   : > { %v8896_v59 = vpop.f32.mrb[57].mxu0  ;;  %v22002_v55 = vadd.f32 %v21028_v35, %v26817_v50  ;;  %v11119_v26 = vsel %vm24192_vm10, %v11114_v13, %v11118_v52  ;;  %v27060_v25 = vrot.slane %v11145_v20, 4  ;;  %v11150_v17 = vrot.slane %v11148_v41, 5 }
 0x73f   : > { %v9012_v24 = vadd.f32 %v9011_v4, %v8981_v36  ;;  %v22003_v53 = vadd.f32 %v8896_v59, %v26845_v2  ;;  %v21029_v11 = vpop.f32.mrb[58].mxu0  ;;  %21277 = vmatpush3.bf16.msra.mxu0 %v23417_v12  ;;  %v11138_v44 = vrot.slane %v11137_v10, 4  ;;  %v27069_v8 = vrot.slane %v11154_v61, 5  ;;  %v10907_v61 = vld [vmem:[#allocation2 + $0x84] sm:$0xf] }
 0x740   : > { %v8899_v23 = vpop.f32.mrb[59].mxu0  ;;  %21278 = vmatprep.subr.bf16.mxu0 %v23418_v28  ;;  %v22004_v54 = vadd.f32 %v21029_v11, %v26848_v39  ;;  %v11160_v27 = vrot.slane %v11158_v15, 4  ;;  %v8985_v57 = vmax.f32 %v22002_v55, 0.0  ;;  %v27071_v56 = vcombine.low %v11109_v45, %v11119_v26  ;;  %v23421_v11 = vld [vmem:[%s29000_s3 + $0x128] sm:$0xff]   ;;  %v29394_v45 = vld [vmem:[#allocation65_spill] sm:$0xff] }
 0x741   : > { %v8983_v47 = vmax.f32 %v22003_v53, 0.0  ;;  %v9013_v2 = vadd.f32 %v9012_v24, %v8982_v60  ;;  %v22005_v12 = vadd.f32 %v8899_v23, %v26851_v29  ;;  %v11128_v29 = vrot.slane %v11127_v14, 4  ;;  %v29393_v14 = vld [vmem:[#allocation73_spill] sm:$0xff] }
 0x742   : > { %21247 = vmatmul.mubr.bf16.gmra.mrb[68].mxu0 %v26966_v22  ;;  %v11142_v49 = vrot.slane %v11140_v43, 5  ;;  %v11164_v3 = vshll.u32 %v27058_v63, 16  ;;  %v11169_v0 = vshrl.u32 %v10904_v18, 16  ;;  %v11178_v36 = vshll.u32 %v27064_v51, 16 }
 0x743   : > { %v9014_v50 = vadd.f32 %v9013_v2, %v8983_v47  ;;  %v8984_v5 = vmax.f32 %v22005_v12, 0.0  ;;  %21250 = vmatprep.mubr.bf16.mxu0 %v26988_v58  ;;  %21279 = vmatpush3.bf16.msra.mxu0 %v23418_v28  ;;  %v11182_v4 = vshrl.u32 %v27064_v51, 16  ;;  %v8986_v35 = vmax.f32 %v22004_v54, 0.0  ;;  %v27092_v2 = vld [vmem:[#allocation2 + $0x88] sm:$0xf] }
 0x744   : > { %21280 = vmatprep.subr.bf16.mxu0 %v23419_v9  ;;  %v11172_v52 = vshll.u32 %v10904_v18, 16  ;;  %v11133_v43 = vsel %vm24192_vm10, %v11128_v29, %v27034_v19  ;;  %v11143_v60 = vsel %vm24192_vm10, %v11138_v44, %v11142_v49  ;;  %v11151_v24 = vor.u32 %v11150_v17, %v27060_v25  ;;  %v27096_v54 = vld [vmem:[#allocation2 + $0x94] sm:$0xf]  ;;  %v27100_v29 = vld [vmem:[#allocation2 + $0x80] sm:$0x1] }
 0x745   : > { %v9015_v39 = vadd.f32 %v9014_v50, %v8984_v5  ;;  %v21032_v34 = vpop.f32.mrb[60].mxu0  ;;  %v11161_v53 = vor.u32 %v11160_v27, %v27069_v8  ;;  %v11166_v19 = vrot.slane %v11164_v3, 5  ;;  %v11171_v15 = vrot.slane %v11169_v0, 4  ;;  %v23422_v17 = vld [vmem:[%s29000_s3 + $0x130] sm:$0xff]  }
 0x746   : > { %v8912_v28 = vpop.f32.mrb[61].mxu0  ;;  %v22006_v23 = vadd.f32 %v21032_v34, %v29393_v14  ;;  %v27090_v55 = vrot.slane %v11178_v36, 5  ;;  %v11184_v47 = vrot.slane %v11182_v4, 4  ;;  %v11174_v50 = vrot.slane %v11172_v52, 5  ;;  %v10910_v34 = vld [vmem:[#allocation2 + $0x90] sm:$0xf] }
 0x747   : > { %v9016_v7 = vadd.f32 %v9015_v39, %v8985_v57  ;;  %v22007_v59 = vadd.f32 %v8912_v28, %v29392_v1  ;;  %v21033_v13 = vpop.f32.mrb[62].mxu0  ;;  %21281 = vmatpush3.bf16.msra.mxu0 %v23419_v9  ;;  %v11162_v5 = vrot.slane %v11161_v53, 4  ;;  %v11193_v18 = vshrl.u32 %v10907_v61, 16 }
 0x748   : > { %v8915_v20 = vpop.f32.mrb[63].mxu0  ;;  %21282 = vmatprep.subr.bf16.mxu0 %v23420_v37  ;;  %v22008_v26 = vadd.f32 %v21033_v13, %v29394_v45  ;;  %v11196_v44 = vshll.u32 %v10907_v61, 16  ;;  %v8989_v27 = vmax.f32 %v22006_v23, 0.0  ;;  %v11202_v39 = vshll.u32 %v27092_v2, 16  ;;  %v27129_v61 = vld [vmem:[#allocation2 + $0x8c] sm:$0x1] }
 0x749   : > { %v8987_v9 = vmax.f32 %v22007_v59, 0.0  ;;  %v9017_v10 = vadd.f32 %v9016_v7, %v8986_v35  ;;  %v22009_v41 = vadd.f32 %v8915_v20, %v26892_v30  ;;  %v27098_v30 = vcombine.low %v11133_v43, %v11143_v60  ;;  %v23423_v20 = vld [vmem:[%s29000_s3 + $0x138] sm:$0xff]  }
 0x74a   : > { %21251 = vmatmul.mubr.bf16.gmra.mrb[72].mxu0 %v27028_v48  ;;  %v11152_v49 = vrot.slane %v11151_v24, 4  ;;  %v11185_v28 = vor.u32 %v11184_v47, %v27090_v55  ;;  %v11226_v3 = vshll.u32 %v27096_v54, 16  ;;  %v11230_v0 = vshrl.u32 %v27096_v54, 16 }
 0x74b   : > { %v9018_v12 = vadd.f32 %v9017_v10, %v8987_v9  ;;  %v8988_v25 = vmax.f32 %v22009_v41, 0.0  ;;  %21254 = vmatprep.mubr.bf16.mxu0 %v27051_v6  ;;  %21283 = vmatpush3.bf16.msra.mxu0 %v23420_v37  ;;  %v11206_v37 = vshrl.u32 %v27092_v2, 16  ;;  %v8990_v36 = vmax.f32 %v22008_v26, 0.0  ;;  %v27123_v9 = vld [vmem:[#allocation2 + $0xa0] sm:$0xf] }
 0x74c   : > { %21284 = vmatprep.subr.bf16.mxu0 %v23421_v11  ;;  %v11175_v35 = vor.u32 %v11174_v50, %v11171_v15  ;;  %v11188_v7 = vshll.u32 %v27100_v29, 16  ;;  %v11167_v1 = vsel %vm24192_vm10, %v11162_v5, %v11166_v19  ;;  %v11195_v59 = vrot.slane %v11193_v18, 4  ;;  %v27131_v19 = vld [vmem:[#allocation2 + $0xac] sm:$0xf]  ;;  %v10913_v26 = vld [vmem:[#allocation2 + $0x9c] sm:$0xf] }
 0x74d   : > { %v9019_v57 = vadd.f32 %v9018_v12, %v8988_v25  ;;  %v11217_v13 = vshrl.u32 %v10910_v34, 16  ;;  %v11220_v52 = vshll.u32 %v10910_v34, 16  ;;  %v11198_v60 = vrot.slane %v11196_v44, 5  ;;  %v27138_v25 = vld [vmem:[%s29000_s3 + $0x140] sm:$0xff]   ;;  %v27141_v5 = vld [vmem:[#allocation2 + $0x98] sm:$0x1] }
 0x74e   : > { %v27118_v24 = vrot.slane %v11202_v39, 5  ;;  %v11208_v53 = vrot.slane %v11206_v37, 4  ;;  %v27121_v14 = vrot.slane %v11226_v3, 5  ;;  %v11232_v23 = vrot.slane %v11230_v0, 4 }
 0x74f   : > { %v9020_v4 = vadd.f32 %v9019_v57, %v8989_v27  ;;  %21285 = vmatpush3.bf16.msra.mxu0 %v23421_v11  ;;  %v11186_v11 = vrot.slane %v11185_v28, 4  ;;  %v11157_v10 = vsel %vm24192_vm10, %v11152_v49, %v27069_v8  ;;  %v11176_v41 = vrot.slane %v11175_v35, 4 }
 0x750   : > { %21286 = vmatprep.subr.bf16.mxu0 %v23422_v17  ;;  %v27133_v15 = vcombine.low %v11157_v10, %v11167_v1  ;;  %v11190_v47 = vrot.slane %v11188_v7, 5  ;;  %v11219_v12 = vrot.slane %v11217_v13, 4  ;;  %v11222_v45 = vrot.slane %v11220_v52, 5 }
 0x751   : > { %v27116_v43 = vadd.f32 %v9020_v4, %v8990_v36  ;;  %v11199_v50 = vor.u32 %v11198_v60, %v11195_v59  ;;  %v11209_v8 = vor.u32 %v11208_v53, %v27118_v24  ;;  %v11250_v18 = vshll.u32 %v27123_v9, 16 }
 0x752   : > { %21255 = vmatmul.mubr.bf16.gmra.mrb[76].mxu0 %v27071_v56  ;;  %v11254_v44 = vshrl.u32 %v27123_v9, 16  ;;  %v11191_v27 = vsel %vm24192_vm10, %v11186_v11, %v11190_v47  ;;  %v11233_v57 = vor.u32 %v11232_v23, %v27121_v14  ;;  %v11274_v39 = vshll.u32 %v27131_v19, 16  ;;  %v27159_v11 = vld [vmem:[#allocation2 + $0xb8] sm:$0xf]  ;;  %v27162_v23 = vld [vmem:[#allocation2 + $0xa4] sm:$0x1] }
 0x753   : > { %21258 = vmatprep.mubr.bf16.mxu0 %v27098_v30  ;;  %21287 = vmatpush3.bf16.msra.mxu0 %v23422_v17  ;;  %v10916_v17 = vld [vmem:[#allocation2 + $0xa8] sm:$0xf]  ;;  %v11278_v37 = vshrl.u32 %v27131_v19, 16  ;;  %v11181_v34 = vsel %vm24192_vm10, %v11176_v41, %v27090_v55  ;;  %v11212_v49 = vshll.u32 %v27129_v61, 16  ;;  %v11241_v28 = vshrl.u32 %v10913_v26, 16 }
 0x754   : > { %21288 = vmatprep.subr.bf16.mxu0 %v23423_v20  ;;  %v11244_v3 = vshll.u32 %v10913_v26, 16  ;;  %v11223_v0 = vor.u32 %v11222_v45, %v11219_v12  ;;  %v11236_v36 = vshll.u32 %v27141_v5, 16  ;;  %v11265_v4 = vshrl.u32 %v10916_v17, 16 }
 0x755   : > { %v11268_v35 = vshll.u32 %v10916_v17, 16  ;;  %v27156_v7 = vcombine.low %v11181_v34, %v11191_v27  ;;  %v11210_v1 = vrot.slane %v11209_v8, 4  ;;  %v11252_v59 = vrot.slane %v11250_v18, 5  ;;  %v10919_v8 = vld [vmem:[#allocation2 + $0xb4] sm:$0xf] }
 0x756   : > { %v11256_v13 = vrot.slane %v11254_v44, 4  ;;  %v11200_v55 = vrot.slane %v11199_v50, 4  ;;  %v11234_v52 = vrot.slane %v11233_v57, 4  ;;  %v11276_v60 = vrot.slane %v11274_v39, 5  ;;  %v27166_v44 = vld [vmem:[#allocation2 + $0xb0] sm:$0x1] }
 0x757   : > { %21289 = vmatpush3.bf16.msra.mxu0 %v23423_v20  ;;  %v11280_v53 = vrot.slane %v11278_v37, 4  ;;  %v11214_v20 = vrot.slane %v11212_v49, 5  ;;  %v11243_v10 = vrot.slane %v11241_v28, 4  ;;  %v11246_v41 = vrot.slane %v11244_v3, 5 }
 0x758   : > { %21322 = vmatprep.subr.bf16.mxu0 %v27138_v25  ;;  %v11224_v47 = vrot.slane %v11223_v0, 4  ;;  %v11238_v12 = vrot.slane %v11236_v36, 5  ;;  %v11267_v45 = vrot.slane %v11265_v4, 4  ;;  %v11270_v26 = vrot.slane %v11268_v35, 5 }
 0x759   : > { %v11215_v50 = vsel %vm24192_vm10, %v11210_v1, %v11214_v20  ;;  %v11257_v18 = vor.u32 %v11256_v13, %v11252_v59  ;;  %v11298_v17 = vshll.u32 %v27159_v11, 16  ;;  %v11302_v27 = vshrl.u32 %v27159_v11, 16 }
 0x75a   : > { %21259 = vmatmul.mubr.bf16.gmra.mrb[80].mxu0 %v27133_v15  ;;  %v11205_v57 = vsel %vm24192_vm10, %v11200_v55, %v27118_v24  ;;  %v11239_v39 = vsel %vm24192_vm10, %v11234_v52, %v11238_v12  ;;  %v11281_v37 = vor.u32 %v11280_v53, %v11276_v60  ;;  %v11247_v34 = vor.u32 %v11246_v41, %v11243_v10 }
 0x75b   : > { %21262 = vmatprep.mubr.bf16.mxu0 %v27156_v7  ;;  %v11260_v49 = vshll.u32 %v27162_v23, 16  ;;  %v11289_v28 = vshrl.u32 %v10919_v8, 16  ;;  %v11292_v3 = vshll.u32 %v10919_v8, 16  ;;  %v27176_v0 = vcombine.low %v11205_v57, %v11215_v50 }
 0x75c   : > { %v11229_v36 = vsel %vm24192_vm10, %v11224_v47, %v27121_v14  ;;  %v11271_v4 = vor.u32 %v11270_v26, %v11267_v45  ;;  %v11284_v35 = vshll.u32 %v27166_v44, 16  ;;  %v11258_v24 = vrot.slane %v11257_v18, 4  ;;  %v27186_v14 = vld [vmem:[#allocation2 + $0xbc] sm:$0x1] }
 0x75d   : > { %v27182_v1 = vcombine.low %v11229_v36, %v11239_v39  ;;  %v11300_v13 = vrot.slane %v11298_v17, 5  ;;  %v11304_v55 = vrot.slane %v11302_v27, 4  ;;  %v11282_v52 = vrot.slane %v11281_v37, 4  ;;  %v23426_v36 = vld [vmem:[%s29000_s3 + $0x150] sm:$0xff]  }
 0x75e   : > { %v11248_v53 = vrot.slane %v11247_v34, 4  ;;  %v11262_v20 = vrot.slane %v11260_v49, 5  ;;  %v11291_v10 = vrot.slane %v11289_v28, 4  ;;  %v11294_v41 = vrot.slane %v11292_v3, 5 }
 0x75f   : > { %v11272_v12 = vrot.slane %v11271_v4, 4  ;;  %v11286_v8 = vrot.slane %v11284_v35, 5  ;;  %v11305_v45 = vor.u32 %v11304_v55, %v11300_v13  ;;  %v11308_v17 = vshll.u32 %v27186_v14, 16  ;;  %v23429_v4 = vld [vmem:[%s29000_s3 + $0x168] sm:$0xff]   ;;  %v23430_v35 = vld [vmem:[%s29000_s3 + $0x170] sm:$0xff]  }
 0x760   : > { %v11263_v47 = vsel %vm24192_vm10, %v11258_v24, %v11262_v20  ;;  %v11253_v50 = vsel %vm24192_vm10, %v11248_v53, %v11252_v59  ;;  %v11295_v18 = vor.u32 %v11294_v41, %v11291_v10  ;;  %v23431_v24 = vld [vmem:[%s29000_s3 + $0x178] sm:$0xff]   ;;  %v27245_v55 = vld [vmem:[#allocation2 + $0xc4] sm:$0xf] }
 0x761   : > { %v11287_v26 = vsel %vm24192_vm10, %v11282_v52, %v11286_v8  ;;  %v27195_v27 = vcombine.low %v11253_v50, %v11263_v47  ;;  %v11277_v57 = vsel %vm24192_vm10, %v11272_v12, %v11276_v60  ;;  %v11306_v37 = vrot.slane %v11305_v45, 4  ;;  %v23425_v60 = vld [vmem:[%s29000_s3 + $0x148] sm:$0xff]   ;;  %v10922_v52 = vld [vmem:[#allocation2 + $0xc0] sm:$0xf] }
 0x762   : > { %21263 = vmatmul.mubr.bf16.gmra.mrb[84].mxu0 %v27176_v0  ;;  %v27199_v39 = vcombine.low %v11277_v57, %v11287_v26  ;;  %v11296_v34 = vrot.slane %v11295_v18, 4  ;;  %v11310_v49 = vrot.slane %v11308_v17, 5  ;;  %v11643_v53 = vshll.u32 %v27245_v55, 16  ;;  %v27252_v26 = vld [vmem:[#allocation2 + $0xc8] sm:$0x1] }
 0x763   : > { %21266 = vmatprep.mubr.bf16.mxu0 %v27182_v1  ;;  %v11647_v20 = vshrl.u32 %v27245_v55, 16  ;;  %v11634_v10 = vshrl.u32 %v10922_v52, 16  ;;  %v11637_v41 = vshll.u32 %v10922_v52, 16  ;;  %v11653_v17 = vshll.u32 %v27252_v26, 16 }
 0x764   : > { %v11311_v59 = vsel %vm24192_vm10, %v11306_v37, %v11310_v49  ;;  %v11301_v28 = vsel %vm24192_vm10, %v11296_v34, %v11300_v13  ;;  %v23432_v13 = vld [vmem:[%s29000_s3 + $0x180] sm:$0xff]   ;;  %v11645_v12 = vrot.slane %v11643_v53, 5  ;;  %v27306_v53 = vld [vmem:[#allocation2 + $0xd4] sm:$0x1] }
 0x765   : > { %v27207_v3 = vcombine.low %v11301_v28, %v11311_v59  ;;  %v11649_v8 = vrot.slane %v11647_v20, 4  ;;  %v11636_v47 = vrot.slane %v11634_v10, 4  ;;  %v11639_v45 = vrot.slane %v11637_v41, 5  ;;  %v23550_v41 = vld [vmem:[#allocation2 + $0x4] sm:$0xf] }
 0x766   : > { %v11655_v34 = vrot.slane %v11653_v17, 5  ;;  %v9022_v20 = vrot.slane %v27116_v43, 4  ;;  %v11938_v10 = vshll.u32 %v27306_v53, 16 }
 0x767   : > { %v11650_v50 = vor.u32 %v11649_v8, %v11645_v12  ;;  %v11640_v18 = vor.u32 %v11639_v45, %v11636_v47  ;;  %v12203_v8 = vld [vmem:[#allocation2] sm:$0xe] }
 0x768   : > { %v9023_v47 = vadd.f32 %v9022_v20, %v27116_v43  ;;  %v18664_v17 = vrot.slane %v12203_v8, 9 }
 0x769   : > { %v11651_v57 = vrot.slane %v11650_v50, 4  ;;  %v11641_v37 = vrot.slane %v11640_v18, 4  ;;  %v11940_v18 = vrot.slane %v11938_v10, 5 }
 0x76a   : > { %21267 = vmatmul.mubr.bf16.gmra.mrb[88].mxu0 %v27195_v27 }
 0x76b   : > { %21270 = vmatprep.mubr.bf16.mxu0 %v27199_v39  ;;  %v11656_v49 = vsel %vm24192_vm10, %v11651_v57, %v11655_v34  ;;  %v11646_v59 = vsel %vm24192_vm10, %v11641_v37, %v11645_v12  ;;  %v12271_v12 = vrot.slane %v23550_v41, 5  ;;  %v12274_v37 = vrot.slane %v26931_v62, 5 }
 0x76c   : > { %v27261_v28 = vcombine.low %v11646_v59, %v11656_v49  ;;  %v9024_v34 = vrot.slane %v9023_v47, 2 }
 0x76d   : > { %v12273_v57 = vrot.slane %v12271_v12, 4  ;;  %v12272_v43 = vsel %vm24568_vm13, %v18664_v17, %v12271_v12  ;;  %v23556_v12 = vld [vmem:[#allocation2 + $0x34] sm:$0xf] }
 0x76e   : > { %v12299_v8 = vrot.slane %v23556_v12, 5  ;;  %v12320_v12 = vrot.slane %v26978_v32, 5  ;;  %v23445_v32 = vld [vmem:[%s29000_s3 + $0x1e8] sm:$0xff]  }
 0x76f   : > { %v12275_v59 = vsel %vm24568_vm13, %v12273_v57, %v12274_v37  ;;  %v12206_v37 = vld [vmem:[#allocation2 + $0x24] sm:$0xe] }
 0x772   : > { %21271 = vmatmul.mubr.bf16.gmra.mrb[92].mxu0 %v27207_v3 }
 0x773   : > { %21290 = vmatprep.mubr.bf16.mxu0 %v26887_v40  ;;  %v23427_v40 = vld [vmem:[%s29000_s3 + $0x158] sm:$0xff]  }
 0x77a   : > { %21291 = vmatmul.mubr.bf16.vlgmr.msra.gmra.mrb[64].mxu0 %v26910_v38 }
 0x77b   : > { %21323 = vmatpush3.bf16.msra.mxu0 %v27138_v25  ;;  %21294 = vmatprep.mubr.bf16.mxu0 %v26966_v22  ;;  %v23428_v25 = vld [vmem:[%s29000_s3 + $0x160] sm:$0xff]  }
 0x77c   : > { %21324 = vmatprep.subr.bf16.mxu0 %v23425_v60 }
 0x77f   : > { %21325 = vmatpush3.bf16.msra.mxu0 %v23425_v60  ;;  %v23433_v60 = vld [vmem:[%s29000_s3 + $0x188] sm:$0xff]  }
 0x780   : > { %21326 = vmatprep.subr.bf16.mxu0 %v23426_v36 }
 0x782   : > { %21295 = vmatmul.mubr.bf16.gmra.mrb[68].mxu0 %v26988_v58 }
 0x783   : > { %21298 = vmatprep.mubr.bf16.mxu0 %v27028_v48  ;;  %21327 = vmatpush3.bf16.msra.mxu0 %v23426_v36  ;;  %v23434_v36 = vld [vmem:[%s29000_s3 + $0x190] sm:$0xff]  }
 0x784   : > { %21328 = vmatprep.subr.bf16.mxu0 %v23427_v40 }
 0x787   : > { %21329 = vmatpush3.bf16.msra.mxu0 %v23427_v40  ;;  %v27299_v40 = vld [vmem:[#allocation2 + $0xd0] sm:$0xf] }
 0x788   : > { %21330 = vmatprep.subr.bf16.mxu0 %v23428_v25 }
 0x78a   : > { %21299 = vmatmul.mubr.bf16.gmra.mrb[72].mxu0 %v27051_v6 }
 0x78b   : > { %21302 = vmatprep.mubr.bf16.mxu0 %v27071_v56  ;;  %21331 = vmatpush3.bf16.msra.mxu0 %v23428_v25 }
 0x78c   : > { %21332 = vmatprep.subr.bf16.mxu0 %v23429_v4 }
 0x78f   : > { %21333 = vmatpush3.bf16.msra.mxu0 %v23429_v4  ;;  %v11932_v4 = vshrl.u32 %v27299_v40, 16 }
 0x790   : > { %21334 = vmatprep.subr.bf16.mxu0 %v23430_v35 }
 0x791   : > { %v11934_v52 = vrot.slane %v11932_v4, 4  ;;  %v12205_v4 = vld [vmem:[#allocation2 + $0x18] sm:$0xe] }
 0x792   : > { %21303 = vmatmul.mubr.bf16.gmra.mrb[76].mxu0 %v27098_v30  ;;  %v18666_v10 = vrot.slane %v12205_v4, 9 }
 0x793   : > { %21306 = vmatprep.mubr.bf16.mxu0 %v27133_v15  ;;  %21335 = vmatpush3.bf16.msra.mxu0 %v23430_v35 }
 0x794   : > { %21336 = vmatprep.subr.bf16.mxu0 %v23431_v24 }
 0x797   : > { %21337 = vmatpush3.bf16.msra.mxu0 %v23431_v24 }
 0x798   : > { %21370 = vmatprep.subr.bf16.mxu0 %v23432_v13 }
 0x79a   : > { %21307 = vmatmul.mubr.bf16.gmra.mrb[80].mxu0 %v27156_v7 }
 0x79b   : > { %21310 = vmatprep.mubr.bf16.mxu0 %v27176_v0 }
 0x7a2   : > { %21311 = vmatmul.mubr.bf16.gmra.mrb[84].mxu0 %v27182_v1 }
 0x7a3   : > { %21314 = vmatprep.mubr.bf16.mxu0 %v27195_v27 }
 0x7aa   : > { %21315 = vmatmul.mubr.bf16.gmra.mrb[88].mxu0 %v27199_v39 }
 0x7ab   : > { %21318 = vmatprep.mubr.bf16.mxu0 %v27207_v3 }
 0x7b2   : > { %21319 = vmatmul.mubr.bf16.gmra.mrb[92].mxu0 %v27261_v28 }
 0x7b3   : > { %21338 = vmatprep.mubr.bf16.mxu0 %v26910_v38  ;;  %v23435_v38 = vld [vmem:[%s29000_s3 + $0x198] sm:$0xff]  }
 0x7ba   : > { %21339 = vmatmul.mubr.bf16.vlgmr.msra.gmra.mrb[64].mxu0 %v26966_v22  ;;  %v23436_v22 = vld [vmem:[%s29000_s3 + $0x1a0] sm:$0xff]  }
 0x7bb   : > { %21371 = vmatpush3.bf16.msra.mxu0 %v23432_v13  ;;  %21342 = vmatprep.mubr.bf16.mxu0 %v26988_v58  ;;  %v23437_v58 = vld [vmem:[%s29000_s3 + $0x1a8] sm:$0xff]  }
 0x7bc   : > { %21372 = vmatprep.subr.bf16.mxu0 %v23433_v60 }
 0x7bf   : > { %21373 = vmatpush3.bf16.msra.mxu0 %v23433_v60  ;;  %v23551_v60 = vld [vmem:[#allocation2 + $0x10] sm:$0xf] }
 0x7c0   : > { %21374 = vmatprep.subr.bf16.mxu0 %v23434_v36 }
 0x7c2   : > { %21343 = vmatmul.mubr.bf16.gmra.mrb[68].mxu0 %v27028_v48  ;;  %v23438_v48 = vld [vmem:[%s29000_s3 + $0x1b0] sm:$0xff]  }
 0x7c3   : > { %21346 = vmatprep.mubr.bf16.mxu0 %v27051_v6  ;;  %21375 = vmatpush3.bf16.msra.mxu0 %v23434_v36  ;;  %v23439_v6 = vld [vmem:[%s29000_s3 + $0x1b8] sm:$0xff]   ;;  %v12278_v36 = vrot.slane %v23551_v60, 5 }
 0x7c4   : > { %21376 = vmatprep.subr.bf16.mxu0 %v23435_v38 }
 0x7c7   : > { %21377 = vmatpush3.bf16.msra.mxu0 %v23435_v38  ;;  %v23552_v38 = vld [vmem:[#allocation2 + $0x1c] sm:$0xf] }
 0x7c8   : > { %21378 = vmatprep.subr.bf16.mxu0 %v23436_v22 }
 0x7ca   : > { %21347 = vmatmul.mubr.bf16.gmra.mrb[72].mxu0 %v27071_v56  ;;  %v27297_v56 = vld [vmem:[%s29000_s3 + $0x1c0] sm:$0xff]  }
 0x7cb   : > { %21350 = vmatprep.mubr.bf16.mxu0 %v27098_v30  ;;  %21379 = vmatpush3.bf16.msra.mxu0 %v23436_v22  ;;  %v10925_v30 = vld [vmem:[#allocation2 + $0xcc] sm:$0xf]  ;;  %v18696_v22 = vcombine.low %v12272_v43, %v12275_v59  ;;  %v12207_v43 = vld [vmem:[#allocation2 + $0x30] sm:$0xe]  ;;  %v23558_v59 = vld [vmem:[#allocation2 + $0x38] sm:$0x1] }
 0x7cc   : > { %21380 = vmatprep.subr.bf16.mxu0 %v23437_v58  ;;  %v11922_v25 = vshll.u32 %v10925_v30, 16  ;;  %v12302_v60 = vrot.slane %v23558_v59, 5  ;;  %v12330_v59 = vrot.slane %v27023_v33, 5 }
 0x7ce   : > { %v11924_v24 = vrot.slane %v11922_v25, 5  ;;  %v23553_v25 = vld [vmem:[#allocation2 + $0x14] sm:$0x1] }
 0x7cf   : > { %21381 = vmatpush3.bf16.msra.mxu0 %v23437_v58 }
 0x7d0   : > { %21382 = vmatprep.subr.bf16.mxu0 %v23438_v48 }
 0x7d2   : > { %21351 = vmatmul.mubr.bf16.gmra.mrb[76].mxu0 %v27133_v15  ;;  %v11919_v15 = vshrl.u32 %v10925_v30, 16 }
 0x7d3   : > { %21354 = vmatprep.mubr.bf16.mxu0 %v27156_v7  ;;  %21383 = vmatpush3.bf16.msra.mxu0 %v23438_v48  ;;  %v11928_v7 = vshll.u32 %v27299_v40, 16  ;;  %v12280_v48 = vrot.slane %v12278_v36, 4 }
 0x7d4   : > { %21384 = vmatprep.subr.bf16.mxu0 %v23439_v6  ;;  %v11921_v35 = vrot.slane %v11919_v15, 4 }
 0x7d5   : > { %v11930_v13 = vrot.slane %v11928_v7, 5  ;;  %v12281_v7 = vrot.slane %v23553_v25, 5  ;;  %v23443_v25 = vld [vmem:[%s29000_s3 + $0x1d8] sm:$0xff]  }
 0x7d7   : > { %21385 = vmatpush3.bf16.msra.mxu0 %v23439_v6  ;;  %v12204_v6 = vld [vmem:[#allocation2 + $0xc] sm:$0xe]  ;;  %v12282_v20 = vsel %vm24568_vm13, %v12280_v48, %v12281_v7 }
 0x7d8   : > { %21418 = vmatprep.subr.bf16.mxu0 %v27297_v56 }
 0x7da   : > { %21355 = vmatmul.mubr.bf16.gmra.mrb[80].mxu0 %v27176_v0  ;;  %v11925_v0 = vor.u32 %v11924_v24, %v11921_v35  ;;  %v23554_v35 = vld [vmem:[#allocation2 + $0x20] sm:$0x1] }
 0x7db   : > { %21358 = vmatprep.mubr.bf16.mxu0 %v27182_v1  ;;  %v11935_v1 = vor.u32 %v11934_v52, %v11930_v13  ;;  %v12288_v24 = vrot.slane %v23554_v35, 5  ;;  %v18665_v52 = vrot.slane %v12204_v6, 9  ;;  %v12208_v35 = vld [vmem:[#allocation2 + $0x3c] sm:$0xe] }
 0x7dc   : > { %v11926_v45 = vrot.slane %v11925_v0, 4  ;;  %v23555_v0 = vld [vmem:[#allocation2 + $0x28] sm:$0xf] }
 0x7dd   : > { %v11936_v50 = vrot.slane %v11935_v1, 4  ;;  %v12292_v1 = vrot.slane %v23555_v0, 5  ;;  %v12316_v0 = vrot.slane %v26990_v16, 5 }
 0x7df   : > { %v12294_v57 = vrot.slane %v12292_v1, 4 }
 0x7e2   : > { %21359 = vmatmul.mubr.bf16.gmra.mrb[84].mxu0 %v27195_v27  ;;  %v11931_v27 = vsel %vm24192_vm10, %v11926_v45, %v11930_v13 }
 0x7e3   : > { %21362 = vmatprep.mubr.bf16.mxu0 %v27199_v39  ;;  %v11941_v39 = vsel %vm24192_vm10, %v11936_v50, %v11940_v18  ;;  %v23441_v18 = vld [vmem:[%s29000_s3 + $0x1c8] sm:$0xff]  }
 0x7e4   : > { %v18655_v62 = vcombine.low %v11931_v27, %v11941_v39  ;;  %v23557_v27 = vld [vmem:[#allocation2 + $0x2c] sm:$0x1] }
 0x7e5   : > { %v12295_v39 = vrot.slane %v23557_v27, 5 }
 0x7ea   : > { %21363 = vmatmul.mubr.bf16.gmra.mrb[88].mxu0 %v27207_v3  ;;  %v12285_v3 = vrot.slane %v23552_v38, 5  ;;  %v12296_v38 = vsel %vm24568_vm13, %v12294_v57, %v12295_v39  ;;  %v12323_v39 = vrot.slane %v27008_v21, 5  ;;  %v12341_v21 = vrot.slane %v27064_v51, 5  ;;  %v12212_v51 = vld [vmem:[#allocation2 + $0x6c] sm:$0xe] }
 0x7eb   : > { %21366 = vmatprep.mubr.bf16.mxu0 %v27261_v28  ;;  %v9025_v28 = vadd.f32 %v9024_v34, %v9023_v47  ;;  %v12279_v47 = vsel %vm24568_vm13, %v18665_v52, %v12278_v36  ;;  %v12301_v34 = vrot.slane %v12299_v8, 4  ;;  %v23442_v36 = vld [vmem:[%s29000_s3 + $0x1d0] sm:$0xff]  }
 0x7ec   : > { %v12287_v30 = vrot.slane %v12285_v3, 4  ;;  %v27336_v45 = vcombine.low %v12279_v47, %v12282_v20  ;;  %v12286_v50 = vsel %vm24568_vm13, %v18666_v10, %v12285_v3  ;;  %v23559_v3 = vld [vmem:[#allocation2 + $0x40] sm:$0xf]  ;;  %v12209_v20 = vld [vmem:[#allocation2 + $0x48] sm:$0xe]  ;;  %v18669_v10 = vrot.slane %v12208_v35, 9 }
 0x7ed   : > { %v9026_v58 = vrot.slane %v9025_v28, 1  ;;  %v27420_v35 = vld [vmem:[%s29000_s3 + $0x200] sm:$0xff]  }
 0x7ee   : > { %v12289_v41 = vsel %vm24568_vm13, %v12287_v30, %v12288_v24 }
 0x7ef   : > { %v9027_v15 = vadd.f32 %v9026_v58, %v9025_v28  ;;  %v27343_v17 = vcombine.low %v12286_v50, %v12289_v41  ;;  %v12306_v28 = vrot.slane %v23559_v3, 5  ;;  %v23560_v58 = vld [vmem:[#allocation2 + $0x4c] sm:$0xf]  ;;  %v12327_v50 = vrot.slane %v27002_v31, 5  ;;  %v12210_v31 = vld [vmem:[#allocation2 + $0x54] sm:$0xe] }
 0x7f0   : > { %v12313_v48 = vrot.slane %v23560_v58, 5 }
 0x7f1   : > { %v9029_v13 = vmul.f32 0.00390625, %v9027_v15  ;;  %v12308_v4 = vrot.slane %v12306_v28, 4  ;;  %v12307_v16 = vsel %vm24568_vm13, %v18669_v10, %v12306_v28  ;;  %v12329_v27 = vrot.slane %v12327_v50, 4 }
 0x7f2   : > { %21367 = vmatmul.mubr.bf16.gmra.mrb[92].mxu0 %v18655_v62  ;;  %v18667_v62 = vrot.slane %v12206_v37, 9  ;;  %v12315_v24 = vrot.slane %v12313_v48, 4 }
 0x7f3   : > { %21386 = vmatprep.mubr.bf16.mxu0 %v18696_v22  ;;  %9030 = vst [vmem:[%s27331_s16] sm:$0x1] %v9029_v13  ;;  %v18668_v22 = vrot.slane %v12207_v43, 9  ;;  %v23561_v13 = vld [vmem:[#allocation2 + $0x44] sm:$0x1]  ;;  %v12211_v43 = vld [vmem:[#allocation2 + $0x60] sm:$0xe]  ;;  %v12331_v28 = vsel %vm24568_vm13, %v12329_v27, %v12330_v59 }
 0x7f4   : > { %v12293_v6 = vsel %vm24568_vm13, %v18667_v62, %v12292_v1  ;;  %v12309_v52 = vrot.slane %v23561_v13, 5  ;;  %v23444_v1 = vld [vmem:[%s29000_s3 + $0x1e0] sm:$0xff]   ;;  %v12317_v47 = vsel %vm24568_vm13, %v12315_v24, %v12316_v0  ;;  %v18672_v3 = vrot.slane %v12211_v43, 9 }
 0x7f5   : > { %v27357_v30 = vcombine.low %v12293_v6, %v12296_v38  ;;  %v12300_v15 = vsel %vm24568_vm13, %v18668_v22, %v12299_v8  ;;  %v18670_v8 = vrot.slane %v12209_v20, 9  ;;  %v12334_v38 = vrot.slane %v27038_v46, 5  ;;  %v23447_v46 = vld [vmem:[%s29000_s3 + $0x1f8] sm:$0xff]  }
 0x7f6   : > { %v12310_v41 = vsel %vm24568_vm13, %v12308_v4, %v12309_v52  ;;  %v12343_v6 = vrot.slane %v12341_v21, 4  ;;  %v12344_v4 = vrot.slane %v27100_v29, 5  ;;  %v18673_v24 = vrot.slane %v12212_v51, 9  ;;  %v12218_v51 = vld [vmem:[#allocation2 + $0xb4] sm:$0xe] }
 0x7f7   : > { %v12314_v57 = vsel %vm24568_vm13, %v18670_v8, %v12313_v48  ;;  %v12336_v48 = vrot.slane %v12334_v38, 4  ;;  %v12348_v52 = vrot.slane %v27092_v2, 5  ;;  %v12355_v0 = vrot.slane %v27096_v54, 5 }
 0x7f8   : > { %v27387_v37 = vcombine.low %v12314_v57, %v12317_v47  ;;  %v12335_v29 = vsel %vm24568_vm13, %v18673_v24, %v12334_v38  ;;  %v12351_v54 = vrot.slane %v27129_v61, 5  ;;  %v12215_v47 = vld [vmem:[#allocation2 + $0x90] sm:$0xe]  ;;  %v12369_v27 = vrot.slane %v27131_v19, 5  ;;  %v12217_v19 = vld [vmem:[#allocation2 + $0xa8] sm:$0xe] }
 0x7f9   : > { %v12350_v2 = vrot.slane %v12348_v52, 4  ;;  %v12357_v8 = vrot.slane %v12355_v0, 4  ;;  %v23456_v24 = vld [vmem:[%s29002_s5] sm:$0xff]  }
 0x7fa   : > { %21387 = vmatmul.mubr.bf16.vlgmr.msra.gmra.mrb[64].mxu0 %v27336_v45  ;;  %21514 = vmatprep.subr.bf16.mxu1 %v23456_v24 }
 0x7fb   : > { %21419 = vmatpush3.bf16.msra.mxu0 %v27297_v56  ;;  %21390 = vmatprep.mubr.bf16.mxu0 %v27343_v17  ;;  %v12303_v56 = vsel %vm24568_vm13, %v12301_v34, %v12302_v60  ;;  %v12322_v34 = vrot.slane %v12320_v12, 4  ;;  %v23446_v60 = vld [vmem:[%s29000_s3 + $0x1f0] sm:$0xff]   ;;  %v12352_v57 = vsel %vm24568_vm13, %v12350_v2, %v12351_v54  ;;  %v23455_v2 = vld [vmem:[%s29000_s3 + $0x238] sm:$0xff]   ;;  %v12219_v54 = vld [vmem:[#allocation2 + $0xc0] sm:$0xe] }
 0x7fc   : > { %21420 = vmatprep.subr.bf16.mxu0 %v23441_v18  ;;  %v27364_v7 = vcombine.low %v12300_v15, %v12303_v56  ;;  %v12328_v56 = vsel %vm24568_vm13, %v18672_v3, %v12327_v50  ;;  %v12337_v15 = vrot.slane %v27058_v63, 5  ;;  %v12345_v63 = vsel %vm24568_vm13, %v12343_v6, %v12344_v4  ;;  %21515 = vmatpush3.bf16.msra.mxu1 %v23456_v24 }
 0x7fd   : > { %v12324_v62 = vsel %vm24568_vm13, %v12322_v34, %v12323_v39  ;;  %v27411_v58 = vcombine.low %v12328_v56, %v12331_v28  ;;  %v12358_v50 = vrot.slane %v27141_v5, 5  ;;  %v18676_v34 = vrot.slane %v12215_v47, 9 }
 0x7fe   : > { %v12338_v13 = vsel %vm24568_vm13, %v12336_v48, %v12337_v15  ;;  %v12376_v28 = vrot.slane %v27159_v11, 5  ;;  %v12379_v11 = vrot.slane %v27186_v14, 5  ;;  %v18679_v6 = vrot.slane %v12218_v51, 9  ;;  %v23458_v14 = vld [vmem:[%s29002_s5 + $0x10] sm:$0xff]  }
 0x7ff   : > { %21421 = vmatpush3.bf16.msra.mxu0 %v23441_v18  ;;  %v27380_v18 = vcombine.low %v12307_v16, %v12310_v41  ;;  %v12356_v61 = vsel %vm24568_vm13, %v18676_v34, %v12355_v0  ;;  %v23451_v0 = vld [vmem:[%s29000_s3 + $0x218] sm:$0xff]   ;;  %v12710_v47 = vrot.slane %v27252_v26, 5  ;;  %v12220_v26 = vld [vmem:[#allocation2 + $0xcc] sm:$0xe]  ;;  %v27578_v34 = vld [vmem:[%s29001_s4] ss:$0 sm:$0xff] }
 0x800   : > { %21422 = vmatprep.subr.bf16.mxu0 %v23442_v36 }
 0x802   : > { %21391 = vmatmul.mubr.bf16.gmra.mrb[68].mxu0 %v27357_v30 }
 0x803   : > { %21394 = vmatprep.mubr.bf16.mxu0 %v27364_v7  ;;  %21423 = vmatpush3.bf16.msra.mxu0 %v23442_v36  ;;  %v18671_v36 = vrot.slane %v12210_v31, 9  ;;  %v12359_v31 = vsel %vm24568_vm13, %v12357_v8, %v12358_v50  ;;  %v18720_v50 = vrot.slane %v12219_v54, 9  ;;  %v27588_v54 = vld [vmem:[#allocation2 + $0x18] sm:$0xf] }
 0x804   : > { %21424 = vmatprep.subr.bf16.mxu0 %v23443_v25  ;;  %v27453_v5 = vcombine.low %v12356_v61, %v12359_v31  ;;  %29397 = vst [vmem:[#allocation67_spill] sm:$0xff] %v27588_v54 }
 0x805   : > { %v12321_v33 = vsel %vm24568_vm13, %v18671_v36, %v12320_v12  ;;  %v12214_v12 = vld [vmem:[#allocation2 + $0x84] sm:$0xe]  ;;  %v12365_v36 = vrot.slane %v27162_v23, 5 }
 0x806   : > { %v27404_v22 = vcombine.low %v12321_v33, %v12324_v62  ;;  %v18675_v16 = vrot.slane %v12214_v12, 9  ;;  %v12372_v62 = vrot.slane %v27166_v44, 5  ;;  %v12378_v44 = vrot.slane %v12376_v28, 4 }
 0x807   : > { %21425 = vmatpush3.bf16.msra.mxu0 %v23443_v25  ;;  %v12213_v25 = vld [vmem:[#allocation2 + $0x78] sm:$0xe]  ;;  %v12707_v12 = vrot.slane %v27245_v55, 5  ;;  %v12978_v55 = vrot.slane %v27299_v40, 5  ;;  %v23461_v40 = vld [vmem:[%s29002_s5 + $0x28] sm:$0xff]  }
 0x808   : > { %21426 = vmatprep.subr.bf16.mxu0 %v23444_v1  ;;  %v18674_v20 = vrot.slane %v12213_v25, 9  ;;  %v12349_v39 = vsel %vm24568_vm13, %v18675_v16, %v12348_v52  ;;  %v12380_v15 = vsel %vm24568_vm13, %v12378_v44, %v12379_v11  ;;  %v12377_v25 = vsel %vm24568_vm13, %v18679_v6, %v12376_v28  ;;  %v23449_v52 = vld [vmem:[%s29000_s3 + $0x208] sm:$0xff]  }
 0x809   : > { %v27449_v43 = vcombine.low %v12349_v39, %v12352_v57  ;;  %v27479_v4 = vcombine.low %v12377_v25, %v12380_v15  ;;  %v12709_v8 = vrot.slane %v12707_v12, 4  ;;  %v12708_v57 = vsel %vm24568_vm13, %v18720_v50, %v12707_v12 }
 0x80a   : > { %21395 = vmatmul.mubr.bf16.gmra.mrb[72].mxu0 %v27380_v18  ;;  %v12342_v10 = vsel %vm24568_vm13, %v18674_v20, %v12341_v21  ;;  %v18678_v21 = vrot.slane %v12217_v19, 9  ;;  %v23459_v20 = vld [vmem:[%s29002_s5 + $0x18] sm:$0xff]  }
 0x80b   : > { %21398 = vmatprep.mubr.bf16.mxu0 %v27387_v37  ;;  %21427 = vmatpush3.bf16.msra.mxu0 %v23444_v1  ;;  %v27430_v1 = vcombine.low %v12335_v29, %v12338_v13  ;;  %v27435_v41 = vcombine.low %v12342_v10, %v12345_v63  ;;  %v23457_v13 = vld [vmem:[%s29002_s5 + $0x8] sm:$0xff]   ;;  %v23460_v63 = vld [vmem:[%s29002_s5 + $0x20] sm:$0xff]   ;;  %v23454_v10 = vld [vmem:[%s29000_s3 + $0x230] sm:$0xff]   ;;  %v12711_v16 = vsel %vm24568_vm13, %v12709_v8, %v12710_v47 }
 0x80c   : > { %21428 = vmatprep.subr.bf16.mxu0 %v23445_v32  ;;  %v12370_v23 = vsel %vm24568_vm13, %v18678_v21, %v12369_v27  ;;  %21516 = vmatprep.subr.bf16.mxu1 %v23457_v13  ;;  %v23453_v29 = vld [vmem:[%s29000_s3 + $0x228] sm:$0xff]   ;;  %v27586_v8 = vld [vmem:[#allocation2 + $0x20] sm:$0x1] }
 0x80d   : > { %21517 = vmatpush3.bf16.msra.mxu1 %v23457_v13  ;;  %29396 = vst [vmem:[#allocation74_spill] sm:$0xff] %v27586_v8 }
 0x80e   : > { %21518 = vmatprep.subr.bf16.mxu1 %v23458_v14 }
 0x80f   : > { %21429 = vmatpush3.bf16.msra.mxu0 %v23445_v32  ;;  %v12362_v32 = vrot.slane %v27123_v9, 5  ;;  %v12216_v9 = vld [vmem:[#allocation2 + $0x9c] sm:$0xe] }
 0x810   : > { %21430 = vmatprep.subr.bf16.mxu0 %v23446_v60  ;;  %v18677_v38 = vrot.slane %v12216_v9, 9 }
 0x811   : > { %v12364_v59 = vrot.slane %v12362_v32, 4  ;;  %21519 = vmatpush3.bf16.msra.mxu1 %v23458_v14 }
 0x812   : > { %21399 = vmatmul.mubr.bf16.gmra.mrb[76].mxu0 %v27404_v22  ;;  %v12363_v56 = vsel %vm24568_vm13, %v18677_v38, %v12362_v32  ;;  %21520 = vmatprep.subr.bf16.mxu1 %v23459_v20  ;;  %v18737_v32 = vcombine.low %v12708_v57, %v12711_v16  ;;  %v27592_v16 = vld [vmem:[#allocation2 + $0xc] sm:$0xf] }
 0x813   : > { %21402 = vmatprep.mubr.bf16.mxu0 %v27411_v58  ;;  %21431 = vmatpush3.bf16.msra.mxu0 %v23446_v60  ;;  %v12371_v60 = vrot.slane %v12369_v27, 4  ;;  %v12366_v3 = vsel %vm24568_vm13, %v12364_v59, %v12365_v36  ;;  %29399 = vst [vmem:[#allocation75_spill] sm:$0xff] %v27592_v16 }
 0x814   : > { %21432 = vmatprep.subr.bf16.mxu0 %v23447_v46 }
 0x815   : > { %v12373_v33 = vsel %vm24568_vm13, %v12371_v60, %v12372_v62  ;;  %21521 = vmatpush3.bf16.msra.mxu1 %v23459_v20 }
 0x816   : > { %v27470_v48 = vcombine.low %v12370_v23, %v12373_v33  ;;  %21522 = vmatprep.subr.bf16.mxu1 %v23460_v63 }
 0x817   : > { %21433 = vmatpush3.bf16.msra.mxu0 %v23447_v46  ;;  %v27466_v46 = vcombine.low %v12363_v56, %v12366_v3 }
 0x818   : > { %21466 = vmatprep.subr.bf16.mxu0 %v27420_v35 }
 0x819   : > { %21523 = vmatpush3.bf16.msra.mxu1 %v23460_v63 }
 0x81a   : > { %21403 = vmatmul.mubr.bf16.gmra.mrb[80].mxu0 %v27430_v1  ;;  %21524 = vmatprep.subr.bf16.mxu1 %v23461_v40 }
 0x81b   : > { %21406 = vmatprep.mubr.bf16.mxu0 %v27435_v41 }
 0x81d   : > { %21525 = vmatpush3.bf16.msra.mxu1 %v23461_v40  ;;  %v23489_v40 = vld [vmem:[%s29002_s5 + $0x88] sm:$0xff]  }
 0x822   : > { %21407 = vmatmul.mubr.bf16.gmra.mrb[84].mxu0 %v27449_v43 }
 0x823   : > { %21410 = vmatprep.mubr.bf16.mxu0 %v27453_v5 }
 0x82a   : > { %21411 = vmatmul.mubr.bf16.gmra.mrb[88].mxu0 %v27466_v46 }
 0x82b   : > { %21414 = vmatprep.mubr.bf16.mxu0 %v27470_v48 }
 0x832   : > { %21415 = vmatmul.mubr.bf16.gmra.mrb[92].mxu0 %v27479_v4 }
 0x833   : > { %21434 = vmatprep.mubr.bf16.mxu0 %v27336_v45  ;;  %v23450_v45 = vld [vmem:[%s29000_s3 + $0x210] sm:$0xff]  }
 0x83a   : > { %21435 = vmatmul.mubr.bf16.vlgmr.msra.gmra.mrb[64].mxu0 %v27343_v17 }
 0x83b   : > { %21467 = vmatpush3.bf16.msra.mxu0 %v27420_v35  ;;  %21438 = vmatprep.mubr.bf16.mxu0 %v27357_v30  ;;  %v23452_v35 = vld [vmem:[%s29000_s3 + $0x220] sm:$0xff]  }
 0x83c   : > { %21468 = vmatprep.subr.bf16.mxu0 %v23449_v52 }
 0x83f   : > { %21469 = vmatpush3.bf16.msra.mxu0 %v23449_v52 }
 0x840   : > { %21470 = vmatprep.subr.bf16.mxu0 %v23450_v45 }
 0x842   : > { %21439 = vmatmul.mubr.bf16.gmra.mrb[68].mxu0 %v27364_v7 }
 0x843   : > { %21442 = vmatprep.mubr.bf16.mxu0 %v27380_v18  ;;  %21471 = vmatpush3.bf16.msra.mxu0 %v23450_v45 }
 0x844   : > { %21472 = vmatprep.subr.bf16.mxu0 %v23451_v0 }
 0x847   : > { %21473 = vmatpush3.bf16.msra.mxu0 %v23451_v0 }
 0x848   : > { %21474 = vmatprep.subr.bf16.mxu0 %v23452_v35 }
 0x84a   : > { %21443 = vmatmul.mubr.bf16.gmra.mrb[72].mxu0 %v27387_v37 }
 0x84b   : > { %21446 = vmatprep.mubr.bf16.mxu0 %v27404_v22  ;;  %21475 = vmatpush3.bf16.msra.mxu0 %v23452_v35  ;;  %v14162_v35 = vld [vmem:[#allocation2 + $0x18] sm:$0xf] }
 0x84c   : > { %21476 = vmatprep.subr.bf16.mxu0 %v23453_v29 }
 0x84f   : > { %21477 = vmatpush3.bf16.msra.mxu0 %v23453_v29 }
 0x850   : > { %21478 = vmatprep.subr.bf16.mxu0 %v23454_v10 }
 0x852   : > { %21447 = vmatmul.mubr.bf16.gmra.mrb[76].mxu0 %v27411_v58 }
 0x853   : > { %21450 = vmatprep.mubr.bf16.mxu0 %v27430_v1  ;;  %21479 = vmatpush3.bf16.msra.mxu0 %v23454_v10 }
 0x854   : > { %21480 = vmatprep.subr.bf16.mxu0 %v23455_v2 }
 0x857   : > { %21481 = vmatpush3.bf16.msra.mxu0 %v23455_v2 }
 0x85a   : > { %21451 = vmatmul.mubr.bf16.gmra.mrb[80].mxu0 %v27435_v41 }
 0x85b   : > { %21454 = vmatprep.mubr.bf16.mxu0 %v27449_v43 }
 0x862   : > { %21455 = vmatmul.mubr.bf16.gmra.mrb[84].mxu0 %v27453_v5 }
 0x863   : > { %21458 = vmatprep.mubr.bf16.mxu0 %v27466_v46 }
 0x86a   : > { %21459 = vmatmul.mubr.bf16.gmra.mrb[88].mxu0 %v27470_v48 }
 0x86b   : > { %21462 = vmatprep.mubr.bf16.mxu0 %v27479_v4 }
 0x872   : > { %21463 = vmatmul.mubr.bf16.gmra.mrb[92].mxu0 %v18737_v32 }
 0x873   : > { %21482 = vmatprep.mubr.bf16.mxu0 %v27343_v17  ;;  %v18746_v17 = vrot.slane %v12220_v26, 9  ;;  %v27594_v26 = vld [vmem:[#allocation2 + $0x10] sm:$0xf] }
 0x874   : > { %29400 = vst [vmem:[#allocation84_spill] sm:$0xff] %v27594_v26 }
 0x87a   : > { %21483 = vmatmul.mubr.bf16.vlgmr.msra.gmra.mrb[64].mxu0 %v27357_v30  ;;  %v12980_v30 = vrot.slane %v12978_v55, 4 }
 0x87b   : > { %21486 = vmatprep.mubr.bf16.mxu0 %v27364_v7  ;;  %v12981_v7 = vrot.slane %v27306_v53, 5  ;;  %v23462_v53 = vld [vmem:[%s29002_s5 + $0x30] sm:$0xff]  }
 0x87c   : > { %21526 = vmatprep.subr.bf16.mxu1 %v23462_v53 }
 0x87d   : > { %21527 = vmatpush3.bf16.msra.mxu1 %v23462_v53 }
 0x882   : > { %21487 = vmatmul.mubr.bf16.gmra.mrb[68].mxu0 %v27380_v18  ;;  %v12979_v18 = vsel %vm24568_vm13, %v18746_v17, %v12978_v55 }
 0x883   : > { %21490 = vmatprep.mubr.bf16.mxu0 %v27387_v37  ;;  %v12982_v37 = vsel %vm24568_vm13, %v12980_v30, %v12981_v7  ;;  %v14166_v30 = vld [vmem:[#allocation2 + $0x20] sm:$0x1] }
 0x88a   : > { %21491 = vmatmul.mubr.bf16.gmra.mrb[72].mxu0 %v27404_v22  ;;  %v18763_v22 = vcombine.low %v12979_v18, %v12982_v37 }
 0x88b   : > { %21494 = vmatprep.mubr.bf16.mxu0 %v27411_v58  ;;  %v23463_v58 = vld [vmem:[%s29002_s5 + $0x38] sm:$0xff]  }
 0x88c   : > { %21528 = vmatprep.subr.bf16.mxu1 %v23463_v58 }
 0x88d   : > { %21529 = vmatpush3.bf16.msra.mxu1 %v23463_v58  ;;  %v23490_v58 = vld [vmem:[%s29002_s5 + $0x90] sm:$0xff]  }
 0x892   : > { %21495 = vmatmul.mubr.bf16.gmra.mrb[76].mxu0 %v27430_v1  ;;  %v23464_v1 = vld [vmem:[#allocation2] sm:$0xff]  }
 0x893   : > { %21498 = vmatprep.mubr.bf16.mxu0 %v27435_v41  ;;  %v27572_v41 = vld [vmem:[%s29002_s5 + $0x40] sm:$0xff]   ;;  %21530 = vmatprep.mubr.bf16.mxu1 %v23464_v1 }
 0x894   : > { %21562 = vmatprep.subr.bf16.mxu1 %v27572_v41 }
 0x89a   : > { %21499 = vmatmul.mubr.bf16.gmra.mrb[80].mxu0 %v27449_v43 }
 0x89b   : > { %21502 = vmatprep.mubr.bf16.mxu0 %v27453_v5 }
 0x8a2   : > { %21503 = vmatmul.mubr.bf16.gmra.mrb[84].mxu0 %v27466_v46 }
 0x8a3   : > { %21506 = vmatprep.mubr.bf16.mxu0 %v27470_v48 }
 0x8aa   : > { %21507 = vmatmul.mubr.bf16.gmra.mrb[88].mxu0 %v27479_v4 }
 0x8ab   : > { %21510 = vmatprep.mubr.bf16.mxu0 %v18737_v32 }
 0x8b2   : > { %21511 = vmatmul.mubr.bf16.gmra.mrb[92].mxu0 %v18763_v22  ;;  %v27599_v22 = vld [vmem:[#allocation2 + $0x1c] sm:$0xf] }
 0x8b3   : > { %29401 = vst [vmem:[#allocation83_spill] sm:$0xff] %v27599_v22 }
 0x94d   : > { %v21484_v31 = vpop.f32.mrb[64].mxu0 }
 0x94e   : > { %v22010_v27 = vadd.f32 %v21484_v31, %v27578_v34  ;;  %v13085_v39 = vpop.f32.mrb[65].mxu0  ;;  %v14159_v31 = vld [vmem:[#allocation2 + $0x14] sm:$0x1] }
 0x94f   : > { %v22011_v43 = vadd.f32 %v27578_v34, %v13085_v39  ;;  %v21485_v61 = vpop.f32.mrb[66].mxu0  ;;  %v27605_v39 = vld [vmem:[#allocation2 + $0x14] sm:$0x1] }
 0x950   : > { %v13246_v5 = vmax.f32 %v22010_v27, 0.0  ;;  %v22012_v59 = vadd.f32 %v21485_v61, %v27578_v34  ;;  %v13088_v9 = vpop.f32.mrb[67].mxu0  ;;  %29404 = vst [vmem:[#allocation71_spill] sm:$0xff] %v27605_v39 }
 0x951   : > { %v13244_v60 = vmax.f32 %v22011_v43, 0.0  ;;  %v22013_v36 = vadd.f32 %v27578_v34, %v13088_v9 }
 0x952   : > { %v19180_v19 = vpack.c.bf16 %v13246_v5, %v13246_v5  ;;  %v13247_v62 = vmax.f32 %v22012_v59, 0.0 }
 0x953   : > { %v19178_v38 = vpack.c.bf16 %v13244_v60, %v13244_v60  ;;  %v13245_v3 = vmax.f32 %v22013_v36, 0.0 }
 0x954   : > { %v13854_v28 = vshrl.u32 %v19180_v19, 16  ;;  %v19181_v21 = vpack.c.bf16 %v13247_v62, %v13247_v62  ;;  %v13857_v33 = vshll.u32 %v19180_v19, 16 }
 0x955   : > { %v13837_v56 = vshrl.u32 %v19178_v38, 16  ;;  %v13840_v46 = vshll.u32 %v19178_v38, 16  ;;  %v19179_v23 = vpack.c.bf16 %v13245_v3, %v13245_v3  ;;  %v21488_v48 = vpop.f32.mrb[68].mxu0 }
 0x956   : > { %v13856_v44 = vrot.slane %v13854_v28, 7  ;;  %v13862_v51 = vshrl.u32 %v19181_v21, 16  ;;  %v13865_v11 = vshll.u32 %v19181_v21, 16  ;;  %v22014_v6 = vadd.f32 %v21488_v48, %v27578_v34  ;;  %v13101_v15 = vpop.f32.mrb[69].mxu0 }
 0x957   : > { %v13839_v25 = vrot.slane %v13837_v56, 7  ;;  %v13845_v4 = vshrl.u32 %v19179_v23, 16  ;;  %v13848_v24 = vshll.u32 %v19179_v23, 16  ;;  %v22015_v13 = vadd.f32 %v27578_v34, %v13101_v15  ;;  %v21489_v14 = vpop.f32.mrb[70].mxu0 }
 0x958   : > { %v13859_v52 = vor.u32 %v13857_v33, %v13856_v44  ;;  %v13860_v20 = vrot.slane %v13856_v44, 4  ;;  %v13864_v45 = vrot.slane %v13862_v51, 7  ;;  %v13250_v63 = vmax.f32 %v22014_v6, 0.0  ;;  %v13104_v0 = vpop.f32.mrb[71].mxu0  ;;  %v14176_v51 = vld [vmem:[#allocation2 + $0x30] sm:$0xf] }
 0x959   : > { %v13842_v29 = vor.u32 %v13840_v46, %v13839_v25  ;;  %v13843_v10 = vrot.slane %v13839_v25, 4  ;;  %v13847_v2 = vrot.slane %v13845_v4, 7  ;;  %v13248_v12 = vmax.f32 %v22015_v13, 0.0  ;;  %v27623_v4 = vld [vmem:[#allocation2 + $0x30] sm:$0xf] }
 0x95a   : > { %v14163_v50 = vsel %vm23811_vm5, %v13859_v52, %v14162_v35  ;;  %v13867_v57 = vor.u32 %v13865_v11, %v13864_v45  ;;  %v13869_v32 = vrot.slane %v13864_v45, 4  ;;  %v19184_v55 = vpack.c.bf16 %v13250_v63, %v13250_v63  ;;  %29405 = vst [vmem:[#allocation85_spill] sm:$0xff] %v27623_v4  ;;  %v14169_v13 = vld [vmem:[#allocation2 + $0x24] sm:$0xf] }
 0x95b   : > { %14164 = vst [vmem:[#allocation2 + $0x18] sm:$0xf] %v14163_v50  ;;  %v14156_v17 = vsel %vm23811_vm5, %v13842_v29, %v27592_v16  ;;  %v13850_v7 = vor.u32 %v13848_v24, %v13847_v2  ;;  %v13852_v18 = vrot.slane %v13847_v2, 4  ;;  %v19182_v37 = vpack.c.bf16 %v13248_v12, %v13248_v12  ;;  %v27630_v45 = vld [vmem:[#allocation2 + $0x24] sm:$0xf] }
 0x95c   : > { %14157 = vst [vmem:[#allocation2 + $0xc] sm:$0xf] %v14156_v17  ;;  %v13868_v53 = vsel %vm23818_vm6, %v13860_v20, %v13867_v57  ;;  %v14167_v1 = vsel %vm23824_vm7, %v13869_v32, %v14166_v30  ;;  %v13888_v27 = vshrl.u32 %v19184_v55, 16  ;;  %v13891_v5 = vshll.u32 %v19184_v55, 16  ;;  %29406 = vst [vmem:[#allocation96_spill] sm:$0xff] %v27630_v45 }
 0x95d   : > { %14165 = vst [vmem:[#allocation2 + $0x1c] sm:$0xf] %v13868_v53  ;;  %14168 = vst [vmem:[#allocation2 + $0x20] sm:$0x1] %v14167_v1  ;;  %v13851_v43 = vsel %vm23818_vm6, %v13843_v10, %v13850_v7  ;;  %v14160_v61 = vsel %vm23824_vm7, %v13852_v18, %v14159_v31  ;;  %v13871_v59 = vshrl.u32 %v19182_v37, 16  ;;  %v21492_v9 = vpop.f32.mrb[72].mxu0  ;;  %v22016_v36 = vadd.f32 %v21489_v14, %v27578_v34 }
 0x95e   : > { %14158 = vst [vmem:[#allocation2 + $0x10] sm:$0xf] %v13851_v43  ;;  %14161 = vst [vmem:[#allocation2 + $0x14] sm:$0x1] %v14160_v61  ;;  %v27611_v60 = vrot.slane %v13888_v27, 7  ;;  %v22017_v19 = vadd.f32 %v27578_v34, %v13104_v0  ;;  %v22018_v62 = vadd.f32 %v21492_v9, %v27578_v34  ;;  %v13117_v38 = vpop.f32.mrb[73].mxu0 }
 0x95f   : > { %v27616_v3 = vrot.slane %v13871_v59, 7  ;;  %v13874_v28 = vshll.u32 %v19182_v37, 16  ;;  %v22019_v21 = vadd.f32 %v27578_v34, %v13117_v38  ;;  %v21493_v33 = vpop.f32.mrb[74].mxu0  ;;  %v13251_v23 = vmax.f32 %v22016_v36, 0.0  ;;  %v27638_v10 = vld [vmem:[%s29002_s5 + $0x48] sm:$0xff]  }
 0x960   : > { %v13893_v56 = vor.u32 %v13891_v5, %v27611_v60  ;;  %v13894_v46 = vrot.slane %v27611_v60, 4  ;;  %v13249_v48 = vmax.f32 %v22017_v19, 0.0  ;;  %v13120_v44 = vpop.f32.mrb[75].mxu0  ;;  %v13254_v15 = vmax.f32 %v22018_v62, 0.0  ;;  %v14180_v61 = vld [vmem:[#allocation2 + $0x38] sm:$0x1] }
 0x961   : > { %v13876_v11 = vor.u32 %v13874_v28, %v27616_v3  ;;  %v13877_v6 = vrot.slane %v27616_v3, 4  ;;  %v13252_v25 = vmax.f32 %v22019_v21, 0.0  ;;  %v19185_v14 = vpack.c.bf16 %v13251_v23, %v13251_v23  ;;  %v27652_v62 = vld [vmem:[#allocation2 + $0x2c] sm:$0x1]  ;;  %v27654_v38 = vld [vmem:[#allocation2 + $0x38] sm:$0x1] }
 0x962   : > { %v14177_v24 = vsel %vm23811_vm5, %v13893_v56, %v14176_v51  ;;  %v19183_v52 = vpack.c.bf16 %v13249_v48, %v13249_v48  ;;  %v27628_v20 = vadd.f32 %v21493_v33, %v27578_v34  ;;  %v19188_v0 = vpack.c.bf16 %v13254_v15, %v13254_v15  ;;  %29407 = vst [vmem:[#allocation101_spill] sm:$0xff] %v27652_v62  ;;  %v27656_v3 = vld [vmem:[#allocation2 + $0x34] sm:$0xf]  ;;  %v27658_v33 = vld [vmem:[#allocation2 + $0x28] sm:$0xf] }
 0x963   : > { %14178 = vst [vmem:[#allocation2 + $0x30] sm:$0xf] %v14177_v24  ;;  %v14170_v63 = vsel %vm23811_vm5, %v13876_v11, %v14169_v13  ;;  %v19186_v35 = vpack.c.bf16 %v13252_v25, %v13252_v25  ;;  %v22021_v29 = vadd.f32 %v27578_v34, %v13120_v44  ;;  %v13896_v2 = vshrl.u32 %v19185_v14, 16  ;;  %29408 = vst [vmem:[#allocation61_spill] sm:$0xff] %v27654_v38  ;;  %v14173_v44 = vld [vmem:[#allocation2 + $0x2c] sm:$0x1] }
 0x964   : > { %14171 = vst [vmem:[#allocation2 + $0x24] sm:$0xf] %v14170_v63  ;;  %v13899_v12 = vshll.u32 %v19185_v14, 16  ;;  %v13879_v50 = vshrl.u32 %v19183_v52, 16  ;;  %v13882_v57 = vshll.u32 %v19183_v52, 16  ;;  %v13922_v32 = vshrl.u32 %v19188_v0, 16 }
 0x965   : > { %v13925_v55 = vshll.u32 %v19188_v0, 16  ;;  %v13905_v17 = vshrl.u32 %v19186_v35, 16  ;;  %v13908_v30 = vshll.u32 %v19186_v35, 16  ;;  %v21496_v7 = vpop.f32.mrb[76].mxu0  ;;  %v27640_v18 = vld [vmem:[#allocation2 + $0xc] sm:$0xff]   ;;  %v13898_v37 = vrot.slane %v13896_v2, 7 }
 0x966   : > { %v13881_v53 = vrot.slane %v13879_v50, 7  ;;  %v13255_v1 = vmax.f32 %v27628_v20, 0.0  ;;  %v13253_v31 = vmax.f32 %v22021_v29, 0.0  ;;  %v13133_v27 = vpop.f32.mrb[77].mxu0  ;;  %v27643_v43 = vld [vmem:[#allocation2 + $0x18] sm:$0xff]   ;;  %v27645_v5 = vrot.slane %v13922_v32, 7  ;;  %21531 = vmatmul.mubr.bf16.vlgmr.msra.gmra.mrb[64].mxu1 %v27640_v18 }
 0x967   : > { %v27647_v59 = vrot.slane %v13905_v17, 7  ;;  %v22022_v9 = vadd.f32 %v21496_v7, %v27578_v34  ;;  %v22023_v36 = vadd.f32 %v27578_v34, %v13133_v27  ;;  %v21497_v19 = vpop.f32.mrb[78].mxu0  ;;  %29409 = vst [vmem:[#allocation60_spill] sm:$0xff] %v27656_v3  ;;  %v13901_v28 = vor.u32 %v13899_v12, %v13898_v37  ;;  %29410 = vst [vmem:[#allocation63_spill] sm:$0xff] %v27658_v33  ;;  %v23471_v24 = vld [vmem:[%s29002_s5 + $0x50] sm:$0xff]  }
 0x968   : > { %v13903_v21 = vrot.slane %v13898_v37, 4  ;;  %v13884_v56 = vor.u32 %v13882_v57, %v13881_v53  ;;  %v13886_v23 = vrot.slane %v13881_v53, 4  ;;  %v13136_v48 = vpop.f32.mrb[79].mxu0  ;;  %21563 = vmatpush3.bf16.msra.mxu1 %v27572_v41  ;;  %21534 = vmatprep.mubr.bf16.mxu1 %v27643_v43  ;;  %v13927_v51 = vor.u32 %v13925_v55, %v27645_v5  ;;  %v14190_v20 = vld [vmem:[#allocation2 + $0x48] sm:$0xf]  ;;  %v23474_v37 = vld [vmem:[%s29002_s5 + $0x58] sm:$0xff]  }
 0x969   : > { %v13928_v11 = vrot.slane %v27645_v5, 4  ;;  %v13910_v15 = vor.u32 %v13908_v30, %v27647_v59  ;;  %v13911_v25 = vrot.slane %v27647_v59, 4  ;;  %21564 = vmatprep.subr.bf16.mxu1 %v27638_v10  ;;  %v13902_v41 = vsel %vm23818_vm6, %v13894_v46, %v13901_v28  ;;  %v14183_v63 = vld [vmem:[#allocation2 + $0x3c] sm:$0xf]  ;;  %v27682_v35 = vld [vmem:[#allocation2 + $0x48] sm:$0xf] }
 0x96a   : > { %v14181_v13 = vsel %vm23824_vm7, %v13903_v21, %v14180_v61  ;;  %v13885_v14 = vsel %vm23818_vm6, %v13877_v6, %v13884_v56  ;;  %v14174_v52 = vsel %vm23824_vm7, %v13886_v23, %v14173_v44  ;;  %v27680_v0 = vld [vmem:[#allocation2 + $0x3c] sm:$0xf]  ;;  %29412 = vst [vmem:[#allocation59_spill] sm:$0xff] %v27682_v35  ;;  %14179 = vst [vmem:[#allocation2 + $0x34] sm:$0xf] %v13902_v41  ;;  %v13258_v2 = vmax.f32 %v22022_v9, 0.0 }
 0x96b   : > { %29411 = vst [vmem:[#allocation62_spill] sm:$0xff] %v27680_v0  ;;  %14182 = vst [vmem:[#allocation2 + $0x38] sm:$0x1] %v14181_v13  ;;  %v14191_v60 = vsel %vm23811_vm5, %v13927_v51, %v14190_v20  ;;  %v14184_v46 = vsel %vm23811_vm5, %v13910_v15, %v14183_v63  ;;  %v19189_v6 = vpack.c.bf16 %v13255_v1, %v13255_v1  ;;  %v13256_v12 = vmax.f32 %v22023_v36, 0.0  ;;  %v14194_v21 = vld [vmem:[#allocation2 + $0x50] sm:$0x1] }
 0x96c   : > { %14172 = vst [vmem:[#allocation2 + $0x28] sm:$0xf] %v13885_v14  ;;  %14175 = vst [vmem:[#allocation2 + $0x2c] sm:$0x1] %v14174_v52  ;;  %v19187_v29 = vpack.c.bf16 %v13253_v31, %v13253_v31  ;;  %v22024_v50 = vadd.f32 %v21497_v19, %v27578_v34  ;;  %v22025_v57 = vadd.f32 %v27578_v34, %v13136_v48  ;;  %21565 = vmatpush3.bf16.msra.mxu1 %v27638_v10  ;;  %v27700_v15 = vld [vmem:[#allocation2 + $0x44] sm:$0x1] }
 0x96d   : > { %14192 = vst [vmem:[#allocation2 + $0x48] sm:$0xf] %v14191_v60  ;;  %14185 = vst [vmem:[#allocation2 + $0x3c] sm:$0xf] %v14184_v46  ;;  %v13930_v32 = vshrl.u32 %v19189_v6, 16  ;;  %v13933_v55 = vshll.u32 %v19189_v6, 16  ;;  %21566 = vmatprep.subr.bf16.mxu1 %v23471_v24  ;;  %v19192_v53 = vpack.c.bf16 %v13258_v2, %v13258_v2  ;;  %v19190_v1 = vpack.c.bf16 %v13256_v12, %v13256_v12 }
 0x96e   : > { %v13913_v17 = vshrl.u32 %v19187_v29, 16  ;;  %v13916_v30 = vshll.u32 %v19187_v29, 16  ;;  %v21500_v7 = vpop.f32.mrb[80].mxu0  ;;  %v13259_v31 = vmax.f32 %v22024_v50, 0.0  ;;  %v13257_v27 = vmax.f32 %v22025_v57, 0.0  ;;  %29413 = vst [vmem:[#allocation64_spill] sm:$0xff] %v27700_v15 }
 0x96f   : > { %v13149_v61 = vpop.f32.mrb[81].mxu0  ;;  %v13932_v9 = vrot.slane %v13930_v32, 7  ;;  %v27695_v19 = vadd.f32 %v21500_v7, %v27578_v34  ;;  %v13956_v56 = vshrl.u32 %v19192_v53, 16  ;;  %v13959_v23 = vshll.u32 %v19192_v53, 16  ;;  %v27702_v41 = vld [vmem:[#allocation2 + $0x50] sm:$0x1] }
 0x970   : > { %v13915_v36 = vrot.slane %v13913_v17, 7  ;;  %v27698_v10 = vadd.f32 %v27578_v34, %v13149_v61  ;;  %v21501_v28 = vpop.f32.mrb[82].mxu0  ;;  %v13939_v48 = vshrl.u32 %v19190_v1, 16  ;;  %v13942_v44 = vshll.u32 %v19190_v1, 16  ;;  %21567 = vmatpush3.bf16.msra.mxu1 %v23471_v24  ;;  %29414 = vst [vmem:[#allocation76_spill] sm:$0xff] %v27702_v41  ;;  %v23477_v6 = vld [vmem:[%s29002_s5 + $0x60] sm:$0xff]  }
 0x971   : > { %v13152_v51 = vpop.f32.mrb[83].mxu0  ;;  %v27704_v13 = vld [vmem:[#allocation2 + $0x4c] sm:$0xf]  ;;  %v13935_v14 = vor.u32 %v13933_v55, %v13932_v9  ;;  %v13937_v52 = vrot.slane %v13932_v9, 4  ;;  %v27706_v20 = vld [vmem:[#allocation2 + $0x40] sm:$0xf]  ;;  %21568 = vmatprep.subr.bf16.mxu1 %v23474_v37  ;;  %v19193_v2 = vpack.c.bf16 %v13259_v31, %v13259_v31  ;;  %v19191_v12 = vpack.c.bf16 %v13257_v27, %v13257_v27 }
 0x972   : > { %29415 = vst [vmem:[#allocation66_spill] sm:$0xff] %v27704_v13  ;;  %29416 = vst [vmem:[#allocation77_spill] sm:$0xff] %v27706_v20  ;;  %v13918_v63 = vor.u32 %v13916_v30, %v13915_v36  ;;  %v13920_v60 = vrot.slane %v13915_v36, 4  ;;  %v14187_v46 = vld [vmem:[#allocation2 + $0x44] sm:$0x1]  ;;  %v27711_v29 = vrot.slane %v13956_v56, 7 }
 0x973   : > { %v27713_v24 = vrot.slane %v13939_v48, 7  ;;  %v27715_v50 = vld [vmem:[#allocation2 + $0x24] sm:$0xff]   ;;  %v27717_v57 = vld [vmem:[#allocation2 + $0x30] sm:$0xff]   ;;  %v13936_v32 = vsel %vm23818_vm6, %v13928_v11, %v13935_v14  ;;  %v14195_v55 = vsel %vm23824_vm7, %v13937_v52, %v14194_v21  ;;  %v27731_v7 = vld [vmem:[#allocation2 + $0x60] sm:$0xf]  ;;  %v13967_v27 = vshll.u32 %v19193_v2, 16 }
 0x974   : > { %v13919_v17 = vsel %vm23818_vm6, %v13911_v25, %v13918_v63  ;;  %v14188_v30 = vsel %vm23824_vm7, %v13920_v60, %v14187_v46  ;;  %29417 = vst [vmem:[#allocation78_spill] sm:$0xff] %v27731_v7  ;;  %14193 = vst [vmem:[#allocation2 + $0x4c] sm:$0xf] %v13936_v32  ;;  %v13961_v5 = vor.u32 %v13959_v23, %v27711_v29  ;;  %v13962_v11 = vrot.slane %v27711_v29, 4  ;;  %v14204_v53 = vld [vmem:[#allocation2 + $0x60] sm:$0xf] }
 0x975   : > { %14196 = vst [vmem:[#allocation2 + $0x50] sm:$0x1] %v14195_v55  ;;  %14186 = vst [vmem:[#allocation2 + $0x40] sm:$0xf] %v13919_v17  ;;  %v13944_v1 = vor.u32 %v13942_v44, %v27713_v24  ;;  %v13945_v59 = vrot.slane %v27713_v24, 4  ;;  %21535 = vmatmul.mubr.bf16.gmra.mrb[68].mxu1 %v27715_v50  ;;  %v13964_v25 = vshrl.u32 %v19193_v2, 16  ;;  %v22028_v60 = vadd.f32 %v21501_v28, %v27578_v34 }
 0x976   : > { %14189 = vst [vmem:[#allocation2 + $0x44] sm:$0x1] %v14188_v30  ;;  %v14197_v31 = vld [vmem:[#allocation2 + $0x54] sm:$0xf]  ;;  %v13947_v61 = vshrl.u32 %v19191_v12, 16  ;;  %v13950_v9 = vshll.u32 %v19191_v12, 16  ;;  %21538 = vmatprep.mubr.bf16.mxu1 %v27717_v57  ;;  %21569 = vmatpush3.bf16.msra.mxu1 %v23474_v37  ;;  %v14205_v56 = vsel %vm23811_vm5, %v13961_v5, %v14204_v53  ;;  %v22029_v46 = vadd.f32 %v27578_v34, %v13152_v51 }
 0x977   : > { %v21504_v36 = vpop.f32.mrb[84].mxu0  ;;  %v27739_v21 = vld [vmem:[#allocation2 + $0x54] sm:$0xf]  ;;  %v14198_v23 = vsel %vm23811_vm5, %v13944_v1, %v14197_v31  ;;  %v13262_v48 = vmax.f32 %v27695_v19, 0.0  ;;  %v13260_v44 = vmax.f32 %v27698_v10, 0.0  ;;  %21570 = vmatprep.subr.bf16.mxu1 %v23477_v6  ;;  %v23480_v52 = vld [vmem:[%s29002_s5 + $0x68] sm:$0xff]  }
 0x978   : > { %29418 = vst [vmem:[#allocation70_spill] sm:$0xff] %v27739_v21  ;;  %v13165_v14 = vpop.f32.mrb[85].mxu0  ;;  %14206 = vst [vmem:[#allocation2 + $0x60] sm:$0xf] %v14205_v56  ;;  %v13966_v37 = vrot.slane %v13964_v25, 7  ;;  %v13949_v63 = vrot.slane %v13947_v61, 7  ;;  %v22030_v10 = vadd.f32 %v21504_v36, %v27578_v34 }
 0x979   : > { %14199 = vst [vmem:[#allocation2 + $0x54] sm:$0xf] %v14198_v23  ;;  %v21505_v29 = vpop.f32.mrb[86].mxu0  ;;  %v14208_v24 = vld [vmem:[#allocation2 + $0x68] sm:$0x1]  ;;  %v19196_v2 = vpack.c.bf16 %v13262_v48, %v13262_v48  ;;  %v19194_v19 = vpack.c.bf16 %v13260_v44, %v13260_v44  ;;  %v22031_v12 = vadd.f32 %v27578_v34, %v13165_v14  ;;  %v23483_v23 = vld [vmem:[%s29002_s5 + $0x70] sm:$0xff]  }
 0x97a   : > { %v13168_v32 = vpop.f32.mrb[87].mxu0  ;;  %v27754_v55 = vld [vmem:[#allocation2 + $0x5c] sm:$0x1]  ;;  %v27756_v17 = vld [vmem:[#allocation2 + $0x68] sm:$0x1]  ;;  %v13969_v5 = vor.u32 %v13967_v27, %v13966_v37  ;;  %v13971_v53 = vrot.slane %v13966_v37, 4  ;;  %v13952_v51 = vor.u32 %v13950_v9, %v13949_v63  ;;  %21571 = vmatpush3.bf16.msra.mxu1 %v23477_v6 }
 0x97b   : > { %29419 = vst [vmem:[#allocation69_spill] sm:$0xff] %v27754_v55  ;;  %29420 = vst [vmem:[#allocation79_spill] sm:$0xff] %v27756_v17  ;;  %v27758_v30 = vld [vmem:[#allocation2 + $0x64] sm:$0xf]  ;;  %v27760_v28 = vld [vmem:[#allocation2 + $0x58] sm:$0xf]  ;;  %21572 = vmatprep.subr.bf16.mxu1 %v23480_v52 }
 0x97c   : > { %29421 = vst [vmem:[#allocation81_spill] sm:$0xff] %v27758_v30  ;;  %29422 = vst [vmem:[#allocation80_spill] sm:$0xff] %v27760_v28  ;;  %v13954_v1 = vrot.slane %v13949_v63, 4  ;;  %v14201_v31 = vld [vmem:[#allocation2 + $0x5c] sm:$0x1]  ;;  %v13990_v25 = vshrl.u32 %v19196_v2, 16  ;;  %v13970_v48 = vsel %vm23818_vm6, %v13962_v11, %v13969_v5  ;;  %v14209_v27 = vsel %vm23824_vm7, %v13971_v53, %v14208_v24 }
 0x97d   : > { %v13993_v61 = vshll.u32 %v19196_v2, 16  ;;  %v13973_v36 = vshrl.u32 %v19194_v19, 16  ;;  %v13976_v56 = vshll.u32 %v19194_v19, 16  ;;  %v13953_v9 = vsel %vm23818_vm6, %v13945_v59, %v13952_v51  ;;  %v27773_v44 = vld [vmem:[#allocation2 + $0x3c] sm:$0xff]   ;;  %14207 = vst [vmem:[#allocation2 + $0x64] sm:$0xf] %v13970_v48 }
 0x97e   : > { %v14202_v6 = vsel %vm23824_vm7, %v13954_v1, %v14201_v31  ;;  %14210 = vst [vmem:[#allocation2 + $0x68] sm:$0x1] %v14209_v27  ;;  %14200 = vst [vmem:[#allocation2 + $0x58] sm:$0xf] %v13953_v9  ;;  %v27775_v14 = vrot.slane %v13990_v25, 7  ;;  %v13263_v11 = vmax.f32 %v22028_v60, 0.0  ;;  %v22032_v5 = vadd.f32 %v21505_v29, %v27578_v34  ;;  %21539 = vmatmul.mubr.bf16.gmra.mrb[72].mxu1 %v27773_v44 }
 0x97f   : > { %14203 = vst [vmem:[#allocation2 + $0x5c] sm:$0x1] %v14202_v6  ;;  %v27777_v37 = vrot.slane %v13973_v36, 7  ;;  %v13261_v63 = vmax.f32 %v22029_v46, 0.0  ;;  %v27779_v2 = vld [vmem:[#allocation2 + $0x48] sm:$0xff]   ;;  %v13266_v19 = vmax.f32 %v22030_v10, 0.0  ;;  %v22033_v53 = vadd.f32 %v27578_v34, %v13168_v32  ;;  %21573 = vmatpush3.bf16.msra.mxu1 %v23480_v52 }
 0x980   : > { %v14218_v24 = vld [vmem:[#allocation2 + $0x78] sm:$0xf]  ;;  %v13264_v59 = vmax.f32 %v22031_v12, 0.0  ;;  %v21508_v51 = vpop.f32.mrb[88].mxu0  ;;  %v13995_v31 = vor.u32 %v13993_v61, %v27775_v14  ;;  %21542 = vmatprep.mubr.bf16.mxu1 %v27779_v2  ;;  %v14211_v29 = vld [vmem:[#allocation2 + $0x6c] sm:$0xf]  ;;  %v19197_v12 = vpack.c.bf16 %v13263_v11, %v13263_v11  ;;  %21574 = vmatprep.subr.bf16.mxu1 %v23483_v23 }
 0x981   : > { %v27784_v1 = vld [vmem:[#allocation2 + $0x78] sm:$0xf]  ;;  %v13978_v60 = vor.u32 %v13976_v56, %v27777_v37  ;;  %v13181_v10 = vpop.f32.mrb[89].mxu0  ;;  %v19195_v32 = vpack.c.bf16 %v13261_v63, %v13261_v63  ;;  %v19200_v36 = vpack.c.bf16 %v13266_v19, %v13266_v19  ;;  %v27796_v9 = vld [vmem:[#allocation2 + $0x6c] sm:$0xf]  ;;  %v13267_v6 = vmax.f32 %v22032_v5, 0.0 }
 0x982   : > { %29423 = vst [vmem:[#allocation82_spill] sm:$0xff] %v27784_v1  ;;  %v19198_v48 = vpack.c.bf16 %v13264_v59, %v13264_v59  ;;  %v27791_v27 = vpop.f32.mrb[90].mxu0  ;;  %v23486_v61 = vld [vmem:[%s29002_s5 + $0x78] sm:$0xff]   ;;  %29424 = vst [vmem:[#allocation86_spill] sm:$0xff] %v27796_v9  ;;  %v14219_v56 = vsel %vm23811_vm5, %v13995_v31, %v14218_v24  ;;  %v13265_v11 = vmax.f32 %v22033_v53, 0.0  ;;  %v13998_v19 = vshrl.u32 %v19197_v12, 16 }
 0x983   : > { %v14212_v52 = vsel %vm23811_vm5, %v13978_v60, %v14211_v29  ;;  %v27802_v63 = vpop.f32.mrb[91].mxu0  ;;  %14220 = vst [vmem:[#allocation2 + $0x78] sm:$0xf] %v14219_v56  ;;  %v14001_v59 = vshll.u32 %v19197_v12, 16  ;;  %v13981_v46 = vshrl.u32 %v19195_v32, 16  ;;  %v13984_v25 = vshll.u32 %v19195_v32, 16  ;;  %21575 = vmatpush3.bf16.msra.mxu1 %v23483_v23 }
 0x984   : > { %14213 = vst [vmem:[#allocation2 + $0x6c] sm:$0xf] %v14212_v52  ;;  %v14024_v55 = vshrl.u32 %v19200_v36, 16  ;;  %v14027_v17 = vshll.u32 %v19200_v36, 16  ;;  %v14007_v1 = vshrl.u32 %v19198_v48, 16  ;;  %v14010_v9 = vshll.u32 %v19198_v48, 16  ;;  %21576 = vmatprep.subr.bf16.mxu1 %v23486_v61 }
 0x985   : > { %v14000_v28 = vrot.slane %v13998_v19, 7  ;;  %v13983_v24 = vrot.slane %v13981_v46, 7  ;;  %v27804_v31 = vpack.c.bf16 %v13267_v6, %v13267_v6  ;;  %v27806_v60 = vpack.c.bf16 %v13265_v11, %v13265_v11  ;;  %v27808_v5 = vld [vmem:[#allocation2 + $0x54] sm:$0xff]   ;;  %v27813_v53 = vld [vmem:[%s29002_s5 + $0x80] sm:$0xff]   ;;  %v27827_v52 = vld [vmem:[#allocation2 + $0x7c] sm:$0xf] }
 0x986   : > { %v14222_v29 = vld [vmem:[#allocation2 + $0x80] sm:$0x1]  ;;  %v27815_v12 = vrot.slane %v14024_v55, 7  ;;  %v27817_v32 = vrot.slane %v14007_v1, 7  ;;  %v22034_v23 = vadd.f32 %v21508_v51, %v27578_v34  ;;  %v22035_v46 = vadd.f32 %v27578_v34, %v13181_v10  ;;  %v27823_v48 = vld [vmem:[#allocation2 + $0x74] sm:$0x1]  ;;  %21543 = vmatmul.mubr.bf16.gmra.mrb[76].mxu1 %v27808_v5 }
 0x987   : > { %v27821_v36 = vld [vmem:[#allocation2 + $0x60] sm:$0xff]   ;;  %29425 = vst [vmem:[#allocation89_spill] sm:$0xff] %v27823_v48  ;;  %29427 = vst [vmem:[#allocation90_spill] sm:$0xff] %v27827_v52  ;;  %v14003_v6 = vor.u32 %v14001_v59, %v14000_v28  ;;  %v14005_v11 = vrot.slane %v14000_v28, 4  ;;  %v27829_v19 = vld [vmem:[#allocation2 + $0x70] sm:$0xf]  ;;  %v13986_v55 = vor.u32 %v13984_v25, %v13983_v24  ;;  %21577 = vmatpush3.bf16.msra.mxu1 %v23486_v61 }
 0x988   : > { %v27825_v56 = vld [vmem:[#allocation2 + $0x80] sm:$0x1]  ;;  %29428 = vst [vmem:[#allocation88_spill] sm:$0xff] %v27829_v19  ;;  %v13988_v15 = vrot.slane %v13983_v24, 4  ;;  %v21512_v1 = vpop.f32.mrb[92].mxu0  ;;  %v14029_v48 = vor.u32 %v14027_v17, %v27815_v12  ;;  %v14012_v52 = vor.u32 %v14010_v9, %v27817_v32  ;;  %v14013_v28 = vrot.slane %v27817_v32, 4  ;;  %21546 = vmatprep.mubr.bf16.mxu1 %v27821_v36  ;;  %21610 = vmatprep.subr.bf16.mxu1 %v27813_v53 }
 0x989   : > { %29426 = vst [vmem:[#allocation87_spill] sm:$0xff] %v27825_v56  ;;  %v27832_v51 = vld [vmem:[#allocation2 + $0x84] sm:$0xf]  ;;  %v27834_v10 = vld [vmem:[#allocation2 + $0x90] sm:$0xf]  ;;  %v14030_v56 = vrot.slane %v27815_v12, 4 }
 0x98a   : > { %29429 = vst [vmem:[#allocation92_spill] sm:$0xff] %v27832_v51  ;;  %29430 = vst [vmem:[#allocation93_spill] sm:$0xff] %v27834_v10  ;;  %v14215_v41 = vld [vmem:[#allocation2 + $0x74] sm:$0x1]  ;;  %v13197_v25 = vpop.f32.mrb[93].mxu0  ;;  %v29431_v59 = vrot.slane %v27775_v14, 4  ;;  %v14223_v51 = vsel %vm23824_vm7, %v14005_v11, %v14222_v29 }
 0x98b   : > { %v29432_v17 = vrot.slane %v27777_v37, 4  ;;  %v14216_v9 = vsel %vm23824_vm7, %v13988_v15, %v14215_v41  ;;  %v14232_v32 = vld [vmem:[#allocation2 + $0x90] sm:$0xf]  ;;  %v14225_v10 = vld [vmem:[#allocation2 + $0x84] sm:$0xf]  ;;  %v27853_v19 = vpop.f32.mrb[94].mxu0 }
 0x98c   : > { %v14004_v24 = vsel %vm23818_vm6, %v29431_v59, %v14003_v6  ;;  %14224 = vst [vmem:[#allocation2 + $0x80] sm:$0x1] %v14223_v51  ;;  %14217 = vst [vmem:[#allocation2 + $0x74] sm:$0x1] %v14216_v9  ;;  %v14233_v14 = vsel %vm23811_vm5, %v14029_v48, %v14232_v32  ;;  %v14226_v37 = vsel %vm23811_vm5, %v14012_v52, %v14225_v10  ;;  %v14032_v61 = vshrl.u32 %v27804_v31, 16  ;;  %v27862_v41 = vpop.f32.mrb[95].mxu0 }
 0x98d   : > { %v13987_v12 = vsel %vm23818_vm6, %v29432_v17, %v13986_v55  ;;  %14221 = vst [vmem:[#allocation2 + $0x7c] sm:$0xf] %v14004_v24  ;;  %v14035_v15 = vshll.u32 %v27804_v31, 16  ;;  %14234 = vst [vmem:[#allocation2 + $0x90] sm:$0xf] %v14233_v14  ;;  %v14015_v29 = vshrl.u32 %v27806_v60, 16  ;;  %v22036_v48 = vadd.f32 %v27791_v27, %v27578_v34 }
 0x98e   : > { %14214 = vst [vmem:[#allocation2 + $0x70] sm:$0xf] %v13987_v12  ;;  %14227 = vst [vmem:[#allocation2 + $0x84] sm:$0xf] %v14226_v37  ;;  %v14018_v6 = vshll.u32 %v27806_v60, 16  ;;  %v13270_v11 = vmax.f32 %v22034_v23, 0.0  ;;  %v22037_v52 = vadd.f32 %v27578_v34, %v27802_v63  ;;  %v22038_v10 = vadd.f32 %v21512_v1, %v27578_v34 }
 0x98f   : > { %v13268_v55 = vmax.f32 %v22035_v46, 0.0  ;;  %v14034_v51 = vrot.slane %v14032_v61, 7  ;;  %v14017_v31 = vrot.slane %v14015_v29, 7  ;;  %v22039_v17 = vadd.f32 %v27578_v34, %v13197_v25  ;;  %v27872_v12 = vld [vmem:[#allocation2 + $0x98] sm:$0x1] }
 0x990   : > { %v19204_v59 = vpack.c.bf16 %v13270_v11, %v13270_v11  ;;  %29433 = vst [vmem:[#allocation98_spill] sm:$0xff] %v27872_v12  ;;  %v27874_v9 = vld [vmem:[#allocation2 + $0x94] sm:$0xf]  ;;  %v13271_v46 = vmax.f32 %v22036_v48, 0.0  ;;  %v13269_v32 = vmax.f32 %v22037_v52, 0.0 }
 0x991   : > { %v19202_v24 = vpack.c.bf16 %v13268_v55, %v13268_v55  ;;  %29434 = vst [vmem:[#allocation91_spill] sm:$0xff] %v27874_v9  ;;  %v14037_v60 = vor.u32 %v14035_v15, %v14034_v51  ;;  %v14039_v23 = vrot.slane %v14034_v51, 4  ;;  %v27876_v14 = vld [vmem:[#allocation2 + $0x8c] sm:$0x1]  ;;  %v14236_v27 = vld [vmem:[#allocation2 + $0x98] sm:$0x1]  ;;  %v14020_v37 = vor.u32 %v14018_v6, %v14017_v31 }
 0x992   : > { %29435 = vst [vmem:[#allocation94_spill] sm:$0xff] %v27876_v14  ;;  %v14022_v63 = vrot.slane %v14017_v31, 4  ;;  %v14058_v61 = vshrl.u32 %v19204_v59, 16  ;;  %v14061_v1 = vshll.u32 %v19204_v59, 16  ;;  %v27882_v11 = vld [vmem:[#allocation2 + $0x88] sm:$0xf]  ;;  %v19205_v31 = vpack.c.bf16 %v13271_v46, %v13271_v46 }
 0x993   : > { %v14038_v29 = vsel %vm23818_vm6, %v14030_v56, %v14037_v60  ;;  %v14237_v25 = vsel %vm23824_vm7, %v14039_v23, %v14236_v27  ;;  %29436 = vst [vmem:[#allocation97_spill] sm:$0xff] %v27882_v11  ;;  %v14229_v55 = vld [vmem:[#allocation2 + $0x8c] sm:$0x1]  ;;  %v14041_v15 = vshrl.u32 %v19202_v24, 16  ;;  %v14044_v51 = vshll.u32 %v19202_v24, 16 }
 0x994   : > { %14235 = vst [vmem:[#allocation2 + $0x94] sm:$0xf] %v14038_v29  ;;  %14238 = vst [vmem:[#allocation2 + $0x98] sm:$0x1] %v14237_v25  ;;  %v14021_v48 = vsel %vm23818_vm6, %v14013_v28, %v14020_v37  ;;  %v14230_v6 = vsel %vm23824_vm7, %v14022_v63, %v14229_v55  ;;  %v14060_v52 = vrot.slane %v14058_v61, 7  ;;  %v19203_v60 = vpack.c.bf16 %v13269_v32, %v13269_v32  ;;  %v27890_v14 = vld [vmem:[#allocation2 + $0x78] sm:$0xff]  }
 0x995   : > { %v27888_v59 = vld [vmem:[#allocation2 + $0x6c] sm:$0xff]   ;;  %14228 = vst [vmem:[#allocation2 + $0x88] sm:$0xf] %v14021_v48  ;;  %14231 = vst [vmem:[#allocation2 + $0x8c] sm:$0x1] %v14230_v6  ;;  %v14043_v56 = vrot.slane %v14041_v15, 7 }
 0x996   : > { %v13274_v23 = vmax.f32 %v22038_v10, 0.0  ;;  %v13272_v27 = vmax.f32 %v22039_v17, 0.0  ;;  %v14063_v24 = vor.u32 %v14061_v1, %v14060_v52  ;;  %v14064_v29 = vrot.slane %v14060_v52, 4  ;;  %21547 = vmatmul.mubr.bf16.gmra.mrb[80].mxu1 %v27888_v59  ;;  %v14246_v28 = vld [vmem:[#allocation2 + $0xa8] sm:$0xf] }
 0x997   : > { %v14066_v25 = vshrl.u32 %v19205_v31, 16  ;;  %v14069_v12 = vshll.u32 %v19205_v31, 16  ;;  %v14046_v37 = vor.u32 %v14044_v51, %v14043_v56  ;;  %v14047_v63 = vrot.slane %v14043_v56, 4  ;;  %21550 = vmatprep.mubr.bf16.mxu1 %v27890_v14  ;;  %v27894_v55 = vld [vmem:[#allocation2 + $0xa8] sm:$0xf] }
 0x998   : > { %v14049_v46 = vshrl.u32 %v19203_v60, 16  ;;  %v14052_v61 = vshll.u32 %v19203_v60, 16  ;;  %29437 = vst [vmem:[#allocation95_spill] sm:$0xff] %v27894_v55  ;;  %v14247_v10 = vsel %vm23811_vm5, %v14063_v24, %v14246_v28  ;;  %v14239_v17 = vld [vmem:[#allocation2 + $0x9c] sm:$0xf]  ;;  %v19208_v1 = vpack.c.bf16 %v13274_v23, %v13274_v23 }
 0x999   : > { %v14068_v32 = vrot.slane %v14066_v25, 7  ;;  %v19206_v15 = vpack.c.bf16 %v13272_v27, %v13272_v27  ;;  %v27898_v48 = vld [vmem:[#allocation2 + $0x9c] sm:$0xf]  ;;  %14248 = vst [vmem:[#allocation2 + $0xa8] sm:$0xf] %v14247_v10  ;;  %v14240_v51 = vsel %vm23811_vm5, %v14046_v37, %v14239_v17  ;;  %v22040_v31 = vadd.f32 %v27853_v19, %v27578_v34 }
 0x99a   : > { %29438 = vst [vmem:[#allocation100_spill] sm:$0xff] %v27898_v48  ;;  %v14250_v6 = vld [vmem:[#allocation2 + $0xb0] sm:$0x1]  ;;  %v14051_v52 = vrot.slane %v14049_v46, 7  ;;  %v22041_v56 = vadd.f32 %v27578_v34, %v27862_v41  ;;  %14241 = vst [vmem:[#allocation2 + $0x9c] sm:$0xf] %v14240_v51 }
 0x99b   : > { %v27906_v60 = vld [vmem:[#allocation2 + $0xb0] sm:$0x1]  ;;  %v27908_v24 = vld [vmem:[#allocation2 + $0xac] sm:$0xf]  ;;  %v14071_v23 = vor.u32 %v14069_v12, %v14068_v32  ;;  %v14073_v27 = vrot.slane %v14068_v32, 4  ;;  %v14092_v28 = vshrl.u32 %v19208_v1, 16 }
 0x99c   : > { %29439 = vst [vmem:[#allocation99_spill] sm:$0xff] %v27906_v60  ;;  %29440 = vst [vmem:[#allocation10_spill] sm:$0xff] %v27908_v24  ;;  %v14243_v25 = vld [vmem:[#allocation2 + $0xa4] sm:$0x1]  ;;  %v14095_v10 = vshll.u32 %v19208_v1, 16  ;;  %v14054_v37 = vor.u32 %v14052_v61, %v14051_v52  ;;  %v14056_v46 = vrot.slane %v14051_v52, 4 }
 0x99d   : > { %v27910_v48 = vld [vmem:[#allocation2 + $0xa4] sm:$0x1]  ;;  %v14075_v17 = vshrl.u32 %v19206_v15, 16  ;;  %v14078_v55 = vshll.u32 %v19206_v15, 16  ;;  %v14072_v19 = vsel %vm23818_vm6, %v14064_v29, %v14071_v23  ;;  %v14251_v34 = vsel %vm23824_vm7, %v14073_v27, %v14250_v6  ;;  %v27918_v12 = vld [vmem:[#allocation2 + $0xa0] sm:$0xf] }
 0x99e   : > { %29441 = vst [vmem:[#allocation13_spill] sm:$0xff] %v27910_v48  ;;  %v14094_v41 = vrot.slane %v14092_v28, 7  ;;  %v13275_v51 = vmax.f32 %v22040_v31, 0.0  ;;  %v27916_v60 = vld [vmem:[#allocation2 + $0x84] sm:$0xff]   ;;  %14249 = vst [vmem:[#allocation2 + $0xac] sm:$0xf] %v14072_v19  ;;  %v14055_v61 = vsel %vm23818_vm6, %v14047_v63, %v14054_v37  ;;  %v14244_v32 = vsel %vm23824_vm7, %v14056_v46, %v14243_v25 }
 0x99f   : > { %14252 = vst [vmem:[#allocation2 + $0xb0] sm:$0x1] %v14251_v34  ;;  %29442 = vst [vmem:[#allocation11_spill] sm:$0xff] %v27918_v12  ;;  %v14077_v1 = vrot.slane %v14075_v17, 7  ;;  %v13273_v15 = vmax.f32 %v22041_v56, 0.0  ;;  %v27924_v29 = vld [vmem:[#allocation2 + $0x90] sm:$0xff]   ;;  %21551 = vmatmul.mubr.bf16.gmra.mrb[84].mxu1 %v27916_v60 }
 0x9a0   : > { %14242 = vst [vmem:[#allocation2 + $0xa0] sm:$0xf] %v14055_v61  ;;  %14245 = vst [vmem:[#allocation2 + $0xa4] sm:$0x1] %v14244_v32  ;;  %v14097_v6 = vor.u32 %v14095_v10, %v14094_v41  ;;  %v19209_v52 = vpack.c.bf16 %v13275_v51, %v13275_v51  ;;  %v27927_v31 = vld [vmem:[#allocation2 + $0xc0] sm:$0xf]  ;;  %21554 = vmatprep.mubr.bf16.mxu1 %v27924_v29 }
 0x9a1   : > { %29443 = vst [vmem:[#allocation15_spill] sm:$0xff] %v27927_v31  ;;  %v14260_v23 = vld [vmem:[#allocation2 + $0xc0] sm:$0xf]  ;;  %v14080_v27 = vor.u32 %v14078_v55, %v14077_v1  ;;  %v19207_v28 = vpack.c.bf16 %v13273_v15, %v13273_v15  ;;  %v14253_v25 = vld [vmem:[#allocation2 + $0xb4] sm:$0xf]  ;;  %v14098_v61 = vrot.slane %v14094_v41, 4 }
 0x9a2   : > { %v14261_v63 = vsel %vm23811_vm5, %v14097_v6, %v14260_v23  ;;  %v14100_v56 = vshrl.u32 %v19209_v52, 16  ;;  %v27932_v37 = vld [vmem:[#allocation2 + $0xb4] sm:$0xf]  ;;  %v14103_v19 = vshll.u32 %v19209_v52, 16  ;;  %v27936_v51 = vld [vmem:[#allocation2 + $0xc8] sm:$0x1] }
 0x9a3   : > { %29444 = vst [vmem:[#allocation14_spill] sm:$0xff] %v27932_v37  ;;  %14262 = vst [vmem:[#allocation2 + $0xc0] sm:$0xf] %v14261_v63  ;;  %v14254_v10 = vsel %vm23811_vm5, %v14080_v27, %v14253_v25  ;;  %v14083_v46 = vshrl.u32 %v19207_v28, 16  ;;  %v14086_v55 = vshll.u32 %v19207_v28, 16  ;;  %v14081_v23 = vrot.slane %v14077_v1, 4 }
 0x9a4   : > { %14255 = vst [vmem:[#allocation2 + $0xb4] sm:$0xf] %v14254_v10  ;;  %v14102_v17 = vrot.slane %v14100_v56, 7  ;;  %29445 = vst [vmem:[#allocation18_spill] sm:$0xff] %v27936_v51  ;;  %v14264_v6 = vld [vmem:[#allocation2 + $0xc8] sm:$0x1] }
 0x9a5   : > { %v14085_v34 = vrot.slane %v14083_v46, 7  ;;  %v27940_v63 = vld [vmem:[#allocation2 + $0xc4] sm:$0xf]  ;;  %v14257_v27 = vld [vmem:[#allocation2 + $0xbc] sm:$0x1]  ;;  %v27946_v28 = vld [vmem:[#allocation2 + $0xa8] sm:$0xff]  }
 0x9a6   : > { %v14105_v32 = vor.u32 %v14103_v19, %v14102_v17  ;;  %v14107_v15 = vrot.slane %v14102_v17, 4  ;;  %29446 = vst [vmem:[#allocation16_spill] sm:$0xff] %v27940_v63  ;;  %v27948_v41 = vld [vmem:[#allocation2 + $0xbc] sm:$0x1]  ;;  %v27950_v1 = vld [vmem:[#allocation2 + $0xb8] sm:$0xf] }
 0x9a7   : > { %v14088_v48 = vor.u32 %v14086_v55, %v14085_v34  ;;  %v14090_v31 = vrot.slane %v14085_v34, 4  ;;  %v27938_v37 = vld [vmem:[#allocation2 + $0x9c] sm:$0xff]   ;;  %29447 = vst [vmem:[#allocation21_spill] sm:$0xff] %v27948_v41  ;;  %29448 = vst [vmem:[#allocation12_spill] sm:$0xff] %v27950_v1  ;;  %v23498_v55 = vld [vmem:[%s29002_s5 + $0xc8] sm:$0xff]  }
 0x9a8   : > { %v14106_v47 = vsel %vm23818_vm6, %v14098_v61, %v14105_v32  ;;  %v14265_v52 = vsel %vm23824_vm7, %v14107_v15, %v14264_v6  ;;  %21555 = vmatmul.mubr.bf16.gmra.mrb[88].mxu1 %v27938_v37  ;;  %v23495_v46 = vld [vmem:[%s29002_s5 + $0xb8] sm:$0xff]   ;;  %v23497_v17 = vld [vmem:[%s29002_s5 + $0xc0] sm:$0xff]   ;;  %v28012_v15 = vld [vmem:[#allocation2 + $0x28] sm:$0xf] }
 0x9a9   : > { %14263 = vst [vmem:[#allocation2 + $0xc4] sm:$0xf] %v14106_v47  ;;  %14266 = vst [vmem:[#allocation2 + $0xc8] sm:$0x1] %v14265_v52  ;;  %v14089_v25 = vsel %vm23818_vm6, %v14081_v23, %v14088_v48  ;;  %v14258_v56 = vsel %vm23824_vm7, %v14090_v31, %v14257_v27  ;;  %21558 = vmatprep.mubr.bf16.mxu1 %v27946_v28  ;;  %v23493_v48 = vld [vmem:[%s29002_s5 + $0xa8] sm:$0xff]   ;;  %v23494_v31 = vld [vmem:[%s29002_s5 + $0xb0] sm:$0xff]  }
 0x9aa   : > { %14256 = vst [vmem:[#allocation2 + $0xb8] sm:$0xf] %v14089_v25  ;;  %14259 = vst [vmem:[#allocation2 + $0xbc] sm:$0x1] %v14258_v56  ;;  %v28005_v34 = vld [vmem:[#allocation2 + $0x1c] sm:$0xf] }
 0x9ab   : > { %v28010_v61 = vld [vmem:[#allocation2 + $0x20] sm:$0x1]  ;;  %v16584_v32 = vld [vmem:[#allocation2 + $0x18] sm:$0xe]  ;;  %v16664_v6 = vrot.slane %v28005_v34, 5  ;;  %v23499_v27 = vld [vmem:[%s29002_s5 + $0xd0] sm:$0xff]  }
 0x9ac   : > { %v16585_v23 = vld [vmem:[#allocation2 + $0x24] sm:$0xe]  ;;  %v28016_v47 = vld [vmem:[#allocation2 + $0x2c] sm:$0x1]  ;;  %v28018_v52 = vld [vmem:[#allocation2 + $0x34] sm:$0xf] }
 0x9ad   : > { %v28024_v25 = vld [vmem:[#allocation2 + $0x38] sm:$0x1]  ;;  %v18971_v56 = vrot.slane %v16584_v32, 9  ;;  %v16678_v32 = vrot.slane %v28018_v52, 5  ;;  %v16587_v41 = vld [vmem:[#allocation2 + $0x3c] sm:$0xe] }
 0x9ae   : > { %v16674_v63 = vrot.slane %v28016_v47, 5  ;;  %v16588_v12 = vld [vmem:[#allocation2 + $0x48] sm:$0xe]  ;;  %v28044_v24 = vld [vmem:[#allocation2 + $0x50] sm:$0x1] }
 0x9af   : > { %v18975_v21 = vrot.slane %v16588_v12, 9  ;;  %v16589_v30 = vld [vmem:[#allocation2 + $0x54] sm:$0xe]  ;;  %v28066_v7 = vld [vmem:[#allocation2 + $0x5c] sm:$0x1] }
 0x9b0   : > { %v28001_v19 = vld [vmem:[#allocation2 + $0xc0] sm:$0xff]   ;;  %v16591_v62 = vld [vmem:[#allocation2 + $0x6c] sm:$0xe] }
 0x9b1   : > { %v27958_v10 = vld [vmem:[#allocation2 + $0xb4] sm:$0xff]   ;;  %v16590_v20 = vld [vmem:[#allocation2 + $0x60] sm:$0xe]  ;;  %v28158_v39 = vld [vmem:[#allocation2 + $0xac] sm:$0xf] }
 0x9b2   : > { %21559 = vmatmul.mubr.bf16.gmra.mrb[92].mxu1 %v27958_v10  ;;  %v18977_v0 = vrot.slane %v16590_v20, 9  ;;  %v28164_v4 = vld [vmem:[#allocation2 + $0xb8] sm:$0xf] }
 0x9b3   : > { %21578 = vmatprep.mubr.bf16.mxu1 %v27640_v18  ;;  %v23491_v18 = vld [vmem:[%s29002_s5 + $0x98] sm:$0xff]  }
 0x9ba   : > { %21579 = vmatmul.mubr.bf16.vlgmr.msra.gmra.mrb[64].mxu1 %v27643_v43 }
 0x9bb   : > { %21611 = vmatpush3.bf16.msra.mxu1 %v27813_v53  ;;  %21582 = vmatprep.mubr.bf16.mxu1 %v27715_v50  ;;  %v23492_v53 = vld [vmem:[%s29002_s5 + $0xa0] sm:$0xff]  }
 0x9bc   : > { %21612 = vmatprep.subr.bf16.mxu1 %v23489_v40 }
 0x9bf   : > { %21613 = vmatpush3.bf16.msra.mxu1 %v23489_v40  ;;  %v16666_v40 = vrot.slane %v16664_v6, 4 }
 0x9c0   : > { %21614 = vmatprep.subr.bf16.mxu1 %v23490_v58 }
 0x9c2   : > { %21583 = vmatmul.mubr.bf16.gmra.mrb[68].mxu1 %v27717_v57 }
 0x9c3   : > { %21586 = vmatprep.mubr.bf16.mxu1 %v27773_v44  ;;  %21615 = vmatpush3.bf16.msra.mxu1 %v23490_v58  ;;  %v16667_v58 = vrot.slane %v28010_v61, 5 }
 0x9c4   : > { %21616 = vmatprep.subr.bf16.mxu1 %v23491_v18 }
 0x9c7   : > { %21617 = vmatpush3.bf16.msra.mxu1 %v23491_v18  ;;  %v28029_v18 = vld [vmem:[#allocation2 + $0x44] sm:$0x1] }
 0x9c8   : > { %21618 = vmatprep.subr.bf16.mxu1 %v23492_v53 }
 0x9ca   : > { %21587 = vmatmul.mubr.bf16.gmra.mrb[72].mxu1 %v27779_v2 }
 0x9cb   : > { %21590 = vmatprep.mubr.bf16.mxu1 %v27808_v5  ;;  %21619 = vmatpush3.bf16.msra.mxu1 %v23492_v53  ;;  %v18972_v53 = vrot.slane %v16585_v23, 9 }
 0x9cc   : > { %21620 = vmatprep.subr.bf16.mxu1 %v23493_v48 }
 0x9cf   : > { %21621 = vmatpush3.bf16.msra.mxu1 %v23493_v48  ;;  %v16671_v48 = vrot.slane %v28012_v15, 5 }
 0x9d0   : > { %21622 = vmatprep.subr.bf16.mxu1 %v23494_v31 }
 0x9d1   : > { %v16672_v1 = vsel %vm24568_vm13, %v18972_v53, %v16671_v48  ;;  %v16673_v23 = vrot.slane %v16671_v48, 4  ;;  %v28053_v53 = vld [vmem:[#allocation2 + $0x58] sm:$0xf]  ;;  %v18974_v48 = vrot.slane %v16587_v41, 9 }
 0x9d2   : > { %21591 = vmatmul.mubr.bf16.gmra.mrb[76].mxu1 %v27821_v36 }
 0x9d3   : > { %21594 = vmatprep.mubr.bf16.mxu1 %v27888_v59  ;;  %21623 = vmatpush3.bf16.msra.mxu1 %v23494_v31  ;;  %v28032_v31 = vld [vmem:[#allocation2 + $0x4c] sm:$0xf] }
 0x9d4   : > { %21624 = vmatprep.subr.bf16.mxu1 %v23495_v46 }
 0x9d7   : > { %21625 = vmatpush3.bf16.msra.mxu1 %v23495_v46  ;;  %v16668_v46 = vsel %vm24568_vm13, %v16666_v40, %v16667_v58  ;;  %v23500_v58 = vld [vmem:[%s29002_s5 + $0xd8] sm:$0xff]  }
 0x9d8   : > { %21658 = vmatprep.subr.bf16.mxu1 %v23497_v17 }
 0x9da   : > { %21595 = vmatmul.mubr.bf16.gmra.mrb[80].mxu1 %v27890_v14 }
 0x9db   : > { %21598 = vmatprep.mubr.bf16.mxu1 %v27916_v60 }
 0x9e2   : > { %21599 = vmatmul.mubr.bf16.gmra.mrb[84].mxu1 %v27924_v29 }
 0x9e3   : > { %21602 = vmatprep.mubr.bf16.mxu1 %v27938_v37 }
 0x9ea   : > { %21603 = vmatmul.mubr.bf16.gmra.mrb[88].mxu1 %v27946_v28 }
 0x9eb   : > { %21606 = vmatprep.mubr.bf16.mxu1 %v27958_v10 }
 0x9f2   : > { %21607 = vmatmul.mubr.bf16.gmra.mrb[92].mxu1 %v28001_v19 }
 0x9f3   : > { %21626 = vmatprep.mubr.bf16.mxu1 %v27643_v43  ;;  %v16586_v43 = vld [vmem:[#allocation2 + $0x30] sm:$0xe] }
 0x9fa   : > { %21627 = vmatmul.mubr.bf16.vlgmr.msra.gmra.mrb[64].mxu1 %v27715_v50  ;;  %v28027_v50 = vld [vmem:[#allocation2 + $0x40] sm:$0xf] }
 0x9fb   : > { %21659 = vmatpush3.bf16.msra.mxu1 %v23497_v17  ;;  %21630 = vmatprep.mubr.bf16.mxu1 %v27717_v57  ;;  %v16665_v57 = vsel %vm24568_vm13, %v18971_v56, %v16664_v6  ;;  %v18973_v17 = vrot.slane %v16586_v43, 9  ;;  %v16680_v56 = vrot.slane %v16678_v32, 4  ;;  %v16681_v43 = vrot.slane %v28024_v25, 5 }
 0x9fc   : > { %21660 = vmatprep.subr.bf16.mxu1 %v23498_v55  ;;  %v28039_v51 = vcombine.low %v16665_v57, %v16668_v46  ;;  %v16685_v40 = vrot.slane %v28027_v50, 5  ;;  %v16688_v57 = vrot.slane %v28029_v18, 5  ;;  %v16692_v46 = vrot.slane %v28032_v31, 5 }
 0x9fd   : > { %v16679_v6 = vsel %vm24568_vm13, %v18973_v17, %v16678_v32  ;;  %v28059_v17 = vld [vmem:[#allocation2 + $0x64] sm:$0xf]  ;;  %v16682_v11 = vsel %vm24568_vm13, %v16680_v56, %v16681_v43 }
 0x9fe   : > { %29449 = vst [vmem:[#allocation23_spill] sm:$0xff] %v28039_v51  ;;  %v16687_v9 = vrot.slane %v16685_v40, 4  ;;  %v16694_v41 = vrot.slane %v16692_v46, 4  ;;  %v16686_v12 = vsel %vm24568_vm13, %v18974_v48, %v16685_v40  ;;  %v18976_v40 = vrot.slane %v16589_v30, 9  ;;  %v28093_v48 = vld [vmem:[#allocation2 + $0x74] sm:$0x1] }
 0x9ff   : > { %21661 = vmatpush3.bf16.msra.mxu1 %v23498_v55  ;;  %v16675_v55 = vsel %vm24568_vm13, %v16673_v23, %v16674_v63  ;;  %v28068_v63 = vcombine.low %v16679_v6, %v16682_v11  ;;  %v16695_v23 = vrot.slane %v28044_v24, 5  ;;  %v16693_v11 = vsel %vm24568_vm13, %v18975_v21, %v16692_v46 }
 0xa00   : > { %21662 = vmatprep.subr.bf16.mxu1 %v23499_v27  ;;  %v28061_v32 = vcombine.low %v16672_v1, %v16675_v55  ;;  %v28072_v1 = vld [vmem:[#allocation2 + $0x68] sm:$0x1]  ;;  %v28074_v55 = vld [vmem:[#allocation2 + $0x70] sm:$0xf]  ;;  %v16699_v6 = vrot.slane %v28053_v53, 5  ;;  %v16702_v46 = vrot.slane %v28066_v7, 5 }
 0xa01   : > { %29451 = vst [vmem:[#allocation20_spill] sm:$0xff] %v28068_v63  ;;  %v16696_v43 = vsel %vm24568_vm13, %v16694_v41, %v16695_v23  ;;  %v16709_v35 = vrot.slane %v28072_v1, 5 }
 0xa02   : > { %29450 = vst [vmem:[#allocation17_spill] sm:$0xff] %v28061_v32  ;;  %21631 = vmatmul.mubr.bf16.gmra.mrb[68].mxu1 %v27773_v44  ;;  %v16689_v44 = vsel %vm24568_vm13, %v16687_v9, %v16688_v57  ;;  %v16706_v9 = vrot.slane %v28059_v17, 5  ;;  %v28095_v21 = vcombine.low %v16693_v11, %v16696_v43  ;;  %v16701_v57 = vrot.slane %v16699_v6, 4  ;;  %v16592_v11 = vld [vmem:[#allocation2 + $0x78] sm:$0xe]  ;;  %v23502_v43 = vld [vmem:[%s29002_s5 + $0xe8] sm:$0xff]  }
 0xa03   : > { %21634 = vmatprep.mubr.bf16.mxu1 %v27779_v2  ;;  %21663 = vmatpush3.bf16.msra.mxu1 %v23499_v27  ;;  %v23501_v2 = vld [vmem:[%s29002_s5 + $0xe0] sm:$0xff]   ;;  %v28086_v27 = vld [vmem:[#allocation2 + $0x7c] sm:$0xf]  ;;  %v28088_v56 = vcombine.low %v16686_v12, %v16689_v44  ;;  %v16713_v12 = vrot.slane %v28074_v55, 5  ;;  %v16700_v30 = vsel %vm24568_vm13, %v18976_v40, %v16699_v6  ;;  %v16716_v40 = vrot.slane %v28093_v48, 5 }
 0xa04   : > { %21664 = vmatprep.subr.bf16.mxu1 %v23500_v58  ;;  %29453 = vst [vmem:[#allocation22_spill] sm:$0xff] %v28095_v21  ;;  %v16708_v13 = vrot.slane %v16706_v9, 4  ;;  %v28100_v44 = vld [vmem:[#allocation2 + $0x80] sm:$0x1]  ;;  %v16703_v41 = vsel %vm24568_vm13, %v16701_v57, %v16702_v46  ;;  %v16707_v23 = vsel %vm24568_vm13, %v18977_v0, %v16706_v9  ;;  %v16720_v20 = vrot.slane %v28086_v27, 5 }
 0xa05   : > { %29452 = vst [vmem:[#allocation24_spill] sm:$0xff] %v28088_v56  ;;  %v16715_v6 = vrot.slane %v16713_v12, 4  ;;  %v18978_v46 = vrot.slane %v16591_v62, 9  ;;  %v18979_v9 = vrot.slane %v16592_v11, 9  ;;  %v16723_v3 = vrot.slane %v28100_v44, 5  ;;  %v23503_v62 = vld [vmem:[%s29002_s5 + $0xf0] sm:$0xff]  }
 0xa06   : > { %v16710_v38 = vsel %vm24568_vm13, %v16708_v13, %v16709_v35  ;;  %v16722_v33 = vrot.slane %v16720_v20, 4  ;;  %v28145_v11 = vld [vmem:[#allocation2 + $0x98] sm:$0x1] }
 0xa07   : > { %21665 = vmatpush3.bf16.msra.mxu1 %v23500_v58  ;;  %v28112_v58 = vcombine.low %v16700_v30, %v16703_v41  ;;  %v28117_v57 = vcombine.low %v16707_v23, %v16710_v38  ;;  %v16717_v0 = vsel %vm24568_vm13, %v16715_v6, %v16716_v40  ;;  %v28124_v30 = vld [vmem:[#allocation2 + $0x88] sm:$0xf]  ;;  %v16714_v35 = vsel %vm24568_vm13, %v18978_v46, %v16713_v12  ;;  %v28131_v38 = vld [vmem:[#allocation2 + $0x94] sm:$0xf]  ;;  %v28139_v41 = vld [vmem:[#allocation2 + $0x8c] sm:$0x1] }
 0xa08   : > { %21666 = vmatprep.subr.bf16.mxu1 %v23501_v2  ;;  %v28133_v13 = vcombine.low %v16714_v35, %v16717_v0  ;;  %v28141_v23 = vld [vmem:[#allocation2 + $0xa0] sm:$0xf]  ;;  %v16727_v6 = vrot.slane %v28124_v30, 5  ;;  %v16594_v40 = vld [vmem:[#allocation2 + $0x90] sm:$0xe]  ;;  %v16737_v45 = vrot.slane %v28145_v11, 5 }
 0xa09   : > { %29454 = vst [vmem:[#allocation25_spill] sm:$0xff] %v28112_v58  ;;  %29455 = vst [vmem:[#allocation27_spill] sm:$0xff] %v28117_v57  ;;  %v28148_v46 = vld [vmem:[#allocation2 + $0xa4] sm:$0x1] }
 0xa0a   : > { %21635 = vmatmul.mubr.bf16.gmra.mrb[72].mxu1 %v27808_v5  ;;  %29456 = vst [vmem:[#allocation29_spill] sm:$0xff] %v28133_v13  ;;  %v16721_v5 = vsel %vm24568_vm13, %v18979_v9, %v16720_v20  ;;  %v16734_v20 = vrot.slane %v28131_v38, 5  ;;  %v16595_v9 = vld [vmem:[#allocation2 + $0x9c] sm:$0xe]  ;;  %v16729_v35 = vrot.slane %v16727_v6, 4  ;;  %v16744_v54 = vrot.slane %v28148_v46, 5 }
 0xa0b   : > { %21638 = vmatprep.mubr.bf16.mxu1 %v27821_v36  ;;  %21667 = vmatpush3.bf16.msra.mxu1 %v23501_v2  ;;  %v16724_v36 = vsel %vm24568_vm13, %v16722_v33, %v16723_v3  ;;  %v16593_v2 = vld [vmem:[#allocation2 + $0x84] sm:$0xe]  ;;  %v23504_v3 = vld [vmem:[%s29002_s5 + $0xf8] sm:$0xff]   ;;  %v28154_v33 = vld [vmem:[#allocation2] sm:$0xf]  ;;  %v18982_v16 = vrot.slane %v16595_v9, 9 }
 0xa0c   : > { %21668 = vmatprep.subr.bf16.mxu1 %v23502_v43  ;;  %v28143_v12 = vcombine.low %v16721_v5, %v16724_v36  ;;  %v18980_v0 = vrot.slane %v16593_v2, 9  ;;  %v16730_v5 = vrot.slane %v28139_v41, 5  ;;  %v16741_v36 = vrot.slane %v28141_v23, 5  ;;  %v16597_v13 = vld [vmem:[#allocation2 + $0xb4] sm:$0xe]  ;;  %v28181_v9 = vld [vmem:[%s29002_s5 + $0x100] sm:$0xff]  }
 0xa0d   : > { %v18981_v2 = vrot.slane %v16594_v40, 9  ;;  %v16736_v8 = vrot.slane %v16734_v20, 4 }
 0xa0e   : > { %29457 = vst [vmem:[#allocation26_spill] sm:$0xff] %v28143_v12  ;;  %v16731_v26 = vsel %vm24568_vm13, %v16729_v35, %v16730_v5  ;;  %v16743_v22 = vrot.slane %v16741_v36, 4  ;;  %v28170_v12 = vld [vmem:[#allocation2 + $0xb0] sm:$0x1]  ;;  %v15308_v35 = vshrl.u32 %v28154_v33, 16 }
 0xa0f   : > { %21669 = vmatpush3.bf16.msra.mxu1 %v23502_v43  ;;  %v16728_v43 = vsel %vm24568_vm13, %v18980_v0, %v16727_v6  ;;  %v16735_v40 = vsel %vm24568_vm13, %v18981_v2, %v16734_v20  ;;  %v16596_v0 = vld [vmem:[#allocation2 + $0xa8] sm:$0xe]  ;;  %v16742_v20 = vsel %vm24568_vm13, %v18982_v16, %v16741_v36  ;;  %v16598_v2 = vld [vmem:[#allocation2 + $0xc0] sm:$0xe]  ;;  %v28201_v16 = vld [vmem:[#allocation2 + $0x4] sm:$0xf] }
 0xa10   : > { %21670 = vmatprep.subr.bf16.mxu1 %v23503_v62  ;;  %v28172_v6 = vcombine.low %v16728_v43, %v16731_v26  ;;  %v16755_v43 = vrot.slane %v28164_v4, 5  ;;  %v18983_v57 = vrot.slane %v16596_v0, 9  ;;  %29461 = vst [vmem:[#allocation33_spill] sm:$0xff] %v28201_v16  ;;  %v15317_v56 = vshll.u32 %v28201_v16, 16 }
 0xa12   : > { %21639 = vmatmul.mubr.bf16.gmra.mrb[76].mxu1 %v27888_v59  ;;  %29458 = vst [vmem:[#allocation30_spill] sm:$0xff] %v28172_v6  ;;  %v16738_v59 = vsel %vm24568_vm13, %v16736_v8, %v16737_v45  ;;  %v16745_v8 = vsel %vm24568_vm13, %v16743_v22, %v16744_v54  ;;  %v16748_v45 = vrot.slane %v28158_v39, 5  ;;  %v28198_v6 = vld [vmem:[#allocation2 + $0xc8] sm:$0x1]  ;;  %v15311_v54 = vshll.u32 %v28154_v33, 16 }
 0xa13   : > { %21642 = vmatprep.mubr.bf16.mxu1 %v27890_v14  ;;  %21671 = vmatpush3.bf16.msra.mxu1 %v23503_v62  ;;  %v28183_v14 = vld [vmem:[#allocation2 + $0xbc] sm:$0x1]  ;;  %v28185_v62 = vld [vmem:[#allocation2 + $0xc4] sm:$0xf]  ;;  %v28187_v26 = vcombine.low %v16735_v40, %v16738_v59  ;;  %v28195_v5 = vcombine.low %v16742_v20, %v16745_v8  ;;  %v16751_v59 = vrot.slane %v28170_v12, 5  ;;  %v16757_v22 = vrot.slane %v16755_v43, 4 }
 0xa14   : > { %21672 = vmatprep.subr.bf16.mxu1 %v23504_v3  ;;  %v16750_v40 = vrot.slane %v16748_v45, 4  ;;  %v16758_v36 = vrot.slane %v28183_v14, 5  ;;  %v17086_v20 = vrot.slane %v28185_v62, 5  ;;  %v16749_v8 = vsel %vm24568_vm13, %v18983_v57, %v16748_v45 }
 0xa15   : > { %29459 = vst [vmem:[#allocation28_spill] sm:$0xff] %v28187_v26  ;;  %29460 = vst [vmem:[#allocation31_spill] sm:$0xff] %v28195_v5  ;;  %v18984_v26 = vrot.slane %v16597_v13, 9  ;;  %v17089_v21 = vrot.slane %v28198_v6, 5  ;;  %v15321_v57 = vshrl.u32 %v28201_v16, 16 }
 0xa16   : > { %v16752_v0 = vsel %vm24568_vm13, %v16750_v40, %v16751_v59  ;;  %v16759_v33 = vsel %vm24568_vm13, %v16757_v22, %v16758_v36  ;;  %v17088_v58 = vrot.slane %v17086_v20, 4  ;;  %v28230_v40 = vld [vmem:[#allocation2 + $0x8] sm:$0x1]  ;;  %v15310_v59 = vrot.slane %v15308_v35, 4 }
 0xa17   : > { %21673 = vmatpush3.bf16.msra.mxu1 %v23504_v3  ;;  %v16756_v13 = vsel %vm24568_vm13, %v18984_v26, %v16755_v43  ;;  %v19025_v3 = vrot.slane %v16598_v2, 9  ;;  %v28213_v5 = vcombine.low %v16749_v8, %v16752_v0  ;;  %29465 = vst [vmem:[#allocation32_spill] sm:$0xff] %v28230_v40  ;;  %v15319_v22 = vrot.slane %v15317_v56, 5  ;;  %v15256_v8 = vld [vmem:[#allocation2 + $0xc] sm:$0xf] }
 0xa18   : > { %21706 = vmatprep.subr.bf16.mxu1 %v28181_v9  ;;  %v28221_v45 = vcombine.low %v16756_v13, %v16759_v33  ;;  %v17090_v43 = vsel %vm24568_vm13, %v17088_v58, %v17089_v21  ;;  %v15323_v36 = vrot.slane %v15321_v57, 4  ;;  %v28232_v0 = vld [vmem:[#allocation2 + $0x10] sm:$0xf]  ;;  %v15259_v13 = vld [vmem:[#allocation2 + $0x18] sm:$0xf]  ;;  %v15365_v56 = vshll.u32 %v28005_v34, 16 }
 0xa19   : > { %29462 = vst [vmem:[#allocation35_spill] sm:$0xff] %v28213_v5  ;;  %v17087_v26 = vsel %vm24568_vm13, %v19025_v3, %v17086_v20  ;;  %29466 = vst [vmem:[#allocation39_spill] sm:$0xff] %v28232_v0  ;;  %v15335_v20 = vshll.u32 %v15256_v8, 16  ;;  %v15341_v3 = vshll.u32 %v28232_v0, 16  ;;  %v15345_v58 = vshrl.u32 %v28232_v0, 16 }
 0xa1a   : > { %21643 = vmatmul.mubr.bf16.gmra.mrb[80].mxu1 %v27916_v60  ;;  %29463 = vst [vmem:[#allocation36_spill] sm:$0xff] %v28221_v45  ;;  %v28228_v2 = vcombine.low %v17087_v26, %v17090_v43  ;;  %v15313_v60 = vrot.slane %v15311_v54, 5  ;;  %v15332_v45 = vshrl.u32 %v15256_v8, 16  ;;  %v15324_v21 = vor.u32 %v15323_v36, %v15319_v22  ;;  %v15262_v43 = vld [vmem:[#allocation2 + $0x24] sm:$0xf] }
 0xa1b   : > { %21646 = vmatprep.mubr.bf16.mxu1 %v27924_v29  ;;  %v15327_v29 = vshll.u32 %v28230_v40, 16  ;;  %v15356_v35 = vshrl.u32 %v15259_v13, 16  ;;  %v15359_v54 = vshll.u32 %v15259_v13, 16  ;;  %v15369_v57 = vshrl.u32 %v28005_v34, 16  ;;  %v15265_v40 = vld [vmem:[#allocation2 + $0x30] sm:$0xf] }
 0xa1c   : > { %29464 = vst [vmem:[#allocation37_spill] sm:$0xff] %v28228_v2  ;;  %v15314_v33 = vor.u32 %v15313_v60, %v15310_v59  ;;  %v15389_v59 = vshll.u32 %v28012_v15, 16  ;;  %v15393_v60 = vshrl.u32 %v28012_v15, 16  ;;  %v15334_v2 = vrot.slane %v15332_v45, 4 }
 0xa1d   : > { %v15329_v26 = vrot.slane %v15327_v29, 5  ;;  %v28243_v36 = vrot.slane %v15341_v3, 5  ;;  %v15325_v5 = vrot.slane %v15324_v21, 4  ;;  %v15347_v63 = vrot.slane %v15345_v58, 4 }
 0xa1e   : > { %v15315_v8 = vrot.slane %v15314_v33, 4  ;;  %v15358_v13 = vrot.slane %v15356_v35, 4  ;;  %v15361_v32 = vrot.slane %v15359_v54, 5  ;;  %v15371_v51 = vrot.slane %v15369_v57, 4  ;;  %v28254_v33 = vld [vmem:[#allocation2 + $0x14] sm:$0x1] }
 0xa1f   : > { %v15380_v0 = vshrl.u32 %v15262_v43, 16  ;;  %v15383_v34 = vshll.u32 %v15262_v43, 16  ;;  %v28247_v29 = vrot.slane %v15389_v59, 5  ;;  %v15395_v49 = vrot.slane %v15393_v60, 4 }
 0xa20   : > { %v15320_v15 = vsel %vm24192_vm10, %v15315_v8, %v15319_v22  ;;  %v15330_v45 = vsel %vm24192_vm10, %v15325_v5, %v15329_v26  ;;  %v15362_v3 = vor.u32 %v15361_v32, %v15358_v13  ;;  %v15407_v54 = vshll.u32 %v15265_v40, 16  ;;  %v23505_v26 = vld [vmem:[#allocation2 + $0xcc] sm:$0xff]  }
 0xa21   : > { %v15382_v58 = vrot.slane %v15380_v0, 4  ;;  %v15385_v35 = vrot.slane %v15383_v34, 5  ;;  %v15413_v22 = vshll.u32 %v28018_v52, 16  ;;  %v15351_v57 = vshll.u32 %v28254_v33, 16  ;;  %v15268_v0 = vld [vmem:[#allocation2 + $0x3c] sm:$0xf] }
 0xa22   : > { %21647 = vmatmul.mubr.bf16.gmra.mrb[84].mxu1 %v27938_v37  ;;  %v15337_v37 = vrot.slane %v15335_v20, 5  ;;  %v15348_v20 = vor.u32 %v15347_v63, %v28243_v36  ;;  %v18895_v63 = vcombine.low %v15320_v15, %v15330_v45  ;;  %v15363_v43 = vrot.slane %v15362_v3, 4  ;;  %v15271_v3 = vld [vmem:[#allocation2 + $0x48] sm:$0xf] }
 0xa23   : > { %21650 = vmatprep.mubr.bf16.mxu1 %v27946_v28  ;;  %v28245_v28 = vrot.slane %v15365_v56, 5  ;;  %v15417_v56 = vshrl.u32 %v28018_v52, 16  ;;  %v15386_v60 = vor.u32 %v15385_v35, %v15382_v58  ;;  %v15409_v8 = vrot.slane %v15407_v54, 5 }
 0xa24   : > { %v15338_v16 = vor.u32 %v15337_v37, %v15334_v2  ;;  %v15404_v2 = vshrl.u32 %v15265_v40, 16  ;;  %v15349_v32 = vrot.slane %v15348_v20, 4  ;;  %v28265_v37 = vrot.slane %v15413_v22, 5 }
 0xa25   : > { %v15372_v21 = vor.u32 %v15371_v51, %v28245_v28  ;;  %v15399_v51 = vshll.u32 %v28016_v47, 16  ;;  %v15419_v52 = vrot.slane %v15417_v56, 4  ;;  %v15353_v13 = vrot.slane %v15351_v57, 5 }
 0xa26   : > { %v15339_v5 = vrot.slane %v15338_v16, 4  ;;  %v15428_v34 = vshrl.u32 %v15268_v0, 16  ;;  %v15431_v15 = vshll.u32 %v15268_v0, 16  ;;  %v15437_v45 = vshll.u32 %v28027_v50, 16 }
 0xa27   : > { %v15373_v59 = vrot.slane %v15372_v21, 4  ;;  %v15401_v47 = vrot.slane %v15399_v51, 5  ;;  %v15441_v20 = vshrl.u32 %v28027_v50, 16  ;;  %v15354_v21 = vsel %vm24192_vm10, %v15349_v32, %v15353_v13  ;;  %v15274_v32 = vld [vmem:[#allocation2 + $0x54] sm:$0xf] }
 0xa28   : > { %v15344_v16 = vsel %vm24192_vm10, %v15339_v5, %v28243_v36  ;;  %v15368_v58 = vsel %vm24192_vm10, %v15363_v43, %v28245_v28  ;;  %v15387_v36 = vrot.slane %v15386_v60, 4  ;;  %v15423_v35 = vshll.u32 %v28024_v25, 16 }
 0xa29   : > { %v15420_v50 = vor.u32 %v15419_v52, %v28265_v37  ;;  %v15430_v22 = vrot.slane %v15428_v34, 4  ;;  %v15433_v56 = vrot.slane %v15431_v15, 5  ;;  %v15452_v5 = vshrl.u32 %v15271_v3, 16 }
 0xa2a   : > { %21651 = vmatmul.mubr.bf16.gmra.mrb[88].mxu1 %v27958_v10  ;;  %v15396_v10 = vor.u32 %v15395_v49, %v28247_v29  ;;  %v15406_v49 = vrot.slane %v15404_v2, 4  ;;  %v15455_v57 = vshll.u32 %v15271_v3, 16  ;;  %v15461_v28 = vshll.u32 %v28032_v31, 16 }
 0xa2b   : > { %21654 = vmatprep.mubr.bf16.mxu1 %v28001_v19  ;;  %v15375_v19 = vshll.u32 %v28010_v61, 16  ;;  %v15465_v25 = vshrl.u32 %v28032_v31, 16  ;;  %v15392_v0 = vsel %vm24192_vm10, %v15387_v36, %v28247_v29  ;;  %v15425_v43 = vrot.slane %v15423_v35, 5 }
 0xa2c   : > { %v15397_v40 = vrot.slane %v15396_v10, 4  ;;  %v15410_v54 = vor.u32 %v15409_v8, %v15406_v49  ;;  %v15447_v31 = vshll.u32 %v28029_v18, 16  ;;  %v15277_v8 = vld [vmem:[#allocation2 + $0x60] sm:$0xf]  ;;  %v15454_v52 = vrot.slane %v15452_v5, 4  ;;  %v23509_v5 = vld [vmem:[%s29002_s5 + $0x118] sm:$0xff]  }
 0xa2d   : > { %v15377_v61 = vrot.slane %v15375_v19, 5  ;;  %v28287_v19 = vcombine.low %v15344_v16, %v15354_v21  ;;  %v15457_v16 = vrot.slane %v15455_v57, 5  ;;  %v15476_v13 = vshrl.u32 %v15274_v32, 16 }
 0xa2e   : > { %v15402_v10 = vsel %vm24192_vm10, %v15397_v40, %v15401_v47  ;;  %v15411_v49 = vrot.slane %v15410_v54, 4  ;;  %v15421_v40 = vrot.slane %v15420_v50, 4  ;;  %v15479_v34 = vshll.u32 %v15274_v32, 16 }
 0xa2f   : > { %v15378_v2 = vsel %vm24192_vm10, %v15373_v59, %v15377_v61  ;;  %v23507_v59 = vld [vmem:[%s29002_s5 + $0x108] sm:$0xff]   ;;  %v28297_v60 = vcombine.low %v15392_v0, %v15402_v10  ;;  %v15434_v15 = vor.u32 %v15433_v56, %v15430_v22  ;;  %v28302_v61 = vrot.slane %v15461_v28, 5 }
 0xa30   : > { %v28289_v51 = vcombine.low %v15368_v58, %v15378_v2  ;;  %v15467_v47 = vrot.slane %v15465_v25, 4  ;;  %v15489_v18 = vshrl.u32 %v28053_v53, 16  ;;  %v15503_v3 = vshll.u32 %v15277_v8, 16  ;;  %v15280_v0 = vld [vmem:[#allocation2 + $0x6c] sm:$0xf] }
 0xa31   : > { %v15416_v21 = vsel %vm24192_vm10, %v15411_v49, %v28265_v37  ;;  %v15426_v58 = vsel %vm24192_vm10, %v15421_v40, %v15425_v43  ;;  %v15509_v36 = vshll.u32 %v28059_v17, 16  ;;  %v15513_v35 = vshrl.u32 %v28059_v17, 16 }
 0xa32   : > { %21655 = vmatmul.mubr.bf16.gmra.mrb[92].mxu1 %v23505_v26  ;;  %v28283_v26 = vrot.slane %v15437_v45, 5  ;;  %v15485_v45 = vshll.u32 %v28053_v53, 16  ;;  %v15449_v2 = vrot.slane %v15447_v31, 5  ;;  %v15458_v53 = vor.u32 %v15457_v16, %v15454_v52 }
 0xa33   : > { %21674 = vmatprep.mubr.bf16.mxu1 %v18895_v63  ;;  %v15443_v63 = vrot.slane %v15441_v20, 4  ;;  %v15500_v20 = vshrl.u32 %v15277_v8, 16  ;;  %v15478_v10 = vrot.slane %v15476_v13, 4  ;;  %v15481_v54 = vrot.slane %v15479_v34, 5 }
 0xa34   : > { %v15435_v50 = vrot.slane %v15434_v15, 4  ;;  %v15468_v56 = vor.u32 %v15467_v47, %v28302_v61  ;;  %v15471_v37 = vshll.u32 %v28044_v24, 16  ;;  %v28323_v57 = vrot.slane %v15485_v45, 5 }
 0xa35   : > { %v15444_v29 = vor.u32 %v15443_v63, %v28283_v26  ;;  %v15491_v63 = vrot.slane %v15489_v18, 4  ;;  %v15502_v28 = vrot.slane %v15500_v20, 4  ;;  %v15505_v17 = vrot.slane %v15503_v3, 5  ;;  %v15283_v18 = vld [vmem:[#allocation2 + $0x78] sm:$0xf] }
 0xa36   : > { %v28325_v25 = vrot.slane %v15509_v36, 5  ;;  %v15515_v32 = vrot.slane %v15513_v35, 4  ;;  %v15533_v43 = vshll.u32 %v28074_v55, 16  ;;  %v15537_v49 = vshrl.u32 %v28074_v55, 16 }
 0xa37   : > { %v15445_v22 = vrot.slane %v15444_v29, 4  ;;  %v28329_v24 = vcombine.low %v15416_v21, %v15426_v58  ;;  %v15482_v40 = vor.u32 %v15481_v54, %v15478_v10  ;;  %v15440_v31 = vsel %vm24192_vm10, %v15435_v50, %v28283_v26  ;;  %v23510_v26 = vld [vmem:[%s29002_s5 + $0x120] sm:$0xff]  }
 0xa38   : > { %v15469_v52 = vrot.slane %v15468_v56, 4  ;;  %v15473_v16 = vrot.slane %v15471_v37, 5  ;;  %v15492_v55 = vor.u32 %v15491_v63, %v28323_v57  ;;  %v15524_v13 = vshrl.u32 %v15280_v0, 16  ;;  %v23511_v37 = vld [vmem:[%s29002_s5 + $0x128] sm:$0xff]  }
 0xa39   : > { %v15450_v8 = vsel %vm24192_vm10, %v15445_v22, %v15449_v2  ;;  %v15527_v34 = vshll.u32 %v15280_v0, 16  ;;  %v15506_v15 = vor.u32 %v15505_v17, %v15502_v28  ;;  %v15516_v29 = vor.u32 %v15515_v32, %v28325_v25  ;;  %v15286_v32 = vld [vmem:[#allocation2 + $0x84] sm:$0xf] }
 0xa3a   : > { %21675 = vmatmul.mubr.bf16.vlgmr.msra.gmra.mrb[64].mxu1 %v28287_v19  ;;  %v28343_v47 = vrot.slane %v15533_v43, 5  ;;  %v15539_v45 = vrot.slane %v15537_v49, 4  ;;  %v28345_v20 = vcombine.low %v15440_v31, %v15450_v8  ;;  %v15483_v21 = vrot.slane %v15482_v40, 4 }
 0xa3b   : > { %21707 = vmatpush3.bf16.msra.mxu1 %v28181_v9  ;;  %21678 = vmatprep.mubr.bf16.mxu1 %v28289_v51  ;;  %v23508_v9 = vld [vmem:[%s29002_s5 + $0x110] sm:$0xff]   ;;  %v15495_v58 = vshll.u32 %v28066_v7, 16  ;;  %v15519_v36 = vshll.u32 %v28072_v1, 16  ;;  %v15557_v35 = vshll.u32 %v28086_v27, 16  ;;  %v15561_v2 = vshrl.u32 %v28086_v27, 16 }
 0xa3c   : > { %21708 = vmatprep.subr.bf16.mxu1 %v23507_v59  ;;  %v15529_v10 = vrot.slane %v15527_v34, 5  ;;  %v15548_v54 = vshrl.u32 %v15283_v18, 16  ;;  %v15551_v50 = vshll.u32 %v15283_v18, 16  ;;  %v15493_v22 = vrot.slane %v15492_v55, 4  ;;  %v15289_v34 = vld [vmem:[#allocation2 + $0x90] sm:$0xf] }
 0xa3d   : > { %v15507_v56 = vrot.slane %v15506_v15, 4  ;;  %v15540_v7 = vor.u32 %v15539_v45, %v28343_v47  ;;  %v15497_v63 = vrot.slane %v15495_v58, 5  ;;  %v15521_v27 = vrot.slane %v15519_v36, 5 }
 0xa3e   : > { %v28364_v28 = vrot.slane %v15557_v35, 5  ;;  %v15563_v17 = vrot.slane %v15561_v2, 4  ;;  %v15488_v0 = vsel %vm24192_vm10, %v15483_v21, %v28323_v57  ;;  %v15550_v49 = vrot.slane %v15548_v54, 4  ;;  %v23512_v57 = vld [vmem:[%s29002_s5 + $0x130] sm:$0xff]   ;;  %v23513_v35 = vld [vmem:[%s29002_s5 + $0x138] sm:$0xff]  }
 0xa3f   : > { %21709 = vmatpush3.bf16.msra.mxu1 %v23507_v59  ;;  %v15459_v59 = vrot.slane %v15458_v53, 4  ;;  %v15526_v53 = vrot.slane %v15524_v13, 4  ;;  %v15498_v40 = vsel %vm24192_vm10, %v15493_v22, %v15497_v63  ;;  %v15541_v8 = vrot.slane %v15540_v7, 4 }
 0xa40   : > { %21710 = vmatprep.subr.bf16.mxu1 %v23508_v9  ;;  %v15581_v55 = vshll.u32 %v28124_v30, 16  ;;  %v15585_v13 = vshrl.u32 %v28124_v30, 16  ;;  %v28385_v45 = vcombine.low %v15488_v0, %v15498_v40  ;;  %v15567_v30 = vshll.u32 %v28100_v44, 16 }
 0xa41   : > { %v15464_v3 = vsel %vm24192_vm10, %v15459_v59, %v28302_v61  ;;  %v15517_v61 = vrot.slane %v15516_v29, 4  ;;  %v15530_v43 = vor.u32 %v15529_v10, %v15526_v53  ;;  %v15553_v59 = vrot.slane %v15551_v50, 5 }
 0xa42   : > { %21679 = vmatmul.mubr.bf16.gmra.mrb[68].mxu1 %v28297_v60  ;;  %v15564_v29 = vor.u32 %v15563_v17, %v28364_v28  ;;  %v15599_v36 = vshll.u32 %v15289_v34, 16  ;;  %v28395_v53 = vrot.slane %v15581_v55, 5  ;;  %v15587_v10 = vrot.slane %v15585_v13, 4 }
 0xa43   : > { %21682 = vmatprep.mubr.bf16.mxu1 %v28329_v24  ;;  %21711 = vmatpush3.bf16.msra.mxu1 %v23508_v9  ;;  %v15474_v9 = vsel %vm24192_vm10, %v15469_v52, %v15473_v16  ;;  %v15522_v31 = vsel %vm24192_vm10, %v15517_v61, %v15521_v27  ;;  %v15572_v52 = vshrl.u32 %v15286_v32, 16  ;;  %v15575_v16 = vshll.u32 %v15286_v32, 16  ;;  %v15292_v27 = vld [vmem:[#allocation2 + $0x9c] sm:$0xf] }
 0xa44   : > { %21712 = vmatprep.subr.bf16.mxu1 %v23509_v5  ;;  %v28360_v1 = vcombine.low %v15464_v3, %v15474_v9  ;;  %v15531_v3 = vrot.slane %v15530_v43, 4  ;;  %v15554_v21 = vor.u32 %v15553_v59, %v15550_v49  ;;  %v15596_v9 = vshrl.u32 %v15289_v34, 16  ;;  %v15295_v43 = vld [vmem:[#allocation2 + $0xa8] sm:$0xf] }
 0xa45   : > { %v15577_v2 = vrot.slane %v15575_v16, 5  ;;  %v15565_v54 = vrot.slane %v15564_v29, 4  ;;  %v15569_v7 = vrot.slane %v15567_v30, 5  ;;  %v15601_v63 = vrot.slane %v15599_v36, 5 }
 0xa46   : > { %v15536_v44 = vsel %vm24192_vm10, %v15531_v3, %v28343_v47  ;;  %v15588_v32 = vor.u32 %v15587_v10, %v28395_v53  ;;  %v15629_v0 = vshll.u32 %v28141_v23, 16  ;;  %v15633_v47 = vshrl.u32 %v28141_v23, 16 }
 0xa47   : > { %21713 = vmatpush3.bf16.msra.mxu1 %v23509_v5  ;;  %v15543_v5 = vshll.u32 %v28093_v48, 16  ;;  %v15512_v48 = vsel %vm24192_vm10, %v15507_v56, %v28325_v25  ;;  %v15605_v25 = vshll.u32 %v28131_v38, 16  ;;  %v15555_v56 = vrot.slane %v15554_v21, 4 }
 0xa48   : > { %21714 = vmatprep.subr.bf16.mxu1 %v23510_v26  ;;  %v28387_v18 = vcombine.low %v15512_v48, %v15522_v31  ;;  %v15570_v49 = vsel %vm24192_vm10, %v15565_v54, %v15569_v7  ;;  %v15653_v40 = vshll.u32 %v28158_v39, 16  ;;  %v15657_v48 = vshrl.u32 %v28158_v39, 16 }
 0xa49   : > { %v15545_v15 = vrot.slane %v15543_v5, 5  ;;  %v28398_v50 = vrot.slane %v15605_v25, 5  ;;  %v28409_v5 = vld [vmem:[%s29002_s5 + $0x140] sm:$0xff]   ;;  %v15560_v31 = vsel %vm24192_vm10, %v15555_v56, %v28364_v28  ;;  %v15615_v16 = vshll.u32 %v28145_v11, 16 }
 0xa4a   : > { %21683 = vmatmul.mubr.bf16.gmra.mrb[72].mxu1 %v28345_v20  ;;  %v15644_v55 = vshrl.u32 %v15295_v43, 16  ;;  %v15647_v13 = vshll.u32 %v15295_v43, 16  ;;  %v28425_v34 = vcombine.low %v15560_v31, %v15570_v49  ;;  %v15631_v39 = vrot.slane %v15629_v0, 5 }
 0xa4b   : > { %21686 = vmatprep.mubr.bf16.mxu1 %v28360_v1  ;;  %21715 = vmatpush3.bf16.msra.mxu1 %v23510_v26  ;;  %v15609_v26 = vshrl.u32 %v28131_v38, 16  ;;  %v15546_v58 = vsel %vm24192_vm10, %v15541_v8, %v15545_v15  ;;  %v15574_v38 = vrot.slane %v15572_v52, 4  ;;  %v15591_v8 = vshll.u32 %v28139_v41, 16 }
 0xa4c   : > { %21716 = vmatprep.subr.bf16.mxu1 %v23511_v37  ;;  %v28404_v61 = vcombine.low %v15536_v44, %v15546_v58  ;;  %v15623_v52 = vshll.u32 %v15292_v27, 16  ;;  %v15589_v15 = vrot.slane %v15588_v32, 4  ;;  %v15635_v29 = vrot.slane %v15633_v47, 4 }
 0xa4d   : > { %v15611_v22 = vrot.slane %v15609_v26, 4  ;;  %v15578_v17 = vor.u32 %v15577_v2, %v15574_v38  ;;  %v15655_v41 = vrot.slane %v15653_v40, 5  ;;  %v15659_v26 = vrot.slane %v15657_v48, 4 }
 0xa4e   : > { %v15593_v3 = vrot.slane %v15591_v8, 5  ;;  %v15625_v11 = vrot.slane %v15623_v52, 5  ;;  %v15617_v30 = vrot.slane %v15615_v16, 5  ;;  %v15649_v36 = vrot.slane %v15647_v13, 5 }
 0xa4f   : > { %21717 = vmatpush3.bf16.msra.mxu1 %v23511_v37  ;;  %v15598_v37 = vrot.slane %v15596_v9, 4  ;;  %v15612_v59 = vor.u32 %v15611_v22, %v28398_v50  ;;  %v15579_v28 = vrot.slane %v15578_v17, 4  ;;  %v15646_v9 = vrot.slane %v15644_v55, 4 }
 0xa50   : > { %21718 = vmatprep.subr.bf16.mxu1 %v23512_v57  ;;  %v15594_v38 = vsel %vm24192_vm10, %v15589_v15, %v15593_v3  ;;  %v15636_v2 = vor.u32 %v15635_v29, %v15631_v39  ;;  %v15677_v10 = vshll.u32 %v28164_v4, 16  ;;  %v15681_v54 = vshrl.u32 %v28164_v4, 16 }
 0xa51   : > { %v15602_v23 = vor.u32 %v15601_v63, %v15598_v37  ;;  %v15613_v25 = vrot.slane %v15612_v59, 4  ;;  %v15584_v22 = vsel %vm24192_vm10, %v15579_v28, %v28395_v53  ;;  %v15660_v56 = vor.u32 %v15659_v26, %v15655_v41 }
 0xa52   : > { %21687 = vmatmul.mubr.bf16.gmra.mrb[76].mxu1 %v28385_v45  ;;  %v15639_v37 = vshll.u32 %v28148_v46, 16  ;;  %v28439_v17 = vcombine.low %v15584_v22, %v15594_v38  ;;  %v15650_v4 = vor.u32 %v15649_v36, %v15646_v9  ;;  %v15663_v0 = vshll.u32 %v28170_v12, 16  ;;  %v23522_v9 = vld [vmem:[%s29002_s5 + $0x180] sm:$0xff]  }
 0xa53   : > { %21690 = vmatprep.mubr.bf16.mxu1 %v28387_v18  ;;  %21719 = vmatpush3.bf16.msra.mxu1 %v23512_v57  ;;  %v15620_v57 = vshrl.u32 %v15292_v27, 16  ;;  %v15603_v58 = vrot.slane %v15602_v23, 4  ;;  %v15618_v44 = vsel %vm24192_vm10, %v15613_v25, %v15617_v30  ;;  %v15637_v53 = vrot.slane %v15636_v2, 4  ;;  %v23521_v30 = vld [vmem:[%s29002_s5 + $0x178] sm:$0xff]   ;;  %v15301_v36 = vld [vmem:[#allocation2 + $0xc0] sm:$0xf] }
 0xa54   : > { %21720 = vmatprep.subr.bf16.mxu1 %v23513_v35  ;;  %v15679_v43 = vrot.slane %v15677_v10, 5  ;;  %v15683_v49 = vrot.slane %v15681_v54, 4  ;;  %v15661_v59 = vrot.slane %v15660_v56, 4  ;;  %v15641_v40 = vrot.slane %v15639_v37, 5 }
 0xa55   : > { %v15622_v21 = vrot.slane %v15620_v57, 4  ;;  %v15608_v32 = vsel %vm24192_vm10, %v15603_v58, %v28398_v50  ;;  %v15651_v8 = vrot.slane %v15650_v4, 4  ;;  %v15665_v57 = vrot.slane %v15663_v0, 5  ;;  %v23520_v58 = vld [vmem:[%s29002_s5 + $0x170] sm:$0xff]  }
 0xa56   : > { %v28445_v47 = vcombine.low %v15608_v32, %v15618_v44  ;;  %v15642_v50 = vsel %vm24192_vm10, %v15637_v53, %v15641_v40  ;;  %v15684_v12 = vor.u32 %v15683_v49, %v15679_v43  ;;  %v15687_v55 = vshll.u32 %v28183_v14, 16  ;;  %v28551_v49 = vld [vmem:[#allocation2 + $0xd0] sm:$0xf] }
 0xa57   : > { %21721 = vmatpush3.bf16.msra.mxu1 %v23513_v35  ;;  %v15298_v35 = vld [vmem:[#allocation2 + $0xb4] sm:$0xf]  ;;  %v15626_v7 = vor.u32 %v15625_v11, %v15622_v21  ;;  %v15666_v52 = vsel %vm24192_vm10, %v15661_v59, %v15665_v57  ;;  %v15656_v15 = vsel %vm24192_vm10, %v15651_v8, %v15655_v41  ;;  %v23515_v41 = vld [vmem:[%s29002_s5 + $0x148] sm:$0xff]   ;;  %v16026_v38 = vshrl.u32 %v28185_v62, 16 }
 0xa58   : > { %21754 = vmatprep.subr.bf16.mxu1 %v28409_v5  ;;  %v15668_v63 = vshrl.u32 %v15298_v35, 16  ;;  %v15671_v27 = vshll.u32 %v15298_v35, 16  ;;  %v28460_v29 = vcombine.low %v15656_v15, %v15666_v52  ;;  %v15685_v28 = vrot.slane %v15684_v12, 4  ;;  %v23516_v21 = vld [vmem:[%s29002_s5 + $0x150] sm:$0xff]   ;;  %v23519_v11 = vld [vmem:[%s29002_s5 + $0x168] sm:$0xff]  }
 0xa59   : > { %v15627_v46 = vrot.slane %v15626_v7, 4  ;;  %v15689_v26 = vrot.slane %v15687_v55, 5  ;;  %v16022_v35 = vshll.u32 %v28185_v62, 16  ;;  %v16013_v2 = vshrl.u32 %v15301_v36, 16  ;;  %v28557_v57 = vld [vmem:[#allocation2 + $0xd4] sm:$0x1] }
 0xa5a   : > { %21691 = vmatmul.mubr.bf16.gmra.mrb[80].mxu1 %v28404_v61  ;;  %v15670_v48 = vrot.slane %v15668_v63, 4  ;;  %v15673_v31 = vrot.slane %v15671_v27, 5  ;;  %v16016_v10 = vshll.u32 %v15301_v36, 16  ;;  %v16028_v22 = vrot.slane %v16026_v38, 4  ;;  %v29467_v12 = vld [vmem:[#allocation33_spill] sm:$0xff] }
 0xa5b   : > { %21694 = vmatprep.mubr.bf16.mxu1 %v28425_v34  ;;  %v15632_v23 = vsel %vm24192_vm10, %v15627_v46, %v15631_v39  ;;  %v15690_v39 = vsel %vm24192_vm10, %v15685_v28, %v15689_v26  ;;  %v16024_v54 = vrot.slane %v16022_v35, 5  ;;  %v16015_v44 = vrot.slane %v16013_v2, 4  ;;  %v29468_v26 = vld [vmem:[#allocation32_spill] sm:$0xff] }
 0xa5c   : > { %v15674_v16 = vor.u32 %v15673_v31, %v15670_v48  ;;  %v28456_v13 = vcombine.low %v15632_v23, %v15642_v50  ;;  %v16018_v56 = vrot.slane %v16016_v10, 5  ;;  %v16032_v63 = vshll.u32 %v28198_v6, 16  ;;  %v23523_v6 = vld [vmem:[%s29002_s5 + $0x188] sm:$0xff]   ;;  %v16582_v23 = vld [vmem:[#allocation2] sm:$0xe] }
 0xa5d   : > { %v16029_v7 = vor.u32 %v16028_v22, %v16024_v54  ;;  %v16650_v52 = vrot.slane %v29467_v12, 5  ;;  %v18969_v28 = vrot.slane %v16582_v23, 9  ;;  %v23531_v10 = vld [vmem:[%s29002_s5 + $0x1c8] sm:$0xff]   ;;  %v23533_v22 = vld [vmem:[%s29002_s5 + $0x1d8] sm:$0xff]  }
 0xa5e   : > { %v15675_v25 = vrot.slane %v15674_v16, 4  ;;  %v16019_v37 = vor.u32 %v16018_v56, %v16015_v44  ;;  %v16034_v32 = vrot.slane %v16032_v63, 5  ;;  %v29472_v44 = vld [vmem:[#allocation17_spill] sm:$0xff]  ;;  %v29473_v56 = vld [vmem:[#allocation20_spill] sm:$0xff] }
 0xa5f   : > { %v16030_v27 = vrot.slane %v16029_v7, 4  ;;  %v23534_v7 = vld [vmem:[%s29002_s5 + $0x1e0] sm:$0xff]   ;;  %v29474_v63 = vld [vmem:[#allocation24_spill] sm:$0xff] }
 0xa60   : > { %v15680_v14 = vsel %vm24192_vm10, %v15675_v25, %v15679_v43  ;;  %v16020_v62 = vrot.slane %v16019_v37, 4  ;;  %v23524_v43 = vld [vmem:[%s29002_s5 + $0x190] sm:$0xff]   ;;  %v16652_v25 = vrot.slane %v16650_v52, 4  ;;  %v23535_v37 = vld [vmem:[%s29002_s5 + $0x1e8] sm:$0xff]  }
 0xa61   : > { %v28468_v3 = vcombine.low %v15680_v14, %v15690_v39  ;;  %v16035_v4 = vsel %vm24192_vm10, %v16030_v27, %v16034_v32  ;;  %v16653_v39 = vrot.slane %v29468_v26, 5  ;;  %v29475_v27 = vld [vmem:[#allocation22_spill] sm:$0xff] }
 0xa62   : > { %21695 = vmatmul.mubr.bf16.gmra.mrb[84].mxu1 %v28439_v17  ;;  %v16025_v0 = vsel %vm24192_vm10, %v16020_v62, %v16024_v54  ;;  %v29471_v54 = vld [vmem:[#allocation23_spill] sm:$0xff]  ;;  %v23536_v62 = vld [vmem:[%s29002_s5 + $0x1f0] sm:$0xff]   ;;  %v23537_v32 = vld [vmem:[%s29002_s5 + $0x1f8] sm:$0xff]  }
 0xa63   : > { %21698 = vmatprep.mubr.bf16.mxu1 %v28445_v47  ;;  %v18935_v53 = vcombine.low %v16025_v0, %v16035_v4  ;;  %v29476_v4 = vld [vmem:[#allocation25_spill] sm:$0xff]  ;;  %v29477_v0 = vld [vmem:[#allocation27_spill] sm:$0xff] }
 0xa6a   : > { %21699 = vmatmul.mubr.bf16.gmra.mrb[88].mxu1 %v28456_v13 }
 0xa6b   : > { %21702 = vmatprep.mubr.bf16.mxu1 %v28460_v29 }
 0xa72   : > { %21703 = vmatmul.mubr.bf16.gmra.mrb[92].mxu1 %v28468_v3 }
 0xa73   : > { %21722 = vmatprep.mubr.bf16.mxu1 %v28287_v19  ;;  %v23517_v19 = vld [vmem:[%s29002_s5 + $0x158] sm:$0xff]  }
 0xa7a   : > { %21723 = vmatmul.mubr.bf16.vlgmr.msra.gmra.mrb[64].mxu1 %v28289_v51 }
 0xa7b   : > { %21755 = vmatpush3.bf16.msra.mxu1 %v28409_v5  ;;  %21726 = vmatprep.mubr.bf16.mxu1 %v28297_v60  ;;  %v23518_v5 = vld [vmem:[%s29002_s5 + $0x160] sm:$0xff]  }
 0xa7c   : > { %21756 = vmatprep.subr.bf16.mxu1 %v23515_v41 }
 0xa7f   : > { %21757 = vmatpush3.bf16.msra.mxu1 %v23515_v41  ;;  %v16651_v41 = vsel %vm24568_vm13, %v18969_v28, %v16650_v52 }
 0xa80   : > { %21758 = vmatprep.subr.bf16.mxu1 %v23516_v21 }
 0xa82   : > { %21727 = vmatmul.mubr.bf16.gmra.mrb[68].mxu1 %v28329_v24 }
 0xa83   : > { %21730 = vmatprep.mubr.bf16.mxu1 %v28345_v20  ;;  %21759 = vmatpush3.bf16.msra.mxu1 %v23516_v21  ;;  %v16654_v21 = vsel %vm24568_vm13, %v16652_v25, %v16653_v39  ;;  %v29488_v25 = vld [vmem:[#allocation75_spill] sm:$0xff]  ;;  %v29489_v39 = vld [vmem:[#allocation84_spill] sm:$0xff] }
 0xa84   : > { %21760 = vmatprep.subr.bf16.mxu1 %v23517_v19  ;;  %v13328_v26 = vshll.u32 %v29488_v25, 16  ;;  %v13338_v14 = vshrl.u32 %v29489_v39, 16 }
 0xa87   : > { %21761 = vmatpush3.bf16.msra.mxu1 %v23517_v19  ;;  %v29470_v19 = vld [vmem:[#allocation39_spill] sm:$0xff] }
 0xa88   : > { %21762 = vmatprep.subr.bf16.mxu1 %v23518_v5 }
 0xa8a   : > { %21731 = vmatmul.mubr.bf16.gmra.mrb[72].mxu1 %v28360_v1 }
 0xa8b   : > { %21734 = vmatprep.mubr.bf16.mxu1 %v28385_v45  ;;  %21763 = vmatpush3.bf16.msra.mxu1 %v23518_v5  ;;  %v16657_v5 = vrot.slane %v29470_v19, 5 }
 0xa8c   : > { %21764 = vmatprep.subr.bf16.mxu1 %v23519_v11 }
 0xa8f   : > { %21765 = vmatpush3.bf16.msra.mxu1 %v23519_v11 }
 0xa90   : > { %21766 = vmatprep.subr.bf16.mxu1 %v23520_v58 }
 0xa92   : > { %21735 = vmatmul.mubr.bf16.gmra.mrb[76].mxu1 %v28387_v18 }
 0xa93   : > { %21738 = vmatprep.mubr.bf16.mxu1 %v28404_v61  ;;  %21767 = vmatpush3.bf16.msra.mxu1 %v23520_v58  ;;  %v19001_v58 = vcombine.low %v16651_v41, %v16654_v21 }
 0xa94   : > { %21768 = vmatprep.subr.bf16.mxu1 %v23521_v30 }
 0xa97   : > { %21769 = vmatpush3.bf16.msra.mxu1 %v23521_v30  ;;  %v16659_v30 = vrot.slane %v16657_v5, 4 }
 0xa98   : > { %21802 = vmatprep.subr.bf16.mxu1 %v23522_v9 }
 0xa9a   : > { %21739 = vmatmul.mubr.bf16.gmra.mrb[80].mxu1 %v28425_v34 }
 0xa9b   : > { %21742 = vmatprep.mubr.bf16.mxu1 %v28439_v17 }
 0xaa2   : > { %21743 = vmatmul.mubr.bf16.gmra.mrb[84].mxu1 %v28445_v47 }
 0xaa3   : > { %21746 = vmatprep.mubr.bf16.mxu1 %v28456_v13 }
 0xaaa   : > { %21747 = vmatmul.mubr.bf16.gmra.mrb[88].mxu1 %v28460_v29 }
 0xaab   : > { %21750 = vmatprep.mubr.bf16.mxu1 %v28468_v3 }
 0xab2   : > { %21751 = vmatmul.mubr.bf16.gmra.mrb[92].mxu1 %v18935_v53 }
 0xab3   : > { %21770 = vmatprep.mubr.bf16.mxu1 %v28289_v51  ;;  %v23525_v51 = vld [vmem:[%s29002_s5 + $0x198] sm:$0xff]  }
 0xaba   : > { %21771 = vmatmul.mubr.bf16.vlgmr.msra.gmra.mrb[64].mxu1 %v28297_v60  ;;  %v23526_v60 = vld [vmem:[%s29002_s5 + $0x1a0] sm:$0xff]  }
 0xabb   : > { %21803 = vmatpush3.bf16.msra.mxu1 %v23522_v9  ;;  %21774 = vmatprep.mubr.bf16.mxu1 %v28329_v24  ;;  %v23527_v24 = vld [vmem:[%s29002_s5 + $0x1a8] sm:$0xff]   ;;  %v16660_v9 = vrot.slane %v28254_v33, 5  ;;  %v23532_v33 = vld [vmem:[%s29002_s5 + $0x1d0] sm:$0xff]  }
 0xabc   : > { %21804 = vmatprep.subr.bf16.mxu1 %v23523_v6 }
 0xabd   : > { %v16661_v35 = vsel %vm24568_vm13, %v16659_v30, %v16660_v9  ;;  %v13340_v9 = vrot.slane %v13338_v14, 4 }
 0xabf   : > { %21805 = vmatpush3.bf16.msra.mxu1 %v23523_v6  ;;  %v29478_v6 = vld [vmem:[#allocation29_spill] sm:$0xff] }
 0xac0   : > { %21806 = vmatprep.subr.bf16.mxu1 %v23524_v43 }
 0xac2   : > { %21775 = vmatmul.mubr.bf16.gmra.mrb[68].mxu1 %v28345_v20  ;;  %v23528_v20 = vld [vmem:[%s29002_s5 + $0x1b0] sm:$0xff]  }
 0xac3   : > { %21778 = vmatprep.mubr.bf16.mxu1 %v28360_v1  ;;  %21807 = vmatpush3.bf16.msra.mxu1 %v23524_v43  ;;  %v23529_v1 = vld [vmem:[%s29002_s5 + $0x1b8] sm:$0xff]  }
 0xac4   : > { %21808 = vmatprep.subr.bf16.mxu1 %v23525_v51  ;;  %v29479_v43 = vld [vmem:[#allocation26_spill] sm:$0xff] }
 0xac7   : > { %21809 = vmatpush3.bf16.msra.mxu1 %v23525_v51  ;;  %v29480_v51 = vld [vmem:[#allocation30_spill] sm:$0xff] }
 0xac8   : > { %21810 = vmatprep.subr.bf16.mxu1 %v23526_v60 }
 0xaca   : > { %21779 = vmatmul.mubr.bf16.gmra.mrb[72].mxu1 %v28385_v45  ;;  %v23530_v45 = vld [vmem:[%s29002_s5 + $0x1c0] sm:$0xff]  }
 0xacb   : > { %21782 = vmatprep.mubr.bf16.mxu1 %v28387_v18  ;;  %21811 = vmatpush3.bf16.msra.mxu1 %v23526_v60  ;;  %v15304_v18 = vld [vmem:[#allocation2 + $0xcc] sm:$0xf] }
 0xacc   : > { %21812 = vmatprep.subr.bf16.mxu1 %v23527_v24  ;;  %v16298_v59 = vshrl.u32 %v15304_v18, 16  ;;  %v16301_v46 = vshll.u32 %v15304_v18, 16  ;;  %v29481_v60 = vld [vmem:[#allocation28_spill] sm:$0xff] }
 0xacd   : > { %v23540_v18 = vld [vmem:[%s29002_s5 + $0x210] sm:$0xff]  }
 0xace   : > { %v16300_v40 = vrot.slane %v16298_v59, 4  ;;  %v16303_v48 = vrot.slane %v16301_v46, 5  ;;  %v23541_v59 = vld [vmem:[%s29002_s5 + $0x218] sm:$0xff]   ;;  %v23542_v46 = vld [vmem:[%s29002_s5 + $0x220] sm:$0xff]  }
 0xacf   : > { %21813 = vmatpush3.bf16.msra.mxu1 %v23527_v24  ;;  %v29482_v24 = vld [vmem:[#allocation31_spill] sm:$0xff] }
 0xad0   : > { %21814 = vmatprep.subr.bf16.mxu1 %v23528_v20  ;;  %v16304_v50 = vor.u32 %v16303_v48, %v16300_v40  ;;  %v23545_v40 = vld [vmem:[%s29002_s5 + $0x238] sm:$0xff]  }
 0xad1   : > { %v29485_v48 = vld [vmem:[#allocation37_spill] sm:$0xff] }
 0xad2   : > { %21783 = vmatmul.mubr.bf16.gmra.mrb[76].mxu1 %v28404_v61  ;;  %v16307_v61 = vshll.u32 %v28551_v49, 16  ;;  %v16305_v16 = vrot.slane %v16304_v50, 4 }
 0xad3   : > { %21786 = vmatprep.mubr.bf16.mxu1 %v28425_v34  ;;  %21815 = vmatpush3.bf16.msra.mxu1 %v23528_v20  ;;  %v16311_v34 = vshrl.u32 %v28551_v49, 16  ;;  %v29483_v20 = vld [vmem:[#allocation35_spill] sm:$0xff] }
 0xad4   : > { %21816 = vmatprep.subr.bf16.mxu1 %v23529_v1  ;;  %v16309_v31 = vrot.slane %v16307_v61, 5  ;;  %v23543_v61 = vld [vmem:[%s29002_s5 + $0x228] sm:$0xff]  }
 0xad5   : > { %v16313_v8 = vrot.slane %v16311_v34, 4  ;;  %v23544_v34 = vld [vmem:[%s29002_s5 + $0x230] sm:$0xff]  }
 0xad7   : > { %21817 = vmatpush3.bf16.msra.mxu1 %v23529_v1  ;;  %v29484_v1 = vld [vmem:[#allocation36_spill] sm:$0xff] }
 0xad8   : > { %21850 = vmatprep.subr.bf16.mxu1 %v23530_v45 }
 0xada   : > { %21787 = vmatmul.mubr.bf16.gmra.mrb[80].mxu1 %v28439_v17  ;;  %v16314_v17 = vor.u32 %v16313_v8, %v16309_v31  ;;  %v16599_v8 = vld [vmem:[#allocation2 + $0xcc] sm:$0xe] }
 0xadb   : > { %21790 = vmatprep.mubr.bf16.mxu1 %v28445_v47  ;;  %v16317_v47 = vshll.u32 %v28557_v57, 16  ;;  %v19051_v50 = vrot.slane %v16599_v8, 9 }
 0xadc   : > { %v16315_v55 = vrot.slane %v16314_v17, 4 }
 0xadd   : > { %v16319_v15 = vrot.slane %v16317_v47, 5  ;;  %v17360_v47 = vrot.slane %v28557_v57, 5  ;;  %v13325_v57 = vshrl.u32 %v29488_v25, 16 }
 0xae2   : > { %21791 = vmatmul.mubr.bf16.gmra.mrb[84].mxu1 %v28456_v13  ;;  %v16310_v13 = vsel %vm24192_vm10, %v16305_v16, %v16309_v31  ;;  %v17357_v31 = vrot.slane %v28551_v49, 5  ;;  %v29486_v16 = vld [vmem:[#allocation67_spill] sm:$0xff] }
 0xae3   : > { %21794 = vmatprep.mubr.bf16.mxu1 %v28460_v29  ;;  %v16320_v29 = vsel %vm24192_vm10, %v16315_v55, %v16319_v15  ;;  %v13349_v55 = vshrl.u32 %v29486_v16, 16  ;;  %v13352_v49 = vshll.u32 %v29486_v16, 16  ;;  %v29487_v15 = vld [vmem:[#allocation83_spill] sm:$0xff] }
 0xae4   : > { %v18960_v11 = vcombine.low %v16310_v13, %v16320_v29  ;;  %v17359_v17 = vrot.slane %v17357_v31, 4  ;;  %v17358_v12 = vsel %vm24568_vm13, %v19051_v50, %v17357_v31  ;;  %v13358_v28 = vshll.u32 %v29487_v15, 16  ;;  %v28699_v31 = vld [vmem:[%s29003_s6] ss:$0 sm:$0xff] }
 0xae5   : > { %v13334_v13 = vshll.u32 %v29489_v39, 16  ;;  %v13362_v29 = vshrl.u32 %v29487_v15, 16  ;;  %v13351_v41 = vrot.slane %v13349_v55, 4  ;;  %v13354_v21 = vrot.slane %v13352_v49, 5  ;;  %v29497_v39 = vld [vmem:[#allocation101_spill] sm:$0xff] }
 0xae6   : > { %v17361_v52 = vsel %vm24568_vm13, %v17359_v17, %v17360_v47  ;;  %v13360_v19 = vrot.slane %v13358_v28, 5 }
 0xae7   : > { %v19068_v23 = vcombine.low %v17358_v12, %v17361_v52  ;;  %v13364_v30 = vrot.slane %v13362_v29, 4  ;;  %v29498_v29 = vld [vmem:[#allocation59_spill] sm:$0xff] }
 0xaea   : > { %21795 = vmatmul.mubr.bf16.gmra.mrb[88].mxu1 %v28468_v3  ;;  %v16583_v3 = vld [vmem:[#allocation2 + $0xc] sm:$0xe] }
 0xaeb   : > { %21798 = vmatprep.mubr.bf16.mxu1 %v18935_v53  ;;  %v18970_v36 = vrot.slane %v16583_v3, 9  ;;  %v23538_v53 = vld [vmem:[%s29002_s5 + $0x200] sm:$0xff]   ;;  %v13355_v3 = vor.u32 %v13354_v21, %v13351_v41  ;;  %v13445_v41 = vshrl.u32 %v29498_v29, 16 }
 0xaed   : > { %v16658_v38 = vsel %vm24568_vm13, %v18970_v36, %v16657_v5  ;;  %v13327_v5 = vrot.slane %v13325_v57, 4  ;;  %v29490_v36 = vld [vmem:[#allocation85_spill] sm:$0xff] }
 0xaee   : > { %v19002_v2 = vcombine.low %v16658_v38, %v16661_v35  ;;  %v13397_v35 = vshrl.u32 %v29490_v36, 16  ;;  %v13400_v38 = vshll.u32 %v29490_v36, 16  ;;  %v29496_v57 = vld [vmem:[#allocation61_spill] sm:$0xff] }
 0xaef   : > { %v29501_v36 = vld [vmem:[#allocation77_spill] sm:$0xff] }
 0xaf2   : > { %21799 = vmatmul.mubr.bf16.gmra.mrb[92].mxu1 %v18960_v11  ;;  %v13330_v11 = vrot.slane %v13328_v26, 5  ;;  %v13416_v26 = vshll.u32 %v29496_v57, 16 }
 0xaf3   : > { %21818 = vmatprep.mubr.bf16.mxu1 %v19001_v58  ;;  %v13336_v58 = vrot.slane %v13334_v13, 5  ;;  %v13392_v13 = vshll.u32 %v29497_v39, 16 }
 0xafa   : > { %21819 = vmatmul.mubr.bf16.vlgmr.msra.gmra.mrb[64].mxu1 %v19002_v2 }
 0xafb   : > { %21851 = vmatpush3.bf16.msra.mxu1 %v23530_v45  ;;  %21822 = vmatprep.mubr.bf16.mxu1 %v29471_v54  ;;  %v23539_v45 = vld [vmem:[%s29002_s5 + $0x208] sm:$0xff]  }
 0xafc   : > { %21852 = vmatprep.subr.bf16.mxu1 %v23531_v10 }
 0xaff   : > { %21853 = vmatpush3.bf16.msra.mxu1 %v23531_v10 }
 0xb00   : > { %21854 = vmatprep.subr.bf16.mxu1 %v23532_v33 }
 0xb02   : > { %21823 = vmatmul.mubr.bf16.gmra.mrb[68].mxu1 %v29472_v44 }
 0xb03   : > { %21826 = vmatprep.mubr.bf16.mxu1 %v29473_v56  ;;  %21855 = vmatpush3.bf16.msra.mxu1 %v23532_v33  ;;  %v13331_v33 = vor.u32 %v13330_v11, %v13327_v5  ;;  %v13448_v5 = vshll.u32 %v29498_v29, 16  ;;  %v29499_v11 = vld [vmem:[#allocation66_spill] sm:$0xff] }
 0xb04   : > { %21856 = vmatprep.subr.bf16.mxu1 %v23533_v22 }
 0xb07   : > { %21857 = vmatpush3.bf16.msra.mxu1 %v23533_v22  ;;  %v13365_v22 = vor.u32 %v13364_v30, %v13360_v19  ;;  %v29500_v30 = vld [vmem:[#allocation62_spill] sm:$0xff] }
 0xb08   : > { %21858 = vmatprep.subr.bf16.mxu1 %v23534_v7 }
 0xb0a   : > { %21827 = vmatmul.mubr.bf16.gmra.mrb[72].mxu1 %v29474_v63 }
 0xb0b   : > { %21830 = vmatprep.mubr.bf16.mxu1 %v29475_v27  ;;  %21859 = vmatpush3.bf16.msra.mxu1 %v23534_v7  ;;  %v13399_v7 = vrot.slane %v13397_v35, 4  ;;  %v13430_v35 = vshll.u32 %v29501_v36, 16 }
 0xb0c   : > { %21860 = vmatprep.subr.bf16.mxu1 %v23535_v37 }
 0xb0f   : > { %21861 = vmatpush3.bf16.msra.mxu1 %v23535_v37  ;;  %v13402_v37 = vrot.slane %v13400_v38, 5 }
 0xb10   : > { %21862 = vmatprep.subr.bf16.mxu1 %v23536_v62 }
 0xb12   : > { %21831 = vmatmul.mubr.bf16.gmra.mrb[76].mxu1 %v29476_v4 }
 0xb13   : > { %21834 = vmatprep.mubr.bf16.mxu1 %v29477_v0  ;;  %21863 = vmatpush3.bf16.msra.mxu1 %v23536_v62  ;;  %v29492_v62 = vld [vmem:[#allocation74_spill] sm:$0xff] }
 0xb14   : > { %21864 = vmatprep.subr.bf16.mxu1 %v23537_v32 }
 0xb17   : > { %21865 = vmatpush3.bf16.msra.mxu1 %v23537_v32  ;;  %v13368_v32 = vshll.u32 %v29492_v62, 16  ;;  %v13450_v62 = vrot.slane %v13448_v5, 5 }
 0xb18   : > { %21898 = vmatprep.subr.bf16.mxu1 %v23538_v53 }
 0xb1a   : > { %21835 = vmatmul.mubr.bf16.gmra.mrb[80].mxu1 %v29478_v6 }
 0xb1b   : > { %21838 = vmatprep.mubr.bf16.mxu1 %v29479_v43 }
 0xb22   : > { %21839 = vmatmul.mubr.bf16.gmra.mrb[84].mxu1 %v29480_v51 }
 0xb23   : > { %21842 = vmatprep.mubr.bf16.mxu1 %v29481_v60 }
 0xb2a   : > { %21843 = vmatmul.mubr.bf16.gmra.mrb[88].mxu1 %v29482_v24 }
 0xb2b   : > { %21846 = vmatprep.mubr.bf16.mxu1 %v29483_v20 }
 0xb32   : > { %21847 = vmatmul.mubr.bf16.gmra.mrb[92].mxu1 %v29484_v1 }
 0xb33   : > { %21866 = vmatprep.mubr.bf16.mxu1 %v19002_v2  ;;  %v29491_v2 = vld [vmem:[#allocation96_spill] sm:$0xff] }
 0xb34   : > { %v13373_v10 = vshrl.u32 %v29491_v2, 16 }
 0xb3a   : > { %21867 = vmatmul.mubr.bf16.vlgmr.msra.gmra.mrb[64].mxu1 %v29471_v54 }
 0xb3b   : > { %21899 = vmatpush3.bf16.msra.mxu1 %v23538_v53  ;;  %21870 = vmatprep.mubr.bf16.mxu1 %v29472_v44  ;;  %v13332_v53 = vrot.slane %v13331_v33, 4 }
 0xb3c   : > { %21900 = vmatprep.subr.bf16.mxu1 %v23539_v45 }
 0xb3f   : > { %21901 = vmatpush3.bf16.msra.mxu1 %v23539_v45  ;;  %v29495_v45 = vld [vmem:[#allocation63_spill] sm:$0xff] }
 0xb40   : > { %21902 = vmatprep.subr.bf16.mxu1 %v23540_v18 }
 0xb42   : > { %21871 = vmatmul.mubr.bf16.gmra.mrb[68].mxu1 %v29473_v56 }
 0xb43   : > { %21874 = vmatprep.mubr.bf16.mxu1 %v29474_v63  ;;  %21903 = vmatpush3.bf16.msra.mxu1 %v23540_v18  ;;  %v13382_v18 = vshll.u32 %v29495_v45, 16 }
 0xb44   : > { %21904 = vmatprep.subr.bf16.mxu1 %v23541_v59 }
 0xb45   : > { %v13384_v52 = vrot.slane %v13382_v18, 5 }
 0xb47   : > { %21905 = vmatpush3.bf16.msra.mxu1 %v23541_v59 }
 0xb48   : > { %21906 = vmatprep.subr.bf16.mxu1 %v23542_v46 }
 0xb4a   : > { %21875 = vmatmul.mubr.bf16.gmra.mrb[72].mxu1 %v29475_v27 }
 0xb4b   : > { %21878 = vmatprep.mubr.bf16.mxu1 %v29476_v4  ;;  %21907 = vmatpush3.bf16.msra.mxu1 %v23542_v46  ;;  %v13386_v46 = vshrl.u32 %v29495_v45, 16 }
 0xb4c   : > { %21908 = vmatprep.subr.bf16.mxu1 %v23543_v61 }
 0xb4d   : > { %v13388_v16 = vrot.slane %v13386_v46, 4 }
 0xb4f   : > { %21909 = vmatpush3.bf16.msra.mxu1 %v23543_v61  ;;  %v13370_v61 = vrot.slane %v13368_v32, 5 }
 0xb50   : > { %21910 = vmatprep.subr.bf16.mxu1 %v23544_v34 }
 0xb52   : > { %21879 = vmatmul.mubr.bf16.gmra.mrb[76].mxu1 %v29477_v0 }
 0xb53   : > { %21882 = vmatprep.mubr.bf16.mxu1 %v29478_v6  ;;  %21911 = vmatpush3.bf16.msra.mxu1 %v23544_v34 }
 0xb54   : > { %21912 = vmatprep.subr.bf16.mxu1 %v23545_v40 }
 0xb57   : > { %21913 = vmatpush3.bf16.msra.mxu1 %v23545_v40 }
 0xb5a   : > { %21883 = vmatmul.mubr.bf16.gmra.mrb[80].mxu1 %v29479_v43 }
 0xb5b   : > { %21886 = vmatprep.mubr.bf16.mxu1 %v29480_v51 }
 0xb62   : > { %21887 = vmatmul.mubr.bf16.gmra.mrb[84].mxu1 %v29481_v60 }
 0xb63   : > { %21890 = vmatprep.mubr.bf16.mxu1 %v29482_v24 }
 0xb6a   : > { %21891 = vmatmul.mubr.bf16.gmra.mrb[88].mxu1 %v29483_v20 }
 0xb6b   : > { %21894 = vmatprep.mubr.bf16.mxu1 %v29484_v1 }
 0xb72   : > { %21895 = vmatmul.mubr.bf16.gmra.mrb[92].mxu1 %v29485_v48 }
 0xb73   : > { %21914 = vmatprep.mubr.bf16.mxu1 %v29471_v54  ;;  %v13376_v54 = vshll.u32 %v29491_v2, 16  ;;  %v13458_v2 = vshrl.u32 %v29499_v11, 16 }
 0xb7a   : > { %21915 = vmatmul.mubr.bf16.vlgmr.msra.gmra.mrb[64].mxu1 %v29472_v44  ;;  %v13356_v44 = vrot.slane %v13355_v3, 4  ;;  %v13421_v3 = vshrl.u32 %v29500_v30, 16 }
 0xb7b   : > { %21918 = vmatprep.mubr.bf16.mxu1 %v29473_v56  ;;  %v13341_v56 = vor.u32 %v13340_v9, %v13336_v58  ;;  %v13424_v9 = vshll.u32 %v29500_v30, 16 }
 0xb82   : > { %21919 = vmatmul.mubr.bf16.gmra.mrb[68].mxu1 %v29474_v63  ;;  %v13375_v63 = vrot.slane %v13373_v10, 4  ;;  %v13434_v10 = vshrl.u32 %v29501_v36, 16 }
 0xb83   : > { %21922 = vmatprep.mubr.bf16.mxu1 %v29475_v27  ;;  %v13378_v27 = vrot.slane %v13376_v54, 5  ;;  %v29502_v54 = vld [vmem:[#allocation78_spill] sm:$0xff] }
 0xb84   : > { %v13493_v33 = vshrl.u32 %v29502_v54, 16 }
 0xb8a   : > { %21923 = vmatmul.mubr.bf16.gmra.mrb[72].mxu1 %v29476_v4  ;;  %v29493_v4 = vld [vmem:[#allocation71_spill] sm:$0xff] }
 0xb8b   : > { %21926 = vmatprep.mubr.bf16.mxu1 %v29477_v0  ;;  %v13344_v0 = vshll.u32 %v29493_v4, 16  ;;  %v13423_v4 = vrot.slane %v13421_v3, 4 }
 0xb8d   : > { %v13346_v34 = vrot.slane %v13344_v0, 5  ;;  %v13426_v0 = vrot.slane %v13424_v9, 5 }
 0xb92   : > { %21927 = vmatmul.mubr.bf16.gmra.mrb[76].mxu1 %v29478_v6  ;;  %v13366_v6 = vrot.slane %v13365_v22, 4 }
 0xb93   : > { %21930 = vmatprep.mubr.bf16.mxu1 %v29479_v43  ;;  %v13361_v43 = vsel %vm24192_vm10, %v13356_v44, %v13360_v19  ;;  %v13389_v19 = vor.u32 %v13388_v16, %v13384_v52  ;;  %v13418_v44 = vrot.slane %v13416_v26, 5  ;;  %v29506_v26 = vld [vmem:[#allocation64_spill] sm:$0xff] }
 0xb94   : > { %v14269_v40 = vunpack.c.l.bf16 %v13361_v43  ;;  %v13371_v8 = vsel %vm24192_vm10, %v13366_v6, %v13370_v61  ;;  %v13460_v6 = vrot.slane %v13458_v2, 4  ;;  %v13436_v43 = vrot.slane %v13434_v10, 4  ;;  %v29509_v2 = vld [vmem:[#allocation79_spill] sm:$0xff] }
 0xb95   : > { %v14270_v15 = vunpack.c.l.bf16 %v13371_v8  ;;  %v13440_v39 = vshll.u32 %v29506_v26, 16  ;;  %v13512_v10 = vshll.u32 %v29509_v2, 16 }
 0xb96   : > { %v28706_v55 = vadd.f32 %v28699_v31, %v14269_v40 }
 0xb97   : > { %v28736_v61 = vadd.f32 %v28699_v31, %v14270_v15 }
 0xb9a   : > { %21931 = vmatmul.mubr.bf16.gmra.mrb[80].mxu1 %v29480_v51  ;;  %v13342_v51 = vrot.slane %v13341_v56, 4  ;;  %v13394_v56 = vrot.slane %v13392_v13, 5  ;;  %v29507_v13 = vld [vmem:[#allocation80_spill] sm:$0xff] }
 0xb9b   : > { %21934 = vmatprep.mubr.bf16.mxu1 %v29481_v60  ;;  %v13403_v60 = vor.u32 %v13402_v37, %v13399_v7  ;;  %v13496_v7 = vshll.u32 %v29502_v54, 16  ;;  %v13478_v29 = vshll.u32 %v29507_v13, 16 }
 0xb9c   : > { %v13347_v50 = vsel %vm24192_vm10, %v13342_v51, %v13346_v34  ;;  %v13495_v51 = vrot.slane %v13493_v33, 4  ;;  %v13442_v33 = vrot.slane %v13440_v39, 5 }
 0xb9d   : > { %v13404_v17 = vrot.slane %v13403_v60, 4  ;;  %v14268_v28 = vunpack.c.l.bf16 %v13347_v50  ;;  %v29503_v60 = vld [vmem:[#allocation81_spill] sm:$0xff] }
 0xb9f   : > { %v28739_v34 = vadd.f32 %v28699_v31, %v14268_v28 }
 0xba2   : > { %21935 = vmatmul.mubr.bf16.gmra.mrb[84].mxu1 %v29482_v24  ;;  %v29494_v24 = vld [vmem:[#allocation60_spill] sm:$0xff] }
 0xba3   : > { %21938 = vmatprep.mubr.bf16.mxu1 %v29483_v20  ;;  %v13406_v20 = vshll.u32 %v29494_v24, 16  ;;  %v13410_v59 = vshrl.u32 %v29494_v24, 16  ;;  %v13502_v24 = vshll.u32 %v29503_v60, 16 }
 0xba5   : > { %v13408_v47 = vrot.slane %v13406_v20, 5  ;;  %v13498_v20 = vrot.slane %v13496_v7, 5 }
 0xba7   : > { %v13409_v25 = vsel %vm24192_vm10, %v13404_v17, %v13408_v47  ;;  %v13499_v16 = vor.u32 %v13498_v20, %v13495_v51  ;;  %v29510_v20 = vld [vmem:[#allocation90_spill] sm:$0xff] }
 0xba8   : > { %v14273_v38 = vunpack.c.l.bf16 %v13409_v25  ;;  %v29505_v25 = vld [vmem:[#allocation76_spill] sm:$0xff] }
 0xba9   : > { %v13464_v57 = vshll.u32 %v29505_v25, 16  ;;  %v13500_v36 = vrot.slane %v13499_v16, 4 }
 0xbaa   : > { %21939 = vmatmul.mubr.bf16.gmra.mrb[88].mxu1 %v29484_v1  ;;  %v13379_v1 = vor.u32 %v13378_v27, %v13375_v63  ;;  %v13390_v63 = vrot.slane %v13389_v19, 4  ;;  %v13447_v27 = vrot.slane %v13445_v41, 4  ;;  %v28742_v40 = vadd.f32 %v28699_v31, %v14273_v38  ;;  %v29508_v19 = vld [vmem:[#allocation82_spill] sm:$0xff] }
 0xbab   : > { %21942 = vmatprep.mubr.bf16.mxu1 %v29485_v48  ;;  %v13337_v48 = vsel %vm24192_vm10, %v13332_v53, %v13336_v58  ;;  %v13454_v58 = vshll.u32 %v29499_v11, 16  ;;  %v28726_v53 = vrot.slane %v13430_v35, 5  ;;  %v13482_v41 = vshrl.u32 %v29507_v13, 16 }
 0xbac   : > { %v13380_v12 = vrot.slane %v13379_v1, 4  ;;  %v14267_v49 = vunpack.c.l.bf16 %v13337_v48  ;;  %v29504_v1 = vld [vmem:[#allocation70_spill] sm:$0xff]  ;;  %v13395_v50 = vsel %vm24192_vm10, %v13390_v63, %v13394_v56  ;;  %v13451_v17 = vor.u32 %v13450_v62, %v13447_v27 }
 0xbad   : > { %v28724_v32 = vrot.slane %v13454_v58, 5  ;;  %v13469_v45 = vshrl.u32 %v29504_v1, 16  ;;  %v13472_v18 = vshll.u32 %v29504_v1, 16  ;;  %v13541_v5 = vshrl.u32 %v29508_v19, 16 }
 0xbae   : > { %v13385_v21 = vsel %vm24192_vm10, %v13380_v12, %v13384_v52  ;;  %v28733_v46 = vadd.f32 %v28699_v31, %v14267_v49  ;;  %v13437_v52 = vor.u32 %v13436_v43, %v28726_v53  ;;  %v13544_v11 = vshll.u32 %v29508_v19, 16 }
 0xbaf   : > { %v14271_v22 = vunpack.c.l.bf16 %v13385_v21  ;;  %v13461_v12 = vor.u32 %v13460_v6, %v28724_v32  ;;  %v13471_v49 = vrot.slane %v13469_v45, 4  ;;  %v13474_v15 = vrot.slane %v13472_v18, 5 }
 0xbb0   : > { %v13452_v58 = vrot.slane %v13451_v17, 4  ;;  %v13438_v9 = vrot.slane %v13437_v52, 4  ;;  %v13466_v54 = vrot.slane %v13464_v57, 5  ;;  %v13546_v63 = vrot.slane %v13544_v11, 5 }
 0xbb1   : > { %v28745_v48 = vadd.f32 %v28699_v31, %v14271_v22  ;;  %v13462_v3 = vrot.slane %v13461_v12, 4  ;;  %v13475_v35 = vor.u32 %v13474_v15, %v13471_v49  ;;  %v13480_v22 = vrot.slane %v13478_v29, 5 }
 0xbb2   : > { %21943 = vmatmul.mubr.bf16.gmra.mrb[92].mxu1 %v19068_v23  ;;  %v13412_v23 = vrot.slane %v13410_v59, 4  ;;  %v13506_v59 = vshrl.u32 %v29503_v60, 16  ;;  %v13457_v27 = vsel %vm24192_vm10, %v13452_v58, %v28724_v32  ;;  %v13514_v60 = vrot.slane %v13512_v10, 5  ;;  %v29511_v32 = vld [vmem:[#allocation86_spill] sm:$0xff]  ;;  %v29515_v10 = vld [vmem:[#allocation93_spill] sm:$0xff] }
 0xbb3   : > { %v13476_v43 = vrot.slane %v13475_v35, 4  ;;  %v13550_v1 = vshll.u32 %v29510_v20, 16  ;;  %v13517_v45 = vshrl.u32 %v29511_v32, 16  ;;  %v13520_v18 = vshll.u32 %v29511_v32, 16  ;;  %v29517_v32 = vld [vmem:[#allocation89_spill] sm:$0xff] }
 0xbb4   : > { %v13413_v14 = vor.u32 %v13412_v23, %v13408_v47  ;;  %v13427_v47 = vor.u32 %v13426_v0, %v13423_v4  ;;  %v13504_v23 = vrot.slane %v13502_v24, 5  ;;  %v13508_v28 = vrot.slane %v13506_v59, 4  ;;  %v29512_v59 = vld [vmem:[#allocation88_spill] sm:$0xff] }
 0xbb5   : > { %v13467_v4 = vsel %vm24192_vm10, %v13462_v3, %v13466_v54  ;;  %v13443_v0 = vsel %vm24192_vm10, %v13438_v9, %v13442_v33  ;;  %v13530_v17 = vshrl.u32 %v29512_v59, 16  ;;  %v13552_v26 = vrot.slane %v13550_v1, 5 }
 0xbb6   : > { %v13414_v37 = vrot.slane %v13413_v14, 4  ;;  %v14272_v14 = vunpack.c.l.bf16 %v13395_v50  ;;  %v13428_v30 = vrot.slane %v13427_v47, 4  ;;  %v13509_v38 = vor.u32 %v13508_v28, %v13504_v23 }
 0xbb7   : > { %v13505_v6 = vsel %vm24192_vm10, %v13500_v36, %v13504_v23  ;;  %v13554_v50 = vshrl.u32 %v29510_v20, 16  ;;  %v14277_v47 = vunpack.c.l.bf16 %v13457_v27  ;;  %v14278_v52 = vunpack.c.l.bf16 %v13467_v4  ;;  %v29513_v23 = vld [vmem:[#allocation69_spill] sm:$0xff]  ;;  %v29514_v36 = vld [vmem:[#allocation87_spill] sm:$0xff] }
 0xbb8   : > { %v13419_v8 = vsel %vm24192_vm10, %v13414_v37, %v13418_v44  ;;  %v13484_v44 = vrot.slane %v13482_v41, 4  ;;  %v28764_v7 = vadd.f32 %v28699_v31, %v14272_v14  ;;  %v13543_v37 = vrot.slane %v13541_v5, 4 }
 0xbb9   : > { %v14274_v21 = vunpack.c.l.bf16 %v13419_v8  ;;  %v13433_v62 = vsel %vm24192_vm10, %v13428_v30, %v28726_v53  ;;  %v13510_v51 = vrot.slane %v13509_v38, 4  ;;  %v13526_v8 = vshll.u32 %v29512_v59, 16 }
 0xbba   : > { %v13485_v24 = vor.u32 %v13484_v44, %v13480_v22  ;;  %v13547_v53 = vor.u32 %v13546_v63, %v13543_v37  ;;  %v14275_v12 = vunpack.c.l.bf16 %v13433_v62  ;;  %v13488_v16 = vshll.u32 %v29513_v23, 16  ;;  %v29518_v23 = vld [vmem:[#allocation91_spill] sm:$0xff] }
 0xbbb   : > { %v28761_v56 = vadd.f32 %v28699_v31, %v14274_v21  ;;  %v14276_v49 = vunpack.c.l.bf16 %v13443_v0  ;;  %v14281_v15 = vunpack.c.l.bf16 %v13505_v6  ;;  %v13481_v28 = vsel %vm24192_vm10, %v13476_v43, %v13480_v22  ;;  %v29516_v6 = vld [vmem:[#allocation92_spill] sm:$0xff] }
 0xbbc   : > { %v13515_v25 = vsel %vm24192_vm10, %v13510_v51, %v13514_v60  ;;  %v13486_v57 = vrot.slane %v13485_v24, 4  ;;  %v13519_v39 = vrot.slane %v13517_v45, 4  ;;  %v13522_v13 = vrot.slane %v13520_v18, 5 }
 0xbbd   : > { %v13548_v29 = vrot.slane %v13547_v53, 4  ;;  %v28789_v41 = vrot.slane %v13526_v8, 5  ;;  %v13556_v21 = vrot.slane %v13554_v50, 4  ;;  %v13532_v14 = vrot.slane %v13530_v17, 4 }
 0xbbe   : > { %v28792_v19 = vadd.f32 %v28699_v31, %v14277_v47  ;;  %v14279_v5 = vunpack.c.l.bf16 %v13481_v28  ;;  %v14282_v11 = vunpack.c.l.bf16 %v13515_v25  ;;  %v13490_v58 = vrot.slane %v13488_v16, 5 }
 0xbbf   : > { %v28795_v30 = vadd.f32 %v28699_v31, %v14275_v12  ;;  %v28798_v3 = vadd.f32 %v28699_v31, %v14278_v52  ;;  %v28801_v9 = vadd.f32 %v28699_v31, %v14276_v49  ;;  %v13560_v35 = vshll.u32 %v29514_v36, 16 }
 0xbc0   : > { %v13491_v38 = vsel %vm24192_vm10, %v13486_v57, %v13490_v58  ;;  %v13523_v2 = vor.u32 %v13522_v13, %v13519_v39  ;;  %v13589_v54 = vshrl.u32 %v29515_v10, 16  ;;  %v13592_v33 = vshll.u32 %v29515_v10, 16 }
 0xbc1   : > { %v28809_v44 = vadd.f32 %v28699_v31, %v14281_v15  ;;  %v13553_v37 = vsel %vm24192_vm10, %v13548_v29, %v13552_v26  ;;  %v13557_v63 = vor.u32 %v13556_v21, %v13552_v26  ;;  %v13533_v27 = vor.u32 %v13532_v14, %v28789_v41 }
 0xbc2   : > { %v28815_v4 = vadd.f32 %v28699_v31, %v14279_v5  ;;  %v28818_v0 = vadd.f32 %v28699_v31, %v14282_v11  ;;  %v13565_v43 = vshrl.u32 %v29516_v6, 16  ;;  %v13568_v51 = vshll.u32 %v29516_v6, 16 }
 0xbc3   : > { %v14280_v20 = vunpack.c.l.bf16 %v13491_v38  ;;  %v13562_v1 = vrot.slane %v13560_v35, 5  ;;  %v13536_v45 = vshll.u32 %v29517_v32, 16  ;;  %v14285_v53 = vunpack.c.l.bf16 %v13553_v37  ;;  %v29519_v35 = vld [vmem:[#allocation97_spill] sm:$0xff] }
 0xbc4   : > { %v13524_v59 = vrot.slane %v13523_v2, 4  ;;  %v13591_v8 = vrot.slane %v13589_v54, 4  ;;  %v13594_v50 = vrot.slane %v13592_v33, 5  ;;  %v13558_v12 = vrot.slane %v13557_v63, 4 }
 0xbc5   : > { %v13534_v52 = vrot.slane %v13533_v27, 4  ;;  %v13598_v16 = vshll.u32 %v29518_v23, 16  ;;  %v13567_v49 = vrot.slane %v13565_v43, 4  ;;  %v13602_v15 = vshrl.u32 %v29518_v23, 16 }
 0xbc6   : > { %v13538_v26 = vrot.slane %v13536_v45, 5  ;;  %v28830_v39 = vadd.f32 %v28699_v31, %v14280_v20  ;;  %v13595_v13 = vor.u32 %v13594_v50, %v13591_v8  ;;  %v13563_v5 = vsel %vm24192_vm10, %v13558_v12, %v13562_v1  ;;  %v29520_v45 = vld [vmem:[#allocation98_spill] sm:$0xff]  ;;  %v29522_v12 = vld [vmem:[#allocation95_spill] sm:$0xff] }
 0xbc7   : > { %v13600_v58 = vrot.slane %v13598_v16, 5  ;;  %v13574_v38 = vshll.u32 %v29519_v35, 16  ;;  %v13604_v2 = vrot.slane %v13602_v15, 4  ;;  %v14286_v27 = vunpack.c.l.bf16 %v13563_v5 }
 0xbc8   : > { %v13596_v6 = vrot.slane %v13595_v13, 4 }
 0xbc9   : > { %v13576_v1 = vrot.slane %v13574_v38, 5  ;;  %v13605_v32 = vor.u32 %v13604_v2, %v13600_v58 }
 0xc4d   : > { %v21916_v22 = vpop.f32.mrb[64].mxu1 }
 0xc4e   : > { %v17464_v62 = vpop.f32.mrb[65].mxu1  ;;  %v22042_v17 = vadd.f32 %v21916_v22, %v28706_v55  ;;  %v28833_v55 = vadd.f32 %v28699_v31, %v14285_v53  ;;  %v13578_v22 = vshrl.u32 %v29519_v35, 16 }
 0xc4f   : > { %v22043_v60 = vadd.f32 %v17464_v62, %v28733_v46  ;;  %v21917_v24 = vpop.f32.mrb[66].mxu1  ;;  %v13570_v46 = vrot.slane %v13568_v51, 5 }
 0xc50   : > { %v17467_v18 = vpop.f32.mrb[67].mxu1  ;;  %v22044_v25 = vadd.f32 %v21917_v24, %v28736_v61  ;;  %v17625_v29 = vmax.f32 %v22042_v17, 0.0  ;;  %v13539_v61 = vsel %vm24192_vm10, %v13534_v52, %v13538_v26  ;;  %v13580_v8 = vrot.slane %v13578_v22, 4 }
 0xc51   : > { %v22045_v47 = vadd.f32 %v17467_v18, %v28739_v34  ;;  %v17623_v28 = vmax.f32 %v22043_v60, 0.0  ;;  %v13529_v34 = vsel %vm24192_vm10, %v13524_v59, %v28789_v41  ;;  %v13571_v36 = vor.u32 %v13570_v46, %v13567_v49 }
 0xc52   : > { %v17626_v10 = vmax.f32 %v22044_v25, 0.0  ;;  %v14283_v63 = vunpack.c.l.bf16 %v13529_v34  ;;  %v14284_v62 = vunpack.c.l.bf16 %v13539_v61  ;;  %v13608_v18 = vshll.u32 %v29520_v45, 16 }
 0xc53   : > { %v17624_v57 = vmax.f32 %v22045_v47, 0.0  ;;  %v13572_v20 = vrot.slane %v13571_v36, 4  ;;  %v28853_v17 = vadd.f32 %v28699_v31, %v14286_v27 }
 0xc54   : > { %v28850_v50 = vadd.f32 %v28699_v31, %v14283_v63  ;;  %v28858_v49 = vadd.f32 %v28699_v31, %v14284_v62  ;;  %v13610_v25 = vrot.slane %v13608_v18, 5 }
 0xc55   : > { %v17655_v21 = vadd.f32 %v17624_v57, %v17623_v28  ;;  %v21920_v14 = vpop.f32.mrb[68].mxu1  ;;  %v13577_v15 = vsel %vm24192_vm10, %v13572_v20, %v13576_v1  ;;  %v13606_v28 = vrot.slane %v13605_v32, 4  ;;  %v13640_v57 = vshll.u32 %v29522_v12, 16 }
 0xc56   : > { %v17480_v11 = vpop.f32.mrb[69].mxu1  ;;  %v22046_v43 = vadd.f32 %v21920_v14, %v28742_v40  ;;  %v29521_v40 = vld [vmem:[#allocation94_spill] sm:$0xff] }
 0xc57   : > { %v17656_v54 = vadd.f32 %v17655_v21, %v17625_v29  ;;  %v22047_v41 = vadd.f32 %v17480_v11, %v28745_v48  ;;  %v21921_v33 = vpop.f32.mrb[70].mxu1  ;;  %v13584_v47 = vshll.u32 %v29521_v40, 16  ;;  %v13581_v21 = vor.u32 %v13580_v8, %v13576_v1  ;;  %v29523_v11 = vld [vmem:[#allocation100_spill] sm:$0xff] }
 0xc58   : > { %v17483_v37 = vpop.f32.mrb[71].mxu1  ;;  %v22048_v53 = vadd.f32 %v21921_v33, %v28761_v56  ;;  %v17629_v52 = vmax.f32 %v22046_v43, 0.0  ;;  %v13601_v56 = vsel %vm24192_vm10, %v13596_v6, %v13600_v58  ;;  %v13613_v36 = vshrl.u32 %v29523_v11, 16  ;;  %v29524_v33 = vld [vmem:[#allocation10_spill] sm:$0xff] }
 0xc59   : > { %v17627_v51 = vmax.f32 %v22047_v41, 0.0  ;;  %v17657_v60 = vadd.f32 %v17656_v54, %v17626_v10  ;;  %v22049_v24 = vadd.f32 %v17483_v37, %v28764_v7  ;;  %v13637_v7 = vshrl.u32 %v29522_v12, 16 }
 0xc5a   : > { %v17630_v26 = vmax.f32 %v22048_v53, 0.0  ;;  %v14289_v5 = vunpack.c.l.bf16 %v13601_v56  ;;  %v13616_v58 = vshll.u32 %v29523_v11, 16  ;;  %v14287_v54 = vunpack.c.l.bf16 %v13577_v15 }
 0xc5b   : > { %v17658_v48 = vadd.f32 %v17657_v60, %v17627_v51  ;;  %v17628_v59 = vmax.f32 %v22049_v24, 0.0  ;;  %v13639_v61 = vrot.slane %v13637_v7, 4  ;;  %v13611_v41 = vsel %vm24192_vm10, %v13606_v28, %v13610_v25  ;;  %v29525_v51 = vld [vmem:[#allocation11_spill] sm:$0xff] }
 0xc5c   : > { %v13646_v22 = vshll.u32 %v29524_v33, 16  ;;  %v13582_v62 = vrot.slane %v13581_v21, 4  ;;  %v13615_v6 = vrot.slane %v13613_v36, 4  ;;  %v13618_v43 = vrot.slane %v13616_v58, 5  ;;  %v29529_v58 = vld [vmem:[#allocation14_spill] sm:$0xff] }
 0xc5d   : > { %v17659_v23 = vadd.f32 %v17658_v48, %v17628_v59  ;;  %v21924_v16 = vpop.f32.mrb[72].mxu1  ;;  %v13650_v60 = vshrl.u32 %v29524_v33, 16  ;;  %v28877_v1 = vadd.f32 %v28699_v31, %v14289_v5  ;;  %v13586_v32 = vrot.slane %v13584_v47, 5 }
 0xc5e   : > { %v17496_v46 = vpop.f32.mrb[73].mxu1  ;;  %v22050_v35 = vadd.f32 %v21924_v16, %v28792_v19  ;;  %v13622_v19 = vshll.u32 %v29525_v51, 16  ;;  %v14290_v18 = vunpack.c.l.bf16 %v13611_v41  ;;  %v28879_v53 = vrot.slane %v13646_v22, 5 }
 0xc5f   : > { %v17660_v34 = vadd.f32 %v17659_v23, %v17629_v52  ;;  %v22051_v13 = vadd.f32 %v17496_v46, %v28795_v30  ;;  %v21925_v29 = vpop.f32.mrb[74].mxu1  ;;  %v13642_v30 = vrot.slane %v13640_v57, 5  ;;  %v13587_v7 = vsel %vm24192_vm10, %v13582_v62, %v13586_v32 }
 0xc60   : > { %v17499_v14 = vpop.f32.mrb[75].mxu1  ;;  %v22052_v63 = vadd.f32 %v21925_v29, %v28798_v3  ;;  %v17633_v24 = vmax.f32 %v22050_v35, 0.0  ;;  %v13626_v3 = vshrl.u32 %v29525_v51, 16  ;;  %v28886_v23 = vadd.f32 %v28699_v31, %v14287_v54  ;;  %v29531_v51 = vld [vmem:[#allocation12_spill] sm:$0xff] }
 0xc61   : > { %v17631_v38 = vmax.f32 %v22051_v13, 0.0  ;;  %v17661_v2 = vadd.f32 %v17660_v34, %v17630_v26  ;;  %v22053_v10 = vadd.f32 %v17499_v14, %v28801_v9  ;;  %v13643_v48 = vor.u32 %v13642_v30, %v13639_v61  ;;  %v29526_v34 = vld [vmem:[#allocation15_spill] sm:$0xff] }
 0xc62   : > { %v17634_v59 = vmax.f32 %v22052_v63, 0.0  ;;  %v13619_v47 = vor.u32 %v13618_v43, %v13615_v6  ;;  %v13624_v16 = vrot.slane %v13622_v19, 5  ;;  %v13652_v56 = vrot.slane %v13650_v60, 4  ;;  %v29527_v61 = vld [vmem:[#allocation99_spill] sm:$0xff] }
 0xc63   : > { %v17662_v37 = vadd.f32 %v17661_v2, %v17631_v38  ;;  %v17632_v27 = vmax.f32 %v22053_v10, 0.0  ;;  %v28891_v57 = vadd.f32 %v28699_v31, %v14290_v18  ;;  %v13628_v26 = vrot.slane %v13626_v3, 4 }
 0xc64   : > { %v13685_v13 = vshrl.u32 %v29526_v34, 16  ;;  %v28895_v5 = vrot.slane %v13643_v48, 4  ;;  %v13656_v11 = vshll.u32 %v29527_v61, 16  ;;  %v13661_v35 = vshrl.u32 %v29529_v58, 16 }
 0xc65   : > { %v17663_v9 = vadd.f32 %v17662_v37, %v17632_v27  ;;  %v21928_v20 = vpop.f32.mrb[76].mxu1  ;;  %v13620_v54 = vrot.slane %v13619_v47, 4  ;;  %v13653_v41 = vor.u32 %v13652_v56, %v28879_v53  ;;  %v13629_v33 = vor.u32 %v13628_v26, %v13624_v16  ;;  %v29530_v37 = vld [vmem:[#allocation16_spill] sm:$0xff] }
 0xc66   : > { %v17512_v45 = vpop.f32.mrb[77].mxu1  ;;  %v22054_v46 = vadd.f32 %v21928_v20, %v28809_v44  ;;  %v29528_v44 = vld [vmem:[#allocation13_spill] sm:$0xff]  ;;  %v13688_v22 = vshll.u32 %v29526_v34, 16  ;;  %v13694_v63 = vshll.u32 %v29530_v37, 16  ;;  %v13670_v19 = vshll.u32 %v29531_v51, 16 }
 0xc67   : > { %v17664_v8 = vadd.f32 %v17663_v9, %v17633_v24  ;;  %v22055_v40 = vadd.f32 %v17512_v45, %v28815_v4  ;;  %v21929_v12 = vpop.f32.mrb[78].mxu1  ;;  %v14288_v4 = vunpack.c.l.bf16 %v13587_v7  ;;  %v13632_v36 = vshll.u32 %v29528_v44, 16 }
 0xc68   : > { %v17515_v52 = vpop.f32.mrb[79].mxu1  ;;  %v22056_v21 = vadd.f32 %v21929_v12, %v28818_v0  ;;  %v17637_v38 = vmax.f32 %v22054_v46, 0.0  ;;  %v13687_v0 = vrot.slane %v13685_v13, 4  ;;  %v13663_v24 = vrot.slane %v13661_v35, 4 }
 0xc69   : > { %v17635_v15 = vmax.f32 %v22055_v40, 0.0  ;;  %v17665_v28 = vadd.f32 %v17664_v8, %v17634_v59  ;;  %v22057_v25 = vadd.f32 %v17515_v52, %v28830_v39  ;;  %v13664_v39 = vshll.u32 %v29529_v58, 16 }
 0xc6a   : > { %v17638_v27 = vmax.f32 %v22056_v21, 0.0  ;;  %v13698_v20 = vshrl.u32 %v29530_v37, 16  ;;  %v13674_v32 = vshrl.u32 %v29531_v51, 16  ;;  %v13625_v59 = vsel %vm24192_vm10, %v13620_v54, %v13624_v16 }
 0xc6b   : > { %v17666_v29 = vadd.f32 %v17665_v28, %v17635_v15  ;;  %v17636_v14 = vmax.f32 %v22057_v25, 0.0  ;;  %v13666_v9 = vrot.slane %v13664_v39, 5  ;;  %v13690_v8 = vrot.slane %v13688_v22, 5 }
 0xc6c   : > { %v28912_v40 = vrot.slane %v13694_v63, 5  ;;  %v13630_v47 = vrot.slane %v13629_v33, 4  ;;  %v13672_v46 = vrot.slane %v13670_v19, 5  ;;  %v13700_v15 = vrot.slane %v13698_v20, 4  ;;  %v29533_v33 = vld [vmem:[#allocation21_spill] sm:$0xff] }
 0xc6d   : > { %v17667_v2 = vadd.f32 %v17666_v29, %v17636_v14  ;;  %v21932_v10 = vpop.f32.mrb[80].mxu1  ;;  %v13667_v56 = vor.u32 %v13666_v9, %v13663_v24  ;;  %v13634_v34 = vrot.slane %v13632_v36, 5  ;;  %v13649_v13 = vsel %vm24192_vm10, %v28895_v5, %v28879_v53 }
 0xc6e   : > { %v17528_v30 = vpop.f32.mrb[81].mxu1  ;;  %v22058_v45 = vadd.f32 %v21932_v10, %v28833_v55  ;;  %v13676_v55 = vrot.slane %v13674_v32, 4  ;;  %v14291_v29 = vunpack.c.l.bf16 %v13625_v59  ;;  %v13691_v21 = vor.u32 %v13690_v8, %v13687_v0 }
 0xc6f   : > { %v17668_v62 = vadd.f32 %v17667_v2, %v17637_v38  ;;  %v22059_v6 = vadd.f32 %v17528_v30, %v28850_v50  ;;  %v21933_v43 = vpop.f32.mrb[82].mxu1  ;;  %v13654_v50 = vrot.slane %v13653_v41, 4  ;;  %v13635_v35 = vsel %vm24192_vm10, %v13630_v47, %v13634_v34 }
 0xc70   : > { %v17531_v60 = vpop.f32.mrb[83].mxu1  ;;  %v22060_v7 = vadd.f32 %v21933_v43, %v28853_v17  ;;  %v17641_v28 = vmax.f32 %v22058_v45, 0.0  ;;  %v13658_v17 = vrot.slane %v13656_v11, 5  ;;  %v13668_v36 = vrot.slane %v13667_v56, 4 }
 0xc71   : > { %v17639_v18 = vmax.f32 %v22059_v6, 0.0  ;;  %v17669_v48 = vadd.f32 %v17668_v62, %v17638_v27  ;;  %v22061_v3 = vadd.f32 %v17531_v60, %v28858_v49  ;;  %v14327_v49 = vadd.f32 %v28699_v31, %v14288_v4 }
 0xc72   : > { %v17642_v14 = vmax.f32 %v22060_v7, 0.0  ;;  %v13659_v4 = vsel %vm24192_vm10, %v13654_v50, %v13658_v17  ;;  %v13701_v38 = vor.u32 %v13700_v15, %v28912_v40  ;;  %v13677_v2 = vor.u32 %v13676_v55, %v13672_v46 }
 0xc73   : > { %v17670_v12 = vadd.f32 %v17669_v48, %v17639_v18  ;;  %v17640_v52 = vmax.f32 %v22061_v3, 0.0  ;;  %v14293_v54 = vunpack.c.l.bf16 %v13649_v13  ;;  %v14292_v41 = vunpack.c.l.bf16 %v13635_v35 }
 0xc74   : > { %v13680_v0 = vshll.u32 %v29533_v33, 16  ;;  %v13692_v27 = vrot.slane %v13691_v21, 4  ;;  %v14294_v62 = vunpack.c.l.bf16 %v13659_v4  ;;  %v13702_v6 = vrot.slane %v13701_v38, 4 }
 0xc75   : > { %v17671_v25 = vadd.f32 %v17670_v12, %v17640_v52  ;;  %v21936_v26 = vpop.f32.mrb[84].mxu1  ;;  %v13678_v43 = vrot.slane %v13677_v2, 4  ;;  %v14330_v60 = vadd.f32 %v28699_v31, %v14291_v29  ;;  %v13673_v24 = vsel %vm24192_vm10, %v13668_v36, %v13672_v46 }
 0xc76   : > { %v17544_v16 = vpop.f32.mrb[85].mxu1  ;;  %v22062_v53 = vadd.f32 %v21936_v26, %v28877_v1  ;;  %v14332_v9 = vadd.f32 %v28699_v31, %v14293_v54  ;;  %v14331_v32 = vadd.f32 %v28699_v31, %v14292_v41  ;;  %v13697_v50 = vsel %vm24192_vm10, %v13692_v27, %v28912_v40 }
 0xc77   : > { %v17672_v61 = vadd.f32 %v17671_v25, %v17641_v28  ;;  %v22063_v44 = vadd.f32 %v17544_v16, %v28886_v23  ;;  %v21937_v58 = vpop.f32.mrb[86].mxu1  ;;  %v29532_v23 = vld [vmem:[#allocation18_spill] sm:$0xff]  ;;  %v14333_v8 = vadd.f32 %v28699_v31, %v14294_v62  ;;  %v14295_v7 = vunpack.c.l.bf16 %v13673_v24 }
 0xc78   : > { %v17547_v39 = vpop.f32.mrb[87].mxu1  ;;  %v13704_v30 = vshll.u32 %v29532_v23, 16  ;;  %v22064_v37 = vadd.f32 %v21937_v58, %v28891_v57  ;;  %v17645_v51 = vmax.f32 %v22062_v53, 0.0  ;;  %v13682_v57 = vrot.slane %v13680_v0, 5 }
 0xc79   : > { %v17643_v5 = vmax.f32 %v22063_v44, 0.0  ;;  %v17673_v11 = vadd.f32 %v17672_v61, %v17642_v14  ;;  %v22065_v10 = vadd.f32 %v17547_v39, %v14327_v49  ;;  %v14297_v28 = vunpack.c.l.bf16 %v13697_v50 }
 0xc7a   : > { %v13706_v45 = vrot.slane %v13704_v30, 5  ;;  %v17646_v18 = vmax.f32 %v22064_v37, 0.0  ;;  %v13683_v47 = vsel %vm24192_vm10, %v13678_v43, %v13682_v57  ;;  %v14334_v17 = vadd.f32 %v28699_v31, %v14295_v7 }
 0xc7b   : > { %v17674_v22 = vadd.f32 %v17673_v11, %v17643_v5  ;;  %v17644_v63 = vmax.f32 %v22065_v10, 0.0  ;;  %v14296_v34 = vunpack.c.l.bf16 %v13683_v47  ;;  %v14336_v21 = vadd.f32 %v28699_v31, %v14297_v28 }
 0xc7c   : > { %v13707_v52 = vsel %vm24192_vm10, %v13702_v6, %v13706_v45 }
 0xc7d   : > { %v17675_v19 = vadd.f32 %v17674_v22, %v17644_v63  ;;  %v21940_v1 = vpop.f32.mrb[88].mxu1  ;;  %v14298_v40 = vunpack.c.l.bf16 %v13707_v52  ;;  %v14335_v35 = vadd.f32 %v28699_v31, %v14296_v34 }
 0xc7e   : > { %v17560_v20 = vpop.f32.mrb[89].mxu1  ;;  %v22066_v56 = vadd.f32 %v21940_v1, %v14332_v9 }
 0xc7f   : > { %v17676_v48 = vadd.f32 %v17675_v19, %v17645_v51  ;;  %v22067_v3 = vadd.f32 %v17560_v20, %v14330_v60  ;;  %v21941_v59 = vpop.f32.mrb[90].mxu1  ;;  %v14337_v39 = vadd.f32 %v28699_v31, %v14298_v40 }
 0xc80   : > { %v17563_v12 = vpop.f32.mrb[91].mxu1  ;;  %v22068_v26 = vadd.f32 %v21941_v59, %v14333_v8  ;;  %v17649_v16 = vmax.f32 %v22066_v56, 0.0 }
 0xc81   : > { %v17647_v46 = vmax.f32 %v22067_v3, 0.0  ;;  %v17677_v15 = vadd.f32 %v17676_v48, %v17646_v18  ;;  %v22069_v55 = vadd.f32 %v17563_v12, %v14331_v32 }
 0xc82   : > { %v17650_v42 = vmax.f32 %v22068_v26, 0.0 }
 0xc83   : > { %v17678_v25 = vadd.f32 %v17677_v15, %v17647_v46  ;;  %v17648_v49 = vmax.f32 %v22069_v55, 0.0 }
 0xc85   : > { %v17679_v13 = vadd.f32 %v17678_v25, %v17648_v49  ;;  %v21944_v29 = vpop.f32.mrb[92].mxu1 }
 0xc86   : > { %v17576_v14 = vpop.f32.mrb[93].mxu1  ;;  %v22070_v36 = vadd.f32 %v21944_v29, %v14336_v21 }
 0xc87   : > { %v17680_v61 = vadd.f32 %v17679_v13, %v17649_v16  ;;  %v22071_v44 = vadd.f32 %v17576_v14, %v14334_v17  ;;  %v21945_v58 = vpop.f32.mrb[94].mxu1 }
 0xc88   : > { %v17579_v4 = vpop.f32.mrb[95].mxu1  ;;  %v22072_v11 = vadd.f32 %v21945_v58, %v14337_v39  ;;  %v17653_v54 = vmax.f32 %v22070_v36, 0.0 }
 0xc89   : > { %v17651_v38 = vmax.f32 %v22071_v44, 0.0  ;;  %v17681_v2 = vadd.f32 %v17680_v61, %v17650_v42  ;;  %v22073_v53 = vadd.f32 %v17579_v4, %v14335_v35 }
 0xc8a   : > { %v17654_v23 = vmax.f32 %v22072_v11, 0.0 }
 0xc8b   : > { %v17682_v5 = vadd.f32 %v17681_v2, %v17651_v38  ;;  %v17652_v10 = vmax.f32 %v22073_v53, 0.0 }
 0xc8d   : > { %v17683_v41 = vadd.f32 %v17682_v5, %v17652_v10 }
 0xc8f   : > { %v17684_v30 = vadd.f32 %v17683_v41, %v17653_v54 }
 0xc91   : > { %v17685_v33 = vadd.f32 %v17684_v30, %v17654_v23 }
 0xc93   : > { %v17686_v0 = vrot.slane %v17685_v33, 4 }
 0xc95   : > { %v17687_v31 = vadd.f32 %v17686_v0, %v17685_v33 }
 0xc97   : > { %v17688_v22 = vrot.slane %v17687_v31, 2 }
 0xc99   : > { %v17689_v37 = vadd.f32 %v17688_v22, %v17687_v31 }
 0xc9b   : > { %v17690_v63 = vrot.slane %v17689_v37, 1 }
 0xc9d   : > { %v17691_v27 = vadd.f32 %v17690_v63, %v17689_v37 }
 0xc9f   : > { %v17692_v62 = vmul.f32 0.00390625, %v17691_v27 }
 0xca1   : > { %17693 = vst [vmem:[%s27331_s16 + $0x1] sm:$0x1] %v17692_v62 }
 0xca2   : > { %23575 = shalt.err (!%p23572_p3)
}
 0xca3   : > { %s23576_s14 = scalar_lea.hbm %s28952_s19, 32  ;;  %s23580_s8 = scalar_lea.hbm %s29004_s7, 128 }
 0xca4   : > { %p23577_p4 = scmp.ne.s32.totalorder %s28952_s19, %s23576_s14  ;;  %p23581_p9 = scmp.lt.u32.totalorder %s28952_s19, %s29004_s7 }
 0xca5   : > { %p23582_p10 = scmp.lt.u32.totalorder %s23580_s8, %s23576_s14  ;;  %p23584_p12 = scmp.lt.u32.totalorder %s23576_s14, %s28952_s19 }
 0xca6   : > { %p23578_p7 = pnand %p23577_p4, %p23706_p5 }
 0xca7   : > { %p23583_p11 = por %p23582_p10, %p23581_p9 }
 0xca8   : > { %p23579_p8 = pneg %p23578_p7 }
 0xca9   : > { %p23585_p13 = por %p23584_p12, %p23583_p11 }
 0xcab   : > { %p23586_p0 = pnand %p23585_p13, %p23579_p8 }
 0xcad   : > { %23589 = shalt.err (!%p23586_p0)
}
 0xcae   : > { %23098 = dma.vmem_to_hbm [thread:$0]  (%p23706_p5), %s28954_s15, 32, %s28952_s19, %s17695_s23  }
 0xcaf PF: > { %p23104_p1 = scmp.ge.s32.totalorder %s23624_s27, 2  ;;  %s17720_s17 = sand.u32 1, %s23612_s24  }
 0xcb0   : > { %s17721_s18 = scalar_lea.sflag [#allocation4], %s17720_s17 }
 0xcb1   : > { %p23101_p2 = pnand %p23104_p1, %p23710_p6 }
 0xcb3   : > { %23607 = dma.done.wait (!%p23101_p2), %s17721_s18, 32  }
 0xcb4   : > { %23609 = vsyncadd (!%p23101_p2), %s17721_s18, 4294967264  ;;  %p17_p3 = scmp.ge.s32.totalorder %s23693_s30, 6   ;;  %s29534_s24 = smov %s23616_s25 }
 0xcb5   : > { %s29535_s25 = smov %s23620_s26  ;;  %s29536_s26 = smov %s23704_s10 }
 0xcb6   : > { %s29537_s27 = smov %s23693_s30  ;;  %19 = sbr.rel (!%p17_p3) target bundleno = 3 (0x3), region = 101 }
 0xcbd   :  { %17726 = vsyncpa [#allocation4], 1 }
 0xcbe   :  { %17728 = vsyncpa [#allocation4 + $0x1], 1 }

</bundles_post_ra>
